<compile_context>
chip_gen: v5e
topology: v5e:2x2
jax: 0.10.0
libtpu: 0.0.40
codegen_flags: <defaults>
</compile_context>

<pallas_src>
import functools

import jax
import jax.numpy as jnp
from jax import lax
from jax.experimental import pallas as pl
from jax.experimental.pallas import tpu as pltpu

NEG_SLOPE = 0.1        # nn.LeakyReLU(0.1)
BN_EPS = 1e-5          # nn.BatchNorm2d default eps
TM_MAX = 256           # max tile along the "wide rows" (M) dim (was 512)
M_ALIGN = 16           # bf16 sublane packing: keep tile sizes/starts 16-aligned
LANE = 128             # lane width; Cout is padded to a multiple of this
ACT_DTYPE = jnp.bfloat16


def _round_up(x, m):
    return (x + m - 1) // m * m


def _cdiv(a, b):
    return -(-a // b)


@functools.lru_cache(maxsize=None)
def _vmem_capacity():
    try:
        return int(pltpu.get_tpu_info().vmem_capacity_bytes)
    except Exception:
        return 128 << 20


@functools.lru_cache(maxsize=None)
def _bf16_dyn_slice_ok():
    """True iff Mosaic lowers unaligned dynamic sublane slices of bf16 refs.

    The fused conv kernel slices per-tap (tm, Cin) operands at dynamic offsets
    base + di*Wi + dj with dj in {1, 2} (odd w.r.t. the bf16 sublane packing).
    If that pattern does not lower / compute correctly on this jax+libtpu,
    feed the kernel an f32 input block instead (outputs stay bf16).
    """
    def k(x_ref, w_ref, o_ref):
        base = pl.multiple_of(pl.program_id(0) * 16, 16)
        acc = jnp.dot(x_ref[0, pl.ds(base + 1, 16), :], w_ref[...],
                      preferred_element_type=jnp.float32)
        acc = acc + jnp.dot(x_ref[0, pl.ds(base + 2, 16), :], w_ref[...],
                            preferred_element_type=jnp.float32)
        o_ref[0] = acc.astype(o_ref.dtype)

    try:
        rows, cin = 48, 8
        x = (jnp.arange(rows * cin, dtype=jnp.float32)
             .reshape(1, rows, cin) * 0.01).astype(jnp.bfloat16)
        w = jnp.ones((cin, LANE), jnp.bfloat16)
        out = pl.pallas_call(
            k,
            out_shape=jax.ShapeDtypeStruct((1, 16, LANE), jnp.float32),
            grid_spec=pltpu.PrefetchScalarGridSpec(
                num_scalar_prefetch=0, grid=(1,),
                in_specs=[pl.BlockSpec((1, rows, cin), lambda i: (0, 0, 0)),
                          pl.BlockSpec((cin, LANE), lambda i: (0, 0))],
                out_specs=pl.BlockSpec((1, 16, LANE), lambda i: (0, 0, 0))),
        )(x, w)
        out = jax.block_until_ready(out)
        xs = x.astype(jnp.float32)[0]
        exp = (xs[1:17] + xs[2:18]).sum(-1, keepdims=True) * jnp.ones((1, LANE))
        return bool(jnp.allclose(out[0], exp, rtol=2e-2, atol=2e-2))
    except Exception:
        return False


# ----------------------------- Pallas kernel -------------------------------

def _conv_bn_lrelu_kernel(x_ref, w_ref, s_ref, b_ref, o_ref, *, offsets, tm):
    # x_ref : (1, Li, Cin_eff) bf16 (or f32 fallback)  flattened padded image
    # w_ref : (T, Cin_eff, Cout_p) bf16   one (Cin_eff, Cout_p) matrix per tap
    # s_ref : (1, Cout_p) f32   folded BN scale
    # b_ref : (1, Cout_p) f32   folded BN bias
    # o_ref : (1, tm, Cout_p) bf16
    # Tap partial products are accumulated in vregs (f32) -- no VMEM RMW.
    base = pl.multiple_of(pl.program_id(1) * tm, M_ALIGN)
    acc = None
    for t, off in enumerate(offsets):
        xs = x_ref[0, pl.ds(base + off, tm), :].astype(jnp.bfloat16)
        d = jnp.dot(xs, w_ref[t], preferred_element_type=jnp.float32)
        acc = d if acc is None else acc + d
    y = acc * s_ref[...] + b_ref[...]            # f32 BN epilogue
    y = jnp.where(y >= 0, y, NEG_SLOPE * y)      # LeakyReLU(0.1)
    o_ref[0] = y.astype(o_ref.dtype)


# ----------------------------- Pallas wrapper ------------------------------

def conv_bn_lrelu(x, cell):
    """Fused Conv2d(bias=False) + folded eval-BN + LeakyReLU(0.1).

    x: (N, H, W, Cin) bf16 NHWC.  Returns (N, Ho, Wo, Cout) bf16.
    """
    N, H, W, Cin = x.shape
    kind = cell["kind"]
    cout = cell["cout"]
    wtaps = cell["wtaps"]
    T, cin_eff, coutp = wtaps.shape

    feed_dt = ACT_DTYPE if _bf16_dyn_slice_ok() else jnp.float32
    xc = x.astype(feed_dt)

    if kind == "1x1":
        kh, kw = 1, 1
        Ho, Wo = H, W
        Wi = _round_up(W, 8)
        hi_base = H
    elif kind == "3x3s1":
        kh, kw = 3, 3
        Ho, Wo = H, W
        Wi = _round_up(W + 2, 8)
        hi_base = H + 2
    else:  # "3x3s2": stride-2 3x3 -> stride-1 2x2 over space-to-depth input
        assert H % 2 == 0 and W % 2 == 0, "stride-2 path assumes even H, W"
        kh, kw = 2, 2
        Ho, Wo = H // 2, W // 2
        Wi = _round_up((W + 2) // 2, 8)
        hi_base = (H + 2) // 2

    m_wide = Ho * Wi                          # "wide" rows (Wi cols per row)
    n_m = _cdiv(m_wide, TM_MAX)
    tm = _round_up(_cdiv(m_wide, n_m), M_ALIGN)
    mp = tm * n_m
    max_off = (kh - 1) * Wi + (kw - 1)
    hi_total = max(hi_base, _cdiv(mp + max_off, Wi))   # cover in-kernel reads
    li = hi_total * Wi

    if kind == "1x1":
        xp = jnp.pad(xc, ((0, 0), (0, hi_total - H), (0, Wi - W), (0, 0)))
    elif kind == "3x3s1":
        xp = jnp.pad(xc, ((0, 0), (1, hi_total - H - 1),
                          (1, Wi - W - 1), (0, 0)))
    else:
        xp = jnp.pad(xc, ((0, 0), (1, 2 * hi_total - H - 1),
                          (1, 2 * Wi - W - 1), (0, 0)))
        # space-to-depth: (N, 2*hi_total, 2*Wi, Cin) -> (N, hi_total, Wi, 4Cin)
        xp = xp.reshape(N, hi_total, 2, Wi, 2, Cin)
        xp = xp.transpose(0, 1, 3, 2, 4, 5).reshape(N, hi_total, Wi, 4 * Cin)

    xf = xp.reshape(N, li, cin_eff)

    if kind == "1x1":
        offsets = (0,)
    elif kind == "3x3s1":
        offsets = tuple(di * Wi + dj for di in range(3) for dj in range(3))
    else:
        offsets = tuple(a * Wi + b for a in range(2) for b in range(2))

    kernel = functools.partial(_conv_bn_lrelu_kernel, offsets=offsets, tm=tm)

    in_specs = [
        pl.BlockSpec((1, li, cin_eff), lambda n, m: (n, 0, 0)),    # resident/n
        # TODO(synk): pipeline_mode=pl.Buffered(1) on the 3 constant operands
        # below once real-size layers make their double-buffering matter.
        pl.BlockSpec((T, cin_eff, coutp), lambda n, m: (0, 0, 0)),
        pl.BlockSpec((1, coutp), lambda n, m: (0, 0)),
        pl.BlockSpec((1, coutp), lambda n, m: (0, 0)),
    ]

    # VMEM limit derived from the actual per-call footprint (double-buffer
    # upper bound), clamped to 3/4 of this generation's physical VMEM.
    elt = 2 if feed_dt == jnp.bfloat16 else 4
    footprint = 2 * (li * cin_eff * elt + T * cin_eff * coutp * 2
                     + tm * coutp * 2 + 2 * coutp * 4)
    vlim = int(min(max(32 << 20, 2 * footprint), 3 * _vmem_capacity() // 4))

    out = pl.pallas_call(
        kernel,
        out_shape=jax.ShapeDtypeStruct((N, mp, coutp), ACT_DTYPE),
        grid_spec=pltpu.PrefetchScalarGridSpec(
            num_scalar_prefetch=0,
            grid=(N, n_m),
            in_specs=in_specs,
            out_specs=pl.BlockSpec((1, tm, coutp), lambda n, m: (n, m, 0)),
        ),
        compiler_params=pltpu.CompilerParams(
            dimension_semantics=("parallel", "parallel"),
            vmem_limit_bytes=vlim),
    )(xf, wtaps, cell["scale_p"], cell["bias_p"])

    # Drop the M padding, the garbage "wide" columns and the Cout lane pad.
    out = out[:, :m_wide, :cout].reshape(N, Ho, Wi, cout)[:, :, :Wo, :]
    return out


def _residual_add(y, res):
    # f32 add, bf16 storage; XLA fuses it into the output-slice copy above.
    return (y.astype(jnp.float32) + res.astype(jnp.float32)).astype(ACT_DTYPE)


# ----------------------------- parameter setup -----------------------------

def make_conv_cell(key, cin, cout, k, pad, stride):
    """Deterministic params for common_conv2d + prebuilt Pallas-ready weights."""
    assert (k == 3 and pad == 1 and stride in (1, 2)) or \
           (k == 1 and pad == 0 and stride == 1)
    kw_, kg, kb, km, kv = jax.random.split(key, 5)
    w = jax.random.normal(kw_, (cout, cin, k, k), jnp.float32) * \
        (2.0 / (cin * k * k)) ** 0.5                      # kaiming-ish, OIHW
    gamma = jax.random.uniform(kg, (cout,), jnp.float32, 0.5, 1.5)
    beta = jax.random.normal(kb, (cout,), jnp.float32) * 0.1
    run_mean = jax.random.normal(km, (cout,), jnp.float32) * 0.1
    run_var = jax.random.uniform(kv, (cout,), jnp.float32, 0.5, 1.5)
    scale = gamma / jnp.sqrt(run_var + BN_EPS)            # eval-mode BN fold
    bias = beta - run_mean * scale

    coutp = _round_up(cout, LANE)
    w_hwio = jnp.transpose(w, (2, 3, 1, 0))               # (k, k, cin, cout)
    if k == 1:
        kind = "1x1"
        wtaps = w_hwio.reshape(1, cin, cout)
    elif stride == 1:
        kind = "3x3s1"
        wtaps = w_hwio.reshape(9, cin, cout)              # tap t = di*3 + dj
    else:
        kind = "3x3s2"
        # stride-2 3x3 == stride-1 2x2 over space-to-depth(2x2) input:
        # W2[a, b, (p*2+q)*cin + ci, co] = W[2a+p, 2b+q, ci, co] (0 if oob).
        w2 = jnp.zeros((2, 2, 2, 2, cin, cout), jnp.float32)  # [a,b,p,q,ci,co]
        for a in range(2):
            for b in range(2):
                for p in range(2):
                    for q in range(2):
                        di, dj = 2 * a + p, 2 * b + q
                        if di < 3 and dj < 3:
                            w2 = w2.at[a, b, p, q].set(w_hwio[di, dj])
        wtaps = w2.reshape(4, 4 * cin, cout)               # tap t = a*2 + b

    wtaps = jnp.pad(wtaps, ((0, 0), (0, 0), (0, coutp - cout)))
    wtaps = wtaps.astype(jnp.bfloat16)                     # bf16 MXU weights
    scale_p = jnp.pad(scale, (0, coutp - cout)).reshape(1, coutp)
    bias_p = jnp.pad(bias, (0, coutp - cout)).reshape(1, coutp)

    return dict(kind=kind, cout=cout, wtaps=wtaps, scale_p=scale_p,
                bias_p=bias_p,
                # raw params kept for the pure-JAX reference
                w=w, scale=scale, bias=bias, stride=stride, padding=pad)


def build_darknet_params(key, layers, inplanes, planes, num_stages):
    keys = iter(jax.random.split(key, 128))
    params = {"stem": make_conv_cell(next(keys), inplanes[0], planes[0], 3, 1, 1),
              "stages": []}
    for nlayer, inchannel, channel in zip(layers[:num_stages],
                                          inplanes[1:num_stages + 1],
                                          planes[1:num_stages + 1]):
        assert channel % 2 == 0
        stage = dict(
            down=make_conv_cell(next(keys), inchannel, channel, 3, 1, 2),
            blocks=[])
        for _ in range(nlayer):
            p = channel // 2
            stage["blocks"].append(dict(
                conv1=make_conv_cell(next(keys), channel, p, 1, 0, 1),
                conv2=make_conv_cell(next(keys), p, 2 * p, 3, 1, 1)))
        params["stages"].append(stage)
    return params


# ------------------------------ forward pass -------------------------------

def darknet_v3_forward(x_nchw, params, out_indices):
    """Matches DarknetV3.forward when out_indices is given (returns NCHW
    feature list, like PyTorch)."""
    x = jnp.transpose(x_nchw, (0, 2, 3, 1)).astype(ACT_DTYPE)   # NCHW -> NHWC
    x = conv_bn_lrelu(x, params["stem"])
    outs = []
    for i, stage in enumerate(params["stages"]):
        x = conv_bn_lrelu(x, stage["down"])                # 3x3 stride-2
        for blk in stage["blocks"]:                        # DarknetBasicBlockV3
            res = x
            y = conv_bn_lrelu(x, blk["conv1"])             # 1x1 reduce
            y = conv_bn_lrelu(y, blk["conv2"])             # 3x3
            x = _residual_add(y, res)                      # + residual
        if out_indices and i in out_indices:
            outs.append(jnp.transpose(x, (0, 3, 1, 2)).astype(jnp.float32))
    return outs
    # TODO(synk): classifier head (AvgPool2d(7)+Linear) is unreachable in the
    # reference module when out_indices is supplied, so it is not implemented.


# ---------------------------- pure-JAX reference ---------------------------

def _ref_cell(x, cell):
    # Mirror the kernel's precision policy: bf16 inputs/weights, f32
    # accumulation, f32 BN/LeakyReLU epilogue, bf16 storage.
    xb = x.astype(jnp.float32)
    wb = jnp.transpose(cell["w"], (2, 3, 1, 0))            # OIHW -> HWIO
    wb = wb.astype(jnp.bfloat16).astype(jnp.float32)
    y = lax.conv_general_dilated(
        xb, wb, (cell["stride"],) * 2,
        [(cell["padding"],) * 2] * 2,
        dimension_numbers=("NHWC", "HWIO", "NHWC"),
        precision=lax.Precision.HIGHEST,
        preferred_element_type=jnp.float32)
    y = y * cell["scale"] + cell["bias"]
    y = jnp.where(y >= 0, y, NEG_SLOPE * y)
    return y.astype(ACT_DTYPE)


def ref_forward(x_nchw, params, out_indices):
    x = jnp.transpose(x_nchw, (0, 2, 3, 1)).astype(ACT_DTYPE)
    x = _ref_cell(x, params["stem"])
    outs = []
    for i, stage in enumerate(params["stages"]):
        x = _ref_cell(x, stage["down"])
        for blk in stage["blocks"]:
            res = x
            y = _ref_cell(x, blk["conv1"])
            y = _ref_cell(y, blk["conv2"])
            x = (y.astype(jnp.float32) + res.astype(jnp.float32)).astype(ACT_DTYPE)
        if out_indices and i in out_indices:
            outs.append(jnp.transpose(x, (0, 3, 1, 2)).astype(jnp.float32))
    return outs


# ----------------------------------- main -----------------------------------

if __name__ == "__main__":
    # Small DarknetV3 config (same construction rules as the PyTorch module).
    layers = [1, 1, 2]
    inplanes = [3, 8, 16, 32]
    planes = [8, 16, 32, 64]
    num_stages = 3
    out_indices = (1, 2)

    key = jax.random.PRNGKey(0)
    kp, kx = jax.random.split(key)
    params = build_darknet_params(kp, layers, inplanes, planes, num_stages)

    x = jax.random.normal(kx, (2, 3, 32, 32), jnp.float32)   # NCHW input

    fwd = jax.jit(lambda inp: darknet_v3_forward(inp, params, out_indices))
    outs = jax.block_until_ready(fwd(x))

    refs = jax.block_until_ready(ref_forward(x, params, out_indices))
    for o, r in zip(outs, refs):
        assert o.shape == r.shape, (o.shape, r.shape)
        assert jnp.allclose(o, r, rtol=3e-2, atol=3e-2), float(
            jnp.max(jnp.abs(o - r)))

    print("KERNEL_OK")
</pallas_src>

<mosaic_0001>
module attributes {stable_mosaic.version = 11 : i64} {
  func.func @_conv_bn_lrelu_kernel(%arg0: i32, %arg1: i32, %arg2: memref<1x1400x3xf32, #tpu.memory_space<vmem>>, %arg3: memref<9x3x128xbf16, #tpu.memory_space<vmem>>, %arg4: memref<1x128xf32, #tpu.memory_space<vmem>>, %arg5: memref<1x128xf32, #tpu.memory_space<vmem>>, %arg6: memref<1x256x128xbf16, #tpu.memory_space<vmem>>) attributes {dimension_semantics = [#tpu.dimension_semantics<parallel>, #tpu.dimension_semantics<parallel>], iteration_bounds = array<i64: 2, 5>, scalar_prefetch = 0 : i64, scratch_operands = 0 : i64, tpu.core_type = #tpu.core_type<tc>, window_params = [{transform_indices = @transform_0, window_bounds = array<i64: 1, 1400, 3>}, {pipeline_mode = #tpu.pipeline_mode<synchronous>, transform_indices = @transform_1, window_bounds = array<i64: 9, 3, 128>}, {pipeline_mode = #tpu.pipeline_mode<synchronous>, transform_indices = @transform_2, window_bounds = array<i64: 1, 128>}, {pipeline_mode = #tpu.pipeline_mode<synchronous>, transform_indices = @transform_3, window_bounds = array<i64: 1, 128>}, {transform_indices = @transform_4, window_bounds = array<i64: 1, 256, 128>}]} {
    %c256_i32 = arith.constant 256 : i32
    %0 = arith.muli %arg1, %c256_i32 : i32
    %1 = tpu.assume_multiple %0, 16 : i32
    %c0_i32 = arith.constant 0 : i32
    %2 = arith.addi %1, %c0_i32 : i32
    %c0 = arith.constant 0 : index
    %3 = arith.index_cast %2 : i32 to index
    %c0_0 = arith.constant 0 : index
    %4 = vector.load %arg2[%c0, %3, %c0_0] : memref<1x1400x3xf32, #tpu.memory_space<vmem>>, vector<1x256x3xf32>
    %5 = vector.shape_cast %4 : vector<1x256x3xf32> to vector<256x3xf32>
    %6 = arith.truncf %5 : vector<256x3xf32> to vector<256x3xbf16>
    %c0_1 = arith.constant 0 : index
    %c0_2 = arith.constant 0 : index
    %c0_3 = arith.constant 0 : index
    %7 = vector.load %arg3[%c0_1, %c0_2, %c0_3] : memref<9x3x128xbf16, #tpu.memory_space<vmem>>, vector<1x3x128xbf16>
    %8 = vector.shape_cast %7 : vector<1x3x128xbf16> to vector<3x128xbf16>
    %cst = arith.constant dense<0.000000e+00> : vector<256x128xf32>
    %9 = tpu.matmul %6, %8, %cst {dimension_numbers = #tpu.dot_dimension_numbers<[1], [0], [0], [1], [0, 0, 1, 1], [], []>} : vector<256x3xbf16>, vector<3x128xbf16>, vector<256x128xf32> -> vector<256x128xf32>
    %c1_i32 = arith.constant 1 : i32
    %10 = arith.addi %1, %c1_i32 : i32
    %c0_4 = arith.constant 0 : index
    %11 = arith.index_cast %10 : i32 to index
    %c0_5 = arith.constant 0 : index
    %12 = vector.load %arg2[%c0_4, %11, %c0_5] : memref<1x1400x3xf32, #tpu.memory_space<vmem>>, vector<1x256x3xf32>
    %13 = vector.shape_cast %12 : vector<1x256x3xf32> to vector<256x3xf32>
    %14 = arith.truncf %13 : vector<256x3xf32> to vector<256x3xbf16>
    %c1 = arith.constant 1 : index
    %c0_6 = arith.constant 0 : index
    %c0_7 = arith.constant 0 : index
    %15 = vector.load %arg3[%c1, %c0_6, %c0_7] : memref<9x3x128xbf16, #tpu.memory_space<vmem>>, vector<1x3x128xbf16>
    %16 = vector.shape_cast %15 : vector<1x3x128xbf16> to vector<3x128xbf16>
    %cst_8 = arith.constant dense<0.000000e+00> : vector<256x128xf32>
    %17 = tpu.matmul %14, %16, %cst_8 {dimension_numbers = #tpu.dot_dimension_numbers<[1], [0], [0], [1], [0, 0, 1, 1], [], []>} : vector<256x3xbf16>, vector<3x128xbf16>, vector<256x128xf32> -> vector<256x128xf32>
    %18 = arith.addf %9, %17 : vector<256x128xf32>
    %c2_i32 = arith.constant 2 : i32
    %19 = arith.addi %1, %c2_i32 : i32
    %c0_9 = arith.constant 0 : index
    %20 = arith.index_cast %19 : i32 to index
    %c0_10 = arith.constant 0 : index
    %21 = vector.load %arg2[%c0_9, %20, %c0_10] : memref<1x1400x3xf32, #tpu.memory_space<vmem>>, vector<1x256x3xf32>
    %22 = vector.shape_cast %21 : vector<1x256x3xf32> to vector<256x3xf32>
    %23 = arith.truncf %22 : vector<256x3xf32> to vector<256x3xbf16>
    %c2 = arith.constant 2 : index
    %c0_11 = arith.constant 0 : index
    %c0_12 = arith.constant 0 : index
    %24 = vector.load %arg3[%c2, %c0_11, %c0_12] : memref<9x3x128xbf16, #tpu.memory_space<vmem>>, vector<1x3x128xbf16>
    %25 = vector.shape_cast %24 : vector<1x3x128xbf16> to vector<3x128xbf16>
    %cst_13 = arith.constant dense<0.000000e+00> : vector<256x128xf32>
    %26 = tpu.matmul %23, %25, %cst_13 {dimension_numbers = #tpu.dot_dimension_numbers<[1], [0], [0], [1], [0, 0, 1, 1], [], []>} : vector<256x3xbf16>, vector<3x128xbf16>, vector<256x128xf32> -> vector<256x128xf32>
    %27 = arith.addf %18, %26 : vector<256x128xf32>
    %c40_i32 = arith.constant 40 : i32
    %28 = arith.addi %1, %c40_i32 : i32
    %c0_14 = arith.constant 0 : index
    %29 = arith.index_cast %28 : i32 to index
    %c0_15 = arith.constant 0 : index
    %30 = vector.load %arg2[%c0_14, %29, %c0_15] : memref<1x1400x3xf32, #tpu.memory_space<vmem>>, vector<1x256x3xf32>
    %31 = vector.shape_cast %30 : vector<1x256x3xf32> to vector<256x3xf32>
    %32 = arith.truncf %31 : vector<256x3xf32> to vector<256x3xbf16>
    %c3 = arith.constant 3 : index
    %c0_16 = arith.constant 0 : index
    %c0_17 = arith.constant 0 : index
    %33 = vector.load %arg3[%c3, %c0_16, %c0_17] : memref<9x3x128xbf16, #tpu.memory_space<vmem>>, vector<1x3x128xbf16>
    %34 = vector.shape_cast %33 : vector<1x3x128xbf16> to vector<3x128xbf16>
    %cst_18 = arith.constant dense<0.000000e+00> : vector<256x128xf32>
    %35 = tpu.matmul %32, %34, %cst_18 {dimension_numbers = #tpu.dot_dimension_numbers<[1], [0], [0], [1], [0, 0, 1, 1], [], []>} : vector<256x3xbf16>, vector<3x128xbf16>, vector<256x128xf32> -> vector<256x128xf32>
    %36 = arith.addf %27, %35 : vector<256x128xf32>
    %c41_i32 = arith.constant 41 : i32
    %37 = arith.addi %1, %c41_i32 : i32
    %c0_19 = arith.constant 0 : index
    %38 = arith.index_cast %37 : i32 to index
    %c0_20 = arith.constant 0 : index
    %39 = vector.load %arg2[%c0_19, %38, %c0_20] : memref<1x1400x3xf32, #tpu.memory_space<vmem>>, vector<1x256x3xf32>
    %40 = vector.shape_cast %39 : vector<1x256x3xf32> to vector<256x3xf32>
    %41 = arith.truncf %40 : vector<256x3xf32> to vector<256x3xbf16>
    %c4 = arith.constant 4 : index
    %c0_21 = arith.constant 0 : index
    %c0_22 = arith.constant 0 : index
    %42 = vector.load %arg3[%c4, %c0_21, %c0_22] : memref<9x3x128xbf16, #tpu.memory_space<vmem>>, vector<1x3x128xbf16>
    %43 = vector.shape_cast %42 : vector<1x3x128xbf16> to vector<3x128xbf16>
    %cst_23 = arith.constant dense<0.000000e+00> : vector<256x128xf32>
    %44 = tpu.matmul %41, %43, %cst_23 {dimension_numbers = #tpu.dot_dimension_numbers<[1], [0], [0], [1], [0, 0, 1, 1], [], []>} : vector<256x3xbf16>, vector<3x128xbf16>, vector<256x128xf32> -> vector<256x128xf32>
    %45 = arith.addf %36, %44 : vector<256x128xf32>
    %c42_i32 = arith.constant 42 : i32
    %46 = arith.addi %1, %c42_i32 : i32
    %c0_24 = arith.constant 0 : index
    %47 = arith.index_cast %46 : i32 to index
    %c0_25 = arith.constant 0 : index
    %48 = vector.load %arg2[%c0_24, %47, %c0_25] : memref<1x1400x3xf32, #tpu.memory_space<vmem>>, vector<1x256x3xf32>
    %49 = vector.shape_cast %48 : vector<1x256x3xf32> to vector<256x3xf32>
    %50 = arith.truncf %49 : vector<256x3xf32> to vector<256x3xbf16>
    %c5 = arith.constant 5 : index
    %c0_26 = arith.constant 0 : index
    %c0_27 = arith.constant 0 : index
    %51 = vector.load %arg3[%c5, %c0_26, %c0_27] : memref<9x3x128xbf16, #tpu.memory_space<vmem>>, vector<1x3x128xbf16>
    %52 = vector.shape_cast %51 : vector<1x3x128xbf16> to vector<3x128xbf16>
    %cst_28 = arith.constant dense<0.000000e+00> : vector<256x128xf32>
    %53 = tpu.matmul %50, %52, %cst_28 {dimension_numbers = #tpu.dot_dimension_numbers<[1], [0], [0], [1], [0, 0, 1, 1], [], []>} : vector<256x3xbf16>, vector<3x128xbf16>, vector<256x128xf32> -> vector<256x128xf32>
    %54 = arith.addf %45, %53 : vector<256x128xf32>
    %c80_i32 = arith.constant 80 : i32
    %55 = arith.addi %1, %c80_i32 : i32
    %c0_29 = arith.constant 0 : index
    %56 = arith.index_cast %55 : i32 to index
    %c0_30 = arith.constant 0 : index
    %57 = vector.load %arg2[%c0_29, %56, %c0_30] : memref<1x1400x3xf32, #tpu.memory_space<vmem>>, vector<1x256x3xf32>
    %58 = vector.shape_cast %57 : vector<1x256x3xf32> to vector<256x3xf32>
    %59 = arith.truncf %58 : vector<256x3xf32> to vector<256x3xbf16>
    %c6 = arith.constant 6 : index
    %c0_31 = arith.constant 0 : index
    %c0_32 = arith.constant 0 : index
    %60 = vector.load %arg3[%c6, %c0_31, %c0_32] : memref<9x3x128xbf16, #tpu.memory_space<vmem>>, vector<1x3x128xbf16>
    %61 = vector.shape_cast %60 : vector<1x3x128xbf16> to vector<3x128xbf16>
    %cst_33 = arith.constant dense<0.000000e+00> : vector<256x128xf32>
    %62 = tpu.matmul %59, %61, %cst_33 {dimension_numbers = #tpu.dot_dimension_numbers<[1], [0], [0], [1], [0, 0, 1, 1], [], []>} : vector<256x3xbf16>, vector<3x128xbf16>, vector<256x128xf32> -> vector<256x128xf32>
    %63 = arith.addf %54, %62 : vector<256x128xf32>
    %c81_i32 = arith.constant 81 : i32
    %64 = arith.addi %1, %c81_i32 : i32
    %c0_34 = arith.constant 0 : index
    %65 = arith.index_cast %64 : i32 to index
    %c0_35 = arith.constant 0 : index
    %66 = vector.load %arg2[%c0_34, %65, %c0_35] : memref<1x1400x3xf32, #tpu.memory_space<vmem>>, vector<1x256x3xf32>
    %67 = vector.shape_cast %66 : vector<1x256x3xf32> to vector<256x3xf32>
    %68 = arith.truncf %67 : vector<256x3xf32> to vector<256x3xbf16>
    %c7 = arith.constant 7 : index
    %c0_36 = arith.constant 0 : index
    %c0_37 = arith.constant 0 : index
    %69 = vector.load %arg3[%c7, %c0_36, %c0_37] : memref<9x3x128xbf16, #tpu.memory_space<vmem>>, vector<1x3x128xbf16>
    %70 = vector.shape_cast %69 : vector<1x3x128xbf16> to vector<3x128xbf16>
    %cst_38 = arith.constant dense<0.000000e+00> : vector<256x128xf32>
    %71 = tpu.matmul %68, %70, %cst_38 {dimension_numbers = #tpu.dot_dimension_numbers<[1], [0], [0], [1], [0, 0, 1, 1], [], []>} : vector<256x3xbf16>, vector<3x128xbf16>, vector<256x128xf32> -> vector<256x128xf32>
    %72 = arith.addf %63, %71 : vector<256x128xf32>
    %c82_i32 = arith.constant 82 : i32
    %73 = arith.addi %1, %c82_i32 : i32
    %c0_39 = arith.constant 0 : index
    %74 = arith.index_cast %73 : i32 to index
    %c0_40 = arith.constant 0 : index
    %75 = vector.load %arg2[%c0_39, %74, %c0_40] : memref<1x1400x3xf32, #tpu.memory_space<vmem>>, vector<1x256x3xf32>
    %76 = vector.shape_cast %75 : vector<1x256x3xf32> to vector<256x3xf32>
    %77 = arith.truncf %76 : vector<256x3xf32> to vector<256x3xbf16>
    %c8 = arith.constant 8 : index
    %c0_41 = arith.constant 0 : index
    %c0_42 = arith.constant 0 : index
    %78 = vector.load %arg3[%c8, %c0_41, %c0_42] : memref<9x3x128xbf16, #tpu.memory_space<vmem>>, vector<1x3x128xbf16>
    %79 = vector.shape_cast %78 : vector<1x3x128xbf16> to vector<3x128xbf16>
    %cst_43 = arith.constant dense<0.000000e+00> : vector<256x128xf32>
    %80 = tpu.matmul %77, %79, %cst_43 {dimension_numbers = #tpu.dot_dimension_numbers<[1], [0], [0], [1], [0, 0, 1, 1], [], []>} : vector<256x3xbf16>, vector<3x128xbf16>, vector<256x128xf32> -> vector<256x128xf32>
    %81 = arith.addf %72, %80 : vector<256x128xf32>
    %c0_44 = arith.constant 0 : index
    %c0_45 = arith.constant 0 : index
    %82 = vector.load %arg4[%c0_44, %c0_45] : memref<1x128xf32, #tpu.memory_space<vmem>>, vector<1x128xf32>
    %83 = vector.broadcast %82 : vector<1x128xf32> to vector<256x128xf32>
    %84 = arith.mulf %81, %83 : vector<256x128xf32>
    %c0_46 = arith.constant 0 : index
    %c0_47 = arith.constant 0 : index
    %85 = vector.load %arg5[%c0_46, %c0_47] : memref<1x128xf32, #tpu.memory_space<vmem>>, vector<1x128xf32>
    %86 = vector.broadcast %85 : vector<1x128xf32> to vector<256x128xf32>
    %87 = arith.addf %84, %86 : vector<256x128xf32>
    %cst_48 = arith.constant 0.000000e+00 : f32
    %88 = vector.broadcast %cst_48 : f32 to vector<256x128xf32>
    %89 = arith.cmpf oge, %87, %88 : vector<256x128xf32>
    %cst_49 = arith.constant 1.000000e-01 : f32
    %90 = vector.broadcast %cst_49 : f32 to vector<256x128xf32>
    %91 = arith.mulf %90, %87 : vector<256x128xf32>
    %92 = arith.select %89, %87, %91 : vector<256x128xi1>, vector<256x128xf32>
    %93 = arith.truncf %92 : vector<256x128xf32> to vector<256x128xbf16>
    %c0_50 = arith.constant 0 : index
    %c0_51 = arith.constant 0 : index
    %c0_52 = arith.constant 0 : index
    %94 = vector.load %arg6[%c0_50, %c0_51, %c0_52] : memref<1x256x128xbf16, #tpu.memory_space<vmem>>, vector<1x256x128xbf16>
    %95 = vector.shape_cast %94 : vector<1x256x128xbf16> to vector<256x128xbf16>
    %96 = vector.shape_cast %93 : vector<256x128xbf16> to vector<1x256x128xbf16>
    tpu.vector_store %arg6[%c0_50, %c0_51, %c0_52], %96 {strides = array<i32>} : memref<1x256x128xbf16, #tpu.memory_space<vmem>>, vector<1x256x128xbf16>,
    return
  }
  func.func @transform_0(%arg0: i32, %arg1: i32) -> (i32, i32, i32) {
    %c0_i32 = arith.constant 0 : i32
    %c0_i32_0 = arith.constant 0 : i32
    %c0_i32_1 = arith.constant 0 : i32
    return %arg0, %c0_i32, %c0_i32_0 : i32, i32, i32
  }
  func.func @transform_1(%arg0: i32, %arg1: i32) -> (i32, i32, i32) {
    %c0_i32 = arith.constant 0 : i32
    %c0_i32_0 = arith.constant 0 : i32
    %c0_i32_1 = arith.constant 0 : i32
    %c0_i32_2 = arith.constant 0 : i32
    return %c0_i32, %c0_i32_0, %c0_i32_1 : i32, i32, i32
  }
  func.func @transform_2(%arg0: i32, %arg1: i32) -> (i32, i32) {
    %c0_i32 = arith.constant 0 : i32
    %c0_i32_0 = arith.constant 0 : i32
    %c0_i32_1 = arith.constant 0 : i32
    return %c0_i32, %c0_i32_0 : i32, i32
  }
  func.func @transform_3(%arg0: i32, %arg1: i32) -> (i32, i32) {
    %c0_i32 = arith.constant 0 : i32
    %c0_i32_0 = arith.constant 0 : i32
    %c0_i32_1 = arith.constant 0 : i32
    return %c0_i32, %c0_i32_0 : i32, i32
  }
  func.func @transform_4(%arg0: i32, %arg1: i32) -> (i32, i32, i32) {
    %c0_i32 = arith.constant 0 : i32
    %c0_i32_0 = arith.constant 0 : i32
    return %arg0, %arg1, %c0_i32 : i32, i32, i32
  }
}

module attributes {stable_mosaic.version = 11 : i64} {
  func.func @_conv_bn_lrelu_kernel(%arg0: i32, %arg1: i32, %arg2: memref<1x432x32xf32, #tpu.memory_space<vmem>>, %arg3: memref<4x32x128xbf16, #tpu.memory_space<vmem>>, %arg4: memref<1x128xf32, #tpu.memory_space<vmem>>, %arg5: memref<1x128xf32, #tpu.memory_space<vmem>>, %arg6: memref<1x192x128xbf16, #tpu.memory_space<vmem>>) attributes {dimension_semantics = [#tpu.dimension_semantics<parallel>, #tpu.dimension_semantics<parallel>], iteration_bounds = array<i64: 2, 2>, scalar_prefetch = 0 : i64, scratch_operands = 0 : i64, tpu.core_type = #tpu.core_type<tc>, window_params = [{transform_indices = @transform_0, window_bounds = array<i64: 1, 432, 32>}, {pipeline_mode = #tpu.pipeline_mode<synchronous>, transform_indices = @transform_1, window_bounds = array<i64: 4, 32, 128>}, {pipeline_mode = #tpu.pipeline_mode<synchronous>, transform_indices = @transform_2, window_bounds = array<i64: 1, 128>}, {pipeline_mode = #tpu.pipeline_mode<synchronous>, transform_indices = @transform_3, window_bounds = array<i64: 1, 128>}, {transform_indices = @transform_4, window_bounds = array<i64: 1, 192, 128>}]} {
    %c192_i32 = arith.constant 192 : i32
    %0 = arith.muli %arg1, %c192_i32 : i32
    %1 = tpu.assume_multiple %0, 16 : i32
    %c0_i32 = arith.constant 0 : i32
    %2 = arith.addi %1, %c0_i32 : i32
    %c0 = arith.constant 0 : index
    %3 = arith.index_cast %2 : i32 to index
    %c0_0 = arith.constant 0 : index
    %4 = vector.load %arg2[%c0, %3, %c0_0] : memref<1x432x32xf32, #tpu.memory_space<vmem>>, vector<1x192x32xf32>
    %5 = vector.shape_cast %4 : vector<1x192x32xf32> to vector<192x32xf32>
    %6 = arith.truncf %5 : vector<192x32xf32> to vector<192x32xbf16>
    %c0_1 = arith.constant 0 : index
    %c0_2 = arith.constant 0 : index
    %c0_3 = arith.constant 0 : index
    %7 = vector.load %arg3[%c0_1, %c0_2, %c0_3] : memref<4x32x128xbf16, #tpu.memory_space<vmem>>, vector<1x32x128xbf16>
    %8 = vector.shape_cast %7 : vector<1x32x128xbf16> to vector<32x128xbf16>
    %cst = arith.constant dense<0.000000e+00> : vector<192x128xf32>
    %9 = tpu.matmul %6, %8, %cst {dimension_numbers = #tpu.dot_dimension_numbers<[1], [0], [0], [1], [0, 0, 1, 1], [], []>} : vector<192x32xbf16>, vector<32x128xbf16>, vector<192x128xf32> -> vector<192x128xf32>
    %c1_i32 = arith.constant 1 : i32
    %10 = arith.addi %1, %c1_i32 : i32
    %c0_4 = arith.constant 0 : index
    %11 = arith.index_cast %10 : i32 to index
    %c0_5 = arith.constant 0 : index
    %12 = vector.load %arg2[%c0_4, %11, %c0_5] : memref<1x432x32xf32, #tpu.memory_space<vmem>>, vector<1x192x32xf32>
    %13 = vector.shape_cast %12 : vector<1x192x32xf32> to vector<192x32xf32>
    %14 = arith.truncf %13 : vector<192x32xf32> to vector<192x32xbf16>
    %c1 = arith.constant 1 : index
    %c0_6 = arith.constant 0 : index
    %c0_7 = arith.constant 0 : index
    %15 = vector.load %arg3[%c1, %c0_6, %c0_7] : memref<4x32x128xbf16, #tpu.memory_space<vmem>>, vector<1x32x128xbf16>
    %16 = vector.shape_cast %15 : vector<1x32x128xbf16> to vector<32x128xbf16>
    %cst_8 = arith.constant dense<0.000000e+00> : vector<192x128xf32>
    %17 = tpu.matmul %14, %16, %cst_8 {dimension_numbers = #tpu.dot_dimension_numbers<[1], [0], [0], [1], [0, 0, 1, 1], [], []>} : vector<192x32xbf16>, vector<32x128xbf16>, vector<192x128xf32> -> vector<192x128xf32>
    %18 = arith.addf %9, %17 : vector<192x128xf32>
    %c24_i32 = arith.constant 24 : i32
    %19 = arith.addi %1, %c24_i32 : i32
    %c0_9 = arith.constant 0 : index
    %20 = arith.index_cast %19 : i32 to index
    %c0_10 = arith.constant 0 : index
    %21 = vector.load %arg2[%c0_9, %20, %c0_10] : memref<1x432x32xf32, #tpu.memory_space<vmem>>, vector<1x192x32xf32>
    %22 = vector.shape_cast %21 : vector<1x192x32xf32> to vector<192x32xf32>
    %23 = arith.truncf %22 : vector<192x32xf32> to vector<192x32xbf16>
    %c2 = arith.constant 2 : index
    %c0_11 = arith.constant 0 : index
    %c0_12 = arith.constant 0 : index
    %24 = vector.load %arg3[%c2, %c0_11, %c0_12] : memref<4x32x128xbf16, #tpu.memory_space<vmem>>, vector<1x32x128xbf16>
    %25 = vector.shape_cast %24 : vector<1x32x128xbf16> to vector<32x128xbf16>
    %cst_13 = arith.constant dense<0.000000e+00> : vector<192x128xf32>
    %26 = tpu.matmul %23, %25, %cst_13 {dimension_numbers = #tpu.dot_dimension_numbers<[1], [0], [0], [1], [0, 0, 1, 1], [], []>} : vector<192x32xbf16>, vector<32x128xbf16>, vector<192x128xf32> -> vector<192x128xf32>
    %27 = arith.addf %18, %26 : vector<192x128xf32>
    %c25_i32 = arith.constant 25 : i32
    %28 = arith.addi %1, %c25_i32 : i32
    %c0_14 = arith.constant 0 : index
    %29 = arith.index_cast %28 : i32 to index
    %c0_15 = arith.constant 0 : index
    %30 = vector.load %arg2[%c0_14, %29, %c0_15] : memref<1x432x32xf32, #tpu.memory_space<vmem>>, vector<1x192x32xf32>
    %31 = vector.shape_cast %30 : vector<1x192x32xf32> to vector<192x32xf32>
    %32 = arith.truncf %31 : vector<192x32xf32> to vector<192x32xbf16>
    %c3 = arith.constant 3 : index
    %c0_16 = arith.constant 0 : index
    %c0_17 = arith.constant 0 : index
    %33 = vector.load %arg3[%c3, %c0_16, %c0_17] : memref<4x32x128xbf16, #tpu.memory_space<vmem>>, vector<1x32x128xbf16>
    %34 = vector.shape_cast %33 : vector<1x32x128xbf16> to vector<32x128xbf16>
    %cst_18 = arith.constant dense<0.000000e+00> : vector<192x128xf32>
    %35 = tpu.matmul %32, %34, %cst_18 {dimension_numbers = #tpu.dot_dimension_numbers<[1], [0], [0], [1], [0, 0, 1, 1], [], []>} : vector<192x32xbf16>, vector<32x128xbf16>, vector<192x128xf32> -> vector<192x128xf32>
    %36 = arith.addf %27, %35 : vector<192x128xf32>
    %c0_19 = arith.constant 0 : index
    %c0_20 = arith.constant 0 : index
    %37 = vector.load %arg4[%c0_19, %c0_20] : memref<1x128xf32, #tpu.memory_space<vmem>>, vector<1x128xf32>
    %38 = vector.broadcast %37 : vector<1x128xf32> to vector<192x128xf32>
    %39 = arith.mulf %36, %38 : vector<192x128xf32>
    %c0_21 = arith.constant 0 : index
    %c0_22 = arith.constant 0 : index
    %40 = vector.load %arg5[%c0_21, %c0_22] : memref<1x128xf32, #tpu.memory_space<vmem>>, vector<1x128xf32>
    %41 = vector.broadcast %40 : vector<1x128xf32> to vector<192x128xf32>
    %42 = arith.addf %39, %41 : vector<192x128xf32>
    %cst_23 = arith.constant 0.000000e+00 : f32
    %43 = vector.broadcast %cst_23 : f32 to vector<192x128xf32>
    %44 = arith.cmpf oge, %42, %43 : vector<192x128xf32>
    %cst_24 = arith.constant 1.000000e-01 : f32
    %45 = vector.broadcast %cst_24 : f32 to vector<192x128xf32>
    %46 = arith.mulf %45, %42 : vector<192x128xf32>
    %47 = arith.select %44, %42, %46 : vector<192x128xi1>, vector<192x128xf32>
    %48 = arith.truncf %47 : vector<192x128xf32> to vector<192x128xbf16>
    %c0_25 = arith.constant 0 : index
    %c0_26 = arith.constant 0 : index
    %c0_27 = arith.constant 0 : index
    %49 = vector.load %arg6[%c0_25, %c0_26, %c0_27] : memref<1x192x128xbf16, #tpu.memory_space<vmem>>, vector<1x192x128xbf16>
    %50 = vector.shape_cast %49 : vector<1x192x128xbf16> to vector<192x128xbf16>
    %51 = vector.shape_cast %48 : vector<192x128xbf16> to vector<1x192x128xbf16>
    tpu.vector_store %arg6[%c0_25, %c0_26, %c0_27], %51 {strides = array<i32>} : memref<1x192x128xbf16, #tpu.memory_space<vmem>>, vector<1x192x128xbf16>,
    return
  }
  func.func @transform_0(%arg0: i32, %arg1: i32) -> (i32, i32, i32) {
    %c0_i32 = arith.constant 0 : i32
    %c0_i32_0 = arith.constant 0 : i32
    %c0_i32_1 = arith.constant 0 : i32
    return %arg0, %c0_i32, %c0_i32_0 : i32, i32, i32
  }
  func.func @transform_1(%arg0: i32, %arg1: i32) -> (i32, i32, i32) {
    %c0_i32 = arith.constant 0 : i32
    %c0_i32_0 = arith.constant 0 : i32
    %c0_i32_1 = arith.constant 0 : i32
    %c0_i32_2 = arith.constant 0 : i32
    return %c0_i32, %c0_i32_0, %c0_i32_1 : i32, i32, i32
  }
  func.func @transform_2(%arg0: i32, %arg1: i32) -> (i32, i32) {
    %c0_i32 = arith.constant 0 : i32
    %c0_i32_0 = arith.constant 0 : i32
    %c0_i32_1 = arith.constant 0 : i32
    return %c0_i32, %c0_i32_0 : i32, i32
  }
  func.func @transform_3(%arg0: i32, %arg1: i32) -> (i32, i32) {
    %c0_i32 = arith.constant 0 : i32
    %c0_i32_0 = arith.constant 0 : i32
    %c0_i32_1 = arith.constant 0 : i32
    return %c0_i32, %c0_i32_0 : i32, i32
  }
  func.func @transform_4(%arg0: i32, %arg1: i32) -> (i32, i32, i32) {
    %c0_i32 = arith.constant 0 : i32
    %c0_i32_0 = arith.constant 0 : i32
    return %arg0, %arg1, %c0_i32 : i32, i32, i32
  }
}

module attributes {stable_mosaic.version = 11 : i64} {
  func.func @_conv_bn_lrelu_kernel(%arg0: i32, %arg1: i32, %arg2: memref<1x456x8xf32, #tpu.memory_space<vmem>>, %arg3: memref<9x8x128xbf16, #tpu.memory_space<vmem>>, %arg4: memref<1x128xf32, #tpu.memory_space<vmem>>, %arg5: memref<1x128xf32, #tpu.memory_space<vmem>>, %arg6: memref<1x192x128xbf16, #tpu.memory_space<vmem>>) attributes {dimension_semantics = [#tpu.dimension_semantics<parallel>, #tpu.dimension_semantics<parallel>], iteration_bounds = array<i64: 2, 2>, scalar_prefetch = 0 : i64, scratch_operands = 0 : i64, tpu.core_type = #tpu.core_type<tc>, window_params = [{transform_indices = @transform_0, window_bounds = array<i64: 1, 456, 8>}, {pipeline_mode = #tpu.pipeline_mode<synchronous>, transform_indices = @transform_1, window_bounds = array<i64: 9, 8, 128>}, {pipeline_mode = #tpu.pipeline_mode<synchronous>, transform_indices = @transform_2, window_bounds = array<i64: 1, 128>}, {pipeline_mode = #tpu.pipeline_mode<synchronous>, transform_indices = @transform_3, window_bounds = array<i64: 1, 128>}, {transform_indices = @transform_4, window_bounds = array<i64: 1, 192, 128>}]} {
    %c192_i32 = arith.constant 192 : i32
    %0 = arith.muli %arg1, %c192_i32 : i32
    %1 = tpu.assume_multiple %0, 16 : i32
    %c0_i32 = arith.constant 0 : i32
    %2 = arith.addi %1, %c0_i32 : i32
    %c0 = arith.constant 0 : index
    %3 = arith.index_cast %2 : i32 to index
    %c0_0 = arith.constant 0 : index
    %4 = vector.load %arg2[%c0, %3, %c0_0] : memref<1x456x8xf32, #tpu.memory_space<vmem>>, vector<1x192x8xf32>
    %5 = vector.shape_cast %4 : vector<1x192x8xf32> to vector<192x8xf32>
    %6 = arith.truncf %5 : vector<192x8xf32> to vector<192x8xbf16>
    %c0_1 = arith.constant 0 : index
    %c0_2 = arith.constant 0 : index
    %c0_3 = arith.constant 0 : index
    %7 = vector.load %arg3[%c0_1, %c0_2, %c0_3] : memref<9x8x128xbf16, #tpu.memory_space<vmem>>, vector<1x8x128xbf16>
    %8 = vector.shape_cast %7 : vector<1x8x128xbf16> to vector<8x128xbf16>
    %cst = arith.constant dense<0.000000e+00> : vector<192x128xf32>
    %9 = tpu.matmul %6, %8, %cst {dimension_numbers = #tpu.dot_dimension_numbers<[1], [0], [0], [1], [0, 0, 1, 1], [], []>} : vector<192x8xbf16>, vector<8x128xbf16>, vector<192x128xf32> -> vector<192x128xf32>
    %c1_i32 = arith.constant 1 : i32
    %10 = arith.addi %1, %c1_i32 : i32
    %c0_4 = arith.constant 0 : index
    %11 = arith.index_cast %10 : i32 to index
    %c0_5 = arith.constant 0 : index
    %12 = vector.load %arg2[%c0_4, %11, %c0_5] : memref<1x456x8xf32, #tpu.memory_space<vmem>>, vector<1x192x8xf32>
    %13 = vector.shape_cast %12 : vector<1x192x8xf32> to vector<192x8xf32>
    %14 = arith.truncf %13 : vector<192x8xf32> to vector<192x8xbf16>
    %c1 = arith.constant 1 : index
    %c0_6 = arith.constant 0 : index
    %c0_7 = arith.constant 0 : index
    %15 = vector.load %arg3[%c1, %c0_6, %c0_7] : memref<9x8x128xbf16, #tpu.memory_space<vmem>>, vector<1x8x128xbf16>
    %16 = vector.shape_cast %15 : vector<1x8x128xbf16> to vector<8x128xbf16>
    %cst_8 = arith.constant dense<0.000000e+00> : vector<192x128xf32>
    %17 = tpu.matmul %14, %16, %cst_8 {dimension_numbers = #tpu.dot_dimension_numbers<[1], [0], [0], [1], [0, 0, 1, 1], [], []>} : vector<192x8xbf16>, vector<8x128xbf16>, vector<192x128xf32> -> vector<192x128xf32>
    %18 = arith.addf %9, %17 : vector<192x128xf32>
    %c2_i32 = arith.constant 2 : i32
    %19 = arith.addi %1, %c2_i32 : i32
    %c0_9 = arith.constant 0 : index
    %20 = arith.index_cast %19 : i32 to index
    %c0_10 = arith.constant 0 : index
    %21 = vector.load %arg2[%c0_9, %20, %c0_10] : memref<1x456x8xf32, #tpu.memory_space<vmem>>, vector<1x192x8xf32>
    %22 = vector.shape_cast %21 : vector<1x192x8xf32> to vector<192x8xf32>
    %23 = arith.truncf %22 : vector<192x8xf32> to vector<192x8xbf16>
    %c2 = arith.constant 2 : index
    %c0_11 = arith.constant 0 : index
    %c0_12 = arith.constant 0 : index
    %24 = vector.load %arg3[%c2, %c0_11, %c0_12] : memref<9x8x128xbf16, #tpu.memory_space<vmem>>, vector<1x8x128xbf16>
    %25 = vector.shape_cast %24 : vector<1x8x128xbf16> to vector<8x128xbf16>
    %cst_13 = arith.constant dense<0.000000e+00> : vector<192x128xf32>
    %26 = tpu.matmul %23, %25, %cst_13 {dimension_numbers = #tpu.dot_dimension_numbers<[1], [0], [0], [1], [0, 0, 1, 1], [], []>} : vector<192x8xbf16>, vector<8x128xbf16>, vector<192x128xf32> -> vector<192x128xf32>
    %27 = arith.addf %18, %26 : vector<192x128xf32>
    %c24_i32 = arith.constant 24 : i32
    %28 = arith.addi %1, %c24_i32 : i32
    %c0_14 = arith.constant 0 : index
    %29 = arith.index_cast %28 : i32 to index
    %c0_15 = arith.constant 0 : index
    %30 = vector.load %arg2[%c0_14, %29, %c0_15] : memref<1x456x8xf32, #tpu.memory_space<vmem>>, vector<1x192x8xf32>
    %31 = vector.shape_cast %30 : vector<1x192x8xf32> to vector<192x8xf32>
    %32 = arith.truncf %31 : vector<192x8xf32> to vector<192x8xbf16>
    %c3 = arith.constant 3 : index
    %c0_16 = arith.constant 0 : index
    %c0_17 = arith.constant 0 : index
    %33 = vector.load %arg3[%c3, %c0_16, %c0_17] : memref<9x8x128xbf16, #tpu.memory_space<vmem>>, vector<1x8x128xbf16>
    %34 = vector.shape_cast %33 : vector<1x8x128xbf16> to vector<8x128xbf16>
    %cst_18 = arith.constant dense<0.000000e+00> : vector<192x128xf32>
    %35 = tpu.matmul %32, %34, %cst_18 {dimension_numbers = #tpu.dot_dimension_numbers<[1], [0], [0], [1], [0, 0, 1, 1], [], []>} : vector<192x8xbf16>, vector<8x128xbf16>, vector<192x128xf32> -> vector<192x128xf32>
    %36 = arith.addf %27, %35 : vector<192x128xf32>
    %c25_i32 = arith.constant 25 : i32
    %37 = arith.addi %1, %c25_i32 : i32
    %c0_19 = arith.constant 0 : index
    %38 = arith.index_cast %37 : i32 to index
    %c0_20 = arith.constant 0 : index
    %39 = vector.load %arg2[%c0_19, %38, %c0_20] : memref<1x456x8xf32, #tpu.memory_space<vmem>>, vector<1x192x8xf32>
    %40 = vector.shape_cast %39 : vector<1x192x8xf32> to vector<192x8xf32>
    %41 = arith.truncf %40 : vector<192x8xf32> to vector<192x8xbf16>
    %c4 = arith.constant 4 : index
    %c0_21 = arith.constant 0 : index
    %c0_22 = arith.constant 0 : index
    %42 = vector.load %arg3[%c4, %c0_21, %c0_22] : memref<9x8x128xbf16, #tpu.memory_space<vmem>>, vector<1x8x128xbf16>
    %43 = vector.shape_cast %42 : vector<1x8x128xbf16> to vector<8x128xbf16>
    %cst_23 = arith.constant dense<0.000000e+00> : vector<192x128xf32>
    %44 = tpu.matmul %41, %43, %cst_23 {dimension_numbers = #tpu.dot_dimension_numbers<[1], [0], [0], [1], [0, 0, 1, 1], [], []>} : vector<192x8xbf16>, vector<8x128xbf16>, vector<192x128xf32> -> vector<192x128xf32>
    %45 = arith.addf %36, %44 : vector<192x128xf32>
    %c26_i32 = arith.constant 26 : i32
    %46 = arith.addi %1, %c26_i32 : i32
    %c0_24 = arith.constant 0 : index
    %47 = arith.index_cast %46 : i32 to index
    %c0_25 = arith.constant 0 : index
    %48 = vector.load %arg2[%c0_24, %47, %c0_25] : memref<1x456x8xf32, #tpu.memory_space<vmem>>, vector<1x192x8xf32>
    %49 = vector.shape_cast %48 : vector<1x192x8xf32> to vector<192x8xf32>
    %50 = arith.truncf %49 : vector<192x8xf32> to vector<192x8xbf16>
    %c5 = arith.constant 5 : index
    %c0_26 = arith.constant 0 : index
    %c0_27 = arith.constant 0 : index
    %51 = vector.load %arg3[%c5, %c0_26, %c0_27] : memref<9x8x128xbf16, #tpu.memory_space<vmem>>, vector<1x8x128xbf16>
    %52 = vector.shape_cast %51 : vector<1x8x128xbf16> to vector<8x128xbf16>
    %cst_28 = arith.constant dense<0.000000e+00> : vector<192x128xf32>
    %53 = tpu.matmul %50, %52, %cst_28 {dimension_numbers = #tpu.dot_dimension_numbers<[1], [0], [0], [1], [0, 0, 1, 1], [], []>} : vector<192x8xbf16>, vector<8x128xbf16>, vector<192x128xf32> -> vector<192x128xf32>
    %54 = arith.addf %45, %53 : vector<192x128xf32>
    %c48_i32 = arith.constant 48 : i32
    %55 = arith.addi %1, %c48_i32 : i32
    %c0_29 = arith.constant 0 : index
    %56 = arith.index_cast %55 : i32 to index
    %c0_30 = arith.constant 0 : index
    %57 = vector.load %arg2[%c0_29, %56, %c0_30] : memref<1x456x8xf32, #tpu.memory_space<vmem>>, vector<1x192x8xf32>
    %58 = vector.shape_cast %57 : vector<1x192x8xf32> to vector<192x8xf32>
    %59 = arith.truncf %58 : vector<192x8xf32> to vector<192x8xbf16>
    %c6 = arith.constant 6 : index
    %c0_31 = arith.constant 0 : index
    %c0_32 = arith.constant 0 : index
    %60 = vector.load %arg3[%c6, %c0_31, %c0_32] : memref<9x8x128xbf16, #tpu.memory_space<vmem>>, vector<1x8x128xbf16>
    %61 = vector.shape_cast %60 : vector<1x8x128xbf16> to vector<8x128xbf16>
    %cst_33 = arith.constant dense<0.000000e+00> : vector<192x128xf32>
    %62 = tpu.matmul %59, %61, %cst_33 {dimension_numbers = #tpu.dot_dimension_numbers<[1], [0], [0], [1], [0, 0, 1, 1], [], []>} : vector<192x8xbf16>, vector<8x128xbf16>, vector<192x128xf32> -> vector<192x128xf32>
    %63 = arith.addf %54, %62 : vector<192x128xf32>
    %c49_i32 = arith.constant 49 : i32
    %64 = arith.addi %1, %c49_i32 : i32
    %c0_34 = arith.constant 0 : index
    %65 = arith.index_cast %64 : i32 to index
    %c0_35 = arith.constant 0 : index
    %66 = vector.load %arg2[%c0_34, %65, %c0_35] : memref<1x456x8xf32, #tpu.memory_space<vmem>>, vector<1x192x8xf32>
    %67 = vector.shape_cast %66 : vector<1x192x8xf32> to vector<192x8xf32>
    %68 = arith.truncf %67 : vector<192x8xf32> to vector<192x8xbf16>
    %c7 = arith.constant 7 : index
    %c0_36 = arith.constant 0 : index
    %c0_37 = arith.constant 0 : index
    %69 = vector.load %arg3[%c7, %c0_36, %c0_37] : memref<9x8x128xbf16, #tpu.memory_space<vmem>>, vector<1x8x128xbf16>
    %70 = vector.shape_cast %69 : vector<1x8x128xbf16> to vector<8x128xbf16>
    %cst_38 = arith.constant dense<0.000000e+00> : vector<192x128xf32>
    %71 = tpu.matmul %68, %70, %cst_38 {dimension_numbers = #tpu.dot_dimension_numbers<[1], [0], [0], [1], [0, 0, 1, 1], [], []>} : vector<192x8xbf16>, vector<8x128xbf16>, vector<192x128xf32> -> vector<192x128xf32>
    %72 = arith.addf %63, %71 : vector<192x128xf32>
    %c50_i32 = arith.constant 50 : i32
    %73 = arith.addi %1, %c50_i32 : i32
    %c0_39 = arith.constant 0 : index
    %74 = arith.index_cast %73 : i32 to index
    %c0_40 = arith.constant 0 : index
    %75 = vector.load %arg2[%c0_39, %74, %c0_40] : memref<1x456x8xf32, #tpu.memory_space<vmem>>, vector<1x192x8xf32>
    %76 = vector.shape_cast %75 : vector<1x192x8xf32> to vector<192x8xf32>
    %77 = arith.truncf %76 : vector<192x8xf32> to vector<192x8xbf16>
    %c8 = arith.constant 8 : index
    %c0_41 = arith.constant 0 : index
    %c0_42 = arith.constant 0 : index
    %78 = vector.load %arg3[%c8, %c0_41, %c0_42] : memref<9x8x128xbf16, #tpu.memory_space<vmem>>, vector<1x8x128xbf16>
    %79 = vector.shape_cast %78 : vector<1x8x128xbf16> to vector<8x128xbf16>
    %cst_43 = arith.constant dense<0.000000e+00> : vector<192x128xf32>
    %80 = tpu.matmul %77, %79, %cst_43 {dimension_numbers = #tpu.dot_dimension_numbers<[1], [0], [0], [1], [0, 0, 1, 1], [], []>} : vector<192x8xbf16>, vector<8x128xbf16>, vector<192x128xf32> -> vector<192x128xf32>
    %81 = arith.addf %72, %80 : vector<192x128xf32>
    %c0_44 = arith.constant 0 : index
    %c0_45 = arith.constant 0 : index
    %82 = vector.load %arg4[%c0_44, %c0_45] : memref<1x128xf32, #tpu.memory_space<vmem>>, vector<1x128xf32>
    %83 = vector.broadcast %82 : vector<1x128xf32> to vector<192x128xf32>
    %84 = arith.mulf %81, %83 : vector<192x128xf32>
    %c0_46 = arith.constant 0 : index
    %c0_47 = arith.constant 0 : index
    %85 = vector.load %arg5[%c0_46, %c0_47] : memref<1x128xf32, #tpu.memory_space<vmem>>, vector<1x128xf32>
    %86 = vector.broadcast %85 : vector<1x128xf32> to vector<192x128xf32>
    %87 = arith.addf %84, %86 : vector<192x128xf32>
    %cst_48 = arith.constant 0.000000e+00 : f32
    %88 = vector.broadcast %cst_48 : f32 to vector<192x128xf32>
    %89 = arith.cmpf oge, %87, %88 : vector<192x128xf32>
    %cst_49 = arith.constant 1.000000e-01 : f32
    %90 = vector.broadcast %cst_49 : f32 to vector<192x128xf32>
    %91 = arith.mulf %90, %87 : vector<192x128xf32>
    %92 = arith.select %89, %87, %91 : vector<192x128xi1>, vector<192x128xf32>
    %93 = arith.truncf %92 : vector<192x128xf32> to vector<192x128xbf16>
    %c0_50 = arith.constant 0 : index
    %c0_51 = arith.constant 0 : index
    %c0_52 = arith.constant 0 : index
    %94 = vector.load %arg6[%c0_50, %c0_51, %c0_52] : memref<1x192x128xbf16, #tpu.memory_space<vmem>>, vector<1x192x128xbf16>
    %95 = vector.shape_cast %94 : vector<1x192x128xbf16> to vector<192x128xbf16>
    %96 = vector.shape_cast %93 : vector<192x128xbf16> to vector<1x192x128xbf16>
    tpu.vector_store %arg6[%c0_50, %c0_51, %c0_52], %96 {strides = array<i32>} : memref<1x192x128xbf16, #tpu.memory_space<vmem>>, vector<1x192x128xbf16>,
    return
  }
  func.func @transform_0(%arg0: i32, %arg1: i32) -> (i32, i32, i32) {
    %c0_i32 = arith.constant 0 : i32
    %c0_i32_0 = arith.constant 0 : i32
    %c0_i32_1 = arith.constant 0 : i32
    return %arg0, %c0_i32, %c0_i32_0 : i32, i32, i32
  }
  func.func @transform_1(%arg0: i32, %arg1: i32) -> (i32, i32, i32) {
    %c0_i32 = arith.constant 0 : i32
    %c0_i32_0 = arith.constant 0 : i32
    %c0_i32_1 = arith.constant 0 : i32
    %c0_i32_2 = arith.constant 0 : i32
    return %c0_i32, %c0_i32_0, %c0_i32_1 : i32, i32, i32
  }
  func.func @transform_2(%arg0: i32, %arg1: i32) -> (i32, i32) {
    %c0_i32 = arith.constant 0 : i32
    %c0_i32_0 = arith.constant 0 : i32
    %c0_i32_1 = arith.constant 0 : i32
    return %c0_i32, %c0_i32_0 : i32, i32
  }
  func.func @transform_3(%arg0: i32, %arg1: i32) -> (i32, i32) {
    %c0_i32 = arith.constant 0 : i32
    %c0_i32_0 = arith.constant 0 : i32
    %c0_i32_1 = arith.constant 0 : i32
    return %c0_i32, %c0_i32_0 : i32, i32
  }
  func.func @transform_4(%arg0: i32, %arg1: i32) -> (i32, i32, i32) {
    %c0_i32 = arith.constant 0 : i32
    %c0_i32_0 = arith.constant 0 : i32
    return %arg0, %arg1, %c0_i32 : i32, i32, i32
  }
}

module attributes {stable_mosaic.version = 11 : i64} {
  func.func @_conv_bn_lrelu_kernel(%arg0: i32, %arg1: i32, %arg2: memref<1x256x16xf32, #tpu.memory_space<vmem>>, %arg3: memref<1x16x128xbf16, #tpu.memory_space<vmem>>, %arg4: memref<1x128xf32, #tpu.memory_space<vmem>>, %arg5: memref<1x128xf32, #tpu.memory_space<vmem>>, %arg6: memref<1x256x128xbf16, #tpu.memory_space<vmem>>) attributes {dimension_semantics = [#tpu.dimension_semantics<parallel>, #tpu.dimension_semantics<parallel>], iteration_bounds = array<i64: 2, 1>, scalar_prefetch = 0 : i64, scratch_operands = 0 : i64, tpu.core_type = #tpu.core_type<tc>, window_params = [{transform_indices = @transform_0, window_bounds = array<i64: 1, 256, 16>}, {pipeline_mode = #tpu.pipeline_mode<synchronous>, transform_indices = @transform_1, window_bounds = array<i64: 1, 16, 128>}, {pipeline_mode = #tpu.pipeline_mode<synchronous>, transform_indices = @transform_2, window_bounds = array<i64: 1, 128>}, {pipeline_mode = #tpu.pipeline_mode<synchronous>, transform_indices = @transform_3, window_bounds = array<i64: 1, 128>}, {transform_indices = @transform_4, window_bounds = array<i64: 1, 256, 128>}]} {
    %c256_i32 = arith.constant 256 : i32
    %0 = arith.muli %arg1, %c256_i32 : i32
    %1 = tpu.assume_multiple %0, 16 : i32
    %c0_i32 = arith.constant 0 : i32
    %2 = arith.addi %1, %c0_i32 : i32
    %c0 = arith.constant 0 : index
    %3 = arith.index_cast %2 : i32 to index
    %c0_0 = arith.constant 0 : index
    %4 = vector.load %arg2[%c0, %3, %c0_0] : memref<1x256x16xf32, #tpu.memory_space<vmem>>, vector<1x256x16xf32>
    %5 = vector.shape_cast %4 : vector<1x256x16xf32> to vector<256x16xf32>
    %6 = arith.truncf %5 : vector<256x16xf32> to vector<256x16xbf16>
    %c0_1 = arith.constant 0 : index
    %c0_2 = arith.constant 0 : index
    %c0_3 = arith.constant 0 : index
    %7 = vector.load %arg3[%c0_1, %c0_2, %c0_3] : memref<1x16x128xbf16, #tpu.memory_space<vmem>>, vector<1x16x128xbf16>
    %8 = vector.shape_cast %7 : vector<1x16x128xbf16> to vector<16x128xbf16>
    %cst = arith.constant dense<0.000000e+00> : vector<256x128xf32>
    %9 = tpu.matmul %6, %8, %cst {dimension_numbers = #tpu.dot_dimension_numbers<[1], [0], [0], [1], [0, 0, 1, 1], [], []>} : vector<256x16xbf16>, vector<16x128xbf16>, vector<256x128xf32> -> vector<256x128xf32>
    %c0_4 = arith.constant 0 : index
    %c0_5 = arith.constant 0 : index
    %10 = vector.load %arg4[%c0_4, %c0_5] : memref<1x128xf32, #tpu.memory_space<vmem>>, vector<1x128xf32>
    %11 = vector.broadcast %10 : vector<1x128xf32> to vector<256x128xf32>
    %12 = arith.mulf %9, %11 : vector<256x128xf32>
    %c0_6 = arith.constant 0 : index
    %c0_7 = arith.constant 0 : index
    %13 = vector.load %arg5[%c0_6, %c0_7] : memref<1x128xf32, #tpu.memory_space<vmem>>, vector<1x128xf32>
    %14 = vector.broadcast %13 : vector<1x128xf32> to vector<256x128xf32>
    %15 = arith.addf %12, %14 : vector<256x128xf32>
    %cst_8 = arith.constant 0.000000e+00 : f32
    %16 = vector.broadcast %cst_8 : f32 to vector<256x128xf32>
    %17 = arith.cmpf oge, %15, %16 : vector<256x128xf32>
    %cst_9 = arith.constant 1.000000e-01 : f32
    %18 = vector.broadcast %cst_9 : f32 to vector<256x128xf32>
    %19 = arith.mulf %18, %15 : vector<256x128xf32>
    %20 = arith.select %17, %15, %19 : vector<256x128xi1>, vector<256x128xf32>
    %21 = arith.truncf %20 : vector<256x128xf32> to vector<256x128xbf16>
    %c0_10 = arith.constant 0 : index
    %c0_11 = arith.constant 0 : index
    %c0_12 = arith.constant 0 : index
    %22 = vector.load %arg6[%c0_10, %c0_11, %c0_12] : memref<1x256x128xbf16, #tpu.memory_space<vmem>>, vector<1x256x128xbf16>
    %23 = vector.shape_cast %22 : vector<1x256x128xbf16> to vector<256x128xbf16>
    %24 = vector.shape_cast %21 : vector<256x128xbf16> to vector<1x256x128xbf16>
    tpu.vector_store %arg6[%c0_10, %c0_11, %c0_12], %24 {strides = array<i32>} : memref<1x256x128xbf16, #tpu.memory_space<vmem>>, vector<1x256x128xbf16>,
    return
  }
  func.func @transform_0(%arg0: i32, %arg1: i32) -> (i32, i32, i32) {
    %c0_i32 = arith.constant 0 : i32
    %c0_i32_0 = arith.constant 0 : i32
    %c0_i32_1 = arith.constant 0 : i32
    return %arg0, %c0_i32, %c0_i32_0 : i32, i32, i32
  }
  func.func @transform_1(%arg0: i32, %arg1: i32) -> (i32, i32, i32) {
    %c0_i32 = arith.constant 0 : i32
    %c0_i32_0 = arith.constant 0 : i32
    %c0_i32_1 = arith.constant 0 : i32
    %c0_i32_2 = arith.constant 0 : i32
    return %c0_i32, %c0_i32_0, %c0_i32_1 : i32, i32, i32
  }
  func.func @transform_2(%arg0: i32, %arg1: i32) -> (i32, i32) {
    %c0_i32 = arith.constant 0 : i32
    %c0_i32_0 = arith.constant 0 : i32
    %c0_i32_1 = arith.constant 0 : i32
    return %c0_i32, %c0_i32_0 : i32, i32
  }
  func.func @transform_3(%arg0: i32, %arg1: i32) -> (i32, i32) {
    %c0_i32 = arith.constant 0 : i32
    %c0_i32_0 = arith.constant 0 : i32
    %c0_i32_1 = arith.constant 0 : i32
    return %c0_i32, %c0_i32_0 : i32, i32
  }
  func.func @transform_4(%arg0: i32, %arg1: i32) -> (i32, i32, i32) {
    %c0_i32 = arith.constant 0 : i32
    %c0_i32_0 = arith.constant 0 : i32
    return %arg0, %arg1, %c0_i32 : i32, i32, i32
  }
}

module attributes {stable_mosaic.version = 11 : i64} {
  func.func @_conv_bn_lrelu_kernel(%arg0: i32, %arg1: i32, %arg2: memref<1x160x64xf32, #tpu.memory_space<vmem>>, %arg3: memref<4x64x128xbf16, #tpu.memory_space<vmem>>, %arg4: memref<1x128xf32, #tpu.memory_space<vmem>>, %arg5: memref<1x128xf32, #tpu.memory_space<vmem>>, %arg6: memref<1x128x128xbf16, #tpu.memory_space<vmem>>) attributes {dimension_semantics = [#tpu.dimension_semantics<parallel>, #tpu.dimension_semantics<parallel>], iteration_bounds = array<i64: 2, 1>, scalar_prefetch = 0 : i64, scratch_operands = 0 : i64, tpu.core_type = #tpu.core_type<tc>, window_params = [{transform_indices = @transform_0, window_bounds = array<i64: 1, 160, 64>}, {pipeline_mode = #tpu.pipeline_mode<synchronous>, transform_indices = @transform_1, window_bounds = array<i64: 4, 64, 128>}, {pipeline_mode = #tpu.pipeline_mode<synchronous>, transform_indices = @transform_2, window_bounds = array<i64: 1, 128>}, {pipeline_mode = #tpu.pipeline_mode<synchronous>, transform_indices = @transform_3, window_bounds = array<i64: 1, 128>}, {transform_indices = @transform_4, window_bounds = array<i64: 1, 128, 128>}]} {
    %c128_i32 = arith.constant 128 : i32
    %0 = arith.muli %arg1, %c128_i32 : i32
    %1 = tpu.assume_multiple %0, 16 : i32
    %c0_i32 = arith.constant 0 : i32
    %2 = arith.addi %1, %c0_i32 : i32
    %c0 = arith.constant 0 : index
    %3 = arith.index_cast %2 : i32 to index
    %c0_0 = arith.constant 0 : index
    %4 = vector.load %arg2[%c0, %3, %c0_0] : memref<1x160x64xf32, #tpu.memory_space<vmem>>, vector<1x128x64xf32>
    %5 = vector.shape_cast %4 : vector<1x128x64xf32> to vector<128x64xf32>
    %6 = arith.truncf %5 : vector<128x64xf32> to vector<128x64xbf16>
    %c0_1 = arith.constant 0 : index
    %c0_2 = arith.constant 0 : index
    %c0_3 = arith.constant 0 : index
    %7 = vector.load %arg3[%c0_1, %c0_2, %c0_3] : memref<4x64x128xbf16, #tpu.memory_space<vmem>>, vector<1x64x128xbf16>
    %8 = vector.shape_cast %7 : vector<1x64x128xbf16> to vector<64x128xbf16>
    %cst = arith.constant dense<0.000000e+00> : vector<128x128xf32>
    %9 = tpu.matmul %6, %8, %cst {dimension_numbers = #tpu.dot_dimension_numbers<[1], [0], [0], [1], [0, 0, 1, 1], [], []>} : vector<128x64xbf16>, vector<64x128xbf16>, vector<128x128xf32> -> vector<128x128xf32>
    %c1_i32 = arith.constant 1 : i32
    %10 = arith.addi %1, %c1_i32 : i32
    %c0_4 = arith.constant 0 : index
    %11 = arith.index_cast %10 : i32 to index
    %c0_5 = arith.constant 0 : index
    %12 = vector.load %arg2[%c0_4, %11, %c0_5] : memref<1x160x64xf32, #tpu.memory_space<vmem>>, vector<1x128x64xf32>
    %13 = vector.shape_cast %12 : vector<1x128x64xf32> to vector<128x64xf32>
    %14 = arith.truncf %13 : vector<128x64xf32> to vector<128x64xbf16>
    %c1 = arith.constant 1 : index
    %c0_6 = arith.constant 0 : index
    %c0_7 = arith.constant 0 : index
    %15 = vector.load %arg3[%c1, %c0_6, %c0_7] : memref<4x64x128xbf16, #tpu.memory_space<vmem>>, vector<1x64x128xbf16>
    %16 = vector.shape_cast %15 : vector<1x64x128xbf16> to vector<64x128xbf16>
    %cst_8 = arith.constant dense<0.000000e+00> : vector<128x128xf32>
    %17 = tpu.matmul %14, %16, %cst_8 {dimension_numbers = #tpu.dot_dimension_numbers<[1], [0], [0], [1], [0, 0, 1, 1], [], []>} : vector<128x64xbf16>, vector<64x128xbf16>, vector<128x128xf32> -> vector<128x128xf32>
    %18 = arith.addf %9, %17 : vector<128x128xf32>
    %c16_i32 = arith.constant 16 : i32
    %19 = arith.addi %1, %c16_i32 : i32
    %c0_9 = arith.constant 0 : index
    %20 = arith.index_cast %19 : i32 to index
    %c0_10 = arith.constant 0 : index
    %21 = vector.load %arg2[%c0_9, %20, %c0_10] : memref<1x160x64xf32, #tpu.memory_space<vmem>>, vector<1x128x64xf32>
    %22 = vector.shape_cast %21 : vector<1x128x64xf32> to vector<128x64xf32>
    %23 = arith.truncf %22 : vector<128x64xf32> to vector<128x64xbf16>
    %c2 = arith.constant 2 : index
    %c0_11 = arith.constant 0 : index
    %c0_12 = arith.constant 0 : index
    %24 = vector.load %arg3[%c2, %c0_11, %c0_12] : memref<4x64x128xbf16, #tpu.memory_space<vmem>>, vector<1x64x128xbf16>
    %25 = vector.shape_cast %24 : vector<1x64x128xbf16> to vector<64x128xbf16>
    %cst_13 = arith.constant dense<0.000000e+00> : vector<128x128xf32>
    %26 = tpu.matmul %23, %25, %cst_13 {dimension_numbers = #tpu.dot_dimension_numbers<[1], [0], [0], [1], [0, 0, 1, 1], [], []>} : vector<128x64xbf16>, vector<64x128xbf16>, vector<128x128xf32> -> vector<128x128xf32>
    %27 = arith.addf %18, %26 : vector<128x128xf32>
    %c17_i32 = arith.constant 17 : i32
    %28 = arith.addi %1, %c17_i32 : i32
    %c0_14 = arith.constant 0 : index
    %29 = arith.index_cast %28 : i32 to index
    %c0_15 = arith.constant 0 : index
    %30 = vector.load %arg2[%c0_14, %29, %c0_15] : memref<1x160x64xf32, #tpu.memory_space<vmem>>, vector<1x128x64xf32>
    %31 = vector.shape_cast %30 : vector<1x128x64xf32> to vector<128x64xf32>
    %32 = arith.truncf %31 : vector<128x64xf32> to vector<128x64xbf16>
    %c3 = arith.constant 3 : index
    %c0_16 = arith.constant 0 : index
    %c0_17 = arith.constant 0 : index
    %33 = vector.load %arg3[%c3, %c0_16, %c0_17] : memref<4x64x128xbf16, #tpu.memory_space<vmem>>, vector<1x64x128xbf16>
    %34 = vector.shape_cast %33 : vector<1x64x128xbf16> to vector<64x128xbf16>
    %cst_18 = arith.constant dense<0.000000e+00> : vector<128x128xf32>
    %35 = tpu.matmul %32, %34, %cst_18 {dimension_numbers = #tpu.dot_dimension_numbers<[1], [0], [0], [1], [0, 0, 1, 1], [], []>} : vector<128x64xbf16>, vector<64x128xbf16>, vector<128x128xf32> -> vector<128x128xf32>
    %36 = arith.addf %27, %35 : vector<128x128xf32>
    %c0_19 = arith.constant 0 : index
    %c0_20 = arith.constant 0 : index
    %37 = vector.load %arg4[%c0_19, %c0_20] : memref<1x128xf32, #tpu.memory_space<vmem>>, vector<1x128xf32>
    %38 = vector.broadcast %37 : vector<1x128xf32> to vector<128x128xf32>
    %39 = arith.mulf %36, %38 : vector<128x128xf32>
    %c0_21 = arith.constant 0 : index
    %c0_22 = arith.constant 0 : index
    %40 = vector.load %arg5[%c0_21, %c0_22] : memref<1x128xf32, #tpu.memory_space<vmem>>, vector<1x128xf32>
    %41 = vector.broadcast %40 : vector<1x128xf32> to vector<128x128xf32>
    %42 = arith.addf %39, %41 : vector<128x128xf32>
    %cst_23 = arith.constant 0.000000e+00 : f32
    %43 = vector.broadcast %cst_23 : f32 to vector<128x128xf32>
    %44 = arith.cmpf oge, %42, %43 : vector<128x128xf32>
    %cst_24 = arith.constant 1.000000e-01 : f32
    %45 = vector.broadcast %cst_24 : f32 to vector<128x128xf32>
    %46 = arith.mulf %45, %42 : vector<128x128xf32>
    %47 = arith.select %44, %42, %46 : vector<128x128xi1>, vector<128x128xf32>
    %48 = arith.truncf %47 : vector<128x128xf32> to vector<128x128xbf16>
    %c0_25 = arith.constant 0 : index
    %c0_26 = arith.constant 0 : index
    %c0_27 = arith.constant 0 : index
    %49 = vector.load %arg6[%c0_25, %c0_26, %c0_27] : memref<1x128x128xbf16, #tpu.memory_space<vmem>>, vector<1x128x128xbf16>
    %50 = vector.shape_cast %49 : vector<1x128x128xbf16> to vector<128x128xbf16>
    %51 = vector.shape_cast %48 : vector<128x128xbf16> to vector<1x128x128xbf16>
    tpu.vector_store %arg6[%c0_25, %c0_26, %c0_27], %51 {strides = array<i32>} : memref<1x128x128xbf16, #tpu.memory_space<vmem>>, vector<1x128x128xbf16>,
    return
  }
  func.func @transform_0(%arg0: i32, %arg1: i32) -> (i32, i32, i32) {
    %c0_i32 = arith.constant 0 : i32
    %c0_i32_0 = arith.constant 0 : i32
    %c0_i32_1 = arith.constant 0 : i32
    return %arg0, %c0_i32, %c0_i32_0 : i32, i32, i32
  }
  func.func @transform_1(%arg0: i32, %arg1: i32) -> (i32, i32, i32) {
    %c0_i32 = arith.constant 0 : i32
    %c0_i32_0 = arith.constant 0 : i32
    %c0_i32_1 = arith.constant 0 : i32
    %c0_i32_2 = arith.constant 0 : i32
    return %c0_i32, %c0_i32_0, %c0_i32_1 : i32, i32, i32
  }
  func.func @transform_2(%arg0: i32, %arg1: i32) -> (i32, i32) {
    %c0_i32 = arith.constant 0 : i32
    %c0_i32_0 = arith.constant 0 : i32
    %c0_i32_1 = arith.constant 0 : i32
    return %c0_i32, %c0_i32_0 : i32, i32
  }
  func.func @transform_3(%arg0: i32, %arg1: i32) -> (i32, i32) {
    %c0_i32 = arith.constant 0 : i32
    %c0_i32_0 = arith.constant 0 : i32
    %c0_i32_1 = arith.constant 0 : i32
    return %c0_i32, %c0_i32_0 : i32, i32
  }
  func.func @transform_4(%arg0: i32, %arg1: i32) -> (i32, i32, i32) {
    %c0_i32 = arith.constant 0 : i32
    %c0_i32_0 = arith.constant 0 : i32
    return %arg0, %arg1, %c0_i32 : i32, i32, i32
  }
}

module attributes {stable_mosaic.version = 11 : i64} {
  func.func @_conv_bn_lrelu_kernel(%arg0: i32, %arg1: i32, %arg2: memref<1x64x32xf32, #tpu.memory_space<vmem>>, %arg3: memref<1x32x128xbf16, #tpu.memory_space<vmem>>, %arg4: memref<1x128xf32, #tpu.memory_space<vmem>>, %arg5: memref<1x128xf32, #tpu.memory_space<vmem>>, %arg6: memref<1x64x128xbf16, #tpu.memory_space<vmem>>) attributes {dimension_semantics = [#tpu.dimension_semantics<parallel>, #tpu.dimension_semantics<parallel>], iteration_bounds = array<i64: 2, 1>, scalar_prefetch = 0 : i64, scratch_operands = 0 : i64, tpu.core_type = #tpu.core_type<tc>, window_params = [{transform_indices = @transform_0, window_bounds = array<i64: 1, 64, 32>}, {pipeline_mode = #tpu.pipeline_mode<synchronous>, transform_indices = @transform_1, window_bounds = array<i64: 1, 32, 128>}, {pipeline_mode = #tpu.pipeline_mode<synchronous>, transform_indices = @transform_2, window_bounds = array<i64: 1, 128>}, {pipeline_mode = #tpu.pipeline_mode<synchronous>, transform_indices = @transform_3, window_bounds = array<i64: 1, 128>}, {transform_indices = @transform_4, window_bounds = array<i64: 1, 64, 128>}]} {
    %c64_i32 = arith.constant 64 : i32
    %0 = arith.muli %arg1, %c64_i32 : i32
    %1 = tpu.assume_multiple %0, 16 : i32
    %c0_i32 = arith.constant 0 : i32
    %2 = arith.addi %1, %c0_i32 : i32
    %c0 = arith.constant 0 : index
    %3 = arith.index_cast %2 : i32 to index
    %c0_0 = arith.constant 0 : index
    %4 = vector.load %arg2[%c0, %3, %c0_0] : memref<1x64x32xf32, #tpu.memory_space<vmem>>, vector<1x64x32xf32>
    %5 = vector.shape_cast %4 : vector<1x64x32xf32> to vector<64x32xf32>
    %6 = arith.truncf %5 : vector<64x32xf32> to vector<64x32xbf16>
    %c0_1 = arith.constant 0 : index
    %c0_2 = arith.constant 0 : index
    %c0_3 = arith.constant 0 : index
    %7 = vector.load %arg3[%c0_1, %c0_2, %c0_3] : memref<1x32x128xbf16, #tpu.memory_space<vmem>>, vector<1x32x128xbf16>
    %8 = vector.shape_cast %7 : vector<1x32x128xbf16> to vector<32x128xbf16>
    %cst = arith.constant dense<0.000000e+00> : vector<64x128xf32>
    %9 = tpu.matmul %6, %8, %cst {dimension_numbers = #tpu.dot_dimension_numbers<[1], [0], [0], [1], [0, 0, 1, 1], [], []>} : vector<64x32xbf16>, vector<32x128xbf16>, vector<64x128xf32> -> vector<64x128xf32>
    %c0_4 = arith.constant 0 : index
    %c0_5 = arith.constant 0 : index
    %10 = vector.load %arg4[%c0_4, %c0_5] : memref<1x128xf32, #tpu.memory_space<vmem>>, vector<1x128xf32>
    %11 = vector.broadcast %10 : vector<1x128xf32> to vector<64x128xf32>
    %12 = arith.mulf %9, %11 : vector<64x128xf32>
    %c0_6 = arith.constant 0 : index
    %c0_7 = arith.constant 0 : index
    %13 = vector.load %arg5[%c0_6, %c0_7] : memref<1x128xf32, #tpu.memory_space<vmem>>, vector<1x128xf32>
    %14 = vector.broadcast %13 : vector<1x128xf32> to vector<64x128xf32>
    %15 = arith.addf %12, %14 : vector<64x128xf32>
    %cst_8 = arith.constant 0.000000e+00 : f32
    %16 = vector.broadcast %cst_8 : f32 to vector<64x128xf32>
    %17 = arith.cmpf oge, %15, %16 : vector<64x128xf32>
    %cst_9 = arith.constant 1.000000e-01 : f32
    %18 = vector.broadcast %cst_9 : f32 to vector<64x128xf32>
    %19 = arith.mulf %18, %15 : vector<64x128xf32>
    %20 = arith.select %17, %15, %19 : vector<64x128xi1>, vector<64x128xf32>
    %21 = arith.truncf %20 : vector<64x128xf32> to vector<64x128xbf16>
    %c0_10 = arith.constant 0 : index
    %c0_11 = arith.constant 0 : index
    %c0_12 = arith.constant 0 : index
    %22 = vector.load %arg6[%c0_10, %c0_11, %c0_12] : memref<1x64x128xbf16, #tpu.memory_space<vmem>>, vector<1x64x128xbf16>
    %23 = vector.shape_cast %22 : vector<1x64x128xbf16> to vector<64x128xbf16>
    %24 = vector.shape_cast %21 : vector<64x128xbf16> to vector<1x64x128xbf16>
    tpu.vector_store %arg6[%c0_10, %c0_11, %c0_12], %24 {strides = array<i32>} : memref<1x64x128xbf16, #tpu.memory_space<vmem>>, vector<1x64x128xbf16>,
    return
  }
  func.func @transform_0(%arg0: i32, %arg1: i32) -> (i32, i32, i32) {
    %c0_i32 = arith.constant 0 : i32
    %c0_i32_0 = arith.constant 0 : i32
    %c0_i32_1 = arith.constant 0 : i32
    return %arg0, %c0_i32, %c0_i32_0 : i32, i32, i32
  }
  func.func @transform_1(%arg0: i32, %arg1: i32) -> (i32, i32, i32) {
    %c0_i32 = arith.constant 0 : i32
    %c0_i32_0 = arith.constant 0 : i32
    %c0_i32_1 = arith.constant 0 : i32
    %c0_i32_2 = arith.constant 0 : i32
    return %c0_i32, %c0_i32_0, %c0_i32_1 : i32, i32, i32
  }
  func.func @transform_2(%arg0: i32, %arg1: i32) -> (i32, i32) {
    %c0_i32 = arith.constant 0 : i32
    %c0_i32_0 = arith.constant 0 : i32
    %c0_i32_1 = arith.constant 0 : i32
    return %c0_i32, %c0_i32_0 : i32, i32
  }
  func.func @transform_3(%arg0: i32, %arg1: i32) -> (i32, i32) {
    %c0_i32 = arith.constant 0 : i32
    %c0_i32_0 = arith.constant 0 : i32
    %c0_i32_1 = arith.constant 0 : i32
    return %c0_i32, %c0_i32_0 : i32, i32
  }
  func.func @transform_4(%arg0: i32, %arg1: i32) -> (i32, i32, i32) {
    %c0_i32 = arith.constant 0 : i32
    %c0_i32_0 = arith.constant 0 : i32
    return %arg0, %arg1, %c0_i32 : i32, i32, i32
  }
}

module attributes {stable_mosaic.version = 11 : i64} {
  func.func @_conv_bn_lrelu_kernel(%arg0: i32, %arg1: i32, %arg2: memref<1x176x16xf32, #tpu.memory_space<vmem>>, %arg3: memref<9x16x128xbf16, #tpu.memory_space<vmem>>, %arg4: memref<1x128xf32, #tpu.memory_space<vmem>>, %arg5: memref<1x128xf32, #tpu.memory_space<vmem>>, %arg6: memref<1x128x128xbf16, #tpu.memory_space<vmem>>) attributes {dimension_semantics = [#tpu.dimension_semantics<parallel>, #tpu.dimension_semantics<parallel>], iteration_bounds = array<i64: 2, 1>, scalar_prefetch = 0 : i64, scratch_operands = 0 : i64, tpu.core_type = #tpu.core_type<tc>, window_params = [{transform_indices = @transform_0, window_bounds = array<i64: 1, 176, 16>}, {pipeline_mode = #tpu.pipeline_mode<synchronous>, transform_indices = @transform_1, window_bounds = array<i64: 9, 16, 128>}, {pipeline_mode = #tpu.pipeline_mode<synchronous>, transform_indices = @transform_2, window_bounds = array<i64: 1, 128>}, {pipeline_mode = #tpu.pipeline_mode<synchronous>, transform_indices = @transform_3, window_bounds = array<i64: 1, 128>}, {transform_indices = @transform_4, window_bounds = array<i64: 1, 128, 128>}]} {
    %c128_i32 = arith.constant 128 : i32
    %0 = arith.muli %arg1, %c128_i32 : i32
    %1 = tpu.assume_multiple %0, 16 : i32
    %c0_i32 = arith.constant 0 : i32
    %2 = arith.addi %1, %c0_i32 : i32
    %c0 = arith.constant 0 : index
    %3 = arith.index_cast %2 : i32 to index
    %c0_0 = arith.constant 0 : index
    %4 = vector.load %arg2[%c0, %3, %c0_0] : memref<1x176x16xf32, #tpu.memory_space<vmem>>, vector<1x128x16xf32>
    %5 = vector.shape_cast %4 : vector<1x128x16xf32> to vector<128x16xf32>
    %6 = arith.truncf %5 : vector<128x16xf32> to vector<128x16xbf16>
    %c0_1 = arith.constant 0 : index
    %c0_2 = arith.constant 0 : index
    %c0_3 = arith.constant 0 : index
    %7 = vector.load %arg3[%c0_1, %c0_2, %c0_3] : memref<9x16x128xbf16, #tpu.memory_space<vmem>>, vector<1x16x128xbf16>
    %8 = vector.shape_cast %7 : vector<1x16x128xbf16> to vector<16x128xbf16>
    %cst = arith.constant dense<0.000000e+00> : vector<128x128xf32>
    %9 = tpu.matmul %6, %8, %cst {dimension_numbers = #tpu.dot_dimension_numbers<[1], [0], [0], [1], [0, 0, 1, 1], [], []>} : vector<128x16xbf16>, vector<16x128xbf16>, vector<128x128xf32> -> vector<128x128xf32>
    %c1_i32 = arith.constant 1 : i32
    %10 = arith.addi %1, %c1_i32 : i32
    %c0_4 = arith.constant 0 : index
    %11 = arith.index_cast %10 : i32 to index
    %c0_5 = arith.constant 0 : index
    %12 = vector.load %arg2[%c0_4, %11, %c0_5] : memref<1x176x16xf32, #tpu.memory_space<vmem>>, vector<1x128x16xf32>
    %13 = vector.shape_cast %12 : vector<1x128x16xf32> to vector<128x16xf32>
    %14 = arith.truncf %13 : vector<128x16xf32> to vector<128x16xbf16>
    %c1 = arith.constant 1 : index
    %c0_6 = arith.constant 0 : index
    %c0_7 = arith.constant 0 : index
    %15 = vector.load %arg3[%c1, %c0_6, %c0_7] : memref<9x16x128xbf16, #tpu.memory_space<vmem>>, vector<1x16x128xbf16>
    %16 = vector.shape_cast %15 : vector<1x16x128xbf16> to vector<16x128xbf16>
    %cst_8 = arith.constant dense<0.000000e+00> : vector<128x128xf32>
    %17 = tpu.matmul %14, %16, %cst_8 {dimension_numbers = #tpu.dot_dimension_numbers<[1], [0], [0], [1], [0, 0, 1, 1], [], []>} : vector<128x16xbf16>, vector<16x128xbf16>, vector<128x128xf32> -> vector<128x128xf32>
    %18 = arith.addf %9, %17 : vector<128x128xf32>
    %c2_i32 = arith.constant 2 : i32
    %19 = arith.addi %1, %c2_i32 : i32
    %c0_9 = arith.constant 0 : index
    %20 = arith.index_cast %19 : i32 to index
    %c0_10 = arith.constant 0 : index
    %21 = vector.load %arg2[%c0_9, %20, %c0_10] : memref<1x176x16xf32, #tpu.memory_space<vmem>>, vector<1x128x16xf32>
    %22 = vector.shape_cast %21 : vector<1x128x16xf32> to vector<128x16xf32>
    %23 = arith.truncf %22 : vector<128x16xf32> to vector<128x16xbf16>
    %c2 = arith.constant 2 : index
    %c0_11 = arith.constant 0 : index
    %c0_12 = arith.constant 0 : index
    %24 = vector.load %arg3[%c2, %c0_11, %c0_12] : memref<9x16x128xbf16, #tpu.memory_space<vmem>>, vector<1x16x128xbf16>
    %25 = vector.shape_cast %24 : vector<1x16x128xbf16> to vector<16x128xbf16>
    %cst_13 = arith.constant dense<0.000000e+00> : vector<128x128xf32>
    %26 = tpu.matmul %23, %25, %cst_13 {dimension_numbers = #tpu.dot_dimension_numbers<[1], [0], [0], [1], [0, 0, 1, 1], [], []>} : vector<128x16xbf16>, vector<16x128xbf16>, vector<128x128xf32> -> vector<128x128xf32>
    %27 = arith.addf %18, %26 : vector<128x128xf32>
    %c16_i32 = arith.constant 16 : i32
    %28 = arith.addi %1, %c16_i32 : i32
    %c0_14 = arith.constant 0 : index
    %29 = arith.index_cast %28 : i32 to index
    %c0_15 = arith.constant 0 : index
    %30 = vector.load %arg2[%c0_14, %29, %c0_15] : memref<1x176x16xf32, #tpu.memory_space<vmem>>, vector<1x128x16xf32>
    %31 = vector.shape_cast %30 : vector<1x128x16xf32> to vector<128x16xf32>
    %32 = arith.truncf %31 : vector<128x16xf32> to vector<128x16xbf16>
    %c3 = arith.constant 3 : index
    %c0_16 = arith.constant 0 : index
    %c0_17 = arith.constant 0 : index
    %33 = vector.load %arg3[%c3, %c0_16, %c0_17] : memref<9x16x128xbf16, #tpu.memory_space<vmem>>, vector<1x16x128xbf16>
    %34 = vector.shape_cast %33 : vector<1x16x128xbf16> to vector<16x128xbf16>
    %cst_18 = arith.constant dense<0.000000e+00> : vector<128x128xf32>
    %35 = tpu.matmul %32, %34, %cst_18 {dimension_numbers = #tpu.dot_dimension_numbers<[1], [0], [0], [1], [0, 0, 1, 1], [], []>} : vector<128x16xbf16>, vector<16x128xbf16>, vector<128x128xf32> -> vector<128x128xf32>
    %36 = arith.addf %27, %35 : vector<128x128xf32>
    %c17_i32 = arith.constant 17 : i32
    %37 = arith.addi %1, %c17_i32 : i32
    %c0_19 = arith.constant 0 : index
    %38 = arith.index_cast %37 : i32 to index
    %c0_20 = arith.constant 0 : index
    %39 = vector.load %arg2[%c0_19, %38, %c0_20] : memref<1x176x16xf32, #tpu.memory_space<vmem>>, vector<1x128x16xf32>
    %40 = vector.shape_cast %39 : vector<1x128x16xf32> to vector<128x16xf32>
    %41 = arith.truncf %40 : vector<128x16xf32> to vector<128x16xbf16>
    %c4 = arith.constant 4 : index
    %c0_21 = arith.constant 0 : index
    %c0_22 = arith.constant 0 : index
    %42 = vector.load %arg3[%c4, %c0_21, %c0_22] : memref<9x16x128xbf16, #tpu.memory_space<vmem>>, vector<1x16x128xbf16>
    %43 = vector.shape_cast %42 : vector<1x16x128xbf16> to vector<16x128xbf16>
    %cst_23 = arith.constant dense<0.000000e+00> : vector<128x128xf32>
    %44 = tpu.matmul %41, %43, %cst_23 {dimension_numbers = #tpu.dot_dimension_numbers<[1], [0], [0], [1], [0, 0, 1, 1], [], []>} : vector<128x16xbf16>, vector<16x128xbf16>, vector<128x128xf32> -> vector<128x128xf32>
    %45 = arith.addf %36, %44 : vector<128x128xf32>
    %c18_i32 = arith.constant 18 : i32
    %46 = arith.addi %1, %c18_i32 : i32
    %c0_24 = arith.constant 0 : index
    %47 = arith.index_cast %46 : i32 to index
    %c0_25 = arith.constant 0 : index
    %48 = vector.load %arg2[%c0_24, %47, %c0_25] : memref<1x176x16xf32, #tpu.memory_space<vmem>>, vector<1x128x16xf32>
    %49 = vector.shape_cast %48 : vector<1x128x16xf32> to vector<128x16xf32>
    %50 = arith.truncf %49 : vector<128x16xf32> to vector<128x16xbf16>
    %c5 = arith.constant 5 : index
    %c0_26 = arith.constant 0 : index
    %c0_27 = arith.constant 0 : index
    %51 = vector.load %arg3[%c5, %c0_26, %c0_27] : memref<9x16x128xbf16, #tpu.memory_space<vmem>>, vector<1x16x128xbf16>
    %52 = vector.shape_cast %51 : vector<1x16x128xbf16> to vector<16x128xbf16>
    %cst_28 = arith.constant dense<0.000000e+00> : vector<128x128xf32>
    %53 = tpu.matmul %50, %52, %cst_28 {dimension_numbers = #tpu.dot_dimension_numbers<[1], [0], [0], [1], [0, 0, 1, 1], [], []>} : vector<128x16xbf16>, vector<16x128xbf16>, vector<128x128xf32> -> vector<128x128xf32>
    %54 = arith.addf %45, %53 : vector<128x128xf32>
    %c32_i32 = arith.constant 32 : i32
    %55 = arith.addi %1, %c32_i32 : i32
    %c0_29 = arith.constant 0 : index
    %56 = arith.index_cast %55 : i32 to index
    %c0_30 = arith.constant 0 : index
    %57 = vector.load %arg2[%c0_29, %56, %c0_30] : memref<1x176x16xf32, #tpu.memory_space<vmem>>, vector<1x128x16xf32>
    %58 = vector.shape_cast %57 : vector<1x128x16xf32> to vector<128x16xf32>
    %59 = arith.truncf %58 : vector<128x16xf32> to vector<128x16xbf16>
    %c6 = arith.constant 6 : index
    %c0_31 = arith.constant 0 : index
    %c0_32 = arith.constant 0 : index
    %60 = vector.load %arg3[%c6, %c0_31, %c0_32] : memref<9x16x128xbf16, #tpu.memory_space<vmem>>, vector<1x16x128xbf16>
    %61 = vector.shape_cast %60 : vector<1x16x128xbf16> to vector<16x128xbf16>
    %cst_33 = arith.constant dense<0.000000e+00> : vector<128x128xf32>
    %62 = tpu.matmul %59, %61, %cst_33 {dimension_numbers = #tpu.dot_dimension_numbers<[1], [0], [0], [1], [0, 0, 1, 1], [], []>} : vector<128x16xbf16>, vector<16x128xbf16>, vector<128x128xf32> -> vector<128x128xf32>
    %63 = arith.addf %54, %62 : vector<128x128xf32>
    %c33_i32 = arith.constant 33 : i32
    %64 = arith.addi %1, %c33_i32 : i32
    %c0_34 = arith.constant 0 : index
    %65 = arith.index_cast %64 : i32 to index
    %c0_35 = arith.constant 0 : index
    %66 = vector.load %arg2[%c0_34, %65, %c0_35] : memref<1x176x16xf32, #tpu.memory_space<vmem>>, vector<1x128x16xf32>
    %67 = vector.shape_cast %66 : vector<1x128x16xf32> to vector<128x16xf32>
    %68 = arith.truncf %67 : vector<128x16xf32> to vector<128x16xbf16>
    %c7 = arith.constant 7 : index
    %c0_36 = arith.constant 0 : index
    %c0_37 = arith.constant 0 : index
    %69 = vector.load %arg3[%c7, %c0_36, %c0_37] : memref<9x16x128xbf16, #tpu.memory_space<vmem>>, vector<1x16x128xbf16>
    %70 = vector.shape_cast %69 : vector<1x16x128xbf16> to vector<16x128xbf16>
    %cst_38 = arith.constant dense<0.000000e+00> : vector<128x128xf32>
    %71 = tpu.matmul %68, %70, %cst_38 {dimension_numbers = #tpu.dot_dimension_numbers<[1], [0], [0], [1], [0, 0, 1, 1], [], []>} : vector<128x16xbf16>, vector<16x128xbf16>, vector<128x128xf32> -> vector<128x128xf32>
    %72 = arith.addf %63, %71 : vector<128x128xf32>
    %c34_i32 = arith.constant 34 : i32
    %73 = arith.addi %1, %c34_i32 : i32
    %c0_39 = arith.constant 0 : index
    %74 = arith.index_cast %73 : i32 to index
    %c0_40 = arith.constant 0 : index
    %75 = vector.load %arg2[%c0_39, %74, %c0_40] : memref<1x176x16xf32, #tpu.memory_space<vmem>>, vector<1x128x16xf32>
    %76 = vector.shape_cast %75 : vector<1x128x16xf32> to vector<128x16xf32>
    %77 = arith.truncf %76 : vector<128x16xf32> to vector<128x16xbf16>
    %c8 = arith.constant 8 : index
    %c0_41 = arith.constant 0 : index
    %c0_42 = arith.constant 0 : index
    %78 = vector.load %arg3[%c8, %c0_41, %c0_42] : memref<9x16x128xbf16, #tpu.memory_space<vmem>>, vector<1x16x128xbf16>
    %79 = vector.shape_cast %78 : vector<1x16x128xbf16> to vector<16x128xbf16>
    %cst_43 = arith.constant dense<0.000000e+00> : vector<128x128xf32>
    %80 = tpu.matmul %77, %79, %cst_43 {dimension_numbers = #tpu.dot_dimension_numbers<[1], [0], [0], [1], [0, 0, 1, 1], [], []>} : vector<128x16xbf16>, vector<16x128xbf16>, vector<128x128xf32> -> vector<128x128xf32>
    %81 = arith.addf %72, %80 : vector<128x128xf32>
    %c0_44 = arith.constant 0 : index
    %c0_45 = arith.constant 0 : index
    %82 = vector.load %arg4[%c0_44, %c0_45] : memref<1x128xf32, #tpu.memory_space<vmem>>, vector<1x128xf32>
    %83 = vector.broadcast %82 : vector<1x128xf32> to vector<128x128xf32>
    %84 = arith.mulf %81, %83 : vector<128x128xf32>
    %c0_46 = arith.constant 0 : index
    %c0_47 = arith.constant 0 : index
    %85 = vector.load %arg5[%c0_46, %c0_47] : memref<1x128xf32, #tpu.memory_space<vmem>>, vector<1x128xf32>
    %86 = vector.broadcast %85 : vector<1x128xf32> to vector<128x128xf32>
    %87 = arith.addf %84, %86 : vector<128x128xf32>
    %cst_48 = arith.constant 0.000000e+00 : f32
    %88 = vector.broadcast %cst_48 : f32 to vector<128x128xf32>
    %89 = arith.cmpf oge, %87, %88 : vector<128x128xf32>
    %cst_49 = arith.constant 1.000000e-01 : f32
    %90 = vector.broadcast %cst_49 : f32 to vector<128x128xf32>
    %91 = arith.mulf %90, %87 : vector<128x128xf32>
    %92 = arith.select %89, %87, %91 : vector<128x128xi1>, vector<128x128xf32>
    %93 = arith.truncf %92 : vector<128x128xf32> to vector<128x128xbf16>
    %c0_50 = arith.constant 0 : index
    %c0_51 = arith.constant 0 : index
    %c0_52 = arith.constant 0 : index
    %94 = vector.load %arg6[%c0_50, %c0_51, %c0_52] : memref<1x128x128xbf16, #tpu.memory_space<vmem>>, vector<1x128x128xbf16>
    %95 = vector.shape_cast %94 : vector<1x128x128xbf16> to vector<128x128xbf16>
    %96 = vector.shape_cast %93 : vector<128x128xbf16> to vector<1x128x128xbf16>
    tpu.vector_store %arg6[%c0_50, %c0_51, %c0_52], %96 {strides = array<i32>} : memref<1x128x128xbf16, #tpu.memory_space<vmem>>, vector<1x128x128xbf16>,
    return
  }
  func.func @transform_0(%arg0: i32, %arg1: i32) -> (i32, i32, i32) {
    %c0_i32 = arith.constant 0 : i32
    %c0_i32_0 = arith.constant 0 : i32
    %c0_i32_1 = arith.constant 0 : i32
    return %arg0, %c0_i32, %c0_i32_0 : i32, i32, i32
  }
  func.func @transform_1(%arg0: i32, %arg1: i32) -> (i32, i32, i32) {
    %c0_i32 = arith.constant 0 : i32
    %c0_i32_0 = arith.constant 0 : i32
    %c0_i32_1 = arith.constant 0 : i32
    %c0_i32_2 = arith.constant 0 : i32
    return %c0_i32, %c0_i32_0, %c0_i32_1 : i32, i32, i32
  }
  func.func @transform_2(%arg0: i32, %arg1: i32) -> (i32, i32) {
    %c0_i32 = arith.constant 0 : i32
    %c0_i32_0 = arith.constant 0 : i32
    %c0_i32_1 = arith.constant 0 : i32
    return %c0_i32, %c0_i32_0 : i32, i32
  }
  func.func @transform_3(%arg0: i32, %arg1: i32) -> (i32, i32) {
    %c0_i32 = arith.constant 0 : i32
    %c0_i32_0 = arith.constant 0 : i32
    %c0_i32_1 = arith.constant 0 : i32
    return %c0_i32, %c0_i32_0 : i32, i32
  }
  func.func @transform_4(%arg0: i32, %arg1: i32) -> (i32, i32, i32) {
    %c0_i32 = arith.constant 0 : i32
    %c0_i32_0 = arith.constant 0 : i32
    return %arg0, %arg1, %c0_i32 : i32, i32, i32
  }
}

module attributes {stable_mosaic.version = 11 : i64} {
  func.func @_conv_bn_lrelu_kernel(%arg0: i32, %arg1: i32, %arg2: memref<1x48x128xf32, #tpu.memory_space<vmem>>, %arg3: memref<4x128x128xbf16, #tpu.memory_space<vmem>>, %arg4: memref<1x128xf32, #tpu.memory_space<vmem>>, %arg5: memref<1x128xf32, #tpu.memory_space<vmem>>, %arg6: memref<1x32x128xbf16, #tpu.memory_space<vmem>>) attributes {dimension_semantics = [#tpu.dimension_semantics<parallel>, #tpu.dimension_semantics<parallel>], iteration_bounds = array<i64: 2, 1>, scalar_prefetch = 0 : i64, scratch_operands = 0 : i64, tpu.core_type = #tpu.core_type<tc>, window_params = [{transform_indices = @transform_0, window_bounds = array<i64: 1, 48, 128>}, {pipeline_mode = #tpu.pipeline_mode<synchronous>, transform_indices = @transform_1, window_bounds = array<i64: 4, 128, 128>}, {pipeline_mode = #tpu.pipeline_mode<synchronous>, transform_indices = @transform_2, window_bounds = array<i64: 1, 128>}, {pipeline_mode = #tpu.pipeline_mode<synchronous>, transform_indices = @transform_3, window_bounds = array<i64: 1, 128>}, {transform_indices = @transform_4, window_bounds = array<i64: 1, 32, 128>}]} {
    %c32_i32 = arith.constant 32 : i32
    %0 = arith.muli %arg1, %c32_i32 : i32
    %1 = tpu.assume_multiple %0, 16 : i32
    %c0_i32 = arith.constant 0 : i32
    %2 = arith.addi %1, %c0_i32 : i32
    %c0 = arith.constant 0 : index
    %3 = arith.index_cast %2 : i32 to index
    %c0_0 = arith.constant 0 : index
    %4 = vector.load %arg2[%c0, %3, %c0_0] : memref<1x48x128xf32, #tpu.memory_space<vmem>>, vector<1x32x128xf32>
    %5 = vector.shape_cast %4 : vector<1x32x128xf32> to vector<32x128xf32>
    %6 = arith.truncf %5 : vector<32x128xf32> to vector<32x128xbf16>
    %c0_1 = arith.constant 0 : index
    %c0_2 = arith.constant 0 : index
    %c0_3 = arith.constant 0 : index
    %7 = vector.load %arg3[%c0_1, %c0_2, %c0_3] : memref<4x128x128xbf16, #tpu.memory_space<vmem>>, vector<1x128x128xbf16>
    %8 = vector.shape_cast %7 : vector<1x128x128xbf16> to vector<128x128xbf16>
    %cst = arith.constant dense<0.000000e+00> : vector<32x128xf32>
    %9 = tpu.matmul %6, %8, %cst {dimension_numbers = #tpu.dot_dimension_numbers<[1], [0], [0], [1], [0, 0, 1, 1], [], []>} : vector<32x128xbf16>, vector<128x128xbf16>, vector<32x128xf32> -> vector<32x128xf32>
    %c1_i32 = arith.constant 1 : i32
    %10 = arith.addi %1, %c1_i32 : i32
    %c0_4 = arith.constant 0 : index
    %11 = arith.index_cast %10 : i32 to index
    %c0_5 = arith.constant 0 : index
    %12 = vector.load %arg2[%c0_4, %11, %c0_5] : memref<1x48x128xf32, #tpu.memory_space<vmem>>, vector<1x32x128xf32>
    %13 = vector.shape_cast %12 : vector<1x32x128xf32> to vector<32x128xf32>
    %14 = arith.truncf %13 : vector<32x128xf32> to vector<32x128xbf16>
    %c1 = arith.constant 1 : index
    %c0_6 = arith.constant 0 : index
    %c0_7 = arith.constant 0 : index
    %15 = vector.load %arg3[%c1, %c0_6, %c0_7] : memref<4x128x128xbf16, #tpu.memory_space<vmem>>, vector<1x128x128xbf16>
    %16 = vector.shape_cast %15 : vector<1x128x128xbf16> to vector<128x128xbf16>
    %cst_8 = arith.constant dense<0.000000e+00> : vector<32x128xf32>
    %17 = tpu.matmul %14, %16, %cst_8 {dimension_numbers = #tpu.dot_dimension_numbers<[1], [0], [0], [1], [0, 0, 1, 1], [], []>} : vector<32x128xbf16>, vector<128x128xbf16>, vector<32x128xf32> -> vector<32x128xf32>
    %18 = arith.addf %9, %17 : vector<32x128xf32>
    %c8_i32 = arith.constant 8 : i32
    %19 = arith.addi %1, %c8_i32 : i32
    %c0_9 = arith.constant 0 : index
    %20 = arith.index_cast %19 : i32 to index
    %c0_10 = arith.constant 0 : index
    %21 = vector.load %arg2[%c0_9, %20, %c0_10] : memref<1x48x128xf32, #tpu.memory_space<vmem>>, vector<1x32x128xf32>
    %22 = vector.shape_cast %21 : vector<1x32x128xf32> to vector<32x128xf32>
    %23 = arith.truncf %22 : vector<32x128xf32> to vector<32x128xbf16>
    %c2 = arith.constant 2 : index
    %c0_11 = arith.constant 0 : index
    %c0_12 = arith.constant 0 : index
    %24 = vector.load %arg3[%c2, %c0_11, %c0_12] : memref<4x128x128xbf16, #tpu.memory_space<vmem>>, vector<1x128x128xbf16>
    %25 = vector.shape_cast %24 : vector<1x128x128xbf16> to vector<128x128xbf16>
    %cst_13 = arith.constant dense<0.000000e+00> : vector<32x128xf32>
    %26 = tpu.matmul %23, %25, %cst_13 {dimension_numbers = #tpu.dot_dimension_numbers<[1], [0], [0], [1], [0, 0, 1, 1], [], []>} : vector<32x128xbf16>, vector<128x128xbf16>, vector<32x128xf32> -> vector<32x128xf32>
    %27 = arith.addf %18, %26 : vector<32x128xf32>
    %c9_i32 = arith.constant 9 : i32
    %28 = arith.addi %1, %c9_i32 : i32
    %c0_14 = arith.constant 0 : index
    %29 = arith.index_cast %28 : i32 to index
    %c0_15 = arith.constant 0 : index
    %30 = vector.load %arg2[%c0_14, %29, %c0_15] : memref<1x48x128xf32, #tpu.memory_space<vmem>>, vector<1x32x128xf32>
    %31 = vector.shape_cast %30 : vector<1x32x128xf32> to vector<32x128xf32>
    %32 = arith.truncf %31 : vector<32x128xf32> to vector<32x128xbf16>
    %c3 = arith.constant 3 : index
    %c0_16 = arith.constant 0 : index
    %c0_17 = arith.constant 0 : index
    %33 = vector.load %arg3[%c3, %c0_16, %c0_17] : memref<4x128x128xbf16, #tpu.memory_space<vmem>>, vector<1x128x128xbf16>
    %34 = vector.shape_cast %33 : vector<1x128x128xbf16> to vector<128x128xbf16>
    %cst_18 = arith.constant dense<0.000000e+00> : vector<32x128xf32>
    %35 = tpu.matmul %32, %34, %cst_18 {dimension_numbers = #tpu.dot_dimension_numbers<[1], [0], [0], [1], [0, 0, 1, 1], [], []>} : vector<32x128xbf16>, vector<128x128xbf16>, vector<32x128xf32> -> vector<32x128xf32>
    %36 = arith.addf %27, %35 : vector<32x128xf32>
    %c0_19 = arith.constant 0 : index
    %c0_20 = arith.constant 0 : index
    %37 = vector.load %arg4[%c0_19, %c0_20] : memref<1x128xf32, #tpu.memory_space<vmem>>, vector<1x128xf32>
    %38 = vector.broadcast %37 : vector<1x128xf32> to vector<32x128xf32>
    %39 = arith.mulf %36, %38 : vector<32x128xf32>
    %c0_21 = arith.constant 0 : index
    %c0_22 = arith.constant 0 : index
    %40 = vector.load %arg5[%c0_21, %c0_22] : memref<1x128xf32, #tpu.memory_space<vmem>>, vector<1x128xf32>
    %41 = vector.broadcast %40 : vector<1x128xf32> to vector<32x128xf32>
    %42 = arith.addf %39, %41 : vector<32x128xf32>
    %cst_23 = arith.constant 0.000000e+00 : f32
    %43 = vector.broadcast %cst_23 : f32 to vector<32x128xf32>
    %44 = arith.cmpf oge, %42, %43 : vector<32x128xf32>
    %cst_24 = arith.constant 1.000000e-01 : f32
    %45 = vector.broadcast %cst_24 : f32 to vector<32x128xf32>
    %46 = arith.mulf %45, %42 : vector<32x128xf32>
    %47 = arith.select %44, %42, %46 : vector<32x128xi1>, vector<32x128xf32>
    %48 = arith.truncf %47 : vector<32x128xf32> to vector<32x128xbf16>
    %c0_25 = arith.constant 0 : index
    %c0_26 = arith.constant 0 : index
    %c0_27 = arith.constant 0 : index
    %49 = vector.load %arg6[%c0_25, %c0_26, %c0_27] : memref<1x32x128xbf16, #tpu.memory_space<vmem>>, vector<1x32x128xbf16>
    %50 = vector.shape_cast %49 : vector<1x32x128xbf16> to vector<32x128xbf16>
    %51 = vector.shape_cast %48 : vector<32x128xbf16> to vector<1x32x128xbf16>
    tpu.vector_store %arg6[%c0_25, %c0_26, %c0_27], %51 {strides = array<i32>} : memref<1x32x128xbf16, #tpu.memory_space<vmem>>, vector<1x32x128xbf16>,
    return
  }
  func.func @transform_0(%arg0: i32, %arg1: i32) -> (i32, i32, i32) {
    %c0_i32 = arith.constant 0 : i32
    %c0_i32_0 = arith.constant 0 : i32
    %c0_i32_1 = arith.constant 0 : i32
    return %arg0, %c0_i32, %c0_i32_0 : i32, i32, i32
  }
  func.func @transform_1(%arg0: i32, %arg1: i32) -> (i32, i32, i32) {
    %c0_i32 = arith.constant 0 : i32
    %c0_i32_0 = arith.constant 0 : i32
    %c0_i32_1 = arith.constant 0 : i32
    %c0_i32_2 = arith.constant 0 : i32
    return %c0_i32, %c0_i32_0, %c0_i32_1 : i32, i32, i32
  }
  func.func @transform_2(%arg0: i32, %arg1: i32) -> (i32, i32) {
    %c0_i32 = arith.constant 0 : i32
    %c0_i32_0 = arith.constant 0 : i32
    %c0_i32_1 = arith.constant 0 : i32
    return %c0_i32, %c0_i32_0 : i32, i32
  }
  func.func @transform_3(%arg0: i32, %arg1: i32) -> (i32, i32) {
    %c0_i32 = arith.constant 0 : i32
    %c0_i32_0 = arith.constant 0 : i32
    %c0_i32_1 = arith.constant 0 : i32
    return %c0_i32, %c0_i32_0 : i32, i32
  }
  func.func @transform_4(%arg0: i32, %arg1: i32) -> (i32, i32, i32) {
    %c0_i32 = arith.constant 0 : i32
    %c0_i32_0 = arith.constant 0 : i32
    return %arg0, %arg1, %c0_i32 : i32, i32, i32
  }
}

module attributes {stable_mosaic.version = 11 : i64} {
  func.func @_conv_bn_lrelu_kernel(%arg0: i32, %arg1: i32, %arg2: memref<1x32x64xf32, #tpu.memory_space<vmem>>, %arg3: memref<1x64x128xbf16, #tpu.memory_space<vmem>>, %arg4: memref<1x128xf32, #tpu.memory_space<vmem>>, %arg5: memref<1x128xf32, #tpu.memory_space<vmem>>, %arg6: memref<1x32x128xbf16, #tpu.memory_space<vmem>>) attributes {dimension_semantics = [#tpu.dimension_semantics<parallel>, #tpu.dimension_semantics<parallel>], iteration_bounds = array<i64: 2, 1>, scalar_prefetch = 0 : i64, scratch_operands = 0 : i64, tpu.core_type = #tpu.core_type<tc>, window_params = [{transform_indices = @transform_0, window_bounds = array<i64: 1, 32, 64>}, {pipeline_mode = #tpu.pipeline_mode<synchronous>, transform_indices = @transform_1, window_bounds = array<i64: 1, 64, 128>}, {pipeline_mode = #tpu.pipeline_mode<synchronous>, transform_indices = @transform_2, window_bounds = array<i64: 1, 128>}, {pipeline_mode = #tpu.pipeline_mode<synchronous>, transform_indices = @transform_3, window_bounds = array<i64: 1, 128>}, {transform_indices = @transform_4, window_bounds = array<i64: 1, 32, 128>}]} {
    %c32_i32 = arith.constant 32 : i32
    %0 = arith.muli %arg1, %c32_i32 : i32
    %1 = tpu.assume_multiple %0, 16 : i32
    %c0_i32 = arith.constant 0 : i32
    %2 = arith.addi %1, %c0_i32 : i32
    %c0 = arith.constant 0 : index
    %3 = arith.index_cast %2 : i32 to index
    %c0_0 = arith.constant 0 : index
    %4 = vector.load %arg2[%c0, %3, %c0_0] : memref<1x32x64xf32, #tpu.memory_space<vmem>>, vector<1x32x64xf32>
    %5 = vector.shape_cast %4 : vector<1x32x64xf32> to vector<32x64xf32>
    %6 = arith.truncf %5 : vector<32x64xf32> to vector<32x64xbf16>
    %c0_1 = arith.constant 0 : index
    %c0_2 = arith.constant 0 : index
    %c0_3 = arith.constant 0 : index
    %7 = vector.load %arg3[%c0_1, %c0_2, %c0_3] : memref<1x64x128xbf16, #tpu.memory_space<vmem>>, vector<1x64x128xbf16>
    %8 = vector.shape_cast %7 : vector<1x64x128xbf16> to vector<64x128xbf16>
    %cst = arith.constant dense<0.000000e+00> : vector<32x128xf32>
    %9 = tpu.matmul %6, %8, %cst {dimension_numbers = #tpu.dot_dimension_numbers<[1], [0], [0], [1], [0, 0, 1, 1], [], []>} : vector<32x64xbf16>, vector<64x128xbf16>, vector<32x128xf32> -> vector<32x128xf32>
    %c0_4 = arith.constant 0 : index
    %c0_5 = arith.constant 0 : index
    %10 = vector.load %arg4[%c0_4, %c0_5] : memref<1x128xf32, #tpu.memory_space<vmem>>, vector<1x128xf32>
    %11 = vector.broadcast %10 : vector<1x128xf32> to vector<32x128xf32>
    %12 = arith.mulf %9, %11 : vector<32x128xf32>
    %c0_6 = arith.constant 0 : index
    %c0_7 = arith.constant 0 : index
    %13 = vector.load %arg5[%c0_6, %c0_7] : memref<1x128xf32, #tpu.memory_space<vmem>>, vector<1x128xf32>
    %14 = vector.broadcast %13 : vector<1x128xf32> to vector<32x128xf32>
    %15 = arith.addf %12, %14 : vector<32x128xf32>
    %cst_8 = arith.constant 0.000000e+00 : f32
    %16 = vector.broadcast %cst_8 : f32 to vector<32x128xf32>
    %17 = arith.cmpf oge, %15, %16 : vector<32x128xf32>
    %cst_9 = arith.constant 1.000000e-01 : f32
    %18 = vector.broadcast %cst_9 : f32 to vector<32x128xf32>
    %19 = arith.mulf %18, %15 : vector<32x128xf32>
    %20 = arith.select %17, %15, %19 : vector<32x128xi1>, vector<32x128xf32>
    %21 = arith.truncf %20 : vector<32x128xf32> to vector<32x128xbf16>
    %c0_10 = arith.constant 0 : index
    %c0_11 = arith.constant 0 : index
    %c0_12 = arith.constant 0 : index
    %22 = vector.load %arg6[%c0_10, %c0_11, %c0_12] : memref<1x32x128xbf16, #tpu.memory_space<vmem>>, vector<1x32x128xbf16>
    %23 = vector.shape_cast %22 : vector<1x32x128xbf16> to vector<32x128xbf16>
    %24 = vector.shape_cast %21 : vector<32x128xbf16> to vector<1x32x128xbf16>
    tpu.vector_store %arg6[%c0_10, %c0_11, %c0_12], %24 {strides = array<i32>} : memref<1x32x128xbf16, #tpu.memory_space<vmem>>, vector<1x32x128xbf16>,
    return
  }
  func.func @transform_0(%arg0: i32, %arg1: i32) -> (i32, i32, i32) {
    %c0_i32 = arith.constant 0 : i32
    %c0_i32_0 = arith.constant 0 : i32
    %c0_i32_1 = arith.constant 0 : i32
    return %arg0, %c0_i32, %c0_i32_0 : i32, i32, i32
  }
  func.func @transform_1(%arg0: i32, %arg1: i32) -> (i32, i32, i32) {
    %c0_i32 = arith.constant 0 : i32
    %c0_i32_0 = arith.constant 0 : i32
    %c0_i32_1 = arith.constant 0 : i32
    %c0_i32_2 = arith.constant 0 : i32
    return %c0_i32, %c0_i32_0, %c0_i32_1 : i32, i32, i32
  }
  func.func @transform_2(%arg0: i32, %arg1: i32) -> (i32, i32) {
    %c0_i32 = arith.constant 0 : i32
    %c0_i32_0 = arith.constant 0 : i32
    %c0_i32_1 = arith.constant 0 : i32
    return %c0_i32, %c0_i32_0 : i32, i32
  }
  func.func @transform_3(%arg0: i32, %arg1: i32) -> (i32, i32) {
    %c0_i32 = arith.constant 0 : i32
    %c0_i32_0 = arith.constant 0 : i32
    %c0_i32_1 = arith.constant 0 : i32
    return %c0_i32, %c0_i32_0 : i32, i32
  }
  func.func @transform_4(%arg0: i32, %arg1: i32) -> (i32, i32, i32) {
    %c0_i32 = arith.constant 0 : i32
    %c0_i32_0 = arith.constant 0 : i32
    return %arg0, %arg1, %c0_i32 : i32, i32, i32
  }
}

module attributes {stable_mosaic.version = 11 : i64} {
  func.func @_conv_bn_lrelu_kernel(%arg0: i32, %arg1: i32, %arg2: memref<1x56x32xf32, #tpu.memory_space<vmem>>, %arg3: memref<9x32x128xbf16, #tpu.memory_space<vmem>>, %arg4: memref<1x128xf32, #tpu.memory_space<vmem>>, %arg5: memref<1x128xf32, #tpu.memory_space<vmem>>, %arg6: memref<1x32x128xbf16, #tpu.memory_space<vmem>>) attributes {dimension_semantics = [#tpu.dimension_semantics<parallel>, #tpu.dimension_semantics<parallel>], iteration_bounds = array<i64: 2, 1>, scalar_prefetch = 0 : i64, scratch_operands = 0 : i64, tpu.core_type = #tpu.core_type<tc>, window_params = [{transform_indices = @transform_0, window_bounds = array<i64: 1, 56, 32>}, {pipeline_mode = #tpu.pipeline_mode<synchronous>, transform_indices = @transform_1, window_bounds = array<i64: 9, 32, 128>}, {pipeline_mode = #tpu.pipeline_mode<synchronous>, transform_indices = @transform_2, window_bounds = array<i64: 1, 128>}, {pipeline_mode = #tpu.pipeline_mode<synchronous>, transform_indices = @transform_3, window_bounds = array<i64: 1, 128>}, {transform_indices = @transform_4, window_bounds = array<i64: 1, 32, 128>}]} {
    %c32_i32 = arith.constant 32 : i32
    %0 = arith.muli %arg1, %c32_i32 : i32
    %1 = tpu.assume_multiple %0, 16 : i32
    %c0_i32 = arith.constant 0 : i32
    %2 = arith.addi %1, %c0_i32 : i32
    %c0 = arith.constant 0 : index
    %3 = arith.index_cast %2 : i32 to index
    %c0_0 = arith.constant 0 : index
    %4 = vector.load %arg2[%c0, %3, %c0_0] : memref<1x56x32xf32, #tpu.memory_space<vmem>>, vector<1x32x32xf32>
    %5 = vector.shape_cast %4 : vector<1x32x32xf32> to vector<32x32xf32>
    %6 = arith.truncf %5 : vector<32x32xf32> to vector<32x32xbf16>
    %c0_1 = arith.constant 0 : index
    %c0_2 = arith.constant 0 : index
    %c0_3 = arith.constant 0 : index
    %7 = vector.load %arg3[%c0_1, %c0_2, %c0_3] : memref<9x32x128xbf16, #tpu.memory_space<vmem>>, vector<1x32x128xbf16>
    %8 = vector.shape_cast %7 : vector<1x32x128xbf16> to vector<32x128xbf16>
    %cst = arith.constant dense<0.000000e+00> : vector<32x128xf32>
    %9 = tpu.matmul %6, %8, %cst {dimension_numbers = #tpu.dot_dimension_numbers<[1], [0], [0], [1], [0, 0, 1, 1], [], []>} : vector<32x32xbf16>, vector<32x128xbf16>, vector<32x128xf32> -> vector<32x128xf32>
    %c1_i32 = arith.constant 1 : i32
    %10 = arith.addi %1, %c1_i32 : i32
    %c0_4 = arith.constant 0 : index
    %11 = arith.index_cast %10 : i32 to index
    %c0_5 = arith.constant 0 : index
    %12 = vector.load %arg2[%c0_4, %11, %c0_5] : memref<1x56x32xf32, #tpu.memory_space<vmem>>, vector<1x32x32xf32>
    %13 = vector.shape_cast %12 : vector<1x32x32xf32> to vector<32x32xf32>
    %14 = arith.truncf %13 : vector<32x32xf32> to vector<32x32xbf16>
    %c1 = arith.constant 1 : index
    %c0_6 = arith.constant 0 : index
    %c0_7 = arith.constant 0 : index
    %15 = vector.load %arg3[%c1, %c0_6, %c0_7] : memref<9x32x128xbf16, #tpu.memory_space<vmem>>, vector<1x32x128xbf16>
    %16 = vector.shape_cast %15 : vector<1x32x128xbf16> to vector<32x128xbf16>
    %cst_8 = arith.constant dense<0.000000e+00> : vector<32x128xf32>
    %17 = tpu.matmul %14, %16, %cst_8 {dimension_numbers = #tpu.dot_dimension_numbers<[1], [0], [0], [1], [0, 0, 1, 1], [], []>} : vector<32x32xbf16>, vector<32x128xbf16>, vector<32x128xf32> -> vector<32x128xf32>
    %18 = arith.addf %9, %17 : vector<32x128xf32>
    %c2_i32 = arith.constant 2 : i32
    %19 = arith.addi %1, %c2_i32 : i32
    %c0_9 = arith.constant 0 : index
    %20 = arith.index_cast %19 : i32 to index
    %c0_10 = arith.constant 0 : index
    %21 = vector.load %arg2[%c0_9, %20, %c0_10] : memref<1x56x32xf32, #tpu.memory_space<vmem>>, vector<1x32x32xf32>
    %22 = vector.shape_cast %21 : vector<1x32x32xf32> to vector<32x32xf32>
    %23 = arith.truncf %22 : vector<32x32xf32> to vector<32x32xbf16>
    %c2 = arith.constant 2 : index
    %c0_11 = arith.constant 0 : index
    %c0_12 = arith.constant 0 : index
    %24 = vector.load %arg3[%c2, %c0_11, %c0_12] : memref<9x32x128xbf16, #tpu.memory_space<vmem>>, vector<1x32x128xbf16>
    %25 = vector.shape_cast %24 : vector<1x32x128xbf16> to vector<32x128xbf16>
    %cst_13 = arith.constant dense<0.000000e+00> : vector<32x128xf32>
    %26 = tpu.matmul %23, %25, %cst_13 {dimension_numbers = #tpu.dot_dimension_numbers<[1], [0], [0], [1], [0, 0, 1, 1], [], []>} : vector<32x32xbf16>, vector<32x128xbf16>, vector<32x128xf32> -> vector<32x128xf32>
    %27 = arith.addf %18, %26 : vector<32x128xf32>
    %c8_i32 = arith.constant 8 : i32
    %28 = arith.addi %1, %c8_i32 : i32
    %c0_14 = arith.constant 0 : index
    %29 = arith.index_cast %28 : i32 to index
    %c0_15 = arith.constant 0 : index
    %30 = vector.load %arg2[%c0_14, %29, %c0_15] : memref<1x56x32xf32, #tpu.memory_space<vmem>>, vector<1x32x32xf32>
    %31 = vector.shape_cast %30 : vector<1x32x32xf32> to vector<32x32xf32>
    %32 = arith.truncf %31 : vector<32x32xf32> to vector<32x32xbf16>
    %c3 = arith.constant 3 : index
    %c0_16 = arith.constant 0 : index
    %c0_17 = arith.constant 0 : index
    %33 = vector.load %arg3[%c3, %c0_16, %c0_17] : memref<9x32x128xbf16, #tpu.memory_space<vmem>>, vector<1x32x128xbf16>
    %34 = vector.shape_cast %33 : vector<1x32x128xbf16> to vector<32x128xbf16>
    %cst_18 = arith.constant dense<0.000000e+00> : vector<32x128xf32>
    %35 = tpu.matmul %32, %34, %cst_18 {dimension_numbers = #tpu.dot_dimension_numbers<[1], [0], [0], [1], [0, 0, 1, 1], [], []>} : vector<32x32xbf16>, vector<32x128xbf16>, vector<32x128xf32> -> vector<32x128xf32>
    %36 = arith.addf %27, %35 : vector<32x128xf32>
    %c9_i32 = arith.constant 9 : i32
    %37 = arith.addi %1, %c9_i32 : i32
    %c0_19 = arith.constant 0 : index
    %38 = arith.index_cast %37 : i32 to index
    %c0_20 = arith.constant 0 : index
    %39 = vector.load %arg2[%c0_19, %38, %c0_20] : memref<1x56x32xf32, #tpu.memory_space<vmem>>, vector<1x32x32xf32>
    %40 = vector.shape_cast %39 : vector<1x32x32xf32> to vector<32x32xf32>
    %41 = arith.truncf %40 : vector<32x32xf32> to vector<32x32xbf16>
    %c4 = arith.constant 4 : index
    %c0_21 = arith.constant 0 : index
    %c0_22 = arith.constant 0 : index
    %42 = vector.load %arg3[%c4, %c0_21, %c0_22] : memref<9x32x128xbf16, #tpu.memory_space<vmem>>, vector<1x32x128xbf16>
    %43 = vector.shape_cast %42 : vector<1x32x128xbf16> to vector<32x128xbf16>
    %cst_23 = arith.constant dense<0.000000e+00> : vector<32x128xf32>
    %44 = tpu.matmul %41, %43, %cst_23 {dimension_numbers = #tpu.dot_dimension_numbers<[1], [0], [0], [1], [0, 0, 1, 1], [], []>} : vector<32x32xbf16>, vector<32x128xbf16>, vector<32x128xf32> -> vector<32x128xf32>
    %45 = arith.addf %36, %44 : vector<32x128xf32>
    %c10_i32 = arith.constant 10 : i32
    %46 = arith.addi %1, %c10_i32 : i32
    %c0_24 = arith.constant 0 : index
    %47 = arith.index_cast %46 : i32 to index
    %c0_25 = arith.constant 0 : index
    %48 = vector.load %arg2[%c0_24, %47, %c0_25] : memref<1x56x32xf32, #tpu.memory_space<vmem>>, vector<1x32x32xf32>
    %49 = vector.shape_cast %48 : vector<1x32x32xf32> to vector<32x32xf32>
    %50 = arith.truncf %49 : vector<32x32xf32> to vector<32x32xbf16>
    %c5 = arith.constant 5 : index
    %c0_26 = arith.constant 0 : index
    %c0_27 = arith.constant 0 : index
    %51 = vector.load %arg3[%c5, %c0_26, %c0_27] : memref<9x32x128xbf16, #tpu.memory_space<vmem>>, vector<1x32x128xbf16>
    %52 = vector.shape_cast %51 : vector<1x32x128xbf16> to vector<32x128xbf16>
    %cst_28 = arith.constant dense<0.000000e+00> : vector<32x128xf32>
    %53 = tpu.matmul %50, %52, %cst_28 {dimension_numbers = #tpu.dot_dimension_numbers<[1], [0], [0], [1], [0, 0, 1, 1], [], []>} : vector<32x32xbf16>, vector<32x128xbf16>, vector<32x128xf32> -> vector<32x128xf32>
    %54 = arith.addf %45, %53 : vector<32x128xf32>
    %c16_i32 = arith.constant 16 : i32
    %55 = arith.addi %1, %c16_i32 : i32
    %c0_29 = arith.constant 0 : index
    %56 = arith.index_cast %55 : i32 to index
    %c0_30 = arith.constant 0 : index
    %57 = vector.load %arg2[%c0_29, %56, %c0_30] : memref<1x56x32xf32, #tpu.memory_space<vmem>>, vector<1x32x32xf32>
    %58 = vector.shape_cast %57 : vector<1x32x32xf32> to vector<32x32xf32>
    %59 = arith.truncf %58 : vector<32x32xf32> to vector<32x32xbf16>
    %c6 = arith.constant 6 : index
    %c0_31 = arith.constant 0 : index
    %c0_32 = arith.constant 0 : index
    %60 = vector.load %arg3[%c6, %c0_31, %c0_32] : memref<9x32x128xbf16, #tpu.memory_space<vmem>>, vector<1x32x128xbf16>
    %61 = vector.shape_cast %60 : vector<1x32x128xbf16> to vector<32x128xbf16>
    %cst_33 = arith.constant dense<0.000000e+00> : vector<32x128xf32>
    %62 = tpu.matmul %59, %61, %cst_33 {dimension_numbers = #tpu.dot_dimension_numbers<[1], [0], [0], [1], [0, 0, 1, 1], [], []>} : vector<32x32xbf16>, vector<32x128xbf16>, vector<32x128xf32> -> vector<32x128xf32>
    %63 = arith.addf %54, %62 : vector<32x128xf32>
    %c17_i32 = arith.constant 17 : i32
    %64 = arith.addi %1, %c17_i32 : i32
    %c0_34 = arith.constant 0 : index
    %65 = arith.index_cast %64 : i32 to index
    %c0_35 = arith.constant 0 : index
    %66 = vector.load %arg2[%c0_34, %65, %c0_35] : memref<1x56x32xf32, #tpu.memory_space<vmem>>, vector<1x32x32xf32>
    %67 = vector.shape_cast %66 : vector<1x32x32xf32> to vector<32x32xf32>
    %68 = arith.truncf %67 : vector<32x32xf32> to vector<32x32xbf16>
    %c7 = arith.constant 7 : index
    %c0_36 = arith.constant 0 : index
    %c0_37 = arith.constant 0 : index
    %69 = vector.load %arg3[%c7, %c0_36, %c0_37] : memref<9x32x128xbf16, #tpu.memory_space<vmem>>, vector<1x32x128xbf16>
    %70 = vector.shape_cast %69 : vector<1x32x128xbf16> to vector<32x128xbf16>
    %cst_38 = arith.constant dense<0.000000e+00> : vector<32x128xf32>
    %71 = tpu.matmul %68, %70, %cst_38 {dimension_numbers = #tpu.dot_dimension_numbers<[1], [0], [0], [1], [0, 0, 1, 1], [], []>} : vector<32x32xbf16>, vector<32x128xbf16>, vector<32x128xf32> -> vector<32x128xf32>
    %72 = arith.addf %63, %71 : vector<32x128xf32>
    %c18_i32 = arith.constant 18 : i32
    %73 = arith.addi %1, %c18_i32 : i32
    %c0_39 = arith.constant 0 : index
    %74 = arith.index_cast %73 : i32 to index
    %c0_40 = arith.constant 0 : index
    %75 = vector.load %arg2[%c0_39, %74, %c0_40] : memref<1x56x32xf32, #tpu.memory_space<vmem>>, vector<1x32x32xf32>
    %76 = vector.shape_cast %75 : vector<1x32x32xf32> to vector<32x32xf32>
    %77 = arith.truncf %76 : vector<32x32xf32> to vector<32x32xbf16>
    %c8 = arith.constant 8 : index
    %c0_41 = arith.constant 0 : index
    %c0_42 = arith.constant 0 : index
    %78 = vector.load %arg3[%c8, %c0_41, %c0_42] : memref<9x32x128xbf16, #tpu.memory_space<vmem>>, vector<1x32x128xbf16>
    %79 = vector.shape_cast %78 : vector<1x32x128xbf16> to vector<32x128xbf16>
    %cst_43 = arith.constant dense<0.000000e+00> : vector<32x128xf32>
    %80 = tpu.matmul %77, %79, %cst_43 {dimension_numbers = #tpu.dot_dimension_numbers<[1], [0], [0], [1], [0, 0, 1, 1], [], []>} : vector<32x32xbf16>, vector<32x128xbf16>, vector<32x128xf32> -> vector<32x128xf32>
    %81 = arith.addf %72, %80 : vector<32x128xf32>
    %c0_44 = arith.constant 0 : index
    %c0_45 = arith.constant 0 : index
    %82 = vector.load %arg4[%c0_44, %c0_45] : memref<1x128xf32, #tpu.memory_space<vmem>>, vector<1x128xf32>
    %83 = vector.broadcast %82 : vector<1x128xf32> to vector<32x128xf32>
    %84 = arith.mulf %81, %83 : vector<32x128xf32>
    %c0_46 = arith.constant 0 : index
    %c0_47 = arith.constant 0 : index
    %85 = vector.load %arg5[%c0_46, %c0_47] : memref<1x128xf32, #tpu.memory_space<vmem>>, vector<1x128xf32>
    %86 = vector.broadcast %85 : vector<1x128xf32> to vector<32x128xf32>
    %87 = arith.addf %84, %86 : vector<32x128xf32>
    %cst_48 = arith.constant 0.000000e+00 : f32
    %88 = vector.broadcast %cst_48 : f32 to vector<32x128xf32>
    %89 = arith.cmpf oge, %87, %88 : vector<32x128xf32>
    %cst_49 = arith.constant 1.000000e-01 : f32
    %90 = vector.broadcast %cst_49 : f32 to vector<32x128xf32>
    %91 = arith.mulf %90, %87 : vector<32x128xf32>
    %92 = arith.select %89, %87, %91 : vector<32x128xi1>, vector<32x128xf32>
    %93 = arith.truncf %92 : vector<32x128xf32> to vector<32x128xbf16>
    %c0_50 = arith.constant 0 : index
    %c0_51 = arith.constant 0 : index
    %c0_52 = arith.constant 0 : index
    %94 = vector.load %arg6[%c0_50, %c0_51, %c0_52] : memref<1x32x128xbf16, #tpu.memory_space<vmem>>, vector<1x32x128xbf16>
    %95 = vector.shape_cast %94 : vector<1x32x128xbf16> to vector<32x128xbf16>
    %96 = vector.shape_cast %93 : vector<32x128xbf16> to vector<1x32x128xbf16>
    tpu.vector_store %arg6[%c0_50, %c0_51, %c0_52], %96 {strides = array<i32>} : memref<1x32x128xbf16, #tpu.memory_space<vmem>>, vector<1x32x128xbf16>,
    return
  }
  func.func @transform_0(%arg0: i32, %arg1: i32) -> (i32, i32, i32) {
    %c0_i32 = arith.constant 0 : i32
    %c0_i32_0 = arith.constant 0 : i32
    %c0_i32_1 = arith.constant 0 : i32
    return %arg0, %c0_i32, %c0_i32_0 : i32, i32, i32
  }
  func.func @transform_1(%arg0: i32, %arg1: i32) -> (i32, i32, i32) {
    %c0_i32 = arith.constant 0 : i32
    %c0_i32_0 = arith.constant 0 : i32
    %c0_i32_1 = arith.constant 0 : i32
    %c0_i32_2 = arith.constant 0 : i32
    return %c0_i32, %c0_i32_0, %c0_i32_1 : i32, i32, i32
  }
  func.func @transform_2(%arg0: i32, %arg1: i32) -> (i32, i32) {
    %c0_i32 = arith.constant 0 : i32
    %c0_i32_0 = arith.constant 0 : i32
    %c0_i32_1 = arith.constant 0 : i32
    return %c0_i32, %c0_i32_0 : i32, i32
  }
  func.func @transform_3(%arg0: i32, %arg1: i32) -> (i32, i32) {
    %c0_i32 = arith.constant 0 : i32
    %c0_i32_0 = arith.constant 0 : i32
    %c0_i32_1 = arith.constant 0 : i32
    return %c0_i32, %c0_i32_0 : i32, i32
  }
  func.func @transform_4(%arg0: i32, %arg1: i32) -> (i32, i32, i32) {
    %c0_i32 = arith.constant 0 : i32
    %c0_i32_0 = arith.constant 0 : i32
    return %arg0, %arg1, %c0_i32 : i32, i32, i32
  }
}

</mosaic_0001>

<bundles_post_ra>
// kernel: _lambda_.12
= control target key start
LH: loop header
LB: loop body
LE: loop exit
PB: predicated region body
PF: predicated region fallthrough
CT: control target
= control target key end

     0   :  { %s3157_s15 = smov 0   ;;  %s3159_s16 = smov 0   ;;  %s4232_s0 = inlined_call_operand.vmem [shape: f32[2,1400,3], index: 0, kind: input, shape index: {}]   ;;  %s4233_s1 = inlined_call_operand.vmem [shape: bf16[9,3,128], index: 1, kind: input, shape index: {}]   ;;  %s4234_s2 = inlined_call_operand.vmem [shape: f32[1,128], index: 2, kind: input, shape index: {}]   ;;  %s4235_s3 = inlined_call_operand.vmem [shape: f32[1,128], index: 3, kind: input, shape index: {}]   ;;  %s4236_s4 = inlined_call_operand.vmem [shape: bf16[2,1280,128], index: 4, kind: output, shape index: {}]  }
   0x1   :  { %s3161_s17 = smov 0   ;;  %s3163_s18 = smov 0  }
   0x2   :  { %s3165_s19 = smov 0  }
   0x3 LB: > { %s23_s20 = sadd.s32 1, %s3121_s17  ;;  %s26_s21 = sadd.s32 1, %s3125_s18  ;;  %s3129_s19 = sphi %s3165_s19, %s14_s19   ;;  %s3125_s18 = sphi %s3163_s18, %s4358_s18   ;;  %s3121_s17 = sphi %s3161_s17, %s4357_s17   ;;  %s3117_s16 = sphi %s3159_s16, %s4356_s16   ;;  %s3113_s15 = sphi %s3157_s15, %s4355_s15  }
   0x4   : > { %p24_p0 = scmp.ge.s32.totalorder %s23_s20, 5  ;;  %p2524_p1 = scmp.ge.s32.totalorder %s3129_s19, 1 }
   0x5   : > { %p176_p2 = scmp.lt.s32.totalorder %s3129_s19, 11 }
   0x6   : > { %s4360_s20 = smov (%p24_p0, %s23_s20), 0  ;;  %s4362_s21 = smov (!%p24_p0, %s26_s21), %s3125_s18 }
   0x7   : > { %p177_p3 = pnand %p2524_p1, %p176_p2  ;;  %p28_p4 = scmp.ge.s32.totalorder %s4362_s21, 2 }
   0x9   : > { %s4364_s21 = smov (%p28_p4, %s4362_s21), 0  ;;  %180 = sbr.rel (%p177_p3) target bundleno = 741 (0x2e5), region = 36 }
   0xe   : > { %v2562_v0 = vld [vmem:[%s4233_s1 + $0x2] sm:$0x3]  ;;  %vm374_vm0 = vcmask 1040384   ;;  %vm375_vm1 = vcmask 1041408   ;;  %p206_p5 = scmp.lt.s32.totalorder %s3117_s16, 1  ;;  %v3131_v1 = vmov 65535  }
   0xf   : > { %v376_v2 = vsel %vm374_vm0, 4294967295, %v3131_v1  ;;  %v2628_v3 = vld [vmem:[%s4233_s1 + $0x4] sm:$0x3]  ;;  %v2678_v5 = vld [vmem:[%s4233_s1 + $0x6] sm:$0x3]  ;;  %s2528_s7 = sshll.u32 %s3113_s15, 8 }
  0x10   : > { %v3195_v4 = vsel %vm375_vm1, %v376_v2, 0  ;;  %s4366_s16 = smov (!%p206_p5, %s3117_s16), 1  ;;  %v272_v6 = vld [vmem:[%s4233_s1] sm:$0x3]  ;;  %v2728_v10 = vld [vmem:[%s4233_s1 + $0x8] sm:$0x3] }
  0x11   : > { %v379_v7 = vand.u32 %v2562_v0, %v3195_v4  ;;  %v711_v8 = vand.u32 %v2628_v3, %v3195_v4  ;;  %v935_v9 = vand.u32 %v2678_v5, %v3195_v4  ;;  %s3045_s6 = smul.u32 1400, %s4366_s16  ;;  %v519_v11 = vand.u32 %v3195_v4, %v272_v6  ;;  %v2828_v49 = vld [vmem:[%s4233_s1 + $0xc] sm:$0x3]  ;;  %v2878_v51 = vld [vmem:[%s4233_s1 + $0xe] sm:$0x3]  ;;  %s2526_s27 = sshll.u32 %s3113_s15, 5 }
  0x12   : > { %v1159_v12 = vand.u32 %v2728_v10, %v3195_v4  ;;  %vm325_vm2 = vcmask 23552   ;;  %v1607_v50 = vand.u32 %v2828_v49, %v3195_v4  ;;  %v2778_v52 = vld [vmem:[%s4233_s1 + $0xa] sm:$0x3]  ;;  %v2928_v53 = vld [vmem:[%s4233_s1 + $0x10] sm:$0x3]  ;;  %v1831_v54 = vand.u32 %v2878_v51, %v3195_v4  ;;  %p214_p6 = scmp.lt.s32.totalorder %s2526_s27, 159 }
  0x13   : > { %3042 = vmatpush.bf16.msra.mxu1 %v379_v7  ;;  %3043 = vmatpush.bf16.msra.mxu2 %v379_v7  ;;  %s210_s10 = scalar_lea.vmem %s4232_s0, %s3045_s6  ;;  %v1383_v55 = vand.u32 %v2778_v52, %v3195_v4  ;;  %v2055_v56 = vand.u32 %v2928_v53, %v3195_v4  ;;  %s3046_s5 = smul.u32 160, %s4366_s16 }
  0x14   : > { %3044 = vmatpush.bf16.msra.mxu3 %v379_v7  ;;  %388 = vmatpush.bf16.msra.mxu0 %v379_v7  ;;  %s3218_s11 = scalar_lea.vmem %s210_s10, %s2528_s7  ;;  %s4368_s27 = smov (!%p214_p6, %s2526_s27), 159 }
  0x15   : > { %v3221_v13 = vld [vmem:[%s3218_s11 + $0x41] sm:$0xff]  ;;  %v3224_v14 = vld [vmem:[%s3218_s11 + $0x49] sm:$0xff]  ;;  %v3251_v25 = vld [vmem:[%s3218_s11 + $0x51] sm:$0xff]  ;;  %s217_s6 = sadd.s32 %s3046_s5, %s4368_s27 }
  0x16   : > { %v3227_v15 = vld [vmem:[%s3218_s11 + $0x81] sm:$0xff]  ;;  %v311_v16 = vpack.c.bf16 %v3224_v14, %v3221_v13  ;;  %v3232_v17 = vld [vmem:[%s3218_s11 + $0x89] sm:$0xff]  ;;  %v3254_v26 = vld [vmem:[%s3218_s11 + $0x59] sm:$0xff]  ;;  %v1094_v52 = vpack.c.bf16 %v3251_v25, %v3224_v14  ;;  %s2527_s16 = sshll.u32 %s217_s6, 2 }
  0x17   : > { %720 = vmatpush.bf16.msrb.mxu2 %v711_v8  ;;  %528 = vmatpush.bf16.msrb.mxu1 %v519_v11  ;;  %v3235_v18 = vld [vmem:[%s3218_s11 + $0xc1] sm:$0xff]  ;;  %v3238_v19 = vld [vmem:[%s3218_s11 + $0xc9] sm:$0xff]  ;;  %v315_v20 = vpack.c.bf16 %v3232_v17, %v3227_v15  ;;  %v3257_v27 = vld [vmem:[%s3218_s11 + $0x91] sm:$0xff]  ;;  %v3272_v33 = vpack.c.bf16 %v3254_v26, %v3251_v25  ;;  %s4023_s9 = scalar_lea.vmem %s4236_s4, %s2527_s16 }
  0x18   : > { %944 = vmatpush.bf16.msrb.mxu3 %v935_v9  ;;  %1168 = vmatpush.bf16.msrb.mxu0 %v1159_v12  ;;  %v319_v21 = vpack.c.bf16 %v3238_v19, %v3235_v18  ;;  %v2530_v22 = vld [vmem:[%s3218_s11 + $0x1] sm:$0xff]  ;;  %v2531_v23 = vld [vmem:[%s3218_s11 + $0x9] sm:$0xff]  ;;  %v3260_v28 = vld [vmem:[%s3218_s11 + $0x99] sm:$0xff] }
  0x19   : > { %2567 = vmatmul.msk.bf16.vlgmr.msra.gmra.mxu1 %vm325_vm2, %v311_v16  ;;  %v307_v24 = vpack.c.bf16 %v2531_v23, %v2530_v22  ;;  %2571 = vmatmul.msk.bf16.vlgmr.msra.gmra.mxu2 %vm325_vm2, %v315_v20  ;;  %v3263_v29 = vld [vmem:[%s3218_s11 + $0xd1] sm:$0xff]  ;;  %v3266_v30 = vld [vmem:[%s3218_s11 + $0xd9] sm:$0xff]  ;;  %v316_v34 = vpack.c.bf16 %v3260_v28, %v3257_v27  ;;  %v3284_v37 = vld [vmem:[%s3218_s11 + $0x61] sm:$0xff] }
  0x1a   : > { %2575 = vmatmul.msk.bf16.vlgmr.msra.gmra.mxu3 %vm325_vm2, %v319_v21  ;;  %v2532_v31 = vld [vmem:[%s3218_s11 + $0x11] sm:$0xff]  ;;  %v2533_v32 = vld [vmem:[%s3218_s11 + $0x19] sm:$0xff]  ;;  %v320_v35 = vpack.c.bf16 %v3266_v30, %v3263_v29  ;;  %v3287_v38 = vld [vmem:[%s3218_s11 + $0x69] sm:$0xff] }
  0x1b   : > { %2563 = vmatmul.msk.bf16.vlgmr.msra.gmra.mxu0 %vm325_vm2, %v307_v24  ;;  %v308_v36 = vpack.c.bf16 %v2533_v32, %v2532_v31  ;;  %v3290_v39 = vld [vmem:[%s3218_s11 + $0xa1] sm:$0xff]  ;;  %v3293_v40 = vld [vmem:[%s3218_s11 + $0xa9] sm:$0xff]  ;;  %v3305_v45 = vpack.c.bf16 %v3287_v38, %v3284_v37  ;;  %1616 = vmatpush.bf16.msra.mxu2 %v1607_v50  ;;  %v3333_v57 = vld [vmem:[%s3218_s11 + $0x71] sm:$0xff] }
  0x1c   : > { %v3296_v41 = vld [vmem:[%s3218_s11 + $0xe1] sm:$0xff]  ;;  %v3299_v42 = vld [vmem:[%s3218_s11 + $0xe9] sm:$0xff]  ;;  %v317_v46 = vpack.c.bf16 %v3293_v40, %v3290_v39  ;;  %1840 = vmatpush.bf16.msra.mxu3 %v1831_v54  ;;  %1392 = vmatpush.bf16.msra.mxu1 %v1383_v55  ;;  %v3336_v58 = vld [vmem:[%s3218_s11 + $0x79] sm:$0xff] }
  0x1d   : > { %v2534_v43 = vld [vmem:[%s3218_s11 + $0x21] sm:$0xff]  ;;  %v2535_v44 = vld [vmem:[%s3218_s11 + $0x29] sm:$0xff]  ;;  %v321_v47 = vpack.c.bf16 %v3299_v42, %v3296_v41  ;;  %2064 = vmatpush.bf16.msra.mxu0 %v2055_v56  ;;  %v3339_v59 = vld [vmem:[%s3218_s11 + $0xb1] sm:$0xff]  ;;  %v3354_v1 = vpack.c.bf16 %v3336_v58, %v3333_v57 }
  0x1e   : > { %v309_v48 = vpack.c.bf16 %v2535_v44, %v2534_v43  ;;  %v3342_v60 = vld [vmem:[%s3218_s11 + $0xb9] sm:$0xff]  ;;  %v3345_v61 = vld [vmem:[%s3218_s11 + $0xf1] sm:$0xff]  ;;  %v225_v6 = vld [vmem:[%s3218_s11 + $0x8] sm:$0xff] }
  0x1f   : > { %v3348_v62 = vld [vmem:[%s3218_s11 + $0xf9] sm:$0xff]  ;;  %v2536_v63 = vld [vmem:[%s3218_s11 + $0x31] sm:$0xff]  ;;  %v318_v2 = vpack.c.bf16 %v3342_v60, %v3339_v59  ;;  %v2596_v7 = vld [vmem:[%s3218_s11 + $0x2] sm:$0xff] }
  0x20   : > { %v2537_v0 = vld [vmem:[%s3218_s11 + $0x39] sm:$0xff]  ;;  %v322_v3 = vpack.c.bf16 %v3348_v62, %v3345_v61  ;;  %v2597_v8 = vld [vmem:[%s3218_s11 + $0xa] sm:$0xff]  ;;  %v1092_v20 = vpack.c.bf16 %v2536_v63, %v2535_v44 }
  0x21   : > { %v310_v4 = vpack.c.bf16 %v2537_v0, %v2536_v63  ;;  %v224_v5 = vld [vmem:[%s3218_s11] sm:$0xff]  ;;  %v2646_v9 = vld [vmem:[%s3218_s11 + $0x28] sm:$0xff]  ;;  %v2647_v10 = vld [vmem:[%s3218_s11 + $0x30] sm:$0xff]  ;;  %v644_v12 = vpack.c.bf16 %v2597_v8, %v2596_v7  ;;  %v1093_v43 = vpack.c.bf16 %v3221_v13, %v2537_v0  ;;  %v1095_v0 = vpack.c.bf16 %v3284_v37, %v3254_v26 }
  0x22   : > { %v256_v11 = vpack.c.bf16 %v225_v6, %v224_v5  ;;  %v868_v16 = vpack.c.bf16 %v2647_v10, %v2646_v9  ;;  %v226_v21 = vld [vmem:[%s3218_s11 + $0x10] sm:$0xff]  ;;  %v227_v22 = vld [vmem:[%s3218_s11 + $0x18] sm:$0xff]  ;;  %v2649_v32 = vld [vmem:[%s3218_s11 + $0x40] sm:$0xff]  ;;  %v1096_v8 = vpack.c.bf16 %v3333_v57, %v3287_v38 }
  0x23   : > { %v2598_v23 = vld [vmem:[%s3218_s11 + $0x12] sm:$0xff]  ;;  %v2599_v24 = vld [vmem:[%s3218_s11 + $0x1a] sm:$0xff] }
  0x24   : > { %v2648_v31 = vld [vmem:[%s3218_s11 + $0x38] sm:$0xff]  ;;  %v228_v44 = vld [vmem:[%s3218_s11 + $0x20] sm:$0xff]  ;;  %v2651_v49 = vld [vmem:[%s3218_s11 + $0x50] sm:$0xff] }
  0x25   : > { %v258_v50 = vpack.c.bf16 %v2646_v9, %v228_v44  ;;  %v3401_v53 = vld [vmem:[%s3218_s11 + $0x32] sm:$0xff]  ;;  %v3404_v54 = vld [vmem:[%s3218_s11 + $0x3a] sm:$0xff]  ;;  %v259_v63 = vpack.c.bf16 %v2648_v31, %v2647_v10 }
  0x26   : > { %v2652_v55 = vld [vmem:[%s3218_s11 + $0x58] sm:$0xff]  ;;  %v2653_v56 = vld [vmem:[%s3218_s11 + $0x60] sm:$0xff]  ;;  %v647_v14 = vpack.c.bf16 %v3404_v54, %v3401_v53  ;;  %v2655_v5 = vld [vmem:[%s3218_s11 + $0x70] sm:$0xff] }
  0x27   : > { %v871_v25 = vpack.c.bf16 %v2653_v56, %v2652_v55  ;;  %v3448_v38 = vld [vmem:[%s3218_s11 + $0x5a] sm:$0xff] }
  0x28   : > { %4260 = vst [vmem:[#allocation3_spill] sm:$0xff] %v3448_v38  ;;  %v2656_v57 = vld [vmem:[%s3218_s11 + $0x78] sm:$0xff] }
  0x29   : > { %2568 = vmatmul.msk.bf16.gmra.mxu1 %vm325_vm2, %v3272_v33  ;;  %2572 = vmatmul.msk.bf16.gmra.mxu2 %vm325_vm2, %v316_v34  ;;  %v257_v34 = vpack.c.bf16 %v227_v22, %v226_v21  ;;  %v3452_v21 = vld [vmem:[%s3218_s11 + $0x80] sm:$0xff] }
  0x2a   : > { %2576 = vmatmul.msk.bf16.gmra.mxu3 %vm325_vm2, %v320_v35  ;;  %v645_v35 = vpack.c.bf16 %v2599_v24, %v2598_v23  ;;  %v3458_v24 = vpack.c.bf16 %v2652_v55, %v2651_v49 }
  0x2b   : > { %2564 = vmatmul.msk.bf16.gmra.mxu0 %vm325_vm2, %v308_v36  ;;  %v869_v36 = vpack.c.bf16 %v2649_v32, %v2648_v31 }
  0x39   : > { %2569 = vmatmul.msk.bf16.gmra.mxu1 %vm325_vm2, %v3305_v45  ;;  %2573 = vmatmul.msk.bf16.gmra.mxu2 %vm325_vm2, %v317_v46  ;;  %v2600_v46 = vld [vmem:[%s3218_s11 + $0x22] sm:$0xff] }
  0x3a   : > { %2577 = vmatmul.msk.bf16.gmra.mxu3 %vm325_vm2, %v321_v47  ;;  %v3389_v47 = vld [vmem:[%s3218_s11 + $0x2a] sm:$0xff] }
  0x3b   : > { %2565 = vmatmul.msk.bf16.gmra.mxu0 %vm325_vm2, %v309_v48  ;;  %v2650_v48 = vld [vmem:[%s3218_s11 + $0x48] sm:$0xff]  ;;  %v646_v13 = vpack.c.bf16 %v3389_v47, %v2600_v46 }
  0x3c   : > { %v870_v51 = vpack.c.bf16 %v2651_v49, %v2650_v48  ;;  %v260_v6 = vpack.c.bf16 %v2650_v48, %v2649_v32  ;;  %v2658_v49 = vld [vmem:[%s3218_s11 + $0x88] sm:$0xff] }
  0x49   : > { %2570 = vmatmul.msk.bf16.gmra.mxu1 %vm325_vm2, %v3354_v1  ;;  %2574 = vmatmul.msk.bf16.gmra.mxu2 %vm325_vm2, %v318_v2  ;;  %v3417_v2 = vld [vmem:[%s3218_s11 + $0x42] sm:$0xff] }
  0x4a   : > { %2578 = vmatmul.msk.bf16.gmra.mxu3 %vm325_vm2, %v322_v3  ;;  %v3420_v3 = vld [vmem:[%s3218_s11 + $0x4a] sm:$0xff] }
  0x4b   : > { %2566 = vmatmul.msk.bf16.gmra.mxu0 %vm325_vm2, %v310_v4  ;;  %v2654_v4 = vld [vmem:[%s3218_s11 + $0x68] sm:$0xff]  ;;  %v648_v26 = vpack.c.bf16 %v3420_v3, %v3417_v2 }
  0x4c   : > { %v872_v37 = vpack.c.bf16 %v2655_v5, %v2654_v4 }
  0x59   : > { %2579 = vmatmul.msk.bf16.vlgmr.msrb.gmra.mxu1 %vm325_vm2, %v256_v11  ;;  %2629 = vmatmul.msk.bf16.vlgmr.msrb.gmra.mxu2 %vm325_vm2, %v644_v12 }
  0x5a   : > { %2679 = vmatmul.msk.bf16.vlgmr.msrb.gmra.mxu3 %vm325_vm2, %v868_v16 }
  0x5b   : > { %2729 = vmatmul.msk.bf16.vlgmr.msrb.gmra.mxu0 %vm325_vm2, %v1092_v20  ;;  %v3445_v20 = vld [vmem:[%s3218_s11 + $0x52] sm:$0xff] }
  0x5c   : > { %v3464_v32 = vpack.c.bf16 %v3448_v38, %v3445_v20 }
  0x69   : > { %2580 = vmatmul.msk.bf16.gmra.mxu1 %vm325_vm2, %v257_v34  ;;  %2630 = vmatmul.msk.bf16.gmra.mxu2 %vm325_vm2, %v645_v35  ;;  %v873_v34 = vpack.c.bf16 %v3452_v21, %v2656_v57  ;;  %v1097_v35 = vpack.c.bf16 %v3227_v15, %v3336_v58  ;;  %v3486_v15 = vld [vmem:[%s3218_s11 + $0x62] sm:$0xff]  ;;  %v3489_v58 = vld [vmem:[%s3218_s11 + $0x6a] sm:$0xff] }
  0x6a   : > { %2680 = vmatmul.msk.bf16.gmra.mxu3 %vm325_vm2, %v869_v36  ;;  %4263 = vst [vmem:[#allocation6_spill] sm:$0xff] %v3486_v15 }
  0x6b   : > { %2730 = vmatmul.msk.bf16.gmra.mxu0 %vm325_vm2, %v1093_v43  ;;  %4264 = vst [vmem:[#allocation7_spill] sm:$0xff] %v3489_v58 }
  0x79   : > { %2581 = vmatmul.msk.bf16.gmra.mxu1 %vm325_vm2, %v258_v50  ;;  %2631 = vmatmul.msk.bf16.gmra.mxu2 %vm325_vm2, %v646_v13  ;;  %v3493_v50 = vld [vmem:[%s3218_s11 + $0x90] sm:$0xff] }
  0x7a   : > { %2681 = vmatmul.msk.bf16.gmra.mxu3 %vm325_vm2, %v870_v51 }
  0x7b   : > { %2731 = vmatmul.msk.bf16.gmra.mxu0 %vm325_vm2, %v1094_v52  ;;  %v3499_v52 = vpack.c.bf16 %v2654_v4, %v2653_v56 }
  0x89   : > { %2582 = vmatmul.msk.bf16.gmra.mxu1 %vm325_vm2, %v259_v63  ;;  %2632 = vmatmul.msk.bf16.gmra.mxu2 %vm325_vm2, %v647_v14  ;;  %v3505_v63 = vpack.c.bf16 %v3489_v58, %v3486_v15  ;;  %v874_v14 = vpack.c.bf16 %v3493_v50, %v2658_v49 }
  0x8a   : > { %2682 = vmatmul.msk.bf16.gmra.mxu3 %vm325_vm2, %v871_v25  ;;  %v1098_v25 = vpack.c.bf16 %v3257_v27, %v3232_v17  ;;  %v3527_v17 = vld [vmem:[%s3218_s11 + $0x72] sm:$0xff]  ;;  %v3530_v27 = vld [vmem:[%s3218_s11 + $0x7a] sm:$0xff] }
  0x8b   : > { %2732 = vmatmul.msk.bf16.gmra.mxu0 %vm325_vm2, %v1095_v0  ;;  %4268 = vst [vmem:[#allocation11_spill] sm:$0xff] %v3527_v17 }
  0x8c   : > { %4269 = vst [vmem:[#allocation12_spill] sm:$0xff] %v3530_v27 }
  0x96   : > { %v3424_v7 = vpop.f32.mrf.mxu1 }
  0x98   : > { %v3430_v9 = vpop.f32.mrf.mxu0 }
  0x99   : > { %2583 = vmatmul.msk.bf16.gmra.mxu1 %vm325_vm2, %v260_v6  ;;  %2633 = vmatmul.msk.bf16.gmra.mxu2 %vm325_vm2, %v648_v26 }
  0x9a   : > { %2683 = vmatmul.msk.bf16.gmra.mxu3 %vm325_vm2, %v872_v37  ;;  %v2660_v37 = vld [vmem:[%s3218_s11 + $0x98] sm:$0xff] }
  0x9b   : > { %2733 = vmatmul.msk.bf16.gmra.mxu0 %vm325_vm2, %v1096_v8  ;;  %v3534_v8 = vld [vmem:[%s3218_s11 + $0xa0] sm:$0xff] }
  0x9c   : > { %v3436_v10 = vpop.f32.mrf.mxu2 }
  0x9d   : > { %v3438_v11 = vpop.f32.mrf.mxu3 }
  0x9e   : > { %4259 = vst [vmem:[#allocation2_spill] sm:$0xff] %v3438_v11  ;;  %v3440_v12 = vpop.f32.mrf.mxu1  ;;  %v2662_v11 = vld [vmem:[%s3218_s11 + $0xa8] sm:$0xff] }
  0xa0   : > { %v3442_v16 = vpop.f32.mrf.mxu0 }
  0xa4   : > { %v3454_v22 = vpop.f32.mrf.mxu2 }
  0xa5   : > { %v3456_v23 = vpop.f32.mrf.mxu3 }
  0xa6   : > { %4261 = vst [vmem:[#allocation4_spill] sm:$0xff] %v3456_v23  ;;  %v3460_v31 = vpop.f32.mrf.mxu1 }
  0xa8   : > { %v3469_v36 = vpop.f32.mrf.mxu0 }
  0xa9   : > { %2584 = vmatmul.msk.bf16.gmra.mxu1 %vm325_vm2, %v3458_v24  ;;  %2634 = vmatmul.msk.bf16.gmra.mxu2 %vm325_vm2, %v3464_v32 }
  0xaa   : > { %2684 = vmatmul.msk.bf16.gmra.mxu3 %vm325_vm2, %v873_v34 }
  0xab   : > { %2734 = vmatmul.msk.bf16.gmra.mxu0 %vm325_vm2, %v1097_v35 }
  0xac   : > { %v3477_v43 = vpop.f32.mrf.mxu2 }
  0xad   : > { %v3479_v44 = vpop.f32.mrf.mxu3 }
  0xae   : > { %4262 = vst [vmem:[#allocation5_spill] sm:$0xff] %v3479_v44  ;;  %v3481_v46 = vpop.f32.mrf.mxu1  ;;  %v1099_v44 = vpack.c.bf16 %v3290_v39, %v3260_v28  ;;  %v3568_v28 = vld [vmem:[%s3218_s11 + $0x82] sm:$0xff]  ;;  %v3571_v39 = vld [vmem:[%s3218_s11 + $0x8a] sm:$0xff] }
  0xaf   : > { %4275 = vst [vmem:[#allocation18_spill] sm:$0xff] %v3568_v28 }
  0xb0   : > { %v3483_v48 = vpop.f32.mrf.mxu0  ;;  %4276 = vst [vmem:[#allocation19_spill] sm:$0xff] %v3571_v39 }
  0xb4   : > { %v3495_v13 = vpop.f32.mrf.mxu2 }
  0xb5   : > { %v3497_v51 = vpop.f32.mrf.mxu3 }
  0xb6   : > { %4265 = vst [vmem:[#allocation8_spill] sm:$0xff] %v3497_v51  ;;  %v3501_v55 = vpop.f32.mrf.mxu1  ;;  %v875_v51 = vpack.c.bf16 %v3534_v8, %v2660_v37 }
  0xb8   : > { %v3510_v0 = vpop.f32.mrf.mxu0 }
  0xb9   : > { %2585 = vmatmul.msk.bf16.gmra.mxu1 %vm325_vm2, %v3499_v52  ;;  %2635 = vmatmul.msk.bf16.gmra.mxu2 %vm325_vm2, %v3505_v63 }
  0xba   : > { %2685 = vmatmul.msk.bf16.gmra.mxu3 %vm325_vm2, %v874_v14  ;;  %v3540_v14 = vpack.c.bf16 %v2656_v57, %v2655_v5 }
  0xbb   : > { %2735 = vmatmul.msk.bf16.gmra.mxu0 %vm325_vm2, %v1098_v25 }
  0xbc   : > { %v3518_v56 = vpop.f32.mrf.mxu2 }
  0xbd   : > { %4266 = vst [vmem:[#allocation9_spill] sm:$0xff] %v3518_v56  ;;  %v3520_v4 = vpop.f32.mrf.mxu3  ;;  %v2664_v56 = vld [vmem:[%s3218_s11 + $0xb8] sm:$0xff] }
  0xbe   : > { %4267 = vst [vmem:[#allocation10_spill] sm:$0xff] %v3520_v4  ;;  %v3522_v6 = vpop.f32.mrf.mxu1  ;;  %v3546_v4 = vpack.c.bf16 %v3530_v27, %v3527_v17  ;;  %v3575_v17 = vld [vmem:[%s3218_s11 + $0xb0] sm:$0xff] }
  0xbf   : > { %v876_v15 = vpack.c.bf16 %v3575_v17, %v2662_v11 }
  0xc0   : > { %v3524_v26 = vpop.f32.mrf.mxu0  ;;  %4272 = vst [vmem:[#allocation15_spill] sm:$0xff] %v3546_v4 }
  0xc4   : > { %v3536_v34 = vpop.f32.mrf.mxu2 }
  0xc5   : > { %4270 = vst [vmem:[#allocation13_spill] sm:$0xff] %v3536_v34  ;;  %v3538_v35 = vpop.f32.mrf.mxu3  ;;  %v1100_v34 = vpack.c.bf16 %v3339_v59, %v3293_v40 }
  0xc6   : > { %4271 = vst [vmem:[#allocation14_spill] sm:$0xff] %v3538_v35  ;;  %v3542_v25 = vpop.f32.mrf.mxu1 }
  0xc8   : > { %v3551_v23 = vpop.f32.mrf.mxu0 }
  0xc9   : > { %2586 = vmatmul.msk.bf16.gmra.mxu1 %vm325_vm2, %v3540_v14  ;;  %2636 = vmatmul.msk.bf16.gmra.mxu2 %vm325_vm2, %v3546_v4 }
  0xca   : > { %2686 = vmatmul.msk.bf16.gmra.mxu3 %vm325_vm2, %v875_v51 }
  0xcb   : > { %2736 = vmatmul.msk.bf16.gmra.mxu0 %vm325_vm2, %v1099_v44  ;;  %v3582_v44 = vpack.c.bf16 %v2658_v49, %v3452_v21 }
  0xcc   : > { %v3559_v5 = vpop.f32.mrf.mxu2 }
  0xcd   : > { %4273 = vst [vmem:[#allocation16_spill] sm:$0xff] %v3559_v5  ;;  %v3561_v57 = vpop.f32.mrf.mxu3 }
  0xce   : > { %4274 = vst [vmem:[#allocation17_spill] sm:$0xff] %v3561_v57  ;;  %v3563_v35 = vpop.f32.mrf.mxu1  ;;  %v3586_v57 = vpack.c.bf16 %v3571_v39, %v3568_v28  ;;  %v3600_v39 = vld [vmem:[%s3218_s11 + $0x92] sm:$0xff] }
  0xcf   : > { %4279 = vst [vmem:[#allocation22_spill] sm:$0xff] %v3582_v44 }
  0xd0   : > { %v3565_v27 = vpop.f32.mrf.mxu0  ;;  %4280 = vst [vmem:[#allocation23_spill] sm:$0xff] %v3586_v57 }
  0xd4   : > { %v3577_v58 = vpop.f32.mrf.mxu2 }
  0xd5   : > { %4277 = vst [vmem:[#allocation20_spill] sm:$0xff] %v3577_v58  ;;  %v3579_v51 = vpop.f32.mrf.mxu3 }
  0xd6   : > { %4278 = vst [vmem:[#allocation21_spill] sm:$0xff] %v3579_v51  ;;  %v530_v5 = vpop.f32.mrf.mxu1 }
  0xd7   : > { %v531_v38 = vadd.f32 %v530_v5, %v3430_v9 }
  0xd8   : > { %v1170_v58 = vpop.f32.mrf.mxu0 }
  0xd9   : > { %2587 = vmatmul.msk.bf16.gmra.mxu1 %vm325_vm2, %v3582_v44  ;;  %2637 = vmatmul.msk.bf16.gmra.mxu2 %vm325_vm2, %v3586_v57  ;;  %v3605_v44 = vld [vmem:[%s3218_s11 + $0x9a] sm:$0xff] }
  0xda   : > { %2687 = vmatmul.msk.bf16.gmra.mxu3 %vm325_vm2, %v876_v15  ;;  %4282 = vst [vmem:[#allocation25_spill] sm:$0xff] %v3605_v44  ;;  %v3609_v57 = vld [vmem:[%s3218_s11 + $0xc0] sm:$0xff] }
  0xdb   : > { %2737 = vmatmul.msk.bf16.gmra.mxu0 %vm325_vm2, %v1100_v34  ;;  %v3612_v34 = vpack.c.bf16 %v2660_v37, %v3493_v50 }
  0xdc   : > { %v722_v21 = vpop.f32.mrf.mxu2 }
  0xdd   : > { %v946_v49 = vpop.f32.mrf.mxu3  ;;  %v802_v9 = vadd.f32 %v722_v21, %v531_v38 }
  0xde   : > { %v532_v5 = vpop.f32.mrf.mxu1 }
  0xdf   : > { %v533_v51 = vadd.f32 %v532_v5, %v3442_v16  ;;  %v1026_v40 = vadd.f32 %v946_v49, %v802_v9  ;;  %v3616_v16 = vpack.c.bf16 %v3605_v44, %v3600_v39  ;;  %v877_v49 = vpack.c.bf16 %v3609_v57, %v2664_v56  ;;  %v2666_v44 = vld [vmem:[%s3218_s11 + $0xc8] sm:$0xff] }
  0xe0   : > { %v1172_v59 = vpop.f32.mrf.mxu0  ;;  %v1101_v9 = vpack.c.bf16 %v3235_v18, %v3342_v60 }
  0xe1   : > { %v3602_v28 = vadd.f32 %v1170_v58, %v1026_v40 }
  0xe3   : > { %4281 = vst [vmem:[#allocation24_spill] sm:$0xff] %v3602_v28  ;;  %v3637_v28 = vld [vmem:[%s3218_s11 + $0xaa] sm:$0xff] }
  0xe4   : > { %v724_v15 = vpop.f32.mrf.mxu2 }
  0xe5   : > { %v948_v4 = vpop.f32.mrf.mxu3  ;;  %v803_v38 = vadd.f32 %v724_v15, %v533_v51 }
  0xe6   : > { %v535_v21 = vpop.f32.mrf.mxu1 }
  0xe7   : > { %v536_v58 = vadd.f32 %v535_v21, %v3469_v36  ;;  %v1027_v5 = vadd.f32 %v948_v4, %v803_v38  ;;  %v3632_v38 = vld [vmem:[%s3218_s11 + $0xa2] sm:$0xff] }
  0xe8   : > { %v1175_v40 = vpop.f32.mrf.mxu0 }
  0xe9   : > { %2588 = vmatmul.msk.bf16.gmra.mxu1 %vm325_vm2, %v3612_v34  ;;  %2638 = vmatmul.msk.bf16.gmra.mxu2 %vm325_vm2, %v3616_v16  ;;  %v3627_v50 = vadd.f32 %v1172_v59, %v1027_v5 }
  0xea   : > { %2688 = vmatmul.msk.bf16.gmra.mxu3 %vm325_vm2, %v877_v49  ;;  %v3641_v49 = vld [vmem:[%s3218_s11 + $0xd0] sm:$0xff] }
  0xeb   : > { %4283 = vst [vmem:[#allocation26_spill] sm:$0xff] %v3627_v50  ;;  %2738 = vmatmul.msk.bf16.gmra.mxu0 %vm325_vm2, %v1101_v9  ;;  %v3644_v9 = vpack.c.bf16 %v2662_v11, %v3534_v8  ;;  %v2668_v50 = vld [vmem:[%s3218_s11 + $0xd8] sm:$0xff] }
  0xec   : > { %v727_v36 = vpop.f32.mrf.mxu2 }
  0xed   : > { %v951_v37 = vpop.f32.mrf.mxu3  ;;  %v804_v18 = vadd.f32 %v727_v36, %v536_v58 }
  0xee   : > { %v537_v60 = vpop.f32.mrf.mxu1 }
  0xef   : > { %v538_v4 = vadd.f32 %v537_v60, %v3483_v48  ;;  %v1028_v51 = vadd.f32 %v951_v37, %v804_v18  ;;  %v3648_v48 = vpack.c.bf16 %v3637_v28, %v3632_v38  ;;  %v878_v37 = vpack.c.bf16 %v3641_v49, %v2666_v44 }
  0xf0   : > { %v1177_v15 = vpop.f32.mrf.mxu0  ;;  %v1102_v18 = vpack.c.bf16 %v3263_v29, %v3238_v19 }
  0xf1   : > { %v3634_v21 = vadd.f32 %v1175_v40, %v1028_v51 }
  0xf3   : > { %4284 = vst [vmem:[#allocation27_spill] sm:$0xff] %v3634_v21  ;;  %v3669_v21 = vld [vmem:[%s3218_s11 + $0xba] sm:$0xff] }
  0xf4   : > { %v729_v59 = vpop.f32.mrf.mxu2 }
  0xf5   : > { %v953_v5 = vpop.f32.mrf.mxu3  ;;  %v805_v58 = vadd.f32 %v729_v59, %v538_v4 }
  0xf6   : > { %v540_v36 = vpop.f32.mrf.mxu1 }
  0xf7   : > { %v541_v40 = vadd.f32 %v540_v36, %v3510_v0  ;;  %v1029_v60 = vadd.f32 %v953_v5, %v805_v58  ;;  %v3664_v58 = vld [vmem:[%s3218_s11 + $0xb2] sm:$0xff] }
  0xf8   : > { %v1180_v51 = vpop.f32.mrf.mxu0 }
  0xf9   : > { %2589 = vmatmul.msk.bf16.gmra.mxu1 %vm325_vm2, %v3644_v9  ;;  %2639 = vmatmul.msk.bf16.gmra.mxu2 %vm325_vm2, %v3648_v48  ;;  %v3659_v11 = vadd.f32 %v1177_v15, %v1029_v60 }
  0xfa   : > { %2689 = vmatmul.msk.bf16.gmra.mxu3 %vm325_vm2, %v878_v37  ;;  %v3673_v37 = vld [vmem:[%s3218_s11 + $0xe0] sm:$0xff] }
  0xfb   : > { %4285 = vst [vmem:[#allocation28_spill] sm:$0xff] %v3659_v11  ;;  %2739 = vmatmul.msk.bf16.gmra.mxu0 %vm325_vm2, %v1102_v18  ;;  %v3676_v18 = vpack.c.bf16 %v2664_v56, %v3575_v17  ;;  %v3704_v11 = vld [vmem:[%s3218_s11 + $0xe8] sm:$0xff] }
  0xfc   : > { %v732_v0 = vpop.f32.mrf.mxu2 }
  0xfd   : > { %v956_v8 = vpop.f32.mrf.mxu3  ;;  %v806_v19 = vadd.f32 %v732_v0, %v541_v40 }
  0xfe   : > { %v542_v29 = vpop.f32.mrf.mxu1 }
  0xff   : > { %v543_v4 = vadd.f32 %v542_v29, %v3524_v26  ;;  %v1030_v59 = vadd.f32 %v956_v8, %v806_v19  ;;  %v3680_v26 = vpack.c.bf16 %v3669_v21, %v3664_v58  ;;  %v879_v8 = vpack.c.bf16 %v3673_v37, %v2668_v50 }
 0x100   : > { %v1182_v5 = vpop.f32.mrf.mxu0  ;;  %v1103_v19 = vpack.c.bf16 %v3296_v41, %v3266_v30 }
 0x101   : > { %v3666_v36 = vadd.f32 %v1180_v51, %v1030_v59 }
 0x103   : > { %4286 = vst [vmem:[#allocation29_spill] sm:$0xff] %v3666_v36  ;;  %v3701_v36 = vld [vmem:[%s3218_s11 + $0xca] sm:$0xff] }
 0x104   : > { %v734_v15 = vpop.f32.mrf.mxu2 }
 0x105   : > { %v958_v60 = vpop.f32.mrf.mxu3  ;;  %v807_v40 = vadd.f32 %v734_v15, %v543_v4 }
 0x106   : > { %v545_v0 = vpop.f32.mrf.mxu1 }
 0x107   : > { %v546_v51 = vadd.f32 %v545_v0, %v3551_v23  ;;  %v1031_v29 = vadd.f32 %v958_v60, %v807_v40  ;;  %v3696_v40 = vld [vmem:[%s3218_s11 + $0xc2] sm:$0xff] }
 0x108   : > { %v1185_v59 = vpop.f32.mrf.mxu0 }
 0x109   : > { %2590 = vmatmul.msk.bf16.gmra.mxu1 %vm325_vm2, %v3676_v18  ;;  %2640 = vmatmul.msk.bf16.gmra.mxu2 %vm325_vm2, %v3680_v26  ;;  %v3691_v56 = vadd.f32 %v1182_v5, %v1031_v29  ;;  %v3707_v5 = vld [vmem:[%s3218_s11 + $0xf0] sm:$0xff]  ;;  %v3710_v29 = vpack.c.bf16 %v2666_v44, %v3609_v57 }
 0x10a   : > { %2690 = vmatmul.msk.bf16.gmra.mxu3 %vm325_vm2, %v879_v8 }
 0x10b   : > { %4287 = vst [vmem:[#allocation30_spill] sm:$0xff] %v3691_v56  ;;  %2740 = vmatmul.msk.bf16.gmra.mxu0 %vm325_vm2, %v1103_v19  ;;  %v3735_v56 = vld [vmem:[%s3218_s11 + $0xda] sm:$0xff] }
 0x10c   : > { %v737_v23 = vpop.f32.mrf.mxu2 }
 0x10d   : > { %v961_v17 = vpop.f32.mrf.mxu3  ;;  %v808_v30 = vadd.f32 %v737_v23, %v546_v51 }
 0x10e   : > { %v547_v41 = vpop.f32.mrf.mxu1 }
 0x10f   : > { %v548_v4 = vadd.f32 %v547_v41, %v3565_v27  ;;  %v1032_v15 = vadd.f32 %v961_v17, %v808_v30  ;;  %v3714_v27 = vpack.c.bf16 %v3701_v36, %v3696_v40  ;;  %v1104_v17 = vpack.c.bf16 %v3345_v61, %v3299_v42 }
 0x110   : > { %v1187_v60 = vpop.f32.mrf.mxu0 }
 0x111   : > { %v3698_v0 = vadd.f32 %v1185_v59, %v1032_v15  ;;  %v880_v59 = vpack.c.bf16 %v3707_v5, %v3704_v11 }
 0x113   : > { %4288 = vst [vmem:[#allocation31_spill] sm:$0xff] %v3698_v0 }
 0x114   : > { %v739_v8 = vpop.f32.mrf.mxu2 }
 0x115   : > { %v963_v19 = vpop.f32.mrf.mxu3  ;;  %v809_v51 = vadd.f32 %v739_v8, %v548_v4 }
 0x116   : > { %v550_v23 = vpop.f32.mrf.mxu1 }
 0x117   : > { %v1033_v30 = vadd.f32 %v963_v19, %v809_v51  ;;  %v551_v42 = vadd.f32 %v550_v23, %v3424_v7  ;;  %v3730_v51 = vld [vmem:[%s3218_s11 + $0xd2] sm:$0xff] }
 0x118   : > { %v1190_v41 = vpop.f32.mrf.mxu0 }
 0x119   : > { %2591 = vmatmul.msk.bf16.gmra.mxu1 %vm325_vm2, %v3710_v29  ;;  %2641 = vmatmul.msk.bf16.gmra.mxu2 %vm325_vm2, %v3714_v27  ;;  %v3725_v57 = vadd.f32 %v1187_v60, %v1033_v30  ;;  %v3741_v60 = vld [vmem:[%s3218_s11 + $0x100] sm:$0xff] }
 0x11a   : > { %2691 = vmatmul.msk.bf16.gmra.mxu3 %vm325_vm2, %v880_v59  ;;  %v3738_v59 = vld [vmem:[%s3218_s11 + $0xf8] sm:$0xff]  ;;  %4291 = vst [vmem:[#allocation34_spill] sm:$0xff] %v3741_v60  ;;  %v3745_v30 = vld [vmem:[%s3218_s11 + $0x101] sm:$0xff] }
 0x11b   : > { %4289 = vst [vmem:[#allocation32_spill] sm:$0xff] %v3725_v57  ;;  %2741 = vmatmul.msk.bf16.gmra.mxu0 %vm325_vm2, %v1104_v17  ;;  %v3768_v57 = vld [vmem:[%s3218_s11 + $0xe2] sm:$0xff] }
 0x11c   : > { %v742_v61 = vpop.f32.mrf.mxu2  ;;  %4292 = vst [vmem:[#allocation35_spill] sm:$0xff] %v3745_v30 }
 0x11d   : > { %v966_v44 = vpop.f32.mrf.mxu3  ;;  %v810_v4 = vadd.f32 %v742_v61, %v551_v42  ;;  %v3748_v42 = vpack.c.bf16 %v2668_v50, %v3641_v49 }
 0x11e   : > { %v552_v15 = vpop.f32.mrf.mxu1 }
 0x11f   : > { %v1034_v8 = vadd.f32 %v966_v44, %v810_v4  ;;  %v553_v17 = vadd.f32 %v552_v15, %v3440_v12  ;;  %v881_v4 = vpack.c.bf16 %v3741_v60, %v3738_v59  ;;  %v1105_v12 = vpack.c.bf16 %v3745_v30, %v3348_v62  ;;  %v3773_v60 = vld [vmem:[%s3218_s11 + $0xea] sm:$0xff] }
 0x120   : > { %v1192_v19 = vpop.f32.mrf.mxu0  ;;  %4295 = vst [vmem:[#allocation38_spill] sm:$0xff] %v3773_v60 }
 0x121   : > { %v3732_v0 = vadd.f32 %v1190_v41, %v1034_v8  ;;  %v3752_v41 = vpack.c.bf16 %v3735_v56, %v3730_v51 }
 0x123   : > { %4290 = vst [vmem:[#allocation33_spill] sm:$0xff] %v3732_v0 }
 0x124   : > { %v744_v7 = vpop.f32.mrf.mxu2 }
 0x125   : > { %v968_v23 = vpop.f32.mrf.mxu3  ;;  %v811_v61 = vadd.f32 %v744_v7, %v553_v17 }
 0x126   : > { %v555_v44 = vpop.f32.mrf.mxu1 }
 0x127   : > { %v1035_v15 = vadd.f32 %v968_v23, %v811_v61  ;;  %v556_v62 = vadd.f32 %v555_v44, %v3460_v31  ;;  %v3786_v31 = vld [vmem:[%s3218_s11 + $0x111] sm:$0xff] }
 0x128   : > { %v1195_v8 = vpop.f32.mrf.mxu0  ;;  %4298 = vst [vmem:[#allocation41_spill] sm:$0xff] %v3786_v31 }
 0x129   : > { %2592 = vmatmul.msk.bf16.gmra.mxu1 %vm325_vm2, %v3748_v42  ;;  %2642 = vmatmul.msk.bf16.gmra.mxu2 %vm325_vm2, %v3752_v41  ;;  %v3763_v50 = vadd.f32 %v1192_v19, %v1035_v15  ;;  %v3779_v19 = vld [vmem:[%s3218_s11 + $0x110] sm:$0xff] }
 0x12a   : > { %2692 = vmatmul.msk.bf16.gmra.mxu3 %vm325_vm2, %v881_v4  ;;  %v3776_v4 = vld [vmem:[%s3218_s11 + $0x108] sm:$0xff]  ;;  %4296 = vst [vmem:[#allocation39_spill] sm:$0xff] %v3779_v19 }
 0x12b   : > { %4293 = vst [vmem:[#allocation36_spill] sm:$0xff] %v3763_v50  ;;  %2742 = vmatmul.msk.bf16.gmra.mxu0 %vm325_vm2, %v1105_v12  ;;  %v3783_v15 = vld [vmem:[%s3218_s11 + $0x109] sm:$0xff] }
 0x12c   : > { %v747_v49 = vpop.f32.mrf.mxu2  ;;  %4297 = vst [vmem:[#allocation40_spill] sm:$0xff] %v3783_v15 }
 0x12d   : > { %v971_v17 = vpop.f32.mrf.mxu3  ;;  %v812_v7 = vadd.f32 %v747_v49, %v556_v62  ;;  %v3790_v49 = vpack.c.bf16 %v3704_v11, %v3673_v37 }
 0x12e   : > { %v557_v23 = vpop.f32.mrf.mxu1 }
 0x12f   : > { %v1036_v61 = vadd.f32 %v971_v17, %v812_v7  ;;  %v558_v12 = vadd.f32 %v557_v23, %v3481_v46  ;;  %v3794_v7 = vpack.c.bf16 %v3773_v60, %v3768_v57  ;;  %v1106_v46 = vpack.c.bf16 %v3786_v31, %v3783_v15  ;;  %v3815_v15 = vld [vmem:[%s3218_s11 + $0xfa] sm:$0xff] }
 0x130   : > { %v1197_v0 = vpop.f32.mrf.mxu0  ;;  %4301 = vst [vmem:[#allocation44_spill] sm:$0xff] %v3815_v15 }
 0x131   : > { %v3770_v30 = vadd.f32 %v1195_v8, %v1036_v61  ;;  %v882_v61 = vpack.c.bf16 %v3779_v19, %v3776_v4  ;;  %v3810_v19 = vld [vmem:[%s3218_s11 + $0xf2] sm:$0xff] }
 0x133   : > { %4294 = vst [vmem:[#allocation37_spill] sm:$0xff] %v3770_v30 }
 0x134   : > { %v749_v44 = vpop.f32.mrf.mxu2 }
 0x135   : > { %v973_v62 = vpop.f32.mrf.mxu3  ;;  %v813_v8 = vadd.f32 %v749_v44, %v558_v12 }
 0x136   : > { %v560_v17 = vpop.f32.mrf.mxu1 }
 0x137   : > { %v1037_v23 = vadd.f32 %v973_v62, %v813_v8  ;;  %v561_v37 = vadd.f32 %v560_v17, %v3501_v55  ;;  %v3828_v55 = vld [vmem:[%s3218_s11 + $0x121] sm:$0xff] }
 0x138   : > { %v1200_v30 = vpop.f32.mrf.mxu0  ;;  %4305 = vst [vmem:[#allocation48_spill] sm:$0xff] %v3828_v55 }
 0x139   : > { %2593 = vmatmul.msk.bf16.gmra.mxu1 %vm325_vm2, %v3790_v49  ;;  %2643 = vmatmul.msk.bf16.gmra.mxu2 %vm325_vm2, %v3794_v7  ;;  %v3805_v11 = vadd.f32 %v1197_v0, %v1037_v23  ;;  %v3821_v0 = vld [vmem:[%s3218_s11 + $0x120] sm:$0xff] }
 0x13a   : > { %2693 = vmatmul.msk.bf16.gmra.mxu3 %vm325_vm2, %v882_v61  ;;  %v3818_v61 = vld [vmem:[%s3218_s11 + $0x118] sm:$0xff]  ;;  %4303 = vst [vmem:[#allocation46_spill] sm:$0xff] %v3821_v0 }
 0x13b   : > { %4299 = vst [vmem:[#allocation42_spill] sm:$0xff] %v3805_v11  ;;  %2743 = vmatmul.msk.bf16.gmra.mxu0 %vm325_vm2, %v1106_v46  ;;  %v3825_v23 = vld [vmem:[%s3218_s11 + $0x119] sm:$0xff] }
 0x13c   : > { %v752_v12 = vpop.f32.mrf.mxu2  ;;  %4302 = vst [vmem:[#allocation45_spill] sm:$0xff] %v3818_v61 }
 0x13d   : > { %v976_v44 = vpop.f32.mrf.mxu3  ;;  %v814_v62 = vadd.f32 %v752_v12, %v561_v37  ;;  %4304 = vst [vmem:[#allocation47_spill] sm:$0xff] %v3825_v23  ;;  %v3832_v12 = vpack.c.bf16 %v3738_v59, %v3707_v5 }
 0x13e   : > { %v562_v8 = vpop.f32.mrf.mxu1 }
 0x13f   : > { %v1038_v50 = vadd.f32 %v976_v44, %v814_v62  ;;  %v563_v46 = vadd.f32 %v562_v8, %v3522_v6  ;;  %v3836_v44 = vpack.c.bf16 %v3815_v15, %v3810_v19  ;;  %v883_v62 = vpack.c.bf16 %v3821_v0, %v3818_v61 }
 0x140   : > { %v1202_v31 = vpop.f32.mrf.mxu0  ;;  %v1107_v6 = vpack.c.bf16 %v3828_v55, %v3825_v23 }
 0x141   : > { %v3812_v60 = vadd.f32 %v1200_v30, %v1038_v50 }
 0x143   : > { %4300 = vst [vmem:[#allocation43_spill] sm:$0xff] %v3812_v60 }
 0x144   : > { %v754_v17 = vpop.f32.mrf.mxu2 }
 0x145   : > { %v978_v37 = vpop.f32.mrf.mxu3  ;;  %v815_v30 = vadd.f32 %v754_v17, %v563_v46 }
 0x146   : > { %v565_v50 = vpop.f32.mrf.mxu1 }
 0x147   : > { %v1039_v8 = vadd.f32 %v978_v37, %v815_v30  ;;  %v566_v59 = vadd.f32 %v565_v50, %v3542_v25 }
 0x148   : > { %v1205_v60 = vpop.f32.mrf.mxu0 }
 0x149   : > { %2594 = vmatmul.msk.bf16.gmra.mxu1 %vm325_vm2, %v3832_v12  ;;  %2644 = vmatmul.msk.bf16.gmra.mxu2 %vm325_vm2, %v3836_v44  ;;  %v3847_v5 = vadd.f32 %v1202_v31, %v1039_v8  ;;  %v1316_v31 = vpack.c.bf16 %v3401_v53, %v3389_v47 }
 0x14a   : > { %2694 = vmatmul.msk.bf16.gmra.mxu3 %vm325_vm2, %v883_v62 }
 0x14b   : > { %4306 = vst [vmem:[#allocation49_spill] sm:$0xff] %v3847_v5  ;;  %2744 = vmatmul.msk.bf16.gmra.mxu0 %vm325_vm2, %v1107_v6 }
 0x14c   : > { %v757_v46 = vpop.f32.mrf.mxu2 }
 0x14d   : > { %v981_v17 = vpop.f32.mrf.mxu3  ;;  %v816_v11 = vadd.f32 %v757_v46, %v566_v59 }
 0x14e   : > { %v567_v55 = vpop.f32.mrf.mxu1 }
 0x14f   : > { %v1040_v37 = vadd.f32 %v981_v17, %v816_v11  ;;  %v568_v15 = vadd.f32 %v567_v55, %v3563_v35 }
 0x150   : > { %v1207_v30 = vpop.f32.mrf.mxu0 }
 0x151   : > { %v3851_v0 = vadd.f32 %v1205_v60, %v1040_v37 }
 0x154   : > { %v759_v23 = vpop.f32.mrf.mxu2 }
 0x155   : > { %v983_v61 = vpop.f32.mrf.mxu3  ;;  %v817_v62 = vadd.f32 %v759_v23, %v568_v15 }
 0x156   : > { %v570_v8 = vpop.f32.mrf.mxu1 }
 0x157   : > { %v1041_v6 = vadd.f32 %v983_v61, %v817_v62  ;;  %v571_v35 = vadd.f32 %v570_v8, %v3436_v10 }
 0x158   : > { %v1210_v5 = vpop.f32.mrf.mxu0 }
 0x159   : > { %2779 = vmatmul.msk.bf16.vlgmr.msra.gmra.mxu1 %vm325_vm2, %v1316_v31  ;;  %2829 = vmatmul.msk.bf16.vlgmr.msra.gmra.mxu2 %vm325_vm2, %v3458_v24  ;;  %v3861_v25 = vadd.f32 %v1207_v30, %v1041_v6 }
 0x15a   : > { %2879 = vmatmul.msk.bf16.vlgmr.msra.gmra.mxu3 %vm325_vm2, %v3272_v33  ;;  %v1317_v33 = vpack.c.bf16 %v3417_v2, %v3404_v54 }
 0x15b   : > { %2929 = vmatmul.msk.bf16.vlgmr.msra.gmra.mxu0 %vm325_vm2, %v3464_v32 }
 0x15c   : > { %v762_v47 = vpop.f32.mrf.mxu2 }
 0x15d   : > { %v986_v53 = vpop.f32.mrf.mxu3  ;;  %v818_v60 = vadd.f32 %v762_v47, %v571_v35 }
 0x15e   : > { %v572_v15 = vpop.f32.mrf.mxu1 }
 0x15f   : > { %v1042_v11 = vadd.f32 %v986_v53, %v818_v60  ;;  %v573_v24 = vadd.f32 %v572_v15, %v3454_v22  ;;  %v4307_v53 = vld [vmem:[#allocation15_spill] sm:$0xff] }
 0x160   : > { %v1212_v61 = vpop.f32.mrf.mxu0 }
 0x161   : > { %v3866_v23 = vadd.f32 %v1210_v5, %v1042_v11 }
 0x164   : > { %v764_v55 = vpop.f32.mrf.mxu2 }
 0x165   : > { %v988_v50 = vpop.f32.mrf.mxu3  ;;  %v819_v59 = vadd.f32 %v764_v55, %v573_v24 }
 0x166   : > { %v575_v46 = vpop.f32.mrf.mxu1 }
 0x167   : > { %v1043_v32 = vadd.f32 %v988_v50, %v819_v59  ;;  %v576_v22 = vadd.f32 %v575_v46, %v3477_v43  ;;  %v4309_v59 = vld [vmem:[#allocation13_spill] sm:$0xff] }
 0x168   : > { %v1215_v17 = vpop.f32.mrf.mxu0 }
 0x169   : > { %2780 = vmatmul.msk.bf16.gmra.mxu1 %vm325_vm2, %v1317_v33  ;;  %2830 = vmatmul.msk.bf16.gmra.mxu2 %vm325_vm2, %v3499_v52  ;;  %v3876_v10 = vadd.f32 %v1212_v61, %v1043_v32  ;;  %v2852_v33 = vld [vmem:[%s3218_s11 + $0x81] sm:$0xff] }
 0x16a   : > { %2880 = vmatmul.msk.bf16.gmra.mxu3 %vm325_vm2, %v3305_v45  ;;  %v1318_v45 = vpack.c.bf16 %v3445_v20, %v3420_v3  ;;  %v4308_v3 = vld [vmem:[#allocation9_spill] sm:$0xff] }
 0x16b   : > { %2930 = vmatmul.msk.bf16.gmra.mxu0 %vm325_vm2, %v3505_v63 }
 0x16c   : > { %v767_v54 = vpop.f32.mrf.mxu2 }
 0x16d   : > { %v991_v2 = vpop.f32.mrf.mxu3  ;;  %v820_v5 = vadd.f32 %v767_v54, %v576_v22  ;;  %v4311_v22 = vld [vmem:[#allocation6_spill] sm:$0xff] }
 0x16e   : > { %v577_v37 = vpop.f32.mrf.mxu1 }
 0x16f   : > { %v1044_v30 = vadd.f32 %v991_v2, %v820_v5  ;;  %v578_v52 = vadd.f32 %v577_v37, %v3495_v13 }
 0x170   : > { %v1217_v31 = vpop.f32.mrf.mxu0 }
 0x171   : > { %v3881_v62 = vadd.f32 %v1215_v17, %v1044_v30  ;;  %v4310_v17 = vld [vmem:[#allocation3_spill] sm:$0xff] }
 0x172   : > { %v1319_v54 = vpack.c.bf16 %v4311_v22, %v4310_v17 }
 0x174   : > { %v769_v8 = vpop.f32.mrf.mxu2 }
 0x175   : > { %v993_v6 = vpop.f32.mrf.mxu3  ;;  %v821_v35 = vadd.f32 %v769_v8, %v578_v52  ;;  %v4312_v52 = vld [vmem:[#allocation22_spill] sm:$0xff] }
 0x176   : > { %v580_v47 = vpop.f32.mrf.mxu1 }
 0x177   : > { %v1045_v63 = vadd.f32 %v993_v6, %v821_v35  ;;  %v581_v20 = vadd.f32 %v580_v47, %v4308_v3  ;;  %v4313_v6 = vld [vmem:[#allocation23_spill] sm:$0xff] }
 0x178   : > { %v1220_v43 = vpop.f32.mrf.mxu0 }
 0x179   : > { %2781 = vmatmul.msk.bf16.gmra.mxu1 %vm325_vm2, %v1318_v45  ;;  %2831 = vmatmul.msk.bf16.gmra.mxu2 %vm325_vm2, %v3540_v14  ;;  %v3891_v13 = vadd.f32 %v1217_v31, %v1045_v63  ;;  %v2853_v14 = vld [vmem:[%s3218_s11 + $0x89] sm:$0xff] }
 0x17a   : > { %2881 = vmatmul.msk.bf16.gmra.mxu3 %vm325_vm2, %v3354_v1  ;;  %v1767_v37 = vpack.c.bf16 %v2853_v14, %v2852_v33  ;;  %v4314_v45 = vld [vmem:[#allocation16_spill] sm:$0xff]  ;;  %v4316_v14 = vld [vmem:[#allocation7_spill] sm:$0xff] }
 0x17b   : > { %2931 = vmatmul.msk.bf16.gmra.mxu0 %vm325_vm2, %v4307_v53 }
 0x17c   : > { %v772_v60 = vpop.f32.mrf.mxu2 }
 0x17d   : > { %v996_v15 = vpop.f32.mrf.mxu3  ;;  %v822_v11 = vadd.f32 %v772_v60, %v581_v20 }
 0x17e   : > { %v582_v61 = vpop.f32.mrf.mxu1 }
 0x17f   : > { %v1046_v24 = vadd.f32 %v996_v15, %v822_v11  ;;  %v583_v46 = vadd.f32 %v582_v61, %v4309_v59  ;;  %v2854_v15 = vld [vmem:[%s3218_s11 + $0x91] sm:$0xff]  ;;  %v2855_v11 = vld [vmem:[%s3218_s11 + $0x99] sm:$0xff]  ;;  %v4317_v59 = vld [vmem:[#allocation11_spill] sm:$0xff] }
 0x180   : > { %v1222_v55 = vpop.f32.mrf.mxu0  ;;  %v4315_v61 = vld [vmem:[#allocation20_spill] sm:$0xff]  ;;  %v1768_v17 = vpack.c.bf16 %v2855_v11, %v2854_v15  ;;  %v4321_v11 = vld [vmem:[#allocation18_spill] sm:$0xff] }
 0x181   : > { %v3896_v50 = vadd.f32 %v1220_v43, %v1046_v24  ;;  %v4320_v15 = vld [vmem:[#allocation12_spill] sm:$0xff] }
 0x184   : > { %v774_v1 = vpop.f32.mrf.mxu2 }
 0x185   : > { %v998_v32 = vpop.f32.mrf.mxu3  ;;  %v823_v2 = vadd.f32 %v774_v1, %v583_v46  ;;  %v1320_v46 = vpack.c.bf16 %v4317_v59, %v4316_v14 }
 0x186   : > { %v585_v5 = vpop.f32.mrf.mxu1 }
 0x187   : > { %v1047_v30 = vadd.f32 %v998_v32, %v823_v2  ;;  %v586_v35 = vadd.f32 %v585_v5, %v4314_v45  ;;  %v4318_v5 = vld [vmem:[#allocation2_spill] sm:$0xff] }
 0x188   : > { %v1225_v31 = vpop.f32.mrf.mxu0 }
 0x189   : > { %2782 = vmatmul.msk.bf16.gmra.mxu1 %vm325_vm2, %v1319_v54  ;;  %2832 = vmatmul.msk.bf16.gmra.mxu2 %vm325_vm2, %v4312_v52  ;;  %v3907_v8 = vadd.f32 %v1222_v55, %v1047_v30 }
 0x18a   : > { %2882 = vmatmul.msk.bf16.gmra.mxu3 %vm325_vm2, %v1767_v37 }
 0x18b   : > { %2932 = vmatmul.msk.bf16.gmra.mxu0 %vm325_vm2, %v4313_v6 }
 0x18c   : > { %v777_v47 = vpop.f32.mrf.mxu2 }
 0x18d   : > { %v1001_v63 = vpop.f32.mrf.mxu3  ;;  %v824_v43 = vadd.f32 %v777_v47, %v586_v35 }
 0x18e   : > { %v587_v53 = vpop.f32.mrf.mxu1 }
 0x18f   : > { %v1048_v3 = vadd.f32 %v1001_v63, %v824_v43  ;;  %v588_v24 = vadd.f32 %v587_v53, %v4315_v61  ;;  %v2856_v63 = vld [vmem:[%s3218_s11 + $0xa1] sm:$0xff]  ;;  %v2857_v43 = vld [vmem:[%s3218_s11 + $0xa9] sm:$0xff]  ;;  %v1321_v61 = vpack.c.bf16 %v4321_v11, %v4320_v15 }
 0x190   : > { %v1227_v20 = vpop.f32.mrf.mxu0 }
 0x191   : > { %v3912_v60 = vadd.f32 %v1225_v31, %v1048_v3 }
 0x194   : > { %v779_v33 = vpop.f32.mrf.mxu2 }
 0x195   : > { %v1003_v55 = vpop.f32.mrf.mxu3  ;;  %v825_v1 = vadd.f32 %v779_v33, %v588_v24  ;;  %v1769_v33 = vpack.c.bf16 %v2857_v43, %v2856_v63  ;;  %v4324_v63 = vld [vmem:[#allocation19_spill] sm:$0xff] }
 0x196   : > { %v590_v32 = vpop.f32.mrf.mxu1  ;;  %v1322_v43 = vpack.c.bf16 %v3600_v39, %v4324_v63  ;;  %v4325_v39 = vld [vmem:[#allocation10_spill] sm:$0xff] }
 0x197   : > { %v1049_v22 = vadd.f32 %v1003_v55, %v825_v1  ;;  %v591_v37 = vadd.f32 %v590_v32, %v4318_v5 }
 0x198   : > { %v1230_v54 = vpop.f32.mrf.mxu0 }
 0x199   : > { %2783 = vmatmul.msk.bf16.gmra.mxu1 %vm325_vm2, %v1320_v46  ;;  %2833 = vmatmul.msk.bf16.gmra.mxu2 %vm325_vm2, %v3612_v34  ;;  %v3923_v2 = vadd.f32 %v1227_v20, %v1049_v22  ;;  %v4319_v34 = vld [vmem:[#allocation4_spill] sm:$0xff]  ;;  %v4322_v46 = vld [vmem:[#allocation5_spill] sm:$0xff] }
 0x19a   : > { %2883 = vmatmul.msk.bf16.gmra.mxu3 %vm325_vm2, %v1768_v17 }
 0x19b   : > { %2933 = vmatmul.msk.bf16.gmra.mxu0 %vm325_vm2, %v3616_v16 }
 0x19c   : > { %v782_v30 = vpop.f32.mrf.mxu2 }
 0x19d   : > { %v1006_v31 = vpop.f32.mrf.mxu3  ;;  %v826_v52 = vadd.f32 %v782_v30, %v591_v37 }
 0x19e   : > { %v592_v6 = vpop.f32.mrf.mxu1 }
 0x19f   : > { %v1050_v45 = vadd.f32 %v1006_v31, %v826_v52  ;;  %v593_v53 = vadd.f32 %v592_v6, %v4319_v34  ;;  %v2858_v31 = vld [vmem:[%s3218_s11 + $0xb1] sm:$0xff]  ;;  %v2859_v52 = vld [vmem:[%s3218_s11 + $0xb9] sm:$0xff] }
 0x1a0   : > { %v1232_v35 = vpop.f32.mrf.mxu0 }
 0x1a1   : > { %v3928_v47 = vadd.f32 %v1230_v54, %v1050_v45 }
 0x1a4   : > { %v784_v3 = vpop.f32.mrf.mxu2 }
 0x1a5   : > { %v1008_v20 = vpop.f32.mrf.mxu3  ;;  %v827_v16 = vadd.f32 %v784_v3, %v593_v53  ;;  %v1770_v53 = vpack.c.bf16 %v2859_v52, %v2858_v31 }
 0x1a6   : > { %v595_v24 = vpop.f32.mrf.mxu1 }
 0x1a7   : > { %v1051_v55 = vadd.f32 %v1008_v20, %v827_v16  ;;  %v596_v1 = vadd.f32 %v595_v24, %v4322_v46 }
 0x1a8   : > { %v1235_v14 = vpop.f32.mrf.mxu0 }
 0x1a9   : > { %2784 = vmatmul.msk.bf16.gmra.mxu1 %vm325_vm2, %v1321_v61  ;;  %2834 = vmatmul.msk.bf16.gmra.mxu2 %vm325_vm2, %v3644_v9  ;;  %v3939_v59 = vadd.f32 %v1232_v35, %v1051_v55  ;;  %v4323_v9 = vld [vmem:[#allocation8_spill] sm:$0xff] }
 0x1aa   : > { %2884 = vmatmul.msk.bf16.gmra.mxu3 %vm325_vm2, %v1769_v33 }
 0x1ab   : > { %2934 = vmatmul.msk.bf16.gmra.mxu0 %vm325_vm2, %v3648_v48 }
 0x1ac   : > { %v787_v32 = vpop.f32.mrf.mxu2 }
 0x1ad   : > { %v1011_v17 = vpop.f32.mrf.mxu3  ;;  %v828_v22 = vadd.f32 %v787_v32, %v596_v1  ;;  %v2860_v1 = vld [vmem:[%s3218_s11 + $0xc1] sm:$0xff]  ;;  %v2861_v32 = vld [vmem:[%s3218_s11 + $0xc9] sm:$0xff] }
 0x1ae   : > { %v597_v54 = vpop.f32.mrf.mxu1  ;;  %v1771_v52 = vpack.c.bf16 %v2861_v32, %v2860_v1 }
 0x1af   : > { %v1052_v5 = vadd.f32 %v1011_v17, %v828_v22  ;;  %v598_v6 = vadd.f32 %v597_v54, %v4323_v9 }
 0x1b0   : > { %v1237_v37 = vpop.f32.mrf.mxu0 }
 0x1b1   : > { %v3944_v30 = vadd.f32 %v1235_v14, %v1052_v5  ;;  %v4327_v5 = vld [vmem:[#allocation25_spill] sm:$0xff] }
 0x1b4   : > { %v789_v45 = vpop.f32.mrf.mxu2 }
 0x1b5   : > { %v1013_v35 = vpop.f32.mrf.mxu3  ;;  %v829_v48 = vadd.f32 %v789_v45, %v598_v6 }
 0x1b6   : > { %v600_v34 = vpop.f32.mrf.mxu1 }
 0x1b7   : > { %v1053_v3 = vadd.f32 %v1013_v35, %v829_v48  ;;  %v601_v11 = vadd.f32 %v600_v34, %v4325_v39  ;;  %v2862_v39 = vld [vmem:[%s3218_s11 + $0xd1] sm:$0xff] }
 0x1b8   : > { %v1240_v20 = vpop.f32.mrf.mxu0 }
 0x1b9   : > { %2785 = vmatmul.msk.bf16.gmra.mxu1 %vm325_vm2, %v1322_v43  ;;  %2835 = vmatmul.msk.bf16.gmra.mxu2 %vm325_vm2, %v3676_v18  ;;  %v3955_v15 = vadd.f32 %v1237_v37, %v1053_v3  ;;  %v4326_v18 = vld [vmem:[#allocation14_spill] sm:$0xff]  ;;  %v1323_v37 = vpack.c.bf16 %v3632_v38, %v4327_v5  ;;  %v4328_v38 = vld [vmem:[#allocation17_spill] sm:$0xff] }
 0x1ba   : > { %2885 = vmatmul.msk.bf16.gmra.mxu3 %vm325_vm2, %v1770_v53 }
 0x1bb   : > { %2935 = vmatmul.msk.bf16.gmra.mxu0 %vm325_vm2, %v3680_v26 }
 0x1bc   : > { %v792_v61 = vpop.f32.mrf.mxu2 }
 0x1bd   : > { %v1016_v16 = vpop.f32.mrf.mxu3  ;;  %v830_v24 = vadd.f32 %v792_v61, %v601_v11  ;;  %v2863_v11 = vld [vmem:[%s3218_s11 + $0xd9] sm:$0xff] }
 0x1be   : > { %v602_v33 = vpop.f32.mrf.mxu1 }
 0x1bf   : > { %v1054_v55 = vadd.f32 %v1016_v16, %v830_v24  ;;  %v603_v17 = vadd.f32 %v602_v33, %v4326_v18  ;;  %v1324_v33 = vpack.c.bf16 %v3664_v58, %v3637_v28  ;;  %v4330_v28 = vld [vmem:[#allocation24_spill] sm:$0xff] }
 0x1c0   : > { %v1242_v14 = vpop.f32.mrf.mxu0 }
 0x1c1   : > { %v3960_v46 = vadd.f32 %v1240_v20, %v1054_v55 }
 0x1c4   : > { %v794_v22 = vpop.f32.mrf.mxu2 }
 0x1c5   : > { %v1018_v54 = vpop.f32.mrf.mxu3  ;;  %v831_v26 = vadd.f32 %v794_v22, %v603_v17 }
 0x1c6   : > { %v605_v31 = vpop.f32.mrf.mxu1 }
 0x1c7   : > { %v1055_v9 = vadd.f32 %v1018_v54, %v831_v26  ;;  %v606_v35 = vadd.f32 %v605_v31, %v4328_v38 }
 0x1c8   : > { %v1245_v6 = vpop.f32.mrf.mxu0 }
 0x1c9   : > { %2786 = vmatmul.msk.bf16.gmra.mxu1 %vm325_vm2, %v1323_v37  ;;  %2836 = vmatmul.msk.bf16.gmra.mxu2 %vm325_vm2, %v3710_v29  ;;  %v3971_v45 = vadd.f32 %v1242_v14, %v1055_v9  ;;  %v4329_v29 = vld [vmem:[#allocation21_spill] sm:$0xff]  ;;  %v1772_v14 = vpack.c.bf16 %v2863_v11, %v2862_v39  ;;  %v2865_v9 = vld [vmem:[%s3218_s11 + $0xe9] sm:$0xff] }
 0x1ca   : > { %2886 = vmatmul.msk.bf16.gmra.mxu3 %vm325_vm2, %v1771_v52  ;;  %v2864_v52 = vld [vmem:[%s3218_s11 + $0xe1] sm:$0xff] }
 0x1cb   : > { %2936 = vmatmul.msk.bf16.gmra.mxu0 %vm325_vm2, %v3714_v27 }
 0x1cc   : > { %v797_v63 = vpop.f32.mrf.mxu2 }
 0x1cd   : > { %v1021_v43 = vpop.f32.mrf.mxu3  ;;  %v832_v48 = vadd.f32 %v797_v63, %v606_v35  ;;  %v1325_v63 = vpack.c.bf16 %v3696_v40, %v3669_v21  ;;  %v4332_v40 = vld [vmem:[#allocation27_spill] sm:$0xff] }
 0x1ce   : > { %v607_v34 = vpop.f32.mrf.mxu1 }
 0x1cf   : > { %v1056_v53 = vadd.f32 %v1021_v43, %v832_v48  ;;  %v608_v61 = vadd.f32 %v607_v34, %v4329_v29  ;;  %v4007_v48 = vld [vmem:[%s4235_s3] ss:$0 sm:$0xff] }
 0x1d0   : > { %v1247_v3 = vpop.f32.mrf.mxu0 }
 0x1d1   : > { %v3976_v20 = vadd.f32 %v1245_v6, %v1056_v53  ;;  %v4331_v6 = vld [vmem:[#allocation26_spill] sm:$0xff] }
 0x1d4   : > { %v799_v16 = vpop.f32.mrf.mxu2 }
 0x1d5   : > { %v1023_v24 = vpop.f32.mrf.mxu3  ;;  %v833_v27 = vadd.f32 %v799_v16, %v608_v61 }
 0x1d6   : > { %v1394_v55 = vpop.f32.mrf.mxu1 }
 0x1d7   : > { %v1057_v1 = vadd.f32 %v1023_v24, %v833_v27  ;;  %v1474_v58 = vadd.f32 %v1394_v55, %v4330_v28 }
 0x1d8   : > { %v2066_v32 = vpop.f32.mrf.mxu0 }
 0x1d9   : > { %2787 = vmatmul.msk.bf16.gmra.mxu1 %vm325_vm2, %v1324_v33  ;;  %2837 = vmatmul.msk.bf16.gmra.mxu2 %vm325_vm2, %v3748_v42  ;;  %v3987_v18 = vadd.f32 %v1247_v3, %v1057_v1  ;;  %v3996_v42 = vld [vmem:[%s4234_s2] ss:$0 sm:$0xff]  ;;  %v1773_v3 = vpack.c.bf16 %v2865_v9, %v2864_v52  ;;  %v1326_v9 = vpack.c.bf16 %v3730_v51, %v3701_v36  ;;  %v4334_v51 = vld [vmem:[#allocation29_spill] sm:$0xff] }
 0x1da   : > { %2887 = vmatmul.msk.bf16.gmra.mxu3 %vm325_vm2, %v1772_v14 }
 0x1db   : > { %2937 = vmatmul.msk.bf16.gmra.mxu0 %vm325_vm2, %v3752_v41 }
 0x1dc   : > { %v1618_v17 = vpop.f32.mrf.mxu2 }
 0x1dd   : > { %v1842_v22 = vpop.f32.mrf.mxu3  ;;  %v1698_v54 = vadd.f32 %v1618_v17, %v1474_v58 }
 0x1de   : > { %v1396_v5 = vpop.f32.mrf.mxu1 }
 0x1df   : > { %v1922_v37 = vadd.f32 %v1842_v22, %v1698_v54  ;;  %v1475_v41 = vadd.f32 %v1396_v5, %v4331_v6  ;;  %v2866_v54 = vld [vmem:[%s3218_s11 + $0xf1] sm:$0xff]  ;;  %v2867_v5 = vld [vmem:[%s3218_s11 + $0xf9] sm:$0xff] }
 0x1e0   : > { %v2068_v26 = vpop.f32.mrf.mxu0 }
 0x1e1   : > { %v2146_v31 = vadd.f32 %v2066_v32, %v1922_v37  ;;  %v4333_v37 = vld [vmem:[#allocation28_spill] sm:$0xff] }
 0x1e3   : > { %v2182_v43 = vmul.f32 %v3996_v42, %v2146_v31 }
 0x1e4   : > { %v1620_v38 = vpop.f32.mrf.mxu2 }
 0x1e5   : > { %v1844_v35 = vpop.f32.mrf.mxu3  ;;  %v1699_v34 = vadd.f32 %v1620_v38, %v1475_v41  ;;  %v2218_v29 = vadd.f32 %v4007_v48, %v2182_v43 }
 0x1e6   : > { %v1399_v53 = vpop.f32.mrf.mxu1 }
 0x1e7   : > { %v1923_v39 = vadd.f32 %v1844_v35, %v1699_v34  ;;  %v1476_v16 = vadd.f32 %v1399_v53, %v4332_v40  ;;  %v2282_v27 = vmul.f32 0.1, %v2218_v29  ;;  %vm2250_vm3 = vcmp.ge.f32.partialorder %v2218_v29, 0.0 }
 0x1e8   : > { %v2071_v11 = vpop.f32.mrf.mxu0  ;;  %v1774_v35 = vpack.c.bf16 %v2867_v5, %v2866_v54  ;;  %v4336_v5 = vld [vmem:[#allocation34_spill] sm:$0xff] }
 0x1e9   : > { %2788 = vmatmul.msk.bf16.gmra.mxu1 %vm325_vm2, %v1325_v63  ;;  %v2147_v61 = vadd.f32 %v2068_v26, %v1923_v39  ;;  %2838 = vmatmul.msk.bf16.gmra.mxu2 %vm325_vm2, %v3790_v49  ;;  %v2314_v28 = vsel %vm2250_vm3, %v2218_v29, %v2282_v27 }
 0x1ea   : > { %2888 = vmatmul.msk.bf16.gmra.mxu3 %vm325_vm2, %v1773_v3 }
 0x1eb   : > { %2938 = vmatmul.msk.bf16.gmra.mxu0 %vm325_vm2, %v3794_v7  ;;  %v2183_v21 = vmul.f32 %v3996_v42, %v2147_v61 }
 0x1ec   : > { %v1623_v24 = vpop.f32.mrf.mxu2 }
 0x1ed   : > { %v1847_v33 = vpop.f32.mrf.mxu3  ;;  %v2219_v55 = vadd.f32 %v4007_v48, %v2183_v21  ;;  %v1700_v14 = vadd.f32 %v1623_v24, %v1476_v16 }
 0x1ee   : > { %v1401_v1 = vpop.f32.mrf.mxu1 }
 0x1ef   : > { %vm2251_vm4 = vcmp.ge.f32.partialorder %v2219_v55, 0.0  ;;  %v2283_v49 = vmul.f32 0.1, %v2219_v55  ;;  %v1924_v32 = vadd.f32 %v1847_v33, %v1700_v14  ;;  %v1477_v26 = vadd.f32 %v1401_v1, %v4333_v37  ;;  %v4335_v14 = vld [vmem:[#allocation30_spill] sm:$0xff] }
 0x1f0   : > { %v2073_v7 = vpop.f32.mrf.mxu0  ;;  %v1551_v37 = vpack.c.bf16 %v3776_v4, %v4336_v5  ;;  %v4339_v4 = vld [vmem:[#allocation31_spill] sm:$0xff] }
 0x1f1   : > { %v2315_v58 = vsel %vm2251_vm4, %v2219_v55, %v2283_v49  ;;  %v2148_v17 = vadd.f32 %v2071_v11, %v1924_v32  ;;  %v4044_v49 = vld [vmem:[%s3218_s11 + $0x102] sm:$0xff]  ;;  %v4047_v32 = vld [vmem:[%s3218_s11 + $0x10a] sm:$0xff] }
 0x1f2   : > { %v2950_v22 = vpack.c.bf16 %v2315_v58, %v2314_v28  ;;  %v1327_v58 = vpack.c.bf16 %v3768_v57, %v3735_v56  ;;  %v4345_v5 = vld [vmem:[#allocation47_spill] sm:$0xff] }
 0x1f3   : > { %v2184_v6 = vmul.f32 %v3996_v42, %v2148_v17 }
 0x1f4   : > { %2951 = vst [vmem:[%s4023_s9] sm:$0xff] %v2950_v22   ;;  %v1625_v31 = vpop.f32.mrf.mxu2 }
 0x1f5   : > { %v1849_v52 = vpop.f32.mrf.mxu3  ;;  %v1701_v41 = vadd.f32 %v1625_v31, %v1477_v26  ;;  %v2220_v34 = vadd.f32 %v4007_v48, %v2184_v6  ;;  %v4337_v26 = vld [vmem:[#allocation35_spill] sm:$0xff]  ;;  %v4338_v31 = vld [vmem:[#allocation40_spill] sm:$0xff] }
 0x1f6   : > { %v1404_v38 = vpop.f32.mrf.mxu1 }
 0x1f7   : > { %v1925_v63 = vadd.f32 %v1849_v52, %v1701_v41  ;;  %v1478_v3 = vadd.f32 %v1404_v38, %v4334_v51  ;;  %v2284_v29 = vmul.f32 0.1, %v2220_v34  ;;  %vm2252_vm5 = vcmp.ge.f32.partialorder %v2220_v34, 0.0 }
 0x1f8   : > { %v2076_v43 = vpop.f32.mrf.mxu0  ;;  %v1775_v52 = vpack.c.bf16 %v4338_v31, %v4337_v26 }
 0x1f9   : > { %2789 = vmatmul.msk.bf16.gmra.mxu1 %vm325_vm2, %v1326_v9  ;;  %v2149_v53 = vadd.f32 %v2073_v7, %v1925_v63  ;;  %2839 = vmatmul.msk.bf16.gmra.mxu2 %vm325_vm2, %v3832_v12  ;;  %v1999_v9 = vpack.c.bf16 %v4047_v32, %v4044_v49 }
 0x1fa   : > { %2889 = vmatmul.msk.bf16.gmra.mxu3 %vm325_vm2, %v1774_v35 }
 0x1fb   : > { %2939 = vmatmul.msk.bf16.gmra.mxu0 %vm325_vm2, %v3836_v44  ;;  %v2185_v36 = vmul.f32 %v3996_v42, %v2149_v53  ;;  %v2316_v44 = vsel %vm2252_vm5, %v2220_v34, %v2284_v29 }
 0x1fc   : > { %v1628_v39 = vpop.f32.mrf.mxu2 }
 0x1fd   : > { %v1852_v11 = vpop.f32.mrf.mxu3  ;;  %v2221_v61 = vadd.f32 %v4007_v48, %v2185_v36  ;;  %v1702_v21 = vadd.f32 %v1628_v39, %v1478_v3 }
 0x1fe   : > { %v1406_v40 = vpop.f32.mrf.mxu1 }
 0x1ff   : > { %vm2253_vm6 = vcmp.ge.f32.partialorder %v2221_v61, 0.0  ;;  %v2285_v12 = vmul.f32 0.1, %v2221_v61  ;;  %v1926_v16 = vadd.f32 %v1852_v11, %v1702_v21  ;;  %v1479_v1 = vadd.f32 %v1406_v40, %v4335_v14 }
 0x200   : > { %v2078_v24 = vpop.f32.mrf.mxu0 }
 0x201   : > { %v2317_v33 = vsel %vm2253_vm6, %v2221_v61, %v2285_v12  ;;  %v2150_v27 = vadd.f32 %v2076_v43, %v1926_v16  ;;  %v4340_v12 = vld [vmem:[#allocation32_spill] sm:$0xff] }
 0x202   : > { %v2955_v55 = vpack.c.bf16 %v2317_v33, %v2316_v44  ;;  %v4072_v44 = vld [vmem:[%s3218_s11 + $0x11a] sm:$0xff] }
 0x203   : > { %v2186_v17 = vmul.f32 %v3996_v42, %v2150_v27 }
 0x204   : > { %3027 = vst [vmem:[%s4023_s9 + $0x8] sm:$0xff] %v2955_v55   ;;  %v1630_v7 = vpop.f32.mrf.mxu2  ;;  %v4341_v55 = vld [vmem:[#allocation38_spill] sm:$0xff] }
 0x205   : > { %v1854_v28 = vpop.f32.mrf.mxu3  ;;  %v1703_v22 = vadd.f32 %v1630_v7, %v1479_v1  ;;  %v2222_v38 = vadd.f32 %v4007_v48, %v2186_v17  ;;  %v1328_v14 = vpack.c.bf16 %v3810_v19, %v4341_v55  ;;  %v4343_v17 = vld [vmem:[#allocation45_spill] sm:$0xff]  ;;  %v4348_v55 = vld [vmem:[#allocation44_spill] sm:$0xff] }
 0x206   : > { %v1409_v54 = vpop.f32.mrf.mxu1 }
 0x207   : > { %v1927_v6 = vadd.f32 %v1854_v28, %v1703_v22  ;;  %v1480_v35 = vadd.f32 %v1409_v54, %v4339_v4  ;;  %v2286_v34 = vmul.f32 0.1, %v2222_v38  ;;  %vm2254_vm7 = vcmp.ge.f32.partialorder %v2222_v38, 0.0  ;;  %v4344_v54 = vld [vmem:[#allocation41_spill] sm:$0xff] }
 0x208   : > { %v2081_v41 = vpop.f32.mrf.mxu0 }
 0x209   : > { %2790 = vmatmul.msk.bf16.gmra.mxu1 %vm325_vm2, %v1327_v58  ;;  %v2151_v56 = vadd.f32 %v2078_v24, %v1927_v6  ;;  %2840 = vmatmul.msk.bf16.gmra.mxu2 %vm325_vm2, %v1551_v37  ;;  %v2318_v29 = vsel %vm2254_vm7, %v2222_v38, %v2286_v34  ;;  %v4069_v24 = vld [vmem:[%s3218_s11 + $0x112] sm:$0xff]  ;;  %v4342_v58 = vld [vmem:[#allocation39_spill] sm:$0xff]  ;;  %v1776_v37 = vpack.c.bf16 %v4345_v5, %v4344_v54 }
 0x20a   : > { %2890 = vmatmul.msk.bf16.gmra.mxu3 %vm325_vm2, %v1775_v52  ;;  %v1552_v22 = vpack.c.bf16 %v4343_v17, %v4342_v58  ;;  %v2000_v26 = vpack.c.bf16 %v4072_v44, %v4069_v24  ;;  %v4349_v58 = vld [vmem:[#allocation46_spill] sm:$0xff] }
 0x20b   : > { %2940 = vmatmul.msk.bf16.gmra.mxu0 %vm325_vm2, %v1999_v9  ;;  %v2187_v57 = vmul.f32 %v3996_v42, %v2151_v56 }
 0x20c   : > { %v1633_v63 = vpop.f32.mrf.mxu2 }
 0x20d   : > { %v1857_v43 = vpop.f32.mrf.mxu3  ;;  %v2223_v53 = vadd.f32 %v4007_v48, %v2187_v57  ;;  %v1704_v36 = vadd.f32 %v1633_v63, %v1480_v35 }
 0x20e   : > { %v1411_v51 = vpop.f32.mrf.mxu1 }
 0x20f   : > { %vm2255_vm8 = vcmp.ge.f32.partialorder %v2223_v53, 0.0  ;;  %v2287_v3 = vmul.f32 0.1, %v2223_v53  ;;  %v1928_v39 = vadd.f32 %v1857_v43, %v1704_v36  ;;  %v1481_v16 = vadd.f32 %v1411_v51, %v4340_v12  ;;  %v4096_v12 = vld [vmem:[%s3218_s11 + $0x122] sm:$0xff] }
 0x210   : > { %v2083_v11 = vpop.f32.mrf.mxu0 }
 0x211   : > { %v2319_v61 = vsel %vm2255_vm8, %v2223_v53, %v2287_v3  ;;  %v2152_v21 = vadd.f32 %v2081_v41, %v1928_v39  ;;  %v4346_v41 = vld [vmem:[#allocation33_spill] sm:$0xff] }
 0x212   : > { %v2960_v40 = vpack.c.bf16 %v2319_v61, %v2318_v29  ;;  %v2823_v29 = vld [vmem:[%s3218_s11 + $0x128] sm:$0xff] }
 0x213   : > { %v2188_v1 = vmul.f32 %v3996_v42, %v2152_v21  ;;  %v2873_v61 = vld [vmem:[%s3218_s11 + $0x129] sm:$0xff]  ;;  %v1553_v17 = vpack.c.bf16 %v2823_v29, %v4349_v58  ;;  %v2875_v29 = vld [vmem:[%s3218_s11 + $0x139] sm:$0xff] }
 0x214   : > { %3028 = vst [vmem:[%s4023_s9 + $0x10] sm:$0xff] %v2960_v40   ;;  %v1635_v33 = vpop.f32.mrf.mxu2  ;;  %v4347_v21 = vld [vmem:[#allocation36_spill] sm:$0xff] }
 0x215   : > { %v1859_v27 = vpop.f32.mrf.mxu3  ;;  %v1705_v7 = vadd.f32 %v1635_v33, %v1481_v16  ;;  %v2224_v9 = vadd.f32 %v4007_v48, %v2188_v1  ;;  %v2923_v16 = vld [vmem:[%s3218_s11 + $0x12a] sm:$0xff] }
 0x216   : > { %v1414_v28 = vpop.f32.mrf.mxu1  ;;  %v2001_v5 = vpack.c.bf16 %v2923_v16, %v4096_v12  ;;  %v2925_v16 = vld [vmem:[%s3218_s11 + $0x13a] sm:$0xff] }
 0x217   : > { %v1929_v31 = vadd.f32 %v1859_v27, %v1705_v7  ;;  %v1482_v38 = vadd.f32 %v1414_v28, %v4346_v41  ;;  %v2288_v4 = vmul.f32 0.1, %v2224_v9  ;;  %vm2256_vm9 = vcmp.ge.f32.partialorder %v2224_v9, 0.0 }
 0x218   : > { %v2086_v52 = vpop.f32.mrf.mxu0 }
 0x219   : > { %2791 = vmatmul.msk.bf16.gmra.mxu1 %vm325_vm2, %v1328_v14  ;;  %v2153_v19 = vadd.f32 %v2083_v11, %v1929_v31  ;;  %2841 = vmatmul.msk.bf16.gmra.mxu2 %vm325_vm2, %v1552_v22  ;;  %v2320_v51 = vsel %vm2256_vm9, %v2224_v9, %v2288_v4  ;;  %v1329_v14 = vpack.c.bf16 %v4044_v49, %v4348_v55  ;;  %v4350_v22 = vld [vmem:[#allocation48_spill] sm:$0xff]  ;;  %v4351_v9 = vld [vmem:[#allocation37_spill] sm:$0xff] }
 0x21a   : > { %2891 = vmatmul.msk.bf16.gmra.mxu3 %vm325_vm2, %v1776_v37  ;;  %v1777_v54 = vpack.c.bf16 %v2873_v61, %v4350_v22  ;;  %v4352_v61 = vld [vmem:[#allocation42_spill] sm:$0xff]  ;;  %v1330_v55 = vpack.c.bf16 %v4069_v24, %v4047_v32  ;;  %v4353_v24 = vld [vmem:[#allocation43_spill] sm:$0xff] }
 0x21b   : > { %2941 = vmatmul.msk.bf16.gmra.mxu0 %vm325_vm2, %v2000_v26  ;;  %v2189_v6 = vmul.f32 %v3996_v42, %v2153_v19 }
 0x21c   : > { %v1638_v56 = vpop.f32.mrf.mxu2 }
 0x21d   : > { %v1862_v57 = vpop.f32.mrf.mxu3  ;;  %v2225_v35 = vadd.f32 %v4007_v48, %v2189_v6  ;;  %v1706_v63 = vadd.f32 %v1638_v56, %v1482_v38 }
 0x21e   : > { %v1416_v43 = vpop.f32.mrf.mxu1 }
 0x21f   : > { %vm2257_vm10 = vcmp.ge.f32.partialorder %v2225_v35, 0.0  ;;  %v2289_v34 = vmul.f32 0.1, %v2225_v35  ;;  %v1930_v53 = vadd.f32 %v1862_v57, %v1706_v63  ;;  %v1483_v40 = vadd.f32 %v1416_v43, %v4347_v21 }
 0x220   : > { %v2088_v36 = vpop.f32.mrf.mxu0 }
 0x221   : > { %v2321_v3 = vsel %vm2257_vm10, %v2225_v35, %v2289_v34  ;;  %v2154_v39 = vadd.f32 %v2086_v52, %v1930_v53 }
 0x222   : > { %v2965_v11 = vpack.c.bf16 %v2321_v3, %v2320_v51  ;;  %v2824_v51 = vld [vmem:[%s3218_s11 + $0x130] sm:$0xff] }
 0x223   : > { %v2190_v1 = vmul.f32 %v3996_v42, %v2154_v39  ;;  %v2825_v39 = vld [vmem:[%s3218_s11 + $0x138] sm:$0xff] }
 0x224   : > { %3029 = vst [vmem:[%s4023_s9 + $0x18] sm:$0xff] %v2965_v11   ;;  %v1640_v33 = vpop.f32.mrf.mxu2  ;;  %v2874_v11 = vld [vmem:[%s3218_s11 + $0x131] sm:$0xff] }
 0x225   : > { %v1864_v27 = vpop.f32.mrf.mxu3  ;;  %v1707_v7 = vadd.f32 %v1640_v33, %v1483_v40  ;;  %v2226_v31 = vadd.f32 %v4007_v48, %v2190_v1  ;;  %v2924_v40 = vld [vmem:[%s3218_s11 + $0x132] sm:$0xff]  ;;  %v1778_v58 = vpack.c.bf16 %v2875_v29, %v2874_v11  ;;  %v2927_v11 = vld [vmem:[%s3218_s11 + $0x14a] sm:$0xff] }
 0x226   : > { %v1419_v28 = vpop.f32.mrf.mxu1 }
 0x227   : > { %v1931_v37 = vadd.f32 %v1864_v27, %v1707_v7  ;;  %v1484_v19 = vadd.f32 %v1419_v28, %v4351_v9  ;;  %v2290_v38 = vmul.f32 0.1, %v2226_v31  ;;  %vm2258_vm11 = vcmp.ge.f32.partialorder %v2226_v31, 0.0 }
 0x228   : > { %v2091_v26 = vpop.f32.mrf.mxu0  ;;  %v1554_v28 = vpack.c.bf16 %v2825_v39, %v2824_v51  ;;  %v4354_v51 = vld [vmem:[#allocation49_spill] sm:$0xff]  ;;  %v2926_v39 = vld [vmem:[%s3218_s11 + $0x142] sm:$0xff] }
 0x229   : > { %2792 = vmatmul.msk.bf16.gmra.mxu1 %vm325_vm2, %v1329_v14  ;;  %v2155_v52 = vadd.f32 %v2088_v36, %v1931_v37  ;;  %2842 = vmatmul.msk.bf16.gmra.mxu2 %vm325_vm2, %v1553_v17  ;;  %v2322_v34 = vsel %vm2258_vm11, %v2226_v31, %v2290_v38  ;;  %v2002_v17 = vpack.c.bf16 %v2925_v16, %v2924_v40 }
 0x22a   : > { %2892 = vmatmul.msk.bf16.gmra.mxu3 %vm325_vm2, %v1777_v54 }
 0x22b   : > { %2942 = vmatmul.msk.bf16.gmra.mxu0 %vm325_vm2, %v2001_v5  ;;  %v2191_v49 = vmul.f32 %v3996_v42, %v2155_v52 }
 0x22c   : > { %v1643_v6 = vpop.f32.mrf.mxu2 }
 0x22d   : > { %v1867_v41 = vpop.f32.mrf.mxu3  ;;  %v2227_v56 = vadd.f32 %v4007_v48, %v2191_v49  ;;  %v1708_v57 = vadd.f32 %v1643_v6, %v1484_v19 }
 0x22e   : > { %v1421_v4 = vpop.f32.mrf.mxu1 }
 0x22f   : > { %vm2259_vm12 = vcmp.ge.f32.partialorder %v2227_v56, 0.0  ;;  %v2291_v35 = vmul.f32 0.1, %v2227_v56  ;;  %v1932_v63 = vadd.f32 %v1867_v41, %v1708_v57  ;;  %v1485_v21 = vadd.f32 %v1421_v4, %v4352_v61 }
 0x230   : > { %v2093_v43 = vpop.f32.mrf.mxu0 }
 0x231   : > { %v2323_v53 = vsel %vm2259_vm12, %v2227_v56, %v2291_v35  ;;  %v2156_v36 = vadd.f32 %v2091_v26, %v1932_v63  ;;  %v2826_v63 = vld [vmem:[%s3218_s11 + $0x140] sm:$0xff] }
 0x232   : > { %v2970_v3 = vpack.c.bf16 %v2323_v53, %v2322_v34  ;;  %v2827_v34 = vld [vmem:[%s3218_s11 + $0x148] sm:$0xff] }
 0x233   : > { %v2192_v14 = vmul.f32 %v3996_v42, %v2156_v36  ;;  %v2876_v53 = vld [vmem:[%s3218_s11 + $0x141] sm:$0xff]  ;;  %v2877_v36 = vld [vmem:[%s3218_s11 + $0x149] sm:$0xff] }
 0x234   : > { %3030 = vst [vmem:[%s4023_s9 + $0x20] sm:$0xff] %v2970_v3   ;;  %v1645_v33 = vpop.f32.mrf.mxu2 }
 0x235   : > { %v1869_v27 = vpop.f32.mrf.mxu3  ;;  %v1709_v1 = vadd.f32 %v1645_v33, %v1485_v21  ;;  %v2228_v5 = vadd.f32 %v4007_v48, %v2192_v14  ;;  %v1331_v21 = vpack.c.bf16 %v4096_v12, %v4072_v44  ;;  %v2003_v14 = vpack.c.bf16 %v2927_v11, %v2926_v39 }
 0x236   : > { %v1424_v7 = vpop.f32.mrf.mxu1 }
 0x237   : > { %v1933_v22 = vadd.f32 %v1869_v27, %v1709_v1  ;;  %v1486_v26 = vadd.f32 %v1424_v7, %v4353_v24  ;;  %v2292_v49 = vmul.f32 0.1, %v2228_v5  ;;  %vm2260_vm13 = vcmp.ge.f32.partialorder %v2228_v5, 0.0 }
 0x238   : > { %v2096_v54 = vpop.f32.mrf.mxu0  ;;  %v1555_v27 = vpack.c.bf16 %v2827_v34, %v2826_v63 }
 0x239   : > { %2793 = vmatmul.msk.bf16.gmra.mxu1 %vm325_vm2, %v1330_v55  ;;  %v2157_v37 = vadd.f32 %v2093_v43, %v1933_v22  ;;  %2843 = vmatmul.msk.bf16.gmra.mxu2 %vm325_vm2, %v1554_v28  ;;  %v2324_v57 = vsel %vm2260_vm13, %v2228_v5, %v2292_v49  ;;  %v1779_v55 = vpack.c.bf16 %v2877_v36, %v2876_v53 }
 0x23a   : > { %2893 = vmatmul.msk.bf16.gmra.mxu3 %vm325_vm2, %v1778_v58 }
 0x23b   : > { %2943 = vmatmul.msk.bf16.gmra.mxu0 %vm325_vm2, %v2002_v17  ;;  %v2193_v32 = vmul.f32 %v3996_v42, %v2157_v37 }
 0x23c   : > { %v1648_v31 = vpop.f32.mrf.mxu2 }
 0x23d   : > { %v1872_v52 = vpop.f32.mrf.mxu3  ;;  %v2229_v9 = vadd.f32 %v4007_v48, %v2193_v32  ;;  %v1710_v19 = vadd.f32 %v1648_v31, %v1486_v26 }
 0x23e   : > { %v1426_v6 = vpop.f32.mrf.mxu1 }
 0x23f   : > { %vm2261_vm14 = vcmp.ge.f32.partialorder %v2229_v9, 0.0  ;;  %v2293_v41 = vmul.f32 0.1, %v2229_v9  ;;  %v1934_v38 = vadd.f32 %v1872_v52, %v1710_v19  ;;  %v1487_v3 = vadd.f32 %v1426_v6, %v4354_v51 }
 0x240   : > { %v2098_v56 = vpop.f32.mrf.mxu0 }
 0x241   : > { %v2325_v4 = vsel %vm2261_vm14, %v2229_v9, %v2293_v41  ;;  %v2158_v35 = vadd.f32 %v2096_v54, %v1934_v38 }
 0x242   : > { %v2975_v43 = vpack.c.bf16 %v2325_v4, %v2324_v57 }
 0x243   : > { %v2194_v40 = vmul.f32 %v3996_v42, %v2158_v35 }
 0x244   : > { %3031 = vst [vmem:[%s4023_s9 + $0x28] sm:$0xff] %v2975_v43   ;;  %v1650_v29 = vpop.f32.mrf.mxu2 }
 0x245   : > { %v1874_v61 = vpop.f32.mrf.mxu3  ;;  %v1711_v16 = vadd.f32 %v1650_v29, %v1487_v3  ;;  %v2230_v28 = vadd.f32 %v4007_v48, %v2194_v40 }
 0x246   : > { %v1429_v33 = vpop.f32.mrf.mxu1 }
 0x247   : > { %v1935_v1 = vadd.f32 %v1874_v61, %v1711_v16  ;;  %v1488_v12 = vadd.f32 %v1429_v33, %v3851_v0  ;;  %v2294_v54 = vmul.f32 0.1, %v2230_v28  ;;  %vm2262_vm15 = vcmp.ge.f32.partialorder %v2230_v28, 0.0 }
 0x248   : > { %v2101_v7 = vpop.f32.mrf.mxu0 }
 0x249   : > { %2794 = vmatmul.msk.bf16.gmra.mxu1 %vm325_vm2, %v1331_v21  ;;  %v2159_v58 = vadd.f32 %v2098_v56, %v1935_v1  ;;  %2844 = vmatmul.msk.bf16.gmra.mxu2 %vm325_vm2, %v1555_v27  ;;  %v2326_v52 = vsel %vm2262_vm15, %v2230_v28, %v2294_v54 }
 0x24a   : > { %2894 = vmatmul.msk.bf16.gmra.mxu3 %vm325_vm2, %v1779_v55 }
 0x24b   : > { %2944 = vmatmul.msk.bf16.gmra.mxu0 %vm325_vm2, %v2003_v14  ;;  %v2195_v44 = vmul.f32 %v3996_v42, %v2159_v58 }
 0x24c   : > { %v1653_v17 = vpop.f32.mrf.mxu2 }
 0x24d   : > { %v1877_v22 = vpop.f32.mrf.mxu3  ;;  %v2231_v5 = vadd.f32 %v4007_v48, %v2195_v44  ;;  %v1712_v37 = vadd.f32 %v1653_v17, %v1488_v12 }
 0x24e   : > { %v1431_v32 = vpop.f32.mrf.mxu1 }
 0x24f   : > { %vm2263_vm0 = vcmp.ge.f32.partialorder %v2231_v5, 0.0  ;;  %v2295_v24 = vmul.f32 0.1, %v2231_v5  ;;  %v1936_v26 = vadd.f32 %v1877_v22, %v1712_v37  ;;  %v1489_v6 = vadd.f32 %v1431_v32, %v3861_v25 }
 0x250   : > { %v2103_v31 = vpop.f32.mrf.mxu0 }
 0x251   : > { %v2327_v49 = vsel %vm2263_vm0, %v2231_v5, %v2295_v24  ;;  %v2160_v9 = vadd.f32 %v2101_v7, %v1936_v26 }
 0x252   : > { %v2980_v19 = vpack.c.bf16 %v2327_v49, %v2326_v52 }
 0x253   : > { %v2196_v38 = vmul.f32 %v3996_v42, %v2160_v9 }
 0x254   : > { %3032 = vst [vmem:[%s4023_s9 + $0x30] sm:$0xff] %v2980_v19   ;;  %v1655_v0 = vpop.f32.mrf.mxu2 }
 0x255   : > { %v1879_v41 = vpop.f32.mrf.mxu3  ;;  %v1713_v56 = vadd.f32 %v1655_v0, %v1489_v6  ;;  %v2232_v63 = vadd.f32 %v4007_v48, %v2196_v38 }
 0x256   : > { %v1434_v57 = vpop.f32.mrf.mxu1 }
 0x257   : > { %v1937_v4 = vadd.f32 %v1879_v41, %v1713_v56  ;;  %v1490_v53 = vadd.f32 %v1434_v57, %v3866_v23  ;;  %v2296_v25 = vmul.f32 0.1, %v2232_v63  ;;  %vm2264_vm1 = vcmp.ge.f32.partialorder %v2232_v63, 0.0 }
 0x258   : > { %v2106_v35 = vpop.f32.mrf.mxu0 }
 0x259   : > { %v2161_v43 = vadd.f32 %v2103_v31, %v1937_v4  ;;  %v2328_v40 = vsel %vm2264_vm1, %v2232_v63, %v2296_v25 }
 0x25b   : > { %v2197_v34 = vmul.f32 %v3996_v42, %v2161_v43 }
 0x25c   : > { %v1658_v36 = vpop.f32.mrf.mxu2 }
 0x25d   : > { %v1882_v51 = vpop.f32.mrf.mxu3  ;;  %v2233_v3 = vadd.f32 %v4007_v48, %v2197_v34  ;;  %v1714_v39 = vadd.f32 %v1658_v36, %v1490_v53 }
 0x25e   : > { %v1436_v11 = vpop.f32.mrf.mxu1 }
 0x25f   : > { %vm2265_vm2 = vcmp.ge.f32.partialorder %v2233_v3, 0.0  ;;  %v2297_v29 = vmul.f32 0.1, %v2233_v3  ;;  %v1938_v61 = vadd.f32 %v1882_v51, %v1714_v39  ;;  %v1491_v55 = vadd.f32 %v1436_v11, %v3876_v10 }
 0x260   : > { %v2108_v21 = vpop.f32.mrf.mxu0 }
 0x261   : > { %v2329_v16 = vsel %vm2265_vm2, %v2233_v3, %v2297_v29  ;;  %v2162_v33 = vadd.f32 %v2106_v35, %v1938_v61 }
 0x262   : > { %v2985_v27 = vpack.c.bf16 %v2329_v16, %v2328_v40 }
 0x263   : > { %v2198_v1 = vmul.f32 %v3996_v42, %v2162_v33 }
 0x264   : > { %3033 = vst [vmem:[%s4023_s9 + $0x38] sm:$0xff] %v2985_v27   ;;  %v1660_v23 = vpop.f32.mrf.mxu2 }
 0x265   : > { %v1884_v14 = vpop.f32.mrf.mxu3  ;;  %v1715_v7 = vadd.f32 %v1660_v23, %v1491_v55  ;;  %v2234_v12 = vadd.f32 %v4007_v48, %v2198_v1 }
 0x266   : > { %v1439_v28 = vpop.f32.mrf.mxu1 }
 0x267   : > { %v1939_v58 = vadd.f32 %v1884_v14, %v1715_v7  ;;  %v1492_v54 = vadd.f32 %v1439_v28, %v3881_v62  ;;  %v2298_v10 = vmul.f32 0.1, %v2234_v12  ;;  %vm2266_vm3 = vcmp.ge.f32.partialorder %v2234_v12, 0.0 }
 0x268   : > { %v2111_v44 = vpop.f32.mrf.mxu0 }
 0x269   : > { %v2163_v17 = vadd.f32 %v2108_v21, %v1939_v58  ;;  %v2330_v9 = vsel %vm2266_vm3, %v2234_v12, %v2298_v10 }
 0x26b   : > { %v2199_v22 = vmul.f32 %v3996_v42, %v2163_v17 }
 0x26c   : > { %v1663_v5 = vpop.f32.mrf.mxu2 }
 0x26d   : > { %v1887_v37 = vpop.f32.mrf.mxu3  ;;  %v2235_v32 = vadd.f32 %v4007_v48, %v2199_v22  ;;  %v1716_v24 = vadd.f32 %v1663_v5, %v1492_v54 }
 0x26e   : > { %v1441_v26 = vpop.f32.mrf.mxu1 }
 0x26f   : > { %vm2267_vm4 = vcmp.ge.f32.partialorder %v2235_v32, 0.0  ;;  %v2299_v31 = vmul.f32 0.1, %v2235_v32  ;;  %v1940_v52 = vadd.f32 %v1887_v37, %v1716_v24  ;;  %v1493_v41 = vadd.f32 %v1441_v26, %v3891_v13 }
 0x270   : > { %v2113_v49 = vpop.f32.mrf.mxu0 }
 0x271   : > { %v2331_v19 = vsel %vm2267_vm4, %v2235_v32, %v2299_v31  ;;  %v2164_v6 = vadd.f32 %v2111_v44, %v1940_v52 }
 0x272   : > { %v2990_v0 = vpack.c.bf16 %v2331_v19, %v2330_v9 }
 0x273   : > { %v2200_v56 = vmul.f32 %v3996_v42, %v2164_v6 }
 0x274   : > { %3034 = vst [vmem:[%s4023_s9 + $0x40] sm:$0xff] %v2990_v0   ;;  %v1665_v62 = vpop.f32.mrf.mxu2 }
 0x275   : > { %v1889_v38 = vpop.f32.mrf.mxu3  ;;  %v1717_v57 = vadd.f32 %v1665_v62, %v1493_v41  ;;  %v2236_v43 = vadd.f32 %v4007_v48, %v2200_v56 }
 0x276   : > { %v1444_v4 = vpop.f32.mrf.mxu1 }
 0x277   : > { %v1941_v35 = vadd.f32 %v1889_v38, %v1717_v57  ;;  %v1494_v36 = vadd.f32 %v1444_v4, %v3896_v50  ;;  %v2300_v13 = vmul.f32 0.1, %v2236_v43  ;;  %vm2268_vm5 = vcmp.ge.f32.partialorder %v2236_v43, 0.0 }
 0x278   : > { %v2116_v63 = vpop.f32.mrf.mxu0 }
 0x279   : > { %v2165_v34 = vadd.f32 %v2113_v49, %v1941_v35  ;;  %v2332_v40 = vsel %vm2268_vm5, %v2236_v43, %v2300_v13 }
 0x27b   : > { %v2201_v53 = vmul.f32 %v3996_v42, %v2165_v34 }
 0x27c   : > { %v1668_v51 = vpop.f32.mrf.mxu2 }
 0x27d   : > { %v1892_v25 = vpop.f32.mrf.mxu3  ;;  %v2237_v3 = vadd.f32 %v4007_v48, %v2201_v53  ;;  %v1718_v39 = vadd.f32 %v1668_v51, %v1494_v36 }
 0x27e   : > { %v1446_v11 = vpop.f32.mrf.mxu1 }
 0x27f   : > { %vm2269_vm6 = vcmp.ge.f32.partialorder %v2237_v3, 0.0  ;;  %v2301_v29 = vmul.f32 0.1, %v2237_v3  ;;  %v1942_v61 = vadd.f32 %v1892_v25, %v1718_v39  ;;  %v1495_v55 = vadd.f32 %v1446_v11, %v3907_v8 }
 0x280   : > { %v2118_v21 = vpop.f32.mrf.mxu0 }
 0x281   : > { %v2333_v16 = vsel %vm2269_vm6, %v2237_v3, %v2301_v29  ;;  %v2166_v33 = vadd.f32 %v2116_v63, %v1942_v61 }
 0x282   : > { %v2995_v27 = vpack.c.bf16 %v2333_v16, %v2332_v40 }
 0x283   : > { %v2202_v14 = vmul.f32 %v3996_v42, %v2166_v33 }
 0x284   : > { %3035 = vst [vmem:[%s4023_s9 + $0x48] sm:$0xff] %v2995_v27   ;;  %v1670_v50 = vpop.f32.mrf.mxu2 }
 0x285   : > { %v1894_v23 = vpop.f32.mrf.mxu3  ;;  %v1719_v1 = vadd.f32 %v1670_v50, %v1495_v55  ;;  %v2238_v44 = vadd.f32 %v4007_v48, %v2202_v14 }
 0x286   : > { %v1449_v7 = vpop.f32.mrf.mxu1 }
 0x287   : > { %v1943_v28 = vadd.f32 %v1894_v23, %v1719_v1  ;;  %v1496_v22 = vadd.f32 %v1449_v7, %v3912_v60  ;;  %v2302_v8 = vmul.f32 0.1, %v2238_v44  ;;  %vm2270_vm7 = vcmp.ge.f32.partialorder %v2238_v44, 0.0 }
 0x288   : > { %v2121_v58 = vpop.f32.mrf.mxu0 }
 0x289   : > { %v2167_v12 = vadd.f32 %v2118_v21, %v1943_v28  ;;  %v2334_v52 = vsel %vm2270_vm7, %v2238_v44, %v2302_v8 }
 0x28b   : > { %v2203_v17 = vmul.f32 %v3996_v42, %v2167_v12 }
 0x28c   : > { %v1673_v54 = vpop.f32.mrf.mxu2 }
 0x28d   : > { %v1897_v5 = vpop.f32.mrf.mxu3  ;;  %v2239_v37 = vadd.f32 %v4007_v48, %v2203_v17  ;;  %v1720_v10 = vadd.f32 %v1673_v54, %v1496_v22 }
 0x28e   : > { %v1451_v32 = vpop.f32.mrf.mxu1 }
 0x28f   : > { %vm2271_vm8 = vcmp.ge.f32.partialorder %v2239_v37, 0.0  ;;  %v2303_v24 = vmul.f32 0.1, %v2239_v37  ;;  %v1944_v26 = vadd.f32 %v1897_v5, %v1720_v10  ;;  %v1497_v6 = vadd.f32 %v1451_v32, %v3923_v2 }
 0x290   : > { %v2123_v31 = vpop.f32.mrf.mxu0 }
 0x291   : > { %v2335_v49 = vsel %vm2271_vm8, %v2239_v37, %v2303_v24  ;;  %v2168_v9 = vadd.f32 %v2121_v58, %v1944_v26 }
 0x292   : > { %v3000_v19 = vpack.c.bf16 %v2335_v49, %v2334_v52 }
 0x293   : > { %v2204_v41 = vmul.f32 %v3996_v42, %v2168_v9 }
 0x294   : > { %3036 = vst [vmem:[%s4023_s9 + $0x50] sm:$0xff] %v3000_v19   ;;  %v1675_v60 = vpop.f32.mrf.mxu2 }
 0x295   : > { %v1899_v0 = vpop.f32.mrf.mxu3  ;;  %v1721_v62 = vadd.f32 %v1675_v60, %v1497_v6  ;;  %v2240_v4 = vadd.f32 %v4007_v48, %v2204_v41 }
 0x296   : > { %v1454_v38 = vpop.f32.mrf.mxu1 }
 0x297   : > { %v1945_v56 = vadd.f32 %v1899_v0, %v1721_v62  ;;  %v1498_v43 = vadd.f32 %v1454_v38, %v3928_v47  ;;  %v2304_v2 = vmul.f32 0.1, %v2240_v4  ;;  %vm2272_vm9 = vcmp.ge.f32.partialorder %v2240_v4, 0.0 }
 0x298   : > { %v2126_v57 = vpop.f32.mrf.mxu0 }
 0x299   : > { %v2169_v35 = vadd.f32 %v2123_v31, %v1945_v56  ;;  %v2336_v11 = vsel %vm2272_vm9, %v2240_v4, %v2304_v2 }
 0x29b   : > { %v2205_v63 = vmul.f32 %v3996_v42, %v2169_v35 }
 0x29c   : > { %v1678_v34 = vpop.f32.mrf.mxu2 }
 0x29d   : > { %v1902_v53 = vpop.f32.mrf.mxu3  ;;  %v2241_v36 = vadd.f32 %v4007_v48, %v2205_v63  ;;  %v1722_v51 = vadd.f32 %v1678_v34, %v1498_v43 }
 0x29e   : > { %v1456_v25 = vpop.f32.mrf.mxu1 }
 0x29f   : > { %vm2273_vm10 = vcmp.ge.f32.partialorder %v2241_v36, 0.0  ;;  %v2305_v13 = vmul.f32 0.1, %v2241_v36  ;;  %v1946_v3 = vadd.f32 %v1902_v53, %v1722_v51  ;;  %v1499_v40 = vadd.f32 %v1456_v25, %v3939_v59 }
 0x2a0   : > { %v2128_v39 = vpop.f32.mrf.mxu0 }
 0x2a1   : > { %v2337_v29 = vsel %vm2273_vm10, %v2241_v36, %v2305_v13  ;;  %v2170_v61 = vadd.f32 %v2126_v57, %v1946_v3 }
 0x2a2   : > { %v3005_v21 = vpack.c.bf16 %v2337_v29, %v2336_v11 }
 0x2a3   : > { %v2206_v33 = vmul.f32 %v3996_v42, %v2170_v61 }
 0x2a4   : > { %3037 = vst [vmem:[%s4023_s9 + $0x58] sm:$0xff] %v3005_v21   ;;  %v1680_v47 = vpop.f32.mrf.mxu2 }
 0x2a5   : > { %v1904_v16 = vpop.f32.mrf.mxu3  ;;  %v1723_v27 = vadd.f32 %v1680_v47, %v1499_v40  ;;  %v2242_v14 = vadd.f32 %v4007_v48, %v2206_v33 }
 0x2a6   : > { %v1459_v55 = vpop.f32.mrf.mxu1 }
 0x2a7   : > { %v1947_v50 = vadd.f32 %v1904_v16, %v1723_v27  ;;  %v1500_v28 = vadd.f32 %v1459_v55, %v3944_v30  ;;  %v2306_v59 = vmul.f32 0.1, %v2242_v14  ;;  %vm2274_vm11 = vcmp.ge.f32.partialorder %v2242_v14, 0.0 }
 0x2a8   : > { %v2131_v23 = vpop.f32.mrf.mxu0 }
 0x2a9   : > { %v2171_v1 = vadd.f32 %v2128_v39, %v1947_v50  ;;  %v2338_v37 = vsel %vm2274_vm11, %v2242_v14, %v2306_v59 }
 0x2ab   : > { %v2207_v7 = vmul.f32 %v3996_v42, %v2171_v1 }
 0x2ac   : > { %v1683_v58 = vpop.f32.mrf.mxu2 }
 0x2ad   : > { %v1907_v44 = vpop.f32.mrf.mxu3  ;;  %v2243_v12 = vadd.f32 %v4007_v48, %v2207_v7  ;;  %v1724_v17 = vadd.f32 %v1683_v58, %v1500_v28 }
 0x2ae   : > { %v1461_v22 = vpop.f32.mrf.mxu1 }
 0x2af   : > { %vm2275_vm12 = vcmp.ge.f32.partialorder %v2243_v12, 0.0  ;;  %v2307_v54 = vmul.f32 0.1, %v2243_v12  ;;  %v1948_v5 = vadd.f32 %v1907_v44, %v1724_v17  ;;  %v1501_v26 = vadd.f32 %v1461_v22, %v3955_v15 }
 0x2b0   : > { %v2133_v8 = vpop.f32.mrf.mxu0 }
 0x2b1   : > { %v2339_v10 = vsel %vm2275_vm12, %v2243_v12, %v2307_v54  ;;  %v2172_v32 = vadd.f32 %v2131_v23, %v1948_v5 }
 0x2b2   : > { %v3010_v24 = vpack.c.bf16 %v2339_v10, %v2338_v37  ;;  %v3090_v10 = vld [vmem:[%s4234_s2] ss:$0 sm:$0xff] }
 0x2b3   : > { %v2208_v52 = vmul.f32 %v3996_v42, %v2172_v32 }
 0x2b4   : > { %3038 = vst [vmem:[%s4023_s9 + $0x60] sm:$0xff] %v3010_v24   ;;  %v1685_v30 = vpop.f32.mrf.mxu2 }
 0x2b5   : > { %v1909_v31 = vpop.f32.mrf.mxu3  ;;  %v1725_v49 = vadd.f32 %v1685_v30, %v1501_v26  ;;  %v2244_v6 = vadd.f32 %v4007_v48, %v2208_v52 }
 0x2b6   : > { %v1464_v9 = vpop.f32.mrf.mxu1 }
 0x2b7   : > { %v1949_v19 = vadd.f32 %v1909_v31, %v1725_v49  ;;  %v1502_v62 = vadd.f32 %v1464_v9, %v3960_v46  ;;  %v2308_v15 = vmul.f32 0.1, %v2244_v6  ;;  %vm2276_vm13 = vcmp.ge.f32.partialorder %v2244_v6, 0.0 }
 0x2b8   : > { %v2136_v0 = vpop.f32.mrf.mxu0 }
 0x2b9   : > { %v2173_v60 = vadd.f32 %v2133_v8, %v1949_v19  ;;  %v2340_v34 = vsel %vm2276_vm13, %v2244_v6, %v2308_v15 }
 0x2bb   : > { %v2209_v41 = vmul.f32 %v3996_v42, %v2173_v60 }
 0x2bc   : > { %v1688_v38 = vpop.f32.mrf.mxu2 }
 0x2bd   : > { %v1912_v56 = vpop.f32.mrf.mxu3  ;;  %v2245_v57 = vadd.f32 %v4007_v48, %v2209_v41  ;;  %v1726_v4 = vadd.f32 %v1688_v38, %v1502_v62 }
 0x2be   : > { %v1466_v35 = vpop.f32.mrf.mxu1 }
 0x2bf   : > { %vm2277_vm14 = vcmp.ge.f32.partialorder %v2245_v57, 0.0  ;;  %v2309_v63 = vmul.f32 0.1, %v2245_v57  ;;  %v1950_v43 = vadd.f32 %v1912_v56, %v1726_v4  ;;  %v1503_v51 = vadd.f32 %v1466_v35, %v3971_v45 }
 0x2c0   : > { %v2138_v25 = vpop.f32.mrf.mxu0 }
 0x2c1   : > { %v2341_v53 = vsel %vm2277_vm14, %v2245_v57, %v2309_v63  ;;  %v2174_v2 = vadd.f32 %v2136_v0, %v1950_v43 }
 0x2c2   : > { %v3015_v36 = vpack.c.bf16 %v2341_v53, %v2340_v34 }
 0x2c3   : > { %v2210_v3 = vmul.f32 %v3996_v42, %v2174_v2 }
 0x2c4   : > { %3039 = vst [vmem:[%s4023_s9 + $0x68] sm:$0xff] %v3015_v36   ;;  %v1690_v46 = vpop.f32.mrf.mxu2 }
 0x2c5   : > { %v1914_v13 = vpop.f32.mrf.mxu3  ;;  %v1727_v39 = vadd.f32 %v1690_v46, %v1503_v51  ;;  %v2246_v61 = vadd.f32 %v4007_v48, %v2210_v3 }
 0x2c6   : > { %v1469_v11 = vpop.f32.mrf.mxu1 }
 0x2c7   : > { %v1951_v29 = vadd.f32 %v1914_v13, %v1727_v39  ;;  %v1504_v47 = vadd.f32 %v1469_v11, %v3976_v20  ;;  %v2310_v45 = vmul.f32 0.1, %v2246_v61  ;;  %vm2278_vm15 = vcmp.ge.f32.partialorder %v2246_v61, 0.0 }
 0x2c8   : > { %v2141_v50 = vpop.f32.mrf.mxu0 }
 0x2c9   : > { %v2175_v21 = vadd.f32 %v2138_v25, %v1951_v29  ;;  %v2342_v7 = vsel %vm2278_vm15, %v2246_v61, %v2310_v45 }
 0x2cb   : > { %v2211_v40 = vmul.f32 %v3996_v42, %v2175_v21 }
 0x2cc   : > { %v1693_v16 = vpop.f32.mrf.mxu2 }
 0x2cd   : > { %v1917_v33 = vpop.f32.mrf.mxu3  ;;  %v2247_v27 = vadd.f32 %v4007_v48, %v2211_v40  ;;  %v1728_v55 = vadd.f32 %v1693_v16, %v1504_v47 }
 0x2ce   : > { %v1471_v1 = vpop.f32.mrf.mxu1 }
 0x2cf   : > { %vm2279_vm0 = vcmp.ge.f32.partialorder %v2247_v27, 0.0  ;;  %v2311_v23 = vmul.f32 0.1, %v2247_v27  ;;  %v1952_v14 = vadd.f32 %v1917_v33, %v1728_v55  ;;  %v1505_v59 = vadd.f32 %v1471_v1, %v3987_v18 }
 0x2d0   : > { %v2143_v5 = vpop.f32.mrf.mxu0 }
 0x2d1   : > { %v2343_v28 = vsel %vm2279_vm0, %v2247_v27, %v2311_v23  ;;  %v2176_v58 = vadd.f32 %v2141_v50, %v1952_v14 }
 0x2d2   : > { %v3020_v44 = vpack.c.bf16 %v2343_v28, %v2342_v7 }
 0x2d3   : > { %v2212_v12 = vmul.f32 %v3996_v42, %v2176_v58 }
 0x2d4   : > { %3040 = vst [vmem:[%s4023_s9 + $0x70] sm:$0xff] %v3020_v44   ;;  %v1695_v20 = vpop.f32.mrf.mxu2 }
 0x2d5   : > { %v1729_v17 = vadd.f32 %v1695_v20, %v1505_v59  ;;  %v1919_v22 = vpop.f32.mrf.mxu3  ;;  %v2248_v8 = vadd.f32 %v4007_v48, %v2212_v12 }
 0x2d7   : > { %v1953_v54 = vadd.f32 %v1919_v22, %v1729_v17  ;;  %v2312_v24 = vmul.f32 0.1, %v2248_v8  ;;  %vm2280_vm1 = vcmp.ge.f32.partialorder %v2248_v8, 0.0 }
 0x2d9   : > { %v2177_v37 = vadd.f32 %v2143_v5, %v1953_v54  ;;  %v2344_v42 = vsel %vm2280_vm1, %v2248_v8, %v2312_v24 }
 0x2db   : > { %v2213_v32 = vmul.f32 %v3090_v10, %v2177_v37 }
 0x2dd   : > { %v2249_v18 = vadd.f32 %v4007_v48, %v2213_v32 }
 0x2df   : > { %vm2281_vm2 = vcmp.ge.f32.partialorder %v2249_v18, 0.0  ;;  %v2313_v26 = vmul.f32 0.1, %v2249_v18 }
 0x2e1   : > { %v2345_v30 = vsel %vm2281_vm2, %v2249_v18, %v2313_v26 }
 0x2e2   : > { %v3025_v31 = vpack.c.bf16 %v2345_v30, %v2344_v42 }
 0x2e4   : > { %3041 = vst [vmem:[%s4023_s9 + $0x78] sm:$0xff] %v3025_v31  }
 0x2e5 PF: > { %s14_s19 = sadd.s32 1, %s3129_s19   ;;  %s4355_s15 = smov %s3121_s17 }
 0x2e6   : > { %p11_p7 = scmp.ge.s32.totalorder %s14_s19, 12   ;;  %s4356_s16 = smov %s3125_s18 }
 0x2e7   : > { %s4357_s17 = smov %s4360_s20  ;;  %s4358_s18 = smov %s4364_s21 }
 0x2e8   :  { %13 = sbr.rel (!%p11_p7) target bundleno = 3 (0x3), region = 83 }

// kernel: _lambda_.13
= control target key start
LH: loop header
LB: loop body
LE: loop exit
PB: predicated region body
PF: predicated region fallthrough
CT: control target
= control target key end

     0   :  { %s1542_s15 = smov 0   ;;  %s1544_s16 = smov 0   ;;  %s1821_s0 = inlined_call_operand.vmem [shape: f32[2,432,32], index: 0, kind: input, shape index: {}]   ;;  %s1822_s1 = inlined_call_operand.vmem [shape: bf16[4,32,128], index: 1, kind: input, shape index: {}]   ;;  %s1823_s2 = inlined_call_operand.vmem [shape: f32[1,128], index: 2, kind: input, shape index: {}]   ;;  %s1824_s3 = inlined_call_operand.vmem [shape: f32[1,128], index: 3, kind: input, shape index: {}]   ;;  %s1825_s4 = inlined_call_operand.vmem [shape: bf16[2,384,128], index: 4, kind: output, shape index: {}]  }
   0x1   :  { %s1546_s17 = smov 0   ;;  %s1548_s18 = smov 0  }
   0x2   :  { %s1550_s19 = smov 0  }
   0x3 LB: > { %s23_s20 = sadd.s32 1, %s1507_s17  ;;  %s26_s21 = sadd.s32 1, %s1511_s18  ;;  %s1515_s19 = sphi %s1550_s19, %s14_s19   ;;  %s1511_s18 = sphi %s1548_s18, %s1829_s18   ;;  %s1507_s17 = sphi %s1546_s17, %s1828_s17   ;;  %s1503_s16 = sphi %s1544_s16, %s1827_s16   ;;  %s1499_s15 = sphi %s1542_s15, %s1826_s15  }
   0x4   : > { %p24_p0 = scmp.ge.s32.totalorder %s23_s20, 2  ;;  %p1185_p1 = scmp.ge.s32.totalorder %s1515_s19, 1 }
   0x5   : > { %p176_p2 = scmp.lt.s32.totalorder %s1515_s19, 5 }
   0x6   : > { %s1831_s20 = smov (%p24_p0, %s23_s20), 0  ;;  %s1833_s21 = smov (!%p24_p0, %s26_s21), %s1511_s18 }
   0x7   : > { %p177_p3 = pnand %p1185_p1, %p176_p2  ;;  %p28_p4 = scmp.ge.s32.totalorder %s1833_s21, 2 }
   0x8   : > { %p206_p5 = scmp.lt.s32.totalorder (!%p177_p3), %s1503_s16, 1  ;;  %s222_s12 = smul.u32 (!%p177_p3), 192, %s1499_s15 }
   0x9   : > { %s1835_s21 = smov (%p28_p4, %s1833_s21), 0  ;;  %180 = sbr.rel (%p177_p3) target bundleno = 354 (0x162), region = 36 }
   0xa   : > { %s211_s25 = smul.u32 (!%p177_p3), 24, %s1499_s15 }
   0xc   : > { %p214_p6 = scmp.lt.s32.totalorder (!%p177_p3), %s211_s25, 47 }
   0xe   : > { %v1357_v0 = vld [vmem:[%s1822_s1 + $0x18] sm:$0xff]  ;;  %v1355_v1 = vld [vmem:[%s1822_s1 + $0x8] sm:$0xff]  ;;  %v1356_v4 = vld [vmem:[%s1822_s1 + $0x10] sm:$0xff]  ;;  %s1837_s16 = smov (!%p206_p5, %s1503_s16), 1  ;;  %vm319_vm0 = vcmask 261120   ;;  %s1839_s25 = smov (!%p214_p6, %s211_s25), 47 }
   0xf   : > { %v1359_v2 = vld [vmem:[%s1822_s1 + $0x28] sm:$0xff]  ;;  %v1361_v3 = vld [vmem:[%s1822_s1 + $0x38] sm:$0xff]  ;;  %362 = vmatpush.bf16.msra.mxu0 %v1357_v0  ;;  %479 = vmatpush.bf16.msra.mxu1 %v1355_v1  ;;  %v1354_v5 = vld [vmem:[%s1822_s1] sm:$0xff]  ;;  %s1433_s13 = smul.u32 432, %s1837_s16 }
  0x10   : > { %639 = vmatpush.bf16.msra.mxu2 %v1359_v2  ;;  %823 = vmatpush.bf16.msra.mxu3 %v1361_v3  ;;  %v1358_v6 = vld [vmem:[%s1822_s1 + $0x20] sm:$0xff]  ;;  %v1360_v7 = vld [vmem:[%s1822_s1 + $0x30] sm:$0xff]  ;;  %s1434_s15 = smul.u32 48, %s1837_s16 }
  0x11   : > { %s210_s23 = scalar_lea.vmem %s1821_s0, %s1433_s13 }
  0x12   : > { %s1605_s24 = scalar_lea.vmem %s210_s23, %s222_s12  ;;  %s217_s30 = sadd.s32 %s1434_s15, %s1839_s25 }
  0x13   : > { %363 = vmatpush.bf16.msra.mxu0 %v1356_v4  ;;  %480 = vmatpush.bf16.msra.mxu1 %v1354_v5  ;;  %v1188_v8 = vld [vmem:[%s1605_s24 + $0x1] sm:$0xff]  ;;  %v1189_v9 = vld [vmem:[%s1605_s24 + $0x9] sm:$0xff]  ;;  %v1256_v13 = vld [vmem:[%s1605_s24 + $0x18] sm:$0xff]  ;;  %s1187_s16 = sshll.u32 %s217_s30, 2 }
  0x14   : > { %640 = vmatpush.bf16.msra.mxu2 %v1358_v6  ;;  %824 = vmatpush.bf16.msra.mxu3 %v1360_v7  ;;  %v224_v10 = vld [vmem:[%s1605_s24] sm:$0xff]  ;;  %v290_v11 = vpack.c.bf16 %v1189_v9, %v1188_v8  ;;  %v225_v12 = vld [vmem:[%s1605_s24 + $0x8] sm:$0xff]  ;;  %v1190_v20 = vld [vmem:[%s1605_s24 + $0x11] sm:$0xff]  ;;  %s1727_s7 = scalar_lea.vmem %s1825_s4, %s1187_s16 }
  0x15   : > { %v1257_v14 = vld [vmem:[%s1605_s24 + $0x20] sm:$0xff]  ;;  %v248_v15 = vpack.c.bf16 %v225_v12, %v224_v10  ;;  %v226_v21 = vld [vmem:[%s1605_s24 + $0x10] sm:$0xff]  ;;  %v1258_v22 = vld [vmem:[%s1605_s24 + $0x28] sm:$0xff] }
  0x16   : > { %v568_v16 = vpack.c.bf16 %v1257_v14, %v1256_v13  ;;  %v1304_v17 = vld [vmem:[%s1605_s24 + $0x19] sm:$0xff]  ;;  %v1305_v18 = vld [vmem:[%s1605_s24 + $0x21] sm:$0xff]  ;;  %1224 = vmatmul.msk.bf16.vlgmr.msra.gmra.mxu0 %vm319_vm0, %v290_v11  ;;  %v1259_v23 = vld [vmem:[%s1605_s24 + $0x30] sm:$0xff]  ;;  %v249_v27 = vpack.c.bf16 %v1256_v13, %v226_v21  ;;  %v250_v35 = vpack.c.bf16 %v1258_v22, %v1257_v14 }
  0x17   : > { %v752_v19 = vpack.c.bf16 %v1305_v18, %v1304_v17  ;;  %1244 = vmatmul.msk.bf16.vlgmr.msra.gmra.mxu1 %vm319_vm0, %v248_v15  ;;  %v1306_v24 = vld [vmem:[%s1605_s24 + $0x29] sm:$0xff]  ;;  %v1307_v25 = vld [vmem:[%s1605_s24 + $0x31] sm:$0xff]  ;;  %v291_v26 = vpack.c.bf16 %v1304_v17, %v1190_v20  ;;  %v569_v28 = vpack.c.bf16 %v1259_v23, %v1258_v22  ;;  %v1261_v31 = vld [vmem:[%s1605_s24 + $0x40] sm:$0xff] }
  0x18   : > { %1292 = vmatmul.msk.bf16.vlgmr.msra.gmra.mxu2 %vm319_vm0, %v568_v16  ;;  %v753_v29 = vpack.c.bf16 %v1307_v25, %v1306_v24  ;;  %v1260_v30 = vld [vmem:[%s1605_s24 + $0x38] sm:$0xff]  ;;  %v1309_v33 = vld [vmem:[%s1605_s24 + $0x41] sm:$0xff]  ;;  %v292_v34 = vpack.c.bf16 %v1306_v24, %v1305_v18  ;;  %v1263_v39 = vld [vmem:[%s1605_s24 + $0x50] sm:$0xff] }
  0x19   : > { %1340 = vmatmul.msk.bf16.vlgmr.msra.gmra.mxu3 %vm319_vm0, %v752_v19  ;;  %v1308_v32 = vld [vmem:[%s1605_s24 + $0x39] sm:$0xff]  ;;  %v570_v36 = vpack.c.bf16 %v1261_v31, %v1260_v30  ;;  %v1262_v38 = vld [vmem:[%s1605_s24 + $0x48] sm:$0xff]  ;;  %v1311_v41 = vld [vmem:[%s1605_s24 + $0x51] sm:$0xff]  ;;  %v251_v43 = vpack.c.bf16 %v1260_v30, %v1259_v23 }
  0x1a   : > { %v754_v37 = vpack.c.bf16 %v1309_v33, %v1308_v32  ;;  %v1310_v40 = vld [vmem:[%s1605_s24 + $0x49] sm:$0xff]  ;;  %v293_v42 = vpack.c.bf16 %v1308_v32, %v1307_v25  ;;  %v571_v44 = vpack.c.bf16 %v1263_v39, %v1262_v38  ;;  %v1264_v46 = vld [vmem:[%s1605_s24 + $0x58] sm:$0xff]  ;;  %v1265_v47 = vld [vmem:[%s1605_s24 + $0x60] sm:$0xff]  ;;  %v252_v51 = vpack.c.bf16 %v1262_v38, %v1261_v31 }
  0x1b   : > { %v755_v45 = vpack.c.bf16 %v1311_v41, %v1310_v40  ;;  %v1312_v48 = vld [vmem:[%s1605_s24 + $0x59] sm:$0xff]  ;;  %v1313_v49 = vld [vmem:[%s1605_s24 + $0x61] sm:$0xff]  ;;  %v294_v50 = vpack.c.bf16 %v1310_v40, %v1309_v33  ;;  %v572_v52 = vpack.c.bf16 %v1265_v47, %v1264_v46  ;;  %v1267_v55 = vld [vmem:[%s1605_s24 + $0x70] sm:$0xff]  ;;  %v253_v59 = vpack.c.bf16 %v1264_v46, %v1263_v39 }
  0x1c   : > { %v756_v53 = vpack.c.bf16 %v1313_v49, %v1312_v48  ;;  %v1266_v54 = vld [vmem:[%s1605_s24 + $0x68] sm:$0xff]  ;;  %v1315_v57 = vld [vmem:[%s1605_s24 + $0x71] sm:$0xff]  ;;  %v295_v58 = vpack.c.bf16 %v1312_v48, %v1311_v41  ;;  %v1269_v63 = vld [vmem:[%s1605_s24 + $0x80] sm:$0xff] }
  0x1d   : > { %v1314_v56 = vld [vmem:[%s1605_s24 + $0x69] sm:$0xff]  ;;  %v573_v60 = vpack.c.bf16 %v1267_v55, %v1266_v54  ;;  %v1268_v62 = vld [vmem:[%s1605_s24 + $0x78] sm:$0xff]  ;;  %v1317_v1 = vld [vmem:[%s1605_s24 + $0x81] sm:$0xff]  ;;  %v254_v3 = vpack.c.bf16 %v1266_v54, %v1265_v47 }
  0x1e   : > { %v757_v61 = vpack.c.bf16 %v1315_v57, %v1314_v56  ;;  %v1316_v0 = vld [vmem:[%s1605_s24 + $0x79] sm:$0xff]  ;;  %v296_v2 = vpack.c.bf16 %v1314_v56, %v1313_v49  ;;  %v574_v4 = vpack.c.bf16 %v1269_v63, %v1268_v62  ;;  %v1270_v6 = vld [vmem:[%s1605_s24 + $0x88] sm:$0xff]  ;;  %v1271_v7 = vld [vmem:[%s1605_s24 + $0x90] sm:$0xff]  ;;  %v255_v11 = vpack.c.bf16 %v1268_v62, %v1267_v55 }
  0x1f   : > { %v758_v5 = vpack.c.bf16 %v1317_v1, %v1316_v0  ;;  %v1318_v8 = vld [vmem:[%s1605_s24 + $0x89] sm:$0xff]  ;;  %v1319_v9 = vld [vmem:[%s1605_s24 + $0x91] sm:$0xff]  ;;  %v297_v10 = vpack.c.bf16 %v1316_v0, %v1315_v57  ;;  %v575_v12 = vpack.c.bf16 %v1271_v7, %v1270_v6  ;;  %v1679_v15 = vld [vmem:[%s1605_s24 + $0xa0] sm:$0xff]  ;;  %v256_v20 = vpack.c.bf16 %v1270_v6, %v1269_v63 }
  0x20   : > { %v759_v13 = vpack.c.bf16 %v1319_v9, %v1318_v8  ;;  %v1272_v14 = vld [vmem:[%s1605_s24 + $0x98] sm:$0xff]  ;;  %v1683_v17 = vld [vmem:[%s1605_s24 + $0xa1] sm:$0xff]  ;;  %v298_v18 = vpack.c.bf16 %v1318_v8, %v1317_v1  ;;  %v1695_v31 = vld [vmem:[%s1823_s2] ss:$0 sm:$0xff] }
  0x21   : > { %v1320_v16 = vld [vmem:[%s1605_s24 + $0x99] sm:$0xff]  ;;  %v576_v21 = vpack.c.bf16 %v1679_v15, %v1272_v14  ;;  %v1698_v32 = vld [vmem:[%s1605_s24 + $0xa8] sm:$0xff]  ;;  %v1701_v33 = vld [vmem:[%s1605_s24 + $0xb0] sm:$0xff] }
  0x22   : > { %v760_v23 = vpack.c.bf16 %v1683_v17, %v1320_v16  ;;  %v1711_v38 = vld [vmem:[%s1605_s24 + $0xb1] sm:$0xff]  ;;  %v299_v40 = vpack.c.bf16 %v1320_v16, %v1319_v9  ;;  %v1277_v1 = vld [vmem:[%s1605_s24 + $0xc0] sm:$0xff] }
  0x23   : > { %v1276_v0 = vld [vmem:[%s1605_s24 + $0xb8] sm:$0xff] }
  0x26   : > { %1225 = vmatmul.msk.bf16.gmra.mxu0 %vm319_vm0, %v291_v26 }
  0x27   : > { %1245 = vmatmul.msk.bf16.gmra.mxu1 %vm319_vm0, %v249_v27 }
  0x28   : > { %1293 = vmatmul.msk.bf16.gmra.mxu2 %vm319_vm0, %v569_v28 }
  0x29   : > { %1341 = vmatmul.msk.bf16.gmra.mxu3 %vm319_vm0, %v753_v29 }
  0x36   : > { %1226 = vmatmul.msk.bf16.gmra.mxu0 %vm319_vm0, %v292_v34 }
  0x37   : > { %1246 = vmatmul.msk.bf16.gmra.mxu1 %vm319_vm0, %v250_v35  ;;  %v1707_v35 = vld [vmem:[%s1824_s3] ss:$0 sm:$0xff] }
  0x38   : > { %1294 = vmatmul.msk.bf16.gmra.mxu2 %vm319_vm0, %v570_v36 }
  0x39   : > { %1342 = vmatmul.msk.bf16.gmra.mxu3 %vm319_vm0, %v754_v37  ;;  %v1322_v37 = vld [vmem:[%s1605_s24 + $0xa9] sm:$0xff] }
  0x3a   : > { %v761_v47 = vpack.c.bf16 %v1711_v38, %v1322_v37 }
  0x46   : > { %1227 = vmatmul.msk.bf16.gmra.mxu0 %vm319_vm0, %v293_v42 }
  0x47   : > { %1247 = vmatmul.msk.bf16.gmra.mxu1 %vm319_vm0, %v251_v43 }
  0x48   : > { %1295 = vmatmul.msk.bf16.gmra.mxu2 %vm319_vm0, %v571_v44  ;;  %v257_v44 = vpack.c.bf16 %v1272_v14, %v1271_v7  ;;  %v300_v7 = vpack.c.bf16 %v1322_v37, %v1683_v17 }
  0x49   : > { %1343 = vmatmul.msk.bf16.gmra.mxu3 %vm319_vm0, %v755_v45  ;;  %v577_v45 = vpack.c.bf16 %v1701_v33, %v1698_v32 }
  0x56   : > { %1228 = vmatmul.msk.bf16.gmra.mxu0 %vm319_vm0, %v294_v50 }
  0x57   : > { %1248 = vmatmul.msk.bf16.gmra.mxu1 %vm319_vm0, %v252_v51 }
  0x58   : > { %1296 = vmatmul.msk.bf16.gmra.mxu2 %vm319_vm0, %v572_v52 }
  0x59   : > { %1344 = vmatmul.msk.bf16.gmra.mxu3 %vm319_vm0, %v756_v53 }
  0x66   : > { %1229 = vmatmul.msk.bf16.gmra.mxu0 %vm319_vm0, %v295_v58 }
  0x67   : > { %1249 = vmatmul.msk.bf16.gmra.mxu1 %vm319_vm0, %v253_v59 }
  0x68   : > { %1297 = vmatmul.msk.bf16.gmra.mxu2 %vm319_vm0, %v573_v60 }
  0x69   : > { %1345 = vmatmul.msk.bf16.gmra.mxu3 %vm319_vm0, %v757_v61 }
  0x76   : > { %1230 = vmatmul.msk.bf16.gmra.mxu0 %vm319_vm0, %v296_v2 }
  0x77   : > { %1250 = vmatmul.msk.bf16.gmra.mxu1 %vm319_vm0, %v254_v3 }
  0x78   : > { %1298 = vmatmul.msk.bf16.gmra.mxu2 %vm319_vm0, %v574_v4  ;;  %v1324_v4 = vld [vmem:[%s1605_s24 + $0xb9] sm:$0xff] }
  0x79   : > { %1346 = vmatmul.msk.bf16.gmra.mxu3 %vm319_vm0, %v758_v5  ;;  %v1325_v5 = vld [vmem:[%s1605_s24 + $0xc1] sm:$0xff] }
  0x7a   : > { %v762_v14 = vpack.c.bf16 %v1325_v5, %v1324_v4 }
  0x86   : > { %1231 = vmatmul.msk.bf16.gmra.mxu0 %vm319_vm0, %v297_v10 }
  0x87   : > { %1251 = vmatmul.msk.bf16.gmra.mxu1 %vm319_vm0, %v255_v11  ;;  %v258_v11 = vpack.c.bf16 %v1698_v32, %v1679_v15  ;;  %v1278_v32 = vld [vmem:[%s1605_s24 + $0xc8] sm:$0xff] }
  0x88   : > { %1299 = vmatmul.msk.bf16.gmra.mxu2 %vm319_vm0, %v575_v12  ;;  %v578_v12 = vpack.c.bf16 %v1277_v1, %v1276_v0 }
  0x89   : > { %1347 = vmatmul.msk.bf16.gmra.mxu3 %vm319_vm0, %v759_v13 }
  0x93   : > { %v365_v19 = vpop.f32.mrf.mxu0 }
  0x94   : > { %v482_v22 = vpop.f32.mrf.mxu1 }
  0x95   : > { %v483_v24 = vadd.f32 %v482_v22, %v365_v19 }
  0x96   : > { %1232 = vmatmul.msk.bf16.gmra.mxu0 %vm319_vm0, %v298_v18 }
  0x97   : > { %1252 = vmatmul.msk.bf16.gmra.mxu1 %vm319_vm0, %v256_v20 }
  0x98   : > { %1300 = vmatmul.msk.bf16.gmra.mxu2 %vm319_vm0, %v576_v21 }
  0x99   : > { %1348 = vmatmul.msk.bf16.gmra.mxu3 %vm319_vm0, %v760_v23 }
  0x9b   : > { %v642_v25 = vpop.f32.mrf.mxu2  ;;  %v367_v28 = vpop.f32.mrf.mxu0 }
  0x9c   : > { %v702_v26 = vadd.f32 %v642_v25, %v483_v24  ;;  %v826_v27 = vpop.f32.mrf.mxu3  ;;  %v484_v29 = vpop.f32.mrf.mxu1 }
  0x9d   : > { %v485_v36 = vadd.f32 %v484_v29, %v367_v28 }
  0x9e   : > { %v886_v30 = vadd.f32 %v826_v27, %v702_v26 }
  0xa0   : > { %v914_v34 = vmul.f32 %v1695_v31, %v886_v30 }
  0xa2   : > { %v942_v48 = vadd.f32 %v1707_v35, %v914_v34  ;;  %v1279_v34 = vld [vmem:[%s1605_s24 + $0xd0] sm:$0xff] }
  0xa3   : > { %v644_v39 = vpop.f32.mrf.mxu2  ;;  %v370_v43 = vpop.f32.mrf.mxu0 }
  0xa4   : > { %v703_v41 = vadd.f32 %v644_v39, %v485_v36  ;;  %v828_v42 = vpop.f32.mrf.mxu3  ;;  %v487_v46 = vpop.f32.mrf.mxu1  ;;  %v990_v52 = vmul.f32 0.1, %v942_v48  ;;  %vm966_vm1 = vcmp.ge.f32.partialorder %v942_v48, 0.0  ;;  %v1326_v39 = vld [vmem:[%s1605_s24 + $0xc9] sm:$0xff] }
  0xa5   : > { %v488_v51 = vadd.f32 %v487_v46, %v370_v43  ;;  %v259_v46 = vpack.c.bf16 %v1276_v0, %v1701_v33 }
  0xa6   : > { %v887_v49 = vadd.f32 %v828_v42, %v703_v41  ;;  %1233 = vmatmul.msk.bf16.gmra.mxu0 %vm319_vm0, %v299_v40  ;;  %v1014_v60 = vsel %vm966_vm1, %v942_v48, %v990_v52  ;;  %v1327_v40 = vld [vmem:[%s1605_s24 + $0xd1] sm:$0xff]  ;;  %v301_v42 = vpack.c.bf16 %v1324_v4, %v1711_v38 }
  0xa7   : > { %1253 = vmatmul.msk.bf16.gmra.mxu1 %vm319_vm0, %v257_v44 }
  0xa8   : > { %v915_v50 = vmul.f32 %v1695_v31, %v887_v49  ;;  %1301 = vmatmul.msk.bf16.gmra.mxu2 %vm319_vm0, %v577_v45  ;;  %v763_v49 = vpack.c.bf16 %v1327_v40, %v1326_v39 }
  0xa9   : > { %1349 = vmatmul.msk.bf16.gmra.mxu3 %vm319_vm0, %v761_v47  ;;  %v579_v47 = vpack.c.bf16 %v1279_v34, %v1278_v32 }
  0xaa   : > { %v943_v53 = vadd.f32 %v1707_v35, %v915_v50 }
  0xab   : > { %v647_v54 = vpop.f32.mrf.mxu2  ;;  %v372_v58 = vpop.f32.mrf.mxu0 }
  0xac   : > { %vm967_vm2 = vcmp.ge.f32.partialorder %v943_v53, 0.0  ;;  %v991_v55 = vmul.f32 0.1, %v943_v53  ;;  %v704_v56 = vadd.f32 %v647_v54, %v488_v51  ;;  %v831_v57 = vpop.f32.mrf.mxu3  ;;  %v489_v59 = vpop.f32.mrf.mxu1 }
  0xad   : > { %v490_v3 = vadd.f32 %v489_v59, %v372_v58 }
  0xae   : > { %v1015_v61 = vsel %vm967_vm2, %v943_v53, %v991_v55  ;;  %v888_v62 = vadd.f32 %v831_v57, %v704_v56 }
  0xaf   : > { %v1365_v63 = vpack.c.bf16 %v1015_v61, %v1014_v60 }
  0xb0   : > { %v916_v2 = vmul.f32 %v1695_v31, %v888_v62 }
  0xb1   : > { %1366 = vst [vmem:[%s1727_s7] sm:$0xff] %v1365_v63  }
  0xb2   : > { %v944_v16 = vadd.f32 %v1707_v35, %v916_v2 }
  0xb3   : > { %v649_v6 = vpop.f32.mrf.mxu2  ;;  %v375_v10 = vpop.f32.mrf.mxu0 }
  0xb4   : > { %v705_v8 = vadd.f32 %v649_v6, %v490_v3  ;;  %v833_v9 = vpop.f32.mrf.mxu3  ;;  %v492_v13 = vpop.f32.mrf.mxu1  ;;  %v992_v15 = vmul.f32 0.1, %v944_v16  ;;  %vm968_vm3 = vcmp.ge.f32.partialorder %v944_v16, 0.0 }
  0xb5   : > { %v493_v20 = vadd.f32 %v492_v13, %v375_v10 }
  0xb6   : > { %v889_v18 = vadd.f32 %v833_v9, %v705_v8  ;;  %1234 = vmatmul.msk.bf16.gmra.mxu0 %vm319_vm0, %v300_v7  ;;  %v1016_v27 = vsel %vm968_vm3, %v944_v16, %v992_v15 }
  0xb7   : > { %1254 = vmatmul.msk.bf16.gmra.mxu1 %vm319_vm0, %v258_v11 }
  0xb8   : > { %v917_v19 = vmul.f32 %v1695_v31, %v889_v18  ;;  %1302 = vmatmul.msk.bf16.gmra.mxu2 %vm319_vm0, %v578_v12 }
  0xb9   : > { %1350 = vmatmul.msk.bf16.gmra.mxu3 %vm319_vm0, %v762_v14 }
  0xba   : > { %v945_v17 = vadd.f32 %v1707_v35, %v917_v19 }
  0xbb   : > { %v652_v21 = vpop.f32.mrf.mxu2  ;;  %v377_v25 = vpop.f32.mrf.mxu0 }
  0xbc   : > { %vm969_vm4 = vcmp.ge.f32.partialorder %v945_v17, 0.0  ;;  %v993_v22 = vmul.f32 0.1, %v945_v17  ;;  %v706_v23 = vadd.f32 %v652_v21, %v493_v20  ;;  %v836_v24 = vpop.f32.mrf.mxu3  ;;  %v494_v26 = vpop.f32.mrf.mxu1 }
  0xbd   : > { %v495_v37 = vadd.f32 %v494_v26, %v377_v25 }
  0xbe   : > { %v1017_v28 = vsel %vm969_vm4, %v945_v17, %v993_v22  ;;  %v890_v29 = vadd.f32 %v836_v24, %v706_v23 }
  0xbf   : > { %v1370_v30 = vpack.c.bf16 %v1017_v28, %v1016_v27 }
  0xc0   : > { %v918_v36 = vmul.f32 %v1695_v31, %v890_v29 }
  0xc1   : > { %1422 = vst [vmem:[%s1727_s7 + $0x8] sm:$0xff] %v1370_v30  }
  0xc2   : > { %v946_v50 = vadd.f32 %v1707_v35, %v918_v36 }
  0xc3   : > { %v654_v41 = vpop.f32.mrf.mxu2  ;;  %v380_v45 = vpop.f32.mrf.mxu0 }
  0xc4   : > { %v707_v43 = vadd.f32 %v654_v41, %v495_v37  ;;  %v838_v44 = vpop.f32.mrf.mxu3  ;;  %v497_v48 = vpop.f32.mrf.mxu1  ;;  %v994_v38 = vmul.f32 0.1, %v946_v50  ;;  %vm970_vm5 = vcmp.ge.f32.partialorder %v946_v50, 0.0 }
  0xc5   : > { %v498_v53 = vadd.f32 %v497_v48, %v380_v45 }
  0xc6   : > { %v891_v51 = vadd.f32 %v838_v44, %v707_v43  ;;  %1235 = vmatmul.msk.bf16.gmra.mxu0 %vm319_vm0, %v301_v42  ;;  %v1018_v60 = vsel %vm970_vm5, %v946_v50, %v994_v38 }
  0xc7   : > { %1255 = vmatmul.msk.bf16.gmra.mxu1 %vm319_vm0, %v259_v46 }
  0xc8   : > { %v919_v52 = vmul.f32 %v1695_v31, %v891_v51  ;;  %1303 = vmatmul.msk.bf16.gmra.mxu2 %vm319_vm0, %v579_v47 }
  0xc9   : > { %1351 = vmatmul.msk.bf16.gmra.mxu3 %vm319_vm0, %v763_v49 }
  0xca   : > { %v947_v33 = vadd.f32 %v1707_v35, %v919_v52 }
  0xcb   : > { %v657_v54 = vpop.f32.mrf.mxu2  ;;  %v382_v58 = vpop.f32.mrf.mxu0 }
  0xcc   : > { %vm971_vm6 = vcmp.ge.f32.partialorder %v947_v33, 0.0  ;;  %v995_v55 = vmul.f32 0.1, %v947_v33  ;;  %v708_v56 = vadd.f32 %v657_v54, %v498_v53  ;;  %v841_v57 = vpop.f32.mrf.mxu3  ;;  %v499_v59 = vpop.f32.mrf.mxu1 }
  0xcd   : > { %v500_v1 = vadd.f32 %v499_v59, %v382_v58 }
  0xce   : > { %v1019_v61 = vsel %vm971_vm6, %v947_v33, %v995_v55  ;;  %v892_v62 = vadd.f32 %v841_v57, %v708_v56 }
  0xcf   : > { %v1375_v63 = vpack.c.bf16 %v1019_v61, %v1018_v60 }
  0xd0   : > { %v920_v0 = vmul.f32 %v1695_v31, %v892_v62 }
  0xd1   : > { %1423 = vst [vmem:[%s1727_s7 + $0x10] sm:$0xff] %v1375_v63  }
  0xd2   : > { %v948_v7 = vadd.f32 %v1707_v35, %v920_v0 }
  0xd3   : > { %v659_v2 = vpop.f32.mrf.mxu2  ;;  %v385_v5 = vpop.f32.mrf.mxu0 }
  0xd4   : > { %v709_v3 = vadd.f32 %v659_v2, %v500_v1  ;;  %v843_v4 = vpop.f32.mrf.mxu3  ;;  %v502_v6 = vpop.f32.mrf.mxu1  ;;  %v996_v11 = vmul.f32 0.1, %v948_v7  ;;  %vm972_vm7 = vcmp.ge.f32.partialorder %v948_v7, 0.0 }
  0xd5   : > { %v503_v10 = vadd.f32 %v502_v6, %v385_v5 }
  0xd6   : > { %v893_v8 = vadd.f32 %v843_v4, %v709_v3  ;;  %v1020_v15 = vsel %vm972_vm7, %v948_v7, %v996_v11 }
  0xd8   : > { %v921_v9 = vmul.f32 %v1695_v31, %v893_v8 }
  0xda   : > { %v949_v12 = vadd.f32 %v1707_v35, %v921_v9 }
  0xdb   : > { %v662_v13 = vpop.f32.mrf.mxu2  ;;  %v387_v19 = vpop.f32.mrf.mxu0 }
  0xdc   : > { %vm973_vm8 = vcmp.ge.f32.partialorder %v949_v12, 0.0  ;;  %v997_v14 = vmul.f32 0.1, %v949_v12  ;;  %v710_v16 = vadd.f32 %v662_v13, %v503_v10  ;;  %v846_v18 = vpop.f32.mrf.mxu3  ;;  %v504_v20 = vpop.f32.mrf.mxu1 }
  0xdd   : > { %v505_v24 = vadd.f32 %v504_v20, %v387_v19 }
  0xde   : > { %v1021_v17 = vsel %vm973_vm8, %v949_v12, %v997_v14  ;;  %v894_v21 = vadd.f32 %v846_v18, %v710_v16 }
  0xdf   : > { %v1380_v22 = vpack.c.bf16 %v1021_v17, %v1020_v15 }
  0xe0   : > { %v922_v23 = vmul.f32 %v1695_v31, %v894_v21 }
  0xe1   : > { %1424 = vst [vmem:[%s1727_s7 + $0x18] sm:$0xff] %v1380_v22  }
  0xe2   : > { %v950_v30 = vadd.f32 %v1707_v35, %v922_v23 }
  0xe3   : > { %v664_v25 = vpop.f32.mrf.mxu2  ;;  %v390_v28 = vpop.f32.mrf.mxu0 }
  0xe4   : > { %v711_v26 = vadd.f32 %v664_v25, %v505_v24  ;;  %v848_v27 = vpop.f32.mrf.mxu3  ;;  %v507_v29 = vpop.f32.mrf.mxu1  ;;  %v998_v37 = vmul.f32 0.1, %v950_v30  ;;  %vm974_vm9 = vcmp.ge.f32.partialorder %v950_v30, 0.0 }
  0xe5   : > { %v508_v36 = vadd.f32 %v507_v29, %v390_v28 }
  0xe6   : > { %v895_v32 = vadd.f32 %v848_v27, %v711_v26  ;;  %v1022_v46 = vsel %vm974_vm9, %v950_v30, %v998_v37 }
  0xe8   : > { %v923_v34 = vmul.f32 %v1695_v31, %v895_v32 }
  0xea   : > { %v951_v39 = vadd.f32 %v1707_v35, %v923_v34 }
  0xeb   : > { %v667_v40 = vpop.f32.mrf.mxu2  ;;  %v392_v44 = vpop.f32.mrf.mxu0 }
  0xec   : > { %vm975_vm10 = vcmp.ge.f32.partialorder %v951_v39, 0.0  ;;  %v999_v41 = vmul.f32 0.1, %v951_v39  ;;  %v712_v42 = vadd.f32 %v667_v40, %v508_v36  ;;  %v851_v43 = vpop.f32.mrf.mxu3  ;;  %v509_v45 = vpop.f32.mrf.mxu1 }
  0xed   : > { %v510_v51 = vadd.f32 %v509_v45, %v392_v44 }
  0xee   : > { %v1023_v47 = vsel %vm975_vm10, %v951_v39, %v999_v41  ;;  %v896_v48 = vadd.f32 %v851_v43, %v712_v42 }
  0xef   : > { %v1385_v49 = vpack.c.bf16 %v1023_v47, %v1022_v46 }
  0xf0   : > { %v924_v50 = vmul.f32 %v1695_v31, %v896_v48 }
  0xf1   : > { %1425 = vst [vmem:[%s1727_s7 + $0x20] sm:$0xff] %v1385_v49  }
  0xf2   : > { %v952_v55 = vadd.f32 %v1707_v35, %v924_v50 }
  0xf3   : > { %v669_v52 = vpop.f32.mrf.mxu2  ;;  %v395_v33 = vpop.f32.mrf.mxu0 }
  0xf4   : > { %v713_v53 = vadd.f32 %v669_v52, %v510_v51  ;;  %v853_v38 = vpop.f32.mrf.mxu3  ;;  %v512_v54 = vpop.f32.mrf.mxu1  ;;  %v1000_v59 = vmul.f32 0.1, %v952_v55  ;;  %vm976_vm11 = vcmp.ge.f32.partialorder %v952_v55, 0.0 }
  0xf5   : > { %v513_v58 = vadd.f32 %v512_v54, %v395_v33 }
  0xf6   : > { %v897_v56 = vadd.f32 %v853_v38, %v713_v53  ;;  %v1024_v3 = vsel %vm976_vm11, %v952_v55, %v1000_v59 }
  0xf8   : > { %v925_v57 = vmul.f32 %v1695_v31, %v897_v56 }
  0xfa   : > { %v953_v60 = vadd.f32 %v1707_v35, %v925_v57 }
  0xfb   : > { %v672_v61 = vpop.f32.mrf.mxu2  ;;  %v397_v1 = vpop.f32.mrf.mxu0 }
  0xfc   : > { %vm977_vm12 = vcmp.ge.f32.partialorder %v953_v60, 0.0  ;;  %v1001_v62 = vmul.f32 0.1, %v953_v60  ;;  %v714_v63 = vadd.f32 %v672_v61, %v513_v58  ;;  %v856_v0 = vpop.f32.mrf.mxu3  ;;  %v514_v2 = vpop.f32.mrf.mxu1 }
  0xfd   : > { %v515_v8 = vadd.f32 %v514_v2, %v397_v1 }
  0xfe   : > { %v1025_v4 = vsel %vm977_vm12, %v953_v60, %v1001_v62  ;;  %v898_v5 = vadd.f32 %v856_v0, %v714_v63 }
  0xff   : > { %v1390_v6 = vpack.c.bf16 %v1025_v4, %v1024_v3 }
 0x100   : > { %v926_v7 = vmul.f32 %v1695_v31, %v898_v5 }
 0x101   : > { %1426 = vst [vmem:[%s1727_s7 + $0x28] sm:$0xff] %v1390_v6  }
 0x102   : > { %v954_v14 = vadd.f32 %v1707_v35, %v926_v7 }
 0x103   : > { %v674_v9 = vpop.f32.mrf.mxu2  ;;  %v400_v12 = vpop.f32.mrf.mxu0 }
 0x104   : > { %v715_v10 = vadd.f32 %v674_v9, %v515_v8  ;;  %v858_v11 = vpop.f32.mrf.mxu3  ;;  %v517_v13 = vpop.f32.mrf.mxu1  ;;  %v1002_v20 = vmul.f32 0.1, %v954_v14  ;;  %vm978_vm13 = vcmp.ge.f32.partialorder %v954_v14, 0.0 }
 0x105   : > { %v518_v19 = vadd.f32 %v517_v13, %v400_v12 }
 0x106   : > { %v899_v16 = vadd.f32 %v858_v11, %v715_v10  ;;  %v1026_v26 = vsel %vm978_vm13, %v954_v14, %v1002_v20 }
 0x108   : > { %v927_v18 = vmul.f32 %v1695_v31, %v899_v16 }
 0x10a   : > { %v955_v15 = vadd.f32 %v1707_v35, %v927_v18 }
 0x10b   : > { %v677_v17 = vpop.f32.mrf.mxu2  ;;  %v402_v24 = vpop.f32.mrf.mxu0 }
 0x10c   : > { %vm979_vm14 = vcmp.ge.f32.partialorder %v955_v15, 0.0  ;;  %v1003_v21 = vmul.f32 0.1, %v955_v15  ;;  %v716_v22 = vadd.f32 %v677_v17, %v518_v19  ;;  %v861_v23 = vpop.f32.mrf.mxu3  ;;  %v519_v25 = vpop.f32.mrf.mxu1 }
 0x10d   : > { %v520_v32 = vadd.f32 %v519_v25, %v402_v24 }
 0x10e   : > { %v1027_v27 = vsel %vm979_vm14, %v955_v15, %v1003_v21  ;;  %v900_v28 = vadd.f32 %v861_v23, %v716_v22 }
 0x10f   : > { %v1395_v29 = vpack.c.bf16 %v1027_v27, %v1026_v26 }
 0x110   : > { %v928_v30 = vmul.f32 %v1695_v31, %v900_v28 }
 0x111   : > { %1427 = vst [vmem:[%s1727_s7 + $0x30] sm:$0xff] %v1395_v29  }
 0x112   : > { %v956_v41 = vadd.f32 %v1707_v35, %v928_v30 }
 0x113   : > { %v679_v34 = vpop.f32.mrf.mxu2  ;;  %v405_v39 = vpop.f32.mrf.mxu0 }
 0x114   : > { %v717_v36 = vadd.f32 %v679_v34, %v520_v32  ;;  %v863_v37 = vpop.f32.mrf.mxu3  ;;  %v522_v40 = vpop.f32.mrf.mxu1  ;;  %v1004_v45 = vmul.f32 0.1, %v956_v41  ;;  %vm980_vm15 = vcmp.ge.f32.partialorder %v956_v41, 0.0 }
 0x115   : > { %v523_v44 = vadd.f32 %v522_v40, %v405_v39 }
 0x116   : > { %v901_v42 = vadd.f32 %v863_v37, %v717_v36  ;;  %v1028_v53 = vsel %vm980_vm15, %v956_v41, %v1004_v45 }
 0x118   : > { %v929_v43 = vmul.f32 %v1695_v31, %v901_v42 }
 0x11a   : > { %v957_v46 = vadd.f32 %v1707_v35, %v929_v43 }
 0x11b   : > { %v682_v47 = vpop.f32.mrf.mxu2  ;;  %v407_v51 = vpop.f32.mrf.mxu0 }
 0x11c   : > { %vm981_vm0 = vcmp.ge.f32.partialorder %v957_v46, 0.0  ;;  %v1005_v48 = vmul.f32 0.1, %v957_v46  ;;  %v718_v49 = vadd.f32 %v682_v47, %v523_v44  ;;  %v866_v50 = vpop.f32.mrf.mxu3  ;;  %v524_v52 = vpop.f32.mrf.mxu1 }
 0x11d   : > { %v525_v56 = vadd.f32 %v524_v52, %v407_v51 }
 0x11e   : > { %v1029_v38 = vsel %vm981_vm0, %v957_v46, %v1005_v48  ;;  %v902_v33 = vadd.f32 %v866_v50, %v718_v49 }
 0x11f   : > { %v1400_v54 = vpack.c.bf16 %v1029_v38, %v1028_v53 }
 0x120   : > { %v930_v55 = vmul.f32 %v1695_v31, %v902_v33 }
 0x121   : > { %1428 = vst [vmem:[%s1727_s7 + $0x38] sm:$0xff] %v1400_v54  }
 0x122   : > { %v958_v62 = vadd.f32 %v1707_v35, %v930_v55 }
 0x123   : > { %v684_v57 = vpop.f32.mrf.mxu2  ;;  %v410_v60 = vpop.f32.mrf.mxu0 }
 0x124   : > { %v719_v58 = vadd.f32 %v684_v57, %v525_v56  ;;  %v868_v59 = vpop.f32.mrf.mxu3  ;;  %v527_v61 = vpop.f32.mrf.mxu1  ;;  %v1006_v2 = vmul.f32 0.1, %v958_v62  ;;  %vm982_vm1 = vcmp.ge.f32.partialorder %v958_v62, 0.0 }
 0x125   : > { %v528_v1 = vadd.f32 %v527_v61, %v410_v60 }
 0x126   : > { %v903_v63 = vadd.f32 %v868_v59, %v719_v58  ;;  %v1030_v10 = vsel %vm982_vm1, %v958_v62, %v1006_v2 }
 0x128   : > { %v931_v0 = vmul.f32 %v1695_v31, %v903_v63 }
 0x12a   : > { %v959_v3 = vadd.f32 %v1707_v35, %v931_v0 }
 0x12b   : > { %v687_v4 = vpop.f32.mrf.mxu2  ;;  %v412_v8 = vpop.f32.mrf.mxu0 }
 0x12c   : > { %vm983_vm2 = vcmp.ge.f32.partialorder %v959_v3, 0.0  ;;  %v1007_v5 = vmul.f32 0.1, %v959_v3  ;;  %v720_v6 = vadd.f32 %v687_v4, %v528_v1  ;;  %v871_v7 = vpop.f32.mrf.mxu3  ;;  %v529_v9 = vpop.f32.mrf.mxu1 }
 0x12d   : > { %v530_v16 = vadd.f32 %v529_v9, %v412_v8 }
 0x12e   : > { %v1031_v11 = vsel %vm983_vm2, %v959_v3, %v1007_v5  ;;  %v904_v12 = vadd.f32 %v871_v7, %v720_v6 }
 0x12f   : > { %v1405_v13 = vpack.c.bf16 %v1031_v11, %v1030_v10 }
 0x130   : > { %v932_v14 = vmul.f32 %v1695_v31, %v904_v12 }
 0x131   : > { %1429 = vst [vmem:[%s1727_s7 + $0x40] sm:$0xff] %v1405_v13  }
 0x132   : > { %v960_v21 = vadd.f32 %v1707_v35, %v932_v14 }
 0x133   : > { %v689_v18 = vpop.f32.mrf.mxu2  ;;  %v415_v15 = vpop.f32.mrf.mxu0 }
 0x134   : > { %v721_v19 = vadd.f32 %v689_v18, %v530_v16  ;;  %v873_v20 = vpop.f32.mrf.mxu3  ;;  %v532_v17 = vpop.f32.mrf.mxu1  ;;  %v1008_v25 = vmul.f32 0.1, %v960_v21  ;;  %vm984_vm3 = vcmp.ge.f32.partialorder %v960_v21, 0.0 }
 0x135   : > { %v533_v24 = vadd.f32 %v532_v17, %v415_v15 }
 0x136   : > { %v905_v22 = vadd.f32 %v873_v20, %v721_v19  ;;  %v1032_v36 = vsel %vm984_vm3, %v960_v21, %v1008_v25 }
 0x138   : > { %v933_v23 = vmul.f32 %v1695_v31, %v905_v22 }
 0x13a   : > { %v961_v26 = vadd.f32 %v1707_v35, %v933_v23 }
 0x13b   : > { %v692_v27 = vpop.f32.mrf.mxu2  ;;  %v417_v32 = vpop.f32.mrf.mxu0 }
 0x13c   : > { %vm985_vm4 = vcmp.ge.f32.partialorder %v961_v26, 0.0  ;;  %v1009_v28 = vmul.f32 0.1, %v961_v26  ;;  %v722_v29 = vadd.f32 %v692_v27, %v533_v24  ;;  %v876_v30 = vpop.f32.mrf.mxu3  ;;  %v534_v34 = vpop.f32.mrf.mxu1 }
 0x13d   : > { %v535_v42 = vadd.f32 %v534_v34, %v417_v32 }
 0x13e   : > { %v1033_v37 = vsel %vm985_vm4, %v961_v26, %v1009_v28  ;;  %v906_v39 = vadd.f32 %v876_v30, %v722_v29 }
 0x13f   : > { %v1410_v40 = vpack.c.bf16 %v1033_v37, %v1032_v36 }
 0x140   : > { %v934_v41 = vmul.f32 %v1695_v31, %v906_v39 }
 0x141   : > { %1430 = vst [vmem:[%s1727_s7 + $0x48] sm:$0xff] %v1410_v40  }
 0x142   : > { %v962_v48 = vadd.f32 %v1707_v35, %v934_v41 }
 0x143   : > { %v694_v43 = vpop.f32.mrf.mxu2  ;;  %v420_v46 = vpop.f32.mrf.mxu0 }
 0x144   : > { %v723_v44 = vadd.f32 %v694_v43, %v535_v42  ;;  %v878_v45 = vpop.f32.mrf.mxu3  ;;  %v537_v47 = vpop.f32.mrf.mxu1  ;;  %v1010_v52 = vmul.f32 0.1, %v962_v48  ;;  %vm986_vm5 = vcmp.ge.f32.partialorder %v962_v48, 0.0 }
 0x145   : > { %v538_v51 = vadd.f32 %v537_v47, %v420_v46 }
 0x146   : > { %v907_v49 = vadd.f32 %v878_v45, %v723_v44  ;;  %v1034_v56 = vsel %vm986_vm5, %v962_v48, %v1010_v52 }
 0x148   : > { %v935_v50 = vmul.f32 %v1695_v31, %v907_v49 }
 0x14a   : > { %v963_v53 = vadd.f32 %v1707_v35, %v935_v50 }
 0x14b   : > { %v697_v38 = vpop.f32.mrf.mxu2  ;;  %v422_v60 = vpop.f32.mrf.mxu0 }
 0x14c   : > { %vm987_vm6 = vcmp.ge.f32.partialorder %v963_v53, 0.0  ;;  %v1011_v33 = vmul.f32 0.1, %v963_v53  ;;  %v724_v54 = vadd.f32 %v697_v38, %v538_v51  ;;  %v881_v55 = vpop.f32.mrf.mxu3  ;;  %v539_v61 = vpop.f32.mrf.mxu1 }
 0x14d   : > { %v540_v63 = vadd.f32 %v539_v61, %v422_v60 }
 0x14e   : > { %v1035_v57 = vsel %vm987_vm6, %v963_v53, %v1011_v33  ;;  %v908_v58 = vadd.f32 %v881_v55, %v724_v54 }
 0x14f   : > { %v1415_v59 = vpack.c.bf16 %v1035_v57, %v1034_v56 }
 0x150   : > { %v936_v62 = vmul.f32 %v1695_v31, %v908_v58 }
 0x151   : > { %1431 = vst [vmem:[%s1727_s7 + $0x50] sm:$0xff] %v1415_v59  }
 0x152   : > { %v964_v3 = vadd.f32 %v1707_v35, %v936_v62 }
 0x153   : > { %v699_v0 = vpop.f32.mrf.mxu2 }
 0x154   : > { %v725_v1 = vadd.f32 %v699_v0, %v540_v63  ;;  %v883_v2 = vpop.f32.mrf.mxu3  ;;  %v1012_v6 = vmul.f32 0.1, %v964_v3  ;;  %vm988_vm7 = vcmp.ge.f32.partialorder %v964_v3, 0.0 }
 0x156   : > { %v909_v4 = vadd.f32 %v883_v2, %v725_v1  ;;  %v1036_v9 = vsel %vm988_vm7, %v964_v3, %v1012_v6 }
 0x158   : > { %v937_v5 = vmul.f32 %v1695_v31, %v909_v4 }
 0x15a   : > { %v965_v7 = vadd.f32 %v1707_v35, %v937_v5 }
 0x15c   : > { %vm989_vm8 = vcmp.ge.f32.partialorder %v965_v7, 0.0  ;;  %v1013_v8 = vmul.f32 0.1, %v965_v7 }
 0x15e   : > { %v1037_v10 = vsel %vm989_vm8, %v965_v7, %v1013_v8 }
 0x15f   : > { %v1420_v11 = vpack.c.bf16 %v1037_v10, %v1036_v9 }
 0x161   : > { %1432 = vst [vmem:[%s1727_s7 + $0x58] sm:$0xff] %v1420_v11  }
 0x162 PF: > { %s14_s19 = sadd.s32 1, %s1515_s19   ;;  %s1826_s15 = smov %s1507_s17 }
 0x163   : > { %p11_p7 = scmp.ge.s32.totalorder %s14_s19, 6   ;;  %s1827_s16 = smov %s1511_s18 }
 0x164   : > { %s1828_s17 = smov %s1831_s20  ;;  %s1829_s18 = smov %s1835_s21 }
 0x165   :  { %13 = sbr.rel (!%p11_p7) target bundleno = 3 (0x3), region = 73 }

// kernel: _lambda_.14
= control target key start
LH: loop header
LB: loop body
LE: loop exit
PB: predicated region body
PF: predicated region fallthrough
CT: control target
= control target key end

     0   :  { %s940_s15 = smov 0   ;;  %s942_s16 = smov 0   ;;  %s1122_s0 = inlined_call_operand.vmem [shape: f32[2,256,16], index: 0, kind: input, shape index: {}]   ;;  %s1123_s1 = inlined_call_operand.vmem [shape: bf16[1,16,128], index: 1, kind: input, shape index: {}]   ;;  %s1124_s2 = inlined_call_operand.vmem [shape: f32[1,128], index: 2, kind: input, shape index: {}]   ;;  %s1125_s3 = inlined_call_operand.vmem [shape: f32[1,128], index: 3, kind: input, shape index: {}]   ;;  %s1126_s4 = inlined_call_operand.vmem [shape: bf16[2,256,128], index: 4, kind: output, shape index: {}]  }
   0x1   :  { %s944_s17 = smov 0  }
   0x2 LB: > { %s26_s18 = sadd.s32 1, %s909_s16  ;;  %p737_p0 = scmp.ge.s32.totalorder %s913_s17, 1  ;;  %s913_s17 = sphi %s944_s17, %s14_s17   ;;  %s909_s16 = sphi %s942_s16, %s1128_s16   ;;  %s905_s15 = sphi %s940_s15, %s1127_s15  }
   0x3   : > { %p28_p1 = scmp.ge.s32.totalorder %s26_s18, 2  ;;  %p176_p2 = scmp.lt.s32.totalorder %s913_s17, 3 }
   0x5   : > { %s1130_s18 = smov (%p28_p1, %s26_s18), 0  ;;  %p177_p3 = pnand %p737_p0, %p176_p2 }
   0x6   : > { %p206_p4 = scmp.lt.s32.totalorder (!%p177_p3), %s905_s15, 1 }
   0x7   : > { %180 = sbr.rel (%p177_p3) target bundleno = 219 (0xdb), region = 36 }
   0xc   : > { %v766_v0 = vld [vmem:[%s1123_s1] sm:$0xff]  ;;  %s1132_s15 = smov (!%p206_p4, %s905_s15), 1  ;;  %vm280_vm0 = vcmask 130048  }
   0xd   : > { %336 = vmatpush.bf16.msra.mxu0 %v766_v0  ;;  %862 = vmatpush.bf16.msra.mxu1 %v766_v0  ;;  %s764_s21 = sshll.u32 %s1132_s15, 8  ;;  %v1020_v49 = vld [vmem:[%s1124_s2] ss:$0 sm:$0xff]  ;;  %s765_s29 = sshll.u32 %s1132_s15, 7 }
   0xe   : > { %863 = vmatpush.bf16.msra.mxu2 %v766_v0  ;;  %864 = vmatpush.bf16.msra.mxu3 %v766_v0  ;;  %s967_s24 = scalar_lea.vmem %s1122_s0, %s764_s21  ;;  %v1026_v53 = vld [vmem:[%s1125_s3] ss:$0 sm:$0xff]  ;;  %s1043_s6 = scalar_lea.vmem %s1126_s4, %s765_s29 }
   0xf   : > { %v224_v1 = vld [vmem:[%s967_s24] sm:$0xff]  ;;  %v225_v2 = vld [vmem:[%s967_s24 + $0x8] sm:$0xff]  ;;  %v226_v13 = vld [vmem:[%s967_s24 + $0x10] sm:$0xff] }
  0x10   : > { %v232_v3 = vld [vmem:[%s967_s24 + $0x40] sm:$0xff]  ;;  %v256_v4 = vpack.c.bf16 %v225_v2, %v224_v1  ;;  %v233_v5 = vld [vmem:[%s967_s24 + $0x48] sm:$0xff]  ;;  %v227_v14 = vld [vmem:[%s967_s24 + $0x18] sm:$0xff] }
  0x11   : > { %v240_v6 = vld [vmem:[%s967_s24 + $0x80] sm:$0xff]  ;;  %v241_v7 = vld [vmem:[%s967_s24 + $0x88] sm:$0xff]  ;;  %v260_v8 = vpack.c.bf16 %v233_v5, %v232_v3  ;;  %v234_v15 = vld [vmem:[%s967_s24 + $0x50] sm:$0xff]  ;;  %v257_v21 = vpack.c.bf16 %v227_v14, %v226_v13 }
  0x12   : > { %v264_v9 = vpack.c.bf16 %v241_v7, %v240_v6  ;;  %v248_v10 = vld [vmem:[%s967_s24 + $0xc0] sm:$0xff]  ;;  %v249_v11 = vld [vmem:[%s967_s24 + $0xc8] sm:$0xff]  ;;  %746 = vmatmul.msk.bf16.vlgmr.msra.gmra.mxu0 %vm280_vm0, %v256_v4  ;;  %v235_v16 = vld [vmem:[%s967_s24 + $0x58] sm:$0xff] }
  0x13   : > { %v268_v12 = vpack.c.bf16 %v249_v11, %v248_v10  ;;  %750 = vmatmul.msk.bf16.vlgmr.msra.gmra.mxu1 %vm280_vm0, %v260_v8  ;;  %v242_v17 = vld [vmem:[%s967_s24 + $0x90] sm:$0xff]  ;;  %v243_v18 = vld [vmem:[%s967_s24 + $0x98] sm:$0xff]  ;;  %v261_v22 = vpack.c.bf16 %v235_v16, %v234_v15  ;;  %v228_v25 = vld [vmem:[%s967_s24 + $0x20] sm:$0xff] }
  0x14   : > { %754 = vmatmul.msk.bf16.vlgmr.msra.gmra.mxu2 %vm280_vm0, %v264_v9  ;;  %v250_v19 = vld [vmem:[%s967_s24 + $0xd0] sm:$0xff]  ;;  %v251_v20 = vld [vmem:[%s967_s24 + $0xd8] sm:$0xff]  ;;  %v265_v23 = vpack.c.bf16 %v243_v18, %v242_v17  ;;  %v229_v26 = vld [vmem:[%s967_s24 + $0x28] sm:$0xff] }
  0x15   : > { %758 = vmatmul.msk.bf16.vlgmr.msra.gmra.mxu3 %vm280_vm0, %v268_v12  ;;  %v269_v24 = vpack.c.bf16 %v251_v20, %v250_v19  ;;  %v236_v27 = vld [vmem:[%s967_s24 + $0x60] sm:$0xff]  ;;  %v237_v28 = vld [vmem:[%s967_s24 + $0x68] sm:$0xff]  ;;  %v258_v33 = vpack.c.bf16 %v229_v26, %v228_v25  ;;  %v230_v37 = vld [vmem:[%s967_s24 + $0x30] sm:$0xff] }
  0x16   : > { %v244_v29 = vld [vmem:[%s967_s24 + $0xa0] sm:$0xff]  ;;  %v245_v30 = vld [vmem:[%s967_s24 + $0xa8] sm:$0xff]  ;;  %v262_v34 = vpack.c.bf16 %v237_v28, %v236_v27  ;;  %v231_v38 = vld [vmem:[%s967_s24 + $0x38] sm:$0xff] }
  0x17   : > { %v252_v31 = vld [vmem:[%s967_s24 + $0xe0] sm:$0xff]  ;;  %v253_v32 = vld [vmem:[%s967_s24 + $0xe8] sm:$0xff]  ;;  %v266_v35 = vpack.c.bf16 %v245_v30, %v244_v29  ;;  %v238_v39 = vld [vmem:[%s967_s24 + $0x70] sm:$0xff]  ;;  %v259_v45 = vpack.c.bf16 %v231_v38, %v230_v37 }
  0x18   : > { %v270_v36 = vpack.c.bf16 %v253_v32, %v252_v31  ;;  %v239_v40 = vld [vmem:[%s967_s24 + $0x78] sm:$0xff]  ;;  %v246_v41 = vld [vmem:[%s967_s24 + $0xb0] sm:$0xff] }
  0x19   : > { %v247_v42 = vld [vmem:[%s967_s24 + $0xb8] sm:$0xff]  ;;  %v254_v43 = vld [vmem:[%s967_s24 + $0xf0] sm:$0xff]  ;;  %v263_v46 = vpack.c.bf16 %v239_v40, %v238_v39 }
  0x1a   : > { %v255_v44 = vld [vmem:[%s967_s24 + $0xf8] sm:$0xff]  ;;  %v267_v47 = vpack.c.bf16 %v247_v42, %v246_v41 }
  0x1b   : > { %v271_v48 = vpack.c.bf16 %v255_v44, %v254_v43 }
  0x22   : > { %747 = vmatmul.msk.bf16.gmra.mxu0 %vm280_vm0, %v257_v21 }
  0x23   : > { %751 = vmatmul.msk.bf16.gmra.mxu1 %vm280_vm0, %v261_v22 }
  0x24   : > { %755 = vmatmul.msk.bf16.gmra.mxu2 %vm280_vm0, %v265_v23 }
  0x25   : > { %759 = vmatmul.msk.bf16.gmra.mxu3 %vm280_vm0, %v269_v24 }
  0x32   : > { %748 = vmatmul.msk.bf16.gmra.mxu0 %vm280_vm0, %v258_v33 }
  0x33   : > { %752 = vmatmul.msk.bf16.gmra.mxu1 %vm280_vm0, %v262_v34 }
  0x34   : > { %756 = vmatmul.msk.bf16.gmra.mxu2 %vm280_vm0, %v266_v35 }
  0x35   : > { %760 = vmatmul.msk.bf16.gmra.mxu3 %vm280_vm0, %v270_v36 }
  0x42   : > { %749 = vmatmul.msk.bf16.gmra.mxu0 %vm280_vm0, %v259_v45 }
  0x43   : > { %753 = vmatmul.msk.bf16.gmra.mxu1 %vm280_vm0, %v263_v46 }
  0x44   : > { %757 = vmatmul.msk.bf16.gmra.mxu2 %vm280_vm0, %v267_v47 }
  0x45   : > { %761 = vmatmul.msk.bf16.gmra.mxu3 %vm280_vm0, %v271_v48 }
  0x8f   : > { %v338_v50 = vpop.f32.mrf.mxu0 }
  0x90   : > { %v358_v51 = vpop.f32.mrf.mxu1  ;;  %v422_v52 = vmul.f32 %v1020_v49, %v338_v50 }
  0x91   : > { %v430_v54 = vmul.f32 %v1020_v49, %v358_v51 }
  0x92   : > { %v458_v55 = vadd.f32 %v1026_v53, %v422_v52 }
  0x93   : > { %v466_v57 = vadd.f32 %v1026_v53, %v430_v54 }
  0x94   : > { %v522_v0 = vmul.f32 0.1, %v458_v55  ;;  %vm490_vm1 = vcmp.ge.f32.partialorder %v458_v55, 0.0 }
  0x95   : > { %v530_v3 = vmul.f32 0.1, %v466_v57  ;;  %vm498_vm2 = vcmp.ge.f32.partialorder %v466_v57, 0.0 }
  0x96   : > { %v554_v8 = vsel %vm490_vm1, %v458_v55, %v522_v0 }
  0x97   : > { %v378_v56 = vpop.f32.mrf.mxu2  ;;  %v340_v59 = vpop.f32.mrf.mxu0  ;;  %v562_v12 = vsel %vm498_vm2, %v466_v57, %v530_v3 }
  0x98   : > { %v398_v58 = vpop.f32.mrf.mxu3  ;;  %v423_v60 = vmul.f32 %v1020_v49, %v340_v59  ;;  %v360_v61 = vpop.f32.mrf.mxu1  ;;  %v438_v62 = vmul.f32 %v1020_v49, %v378_v56 }
  0x99   : > { %v431_v63 = vmul.f32 %v1020_v49, %v360_v61  ;;  %v446_v1 = vmul.f32 %v1020_v49, %v398_v58 }
  0x9a   : > { %v459_v2 = vadd.f32 %v1026_v53, %v423_v60  ;;  %v474_v6 = vadd.f32 %v1026_v53, %v438_v62 }
  0x9b   : > { %v467_v4 = vadd.f32 %v1026_v53, %v431_v63  ;;  %v482_v9 = vadd.f32 %v1026_v53, %v446_v1 }
  0x9c   : > { %vm491_vm3 = vcmp.ge.f32.partialorder %v459_v2, 0.0  ;;  %v523_v5 = vmul.f32 0.1, %v459_v2  ;;  %v538_v21 = vmul.f32 0.1, %v474_v6  ;;  %vm506_vm5 = vcmp.ge.f32.partialorder %v474_v6, 0.0 }
  0x9d   : > { %vm499_vm4 = vcmp.ge.f32.partialorder %v467_v4, 0.0  ;;  %v531_v7 = vmul.f32 0.1, %v467_v4  ;;  %v546_v23 = vmul.f32 0.1, %v482_v9  ;;  %vm514_vm6 = vcmp.ge.f32.partialorder %v482_v9, 0.0 }
  0x9e   : > { %v555_v10 = vsel %vm491_vm3, %v459_v2, %v523_v5  ;;  %v570_v29 = vsel %vm506_vm5, %v474_v6, %v538_v21 }
  0x9f   : > { %v380_v11 = vpop.f32.mrf.mxu2  ;;  %v770_v13 = vpack.c.bf16 %v555_v10, %v554_v8  ;;  %v563_v14 = vsel %vm499_vm4, %v467_v4, %v531_v7  ;;  %v343_v17 = vpop.f32.mrf.mxu0  ;;  %v578_v31 = vsel %vm514_vm6, %v482_v9, %v546_v23 }
  0xa0   : > { %v439_v15 = vmul.f32 %v1020_v49, %v380_v11  ;;  %v400_v16 = vpop.f32.mrf.mxu3  ;;  %v790_v18 = vpack.c.bf16 %v563_v14, %v562_v12  ;;  %v363_v20 = vpop.f32.mrf.mxu1  ;;  %v424_v25 = vmul.f32 %v1020_v49, %v343_v17 }
  0xa1   : > { %v447_v19 = vmul.f32 %v1020_v49, %v400_v16  ;;  %771 = vst [vmem:[%s1043_s6] sm:$0xff] %v770_v13   ;;  %v432_v27 = vmul.f32 %v1020_v49, %v363_v20 }
  0xa2   : > { %v475_v22 = vadd.f32 %v1026_v53, %v439_v15  ;;  %850 = vst [vmem:[%s1043_s6 + $0x20] sm:$0xff] %v790_v18   ;;  %v460_v34 = vadd.f32 %v1026_v53, %v424_v25 }
  0xa3   : > { %v483_v24 = vadd.f32 %v1026_v53, %v447_v19  ;;  %v468_v37 = vadd.f32 %v1026_v53, %v432_v27 }
  0xa4   : > { %vm507_vm7 = vcmp.ge.f32.partialorder %v475_v22, 0.0  ;;  %v539_v26 = vmul.f32 0.1, %v475_v22  ;;  %v524_v44 = vmul.f32 0.1, %v460_v34  ;;  %vm492_vm9 = vcmp.ge.f32.partialorder %v460_v34, 0.0 }
  0xa5   : > { %vm515_vm8 = vcmp.ge.f32.partialorder %v483_v24, 0.0  ;;  %v547_v28 = vmul.f32 0.1, %v483_v24  ;;  %v532_v47 = vmul.f32 0.1, %v468_v37  ;;  %vm500_vm10 = vcmp.ge.f32.partialorder %v468_v37, 0.0 }
  0xa6   : > { %v571_v30 = vsel %vm507_vm7, %v475_v22, %v539_v26  ;;  %v556_v54 = vsel %vm492_vm9, %v460_v34, %v524_v44 }
  0xa7   : > { %v810_v32 = vpack.c.bf16 %v571_v30, %v570_v29  ;;  %v579_v33 = vsel %vm515_vm8, %v483_v24, %v547_v28  ;;  %v383_v35 = vpop.f32.mrf.mxu2  ;;  %v345_v39 = vpop.f32.mrf.mxu0  ;;  %v564_v58 = vsel %vm500_vm10, %v468_v37, %v532_v47 }
  0xa8   : > { %v830_v36 = vpack.c.bf16 %v579_v33, %v578_v31  ;;  %v403_v38 = vpop.f32.mrf.mxu3  ;;  %v425_v40 = vmul.f32 %v1020_v49, %v345_v39  ;;  %v365_v41 = vpop.f32.mrf.mxu1  ;;  %v440_v42 = vmul.f32 %v1020_v49, %v383_v35 }
  0xa9   : > { %854 = vst [vmem:[%s1043_s6 + $0x40] sm:$0xff] %v810_v32   ;;  %v433_v43 = vmul.f32 %v1020_v49, %v365_v41  ;;  %v448_v45 = vmul.f32 %v1020_v49, %v403_v38 }
  0xaa   : > { %858 = vst [vmem:[%s1043_s6 + $0x60] sm:$0xff] %v830_v36   ;;  %v461_v46 = vadd.f32 %v1026_v53, %v425_v40  ;;  %v476_v51 = vadd.f32 %v1026_v53, %v440_v42 }
  0xab   : > { %v469_v48 = vadd.f32 %v1026_v53, %v433_v43  ;;  %v484_v55 = vadd.f32 %v1026_v53, %v448_v45 }
  0xac   : > { %vm493_vm11 = vcmp.ge.f32.partialorder %v461_v46, 0.0  ;;  %v525_v50 = vmul.f32 0.1, %v461_v46  ;;  %v540_v3 = vmul.f32 0.1, %v476_v51  ;;  %vm508_vm13 = vcmp.ge.f32.partialorder %v476_v51, 0.0 }
  0xad   : > { %vm501_vm12 = vcmp.ge.f32.partialorder %v469_v48, 0.0  ;;  %v533_v52 = vmul.f32 0.1, %v469_v48  ;;  %v548_v5 = vmul.f32 0.1, %v484_v55  ;;  %vm516_vm14 = vcmp.ge.f32.partialorder %v484_v55, 0.0 }
  0xae   : > { %v557_v56 = vsel %vm493_vm11, %v461_v46, %v525_v50  ;;  %v572_v11 = vsel %vm508_vm13, %v476_v51, %v540_v3 }
  0xaf   : > { %v385_v57 = vpop.f32.mrf.mxu2  ;;  %v775_v59 = vpack.c.bf16 %v557_v56, %v556_v54  ;;  %v565_v60 = vsel %vm501_vm12, %v469_v48, %v533_v52  ;;  %v348_v63 = vpop.f32.mrf.mxu0  ;;  %v580_v13 = vsel %vm516_vm14, %v484_v55, %v548_v5 }
  0xb0   : > { %v441_v61 = vmul.f32 %v1020_v49, %v385_v57  ;;  %v405_v62 = vpop.f32.mrf.mxu3  ;;  %v795_v0 = vpack.c.bf16 %v565_v60, %v564_v58  ;;  %v368_v2 = vpop.f32.mrf.mxu1  ;;  %v426_v7 = vmul.f32 %v1020_v49, %v348_v63 }
  0xb1   : > { %v449_v1 = vmul.f32 %v1020_v49, %v405_v62  ;;  %847 = vst [vmem:[%s1043_s6 + $0x8] sm:$0xff] %v775_v59   ;;  %v434_v9 = vmul.f32 %v1020_v49, %v368_v2 }
  0xb2   : > { %v477_v4 = vadd.f32 %v1026_v53, %v441_v61  ;;  %851 = vst [vmem:[%s1043_s6 + $0x28] sm:$0xff] %v795_v0   ;;  %v462_v16 = vadd.f32 %v1026_v53, %v426_v7 }
  0xb3   : > { %v485_v6 = vadd.f32 %v1026_v53, %v449_v1  ;;  %v470_v19 = vadd.f32 %v1026_v53, %v434_v9 }
  0xb4   : > { %vm509_vm15 = vcmp.ge.f32.partialorder %v477_v4, 0.0  ;;  %v541_v8 = vmul.f32 0.1, %v477_v4  ;;  %v526_v26 = vmul.f32 0.1, %v462_v16  ;;  %vm494_vm1 = vcmp.ge.f32.partialorder %v462_v16, 0.0 }
  0xb5   : > { %vm517_vm0 = vcmp.ge.f32.partialorder %v485_v6, 0.0  ;;  %v549_v10 = vmul.f32 0.1, %v485_v6  ;;  %v534_v29 = vmul.f32 0.1, %v470_v19  ;;  %vm502_vm2 = vcmp.ge.f32.partialorder %v470_v19, 0.0 }
  0xb6   : > { %v573_v12 = vsel %vm509_vm15, %v477_v4, %v541_v8  ;;  %v558_v34 = vsel %vm494_vm1, %v462_v16, %v526_v26 }
  0xb7   : > { %v815_v14 = vpack.c.bf16 %v573_v12, %v572_v11  ;;  %v581_v15 = vsel %vm517_vm0, %v485_v6, %v549_v10  ;;  %v388_v17 = vpop.f32.mrf.mxu2  ;;  %v350_v21 = vpop.f32.mrf.mxu0  ;;  %v566_v38 = vsel %vm502_vm2, %v470_v19, %v534_v29 }
  0xb8   : > { %v835_v18 = vpack.c.bf16 %v581_v15, %v580_v13  ;;  %v408_v20 = vpop.f32.mrf.mxu3  ;;  %v427_v22 = vmul.f32 %v1020_v49, %v350_v21  ;;  %v370_v23 = vpop.f32.mrf.mxu1  ;;  %v442_v24 = vmul.f32 %v1020_v49, %v388_v17 }
  0xb9   : > { %855 = vst [vmem:[%s1043_s6 + $0x48] sm:$0xff] %v815_v14   ;;  %v435_v25 = vmul.f32 %v1020_v49, %v370_v23  ;;  %v450_v27 = vmul.f32 %v1020_v49, %v408_v20 }
  0xba   : > { %859 = vst [vmem:[%s1043_s6 + $0x68] sm:$0xff] %v835_v18   ;;  %v463_v28 = vadd.f32 %v1026_v53, %v427_v22  ;;  %v478_v32 = vadd.f32 %v1026_v53, %v442_v24 }
  0xbb   : > { %v471_v30 = vadd.f32 %v1026_v53, %v435_v25  ;;  %v486_v35 = vadd.f32 %v1026_v53, %v450_v27 }
  0xbc   : > { %vm495_vm3 = vcmp.ge.f32.partialorder %v463_v28, 0.0  ;;  %v527_v31 = vmul.f32 0.1, %v463_v28  ;;  %v542_v47 = vmul.f32 0.1, %v478_v32  ;;  %vm510_vm5 = vcmp.ge.f32.partialorder %v478_v32, 0.0 }
  0xbd   : > { %vm503_vm4 = vcmp.ge.f32.partialorder %v471_v30, 0.0  ;;  %v535_v33 = vmul.f32 0.1, %v471_v30  ;;  %v550_v50 = vmul.f32 0.1, %v486_v35  ;;  %vm518_vm6 = vcmp.ge.f32.partialorder %v486_v35, 0.0 }
  0xbe   : > { %v559_v36 = vsel %vm495_vm3, %v463_v28, %v527_v31  ;;  %v574_v57 = vsel %vm510_vm5, %v478_v32, %v542_v47 }
  0xbf   : > { %v390_v37 = vpop.f32.mrf.mxu2  ;;  %v780_v39 = vpack.c.bf16 %v559_v36, %v558_v34  ;;  %v567_v40 = vsel %vm503_vm4, %v471_v30, %v535_v33  ;;  %v353_v43 = vpop.f32.mrf.mxu0  ;;  %v582_v59 = vsel %vm518_vm6, %v486_v35, %v550_v50 }
  0xc0   : > { %v443_v41 = vmul.f32 %v1020_v49, %v390_v37  ;;  %v410_v42 = vpop.f32.mrf.mxu3  ;;  %v800_v44 = vpack.c.bf16 %v567_v40, %v566_v38  ;;  %v373_v46 = vpop.f32.mrf.mxu1  ;;  %v428_v52 = vmul.f32 %v1020_v49, %v353_v43 }
  0xc1   : > { %v451_v45 = vmul.f32 %v1020_v49, %v410_v42  ;;  %848 = vst [vmem:[%s1043_s6 + $0x10] sm:$0xff] %v780_v39   ;;  %v436_v55 = vmul.f32 %v1020_v49, %v373_v46 }
  0xc2   : > { %v479_v48 = vadd.f32 %v1026_v53, %v443_v41  ;;  %852 = vst [vmem:[%s1043_s6 + $0x30] sm:$0xff] %v800_v44   ;;  %v464_v62 = vadd.f32 %v1026_v53, %v428_v52 }
  0xc3   : > { %v487_v51 = vadd.f32 %v1026_v53, %v451_v45  ;;  %v472_v1 = vadd.f32 %v1026_v53, %v436_v55 }
  0xc4   : > { %vm511_vm7 = vcmp.ge.f32.partialorder %v479_v48, 0.0  ;;  %v543_v54 = vmul.f32 0.1, %v479_v48  ;;  %v528_v8 = vmul.f32 0.1, %v464_v62  ;;  %vm496_vm9 = vcmp.ge.f32.partialorder %v464_v62, 0.0 }
  0xc5   : > { %vm519_vm8 = vcmp.ge.f32.partialorder %v487_v51, 0.0  ;;  %v551_v56 = vmul.f32 0.1, %v487_v51  ;;  %v536_v11 = vmul.f32 0.1, %v472_v1  ;;  %vm504_vm10 = vcmp.ge.f32.partialorder %v472_v1, 0.0 }
  0xc6   : > { %v575_v58 = vsel %vm511_vm7, %v479_v48, %v543_v54  ;;  %v560_v16 = vsel %vm496_vm9, %v464_v62, %v528_v8 }
  0xc7   : > { %v820_v60 = vpack.c.bf16 %v575_v58, %v574_v57  ;;  %v583_v61 = vsel %vm519_vm8, %v487_v51, %v551_v56  ;;  %v393_v63 = vpop.f32.mrf.mxu2  ;;  %v355_v3 = vpop.f32.mrf.mxu0  ;;  %v568_v20 = vsel %vm504_vm10, %v472_v1, %v536_v11 }
  0xc8   : > { %v840_v0 = vpack.c.bf16 %v583_v61, %v582_v59  ;;  %v413_v2 = vpop.f32.mrf.mxu3  ;;  %v429_v4 = vmul.f32 %v1020_v49, %v355_v3  ;;  %v375_v5 = vpop.f32.mrf.mxu1  ;;  %v444_v6 = vmul.f32 %v1020_v49, %v393_v63 }
  0xc9   : > { %856 = vst [vmem:[%s1043_s6 + $0x50] sm:$0xff] %v820_v60   ;;  %v437_v7 = vmul.f32 %v1020_v49, %v375_v5  ;;  %v452_v9 = vmul.f32 %v1020_v49, %v413_v2 }
  0xca   : > { %860 = vst [vmem:[%s1043_s6 + $0x70] sm:$0xff] %v840_v0   ;;  %v465_v10 = vadd.f32 %v1026_v53, %v429_v4  ;;  %v480_v14 = vadd.f32 %v1026_v53, %v444_v6 }
  0xcb   : > { %v473_v12 = vadd.f32 %v1026_v53, %v437_v7  ;;  %v488_v17 = vadd.f32 %v1026_v53, %v452_v9 }
  0xcc   : > { %vm497_vm11 = vcmp.ge.f32.partialorder %v465_v10, 0.0  ;;  %v529_v13 = vmul.f32 0.1, %v465_v10  ;;  %v544_v27 = vmul.f32 0.1, %v480_v14  ;;  %vm512_vm13 = vcmp.ge.f32.partialorder %v480_v14, 0.0 }
  0xcd   : > { %vm505_vm12 = vcmp.ge.f32.partialorder %v473_v12, 0.0  ;;  %v537_v15 = vmul.f32 0.1, %v473_v12  ;;  %v552_v29 = vmul.f32 0.1, %v488_v17  ;;  %vm520_vm14 = vcmp.ge.f32.partialorder %v488_v17, 0.0 }
  0xce   : > { %v561_v18 = vsel %vm497_vm11, %v465_v10, %v529_v13  ;;  %v576_v33 = vsel %vm512_vm13, %v480_v14, %v544_v27 }
  0xcf   : > { %v395_v19 = vpop.f32.mrf.mxu2  ;;  %v785_v21 = vpack.c.bf16 %v561_v18, %v560_v16  ;;  %v569_v22 = vsel %vm505_vm12, %v473_v12, %v537_v15  ;;  %v584_v35 = vsel %vm520_vm14, %v488_v17, %v552_v29 }
  0xd0   : > { %v445_v23 = vmul.f32 %v1020_v49, %v395_v19  ;;  %v415_v24 = vpop.f32.mrf.mxu3  ;;  %v805_v25 = vpack.c.bf16 %v569_v22, %v568_v20 }
  0xd1   : > { %v453_v26 = vmul.f32 %v1020_v49, %v415_v24  ;;  %849 = vst [vmem:[%s1043_s6 + $0x18] sm:$0xff] %v785_v21  }
  0xd2   : > { %v481_v28 = vadd.f32 %v1026_v53, %v445_v23  ;;  %853 = vst [vmem:[%s1043_s6 + $0x38] sm:$0xff] %v805_v25  }
  0xd3   : > { %v489_v30 = vadd.f32 %v1026_v53, %v453_v26 }
  0xd4   : > { %vm513_vm15 = vcmp.ge.f32.partialorder %v481_v28, 0.0  ;;  %v545_v31 = vmul.f32 0.1, %v481_v28 }
  0xd5   : > { %vm521_vm0 = vcmp.ge.f32.partialorder %v489_v30, 0.0  ;;  %v553_v32 = vmul.f32 0.1, %v489_v30 }
  0xd6   : > { %v577_v34 = vsel %vm513_vm15, %v481_v28, %v545_v31 }
  0xd7   : > { %v825_v49 = vpack.c.bf16 %v577_v34, %v576_v33  ;;  %v585_v36 = vsel %vm521_vm0, %v489_v30, %v553_v32 }
  0xd8   : > { %v845_v37 = vpack.c.bf16 %v585_v36, %v584_v35 }
  0xd9   : > { %857 = vst [vmem:[%s1043_s6 + $0x58] sm:$0xff] %v825_v49  }
  0xda   : > { %861 = vst [vmem:[%s1043_s6 + $0x78] sm:$0xff] %v845_v37  }
  0xdb PF: > { %s14_s17 = sadd.s32 1, %s913_s17   ;;  %s1127_s15 = smov %s909_s16 }
  0xdc   : > { %p11_p5 = scmp.ge.s32.totalorder %s14_s17, 4   ;;  %s1128_s16 = smov %s1130_s18 }
  0xde   :  { %13 = sbr.rel (!%p11_p5) target bundleno = 2 (0x2), region = 67 }

// kernel: _lambda_.15
= control target key start
LH: loop header
LB: loop body
LE: loop exit
PB: predicated region body
PF: predicated region fallthrough
CT: control target
= control target key end

     0   :  { %s2509_s15 = smov 0   ;;  %s2511_s16 = smov 0   ;;  %s3306_s0 = inlined_call_operand.vmem [shape: f32[2,456,8], index: 0, kind: input, shape index: {}]   ;;  %s3307_s1 = inlined_call_operand.vmem [shape: bf16[9,8,128], index: 1, kind: input, shape index: {}]   ;;  %s3308_s2 = inlined_call_operand.vmem [shape: f32[1,128], index: 2, kind: input, shape index: {}]   ;;  %s3309_s3 = inlined_call_operand.vmem [shape: f32[1,128], index: 3, kind: input, shape index: {}]   ;;  %s3310_s4 = inlined_call_operand.vmem [shape: bf16[2,384,128], index: 4, kind: output, shape index: {}]  }
   0x1   :  { %s2513_s17 = smov 0   ;;  %s2515_s18 = smov 0  }
   0x2   :  { %s2517_s19 = smov 0  }
   0x3 LB: > { %s23_s20 = sadd.s32 1, %s2474_s17  ;;  %s26_s21 = sadd.s32 1, %s2478_s18  ;;  %s2482_s19 = sphi %s2517_s19, %s14_s19   ;;  %s2478_s18 = sphi %s2515_s18, %s3389_s18   ;;  %s2474_s17 = sphi %s2513_s17, %s3388_s17   ;;  %s2470_s16 = sphi %s2511_s16, %s3387_s16   ;;  %s2466_s15 = sphi %s2509_s15, %s3386_s15  }
   0x4   : > { %p24_p0 = scmp.ge.s32.totalorder %s23_s20, 2  ;;  %p2013_p1 = scmp.ge.s32.totalorder %s2482_s19, 1 }
   0x5   : > { %p176_p2 = scmp.lt.s32.totalorder %s2482_s19, 5 }
   0x6   : > { %s3391_s20 = smov (%p24_p0, %s23_s20), 0  ;;  %s3393_s21 = smov (!%p24_p0, %s26_s21), %s2478_s18 }
   0x7   : > { %p177_p3 = pnand %p2013_p1, %p176_p2  ;;  %p28_p4 = scmp.ge.s32.totalorder %s3393_s21, 2 }
   0x9   : > { %s3395_s21 = smov (%p28_p4, %s3393_s21), 0  ;;  %180 = sbr.rel (%p177_p3) target bundleno = 597 (0x255), region = 36 }
   0xe   : > { %v2040_v0 = vld [vmem:[%s3307_s1 + $0x4] sm:$0xf]  ;;  %vm338_vm0 = vcmask 1043456   ;;  %p206_p5 = scmp.lt.s32.totalorder %s2470_s16, 1  ;;  %v2089_v2 = vld [vmem:[%s3307_s1 + $0x8] sm:$0xf] }
   0xf   : > { %v340_v1 = vsel %vm338_vm0, %v2040_v0, 0  ;;  %v2126_v3 = vld [vmem:[%s3307_s1 + $0xc] sm:$0xf]  ;;  %v596_v4 = vsel %vm338_vm0, %v2089_v2, 0  ;;  %v260_v6 = vld [vmem:[%s3307_s1] sm:$0xf] }
  0x10   : > { %2397 = vmatpush.bf16.msra.mxu1 %v340_v1  ;;  %2398 = vmatpush.bf16.msra.mxu2 %v340_v1  ;;  %s3397_s16 = smov (!%p206_p5, %s2470_s16), 1  ;;  %v768_v5 = vsel %vm338_vm0, %v2126_v3, 0  ;;  %s222_s30 = smul.u32 192, %s2466_s15  ;;  %v448_v7 = vsel %vm338_vm0, %v260_v6, 0  ;;  %v2163_v8 = vld [vmem:[%s3307_s1 + $0x10] sm:$0xf] }
  0x11   : > { %2399 = vmatpush.bf16.msra.mxu3 %v340_v1  ;;  %349 = vmatpush.bf16.msra.mxu0 %v340_v1  ;;  %s2400_s7 = smul.u32 456, %s3397_s16  ;;  %v940_v9 = vsel %vm338_vm0, %v2163_v8, 0  ;;  %vm301_vm1 = vcmask 64512   ;;  %v2237_v34 = vld [vmem:[%s3307_s1 + $0x18] sm:$0xf] }
  0x12   : > { %v1284_v35 = vsel %vm338_vm0, %v2237_v34, 0  ;;  %v2274_v36 = vld [vmem:[%s3307_s1 + $0x1c] sm:$0xf]  ;;  %v2200_v37 = vld [vmem:[%s3307_s1 + $0x14] sm:$0xf]  ;;  %s211_s27 = smul.u32 24, %s2466_s15 }
  0x13   : > { %s210_s10 = scalar_lea.vmem %s3306_s0, %s2400_s7  ;;  %v1456_v38 = vsel %vm338_vm0, %v2274_v36, 0  ;;  %v1112_v39 = vsel %vm338_vm0, %v2200_v37, 0  ;;  %v2311_v40 = vld [vmem:[%s3307_s1 + $0x20] sm:$0xf]  ;;  %s2401_s6 = smul.u32 48, %s3397_s16 }
  0x14   : > { %605 = vmatpush.bf16.msrb.mxu2 %v596_v4  ;;  %457 = vmatpush.bf16.msrb.mxu1 %v448_v7  ;;  %s2568_s11 = scalar_lea.vmem %s210_s10, %s222_s30  ;;  %v1628_v41 = vsel %vm338_vm0, %v2311_v40, 0  ;;  %p3155_p6 = scmp.lt.s32.totalorder %s211_s27, 47 }
  0x15   : > { %777 = vmatpush.bf16.msrb.mxu3 %v768_v5  ;;  %949 = vmatpush.bf16.msrb.mxu0 %v940_v9  ;;  %v2571_v10 = vld [vmem:[%s2568_s11 + $0x31] sm:$0xff]  ;;  %v2574_v11 = vld [vmem:[%s2568_s11 + $0x39] sm:$0xff]  ;;  %v2577_v12 = vld [vmem:[%s2568_s11 + $0x61] sm:$0xff] }
  0x16   : > { %v2581_v13 = vpack.c.bf16 %v2574_v11, %v2571_v10  ;;  %v2584_v14 = vld [vmem:[%s2568_s11 + $0x69] sm:$0xff]  ;;  %v2587_v15 = vld [vmem:[%s2568_s11 + $0x91] sm:$0xff]  ;;  %v2590_v16 = vld [vmem:[%s2568_s11 + $0x99] sm:$0xff]  ;;  %s3399_s27 = smov (!%p3155_p6, %s211_s27), 47 }
  0x17   : > { %v2594_v17 = vpack.c.bf16 %v2584_v14, %v2577_v12  ;;  %v296_v18 = vpack.c.bf16 %v2590_v16, %v2587_v15  ;;  %v2016_v19 = vld [vmem:[%s2568_s11 + $0x1] sm:$0xff]  ;;  %v2017_v20 = vld [vmem:[%s2568_s11 + $0x9] sm:$0xff]  ;;  %v2613_v24 = vld [vmem:[%s2568_s11 + $0x71] sm:$0xff]  ;;  %s217_s7 = sadd.s32 %s2401_s6, %s3399_s27 }
  0x18   : > { %2044 = vmatmul.msk.bf16.vlgmr.msra.gmra.mxu1 %vm301_vm1, %v2581_v13  ;;  %v287_v21 = vpack.c.bf16 %v2017_v20, %v2016_v19  ;;  %v2607_v22 = vld [vmem:[%s2568_s11 + $0x41] sm:$0xff]  ;;  %v2610_v23 = vld [vmem:[%s2568_s11 + $0x49] sm:$0xff]  ;;  %v2616_v25 = vld [vmem:[%s2568_s11 + $0x79] sm:$0xff]  ;;  %s2015_s16 = sshll.u32 %s217_s7, 2 }
  0x19   : > { %2047 = vmatmul.msk.bf16.vlgmr.msra.gmra.mxu2 %vm301_vm1, %v2594_v17  ;;  %2050 = vmatmul.msk.bf16.vlgmr.msra.gmra.mxu3 %vm301_vm1, %v296_v18  ;;  %v2619_v26 = vld [vmem:[%s2568_s11 + $0xa1] sm:$0xff]  ;;  %v2622_v27 = vld [vmem:[%s2568_s11 + $0xa9] sm:$0xff]  ;;  %v2018_v28 = vld [vmem:[%s2568_s11 + $0x11] sm:$0xff]  ;;  %v2628_v30 = vpack.c.bf16 %v2610_v23, %v2607_v22  ;;  %v2632_v31 = vpack.c.bf16 %v2616_v25, %v2613_v24  ;;  %v891_v0 = vpack.c.bf16 %v2607_v22, %v2574_v11  ;;  %s3190_s10 = scalar_lea.vmem %s3310_s4, %s2015_s16 }
  0x1a   : > { %2041 = vmatmul.msk.bf16.vlgmr.msra.gmra.mxu0 %vm301_vm1, %v287_v21  ;;  %v2019_v29 = vld [vmem:[%s2568_s11 + $0x19] sm:$0xff]  ;;  %v297_v32 = vpack.c.bf16 %v2622_v27, %v2619_v26  ;;  %1293 = vmatpush.bf16.msra.mxu2 %v1284_v35  ;;  %v2659_v42 = vld [vmem:[%s2568_s11 + $0x51] sm:$0xff]  ;;  %v2665_v44 = vld [vmem:[%s2568_s11 + $0x81] sm:$0xff] }
  0x1b   : > { %v288_v33 = vpack.c.bf16 %v2019_v29, %v2018_v28  ;;  %1465 = vmatpush.bf16.msra.mxu3 %v1456_v38  ;;  %1121 = vmatpush.bf16.msra.mxu1 %v1112_v39  ;;  %v2662_v43 = vld [vmem:[%s2568_s11 + $0x59] sm:$0xff]  ;;  %v2668_v45 = vld [vmem:[%s2568_s11 + $0x89] sm:$0xff]  ;;  %v2671_v46 = vld [vmem:[%s2568_s11 + $0xb1] sm:$0xff]  ;;  %v892_v11 = vpack.c.bf16 %v2659_v42, %v2610_v23 }
  0x1c   : > { %1637 = vmatpush.bf16.msra.mxu0 %v1628_v41  ;;  %v2674_v47 = vld [vmem:[%s2568_s11 + $0xb9] sm:$0xff]  ;;  %v2020_v48 = vld [vmem:[%s2568_s11 + $0x21] sm:$0xff]  ;;  %v2021_v49 = vld [vmem:[%s2568_s11 + $0x29] sm:$0xff]  ;;  %v2680_v50 = vpack.c.bf16 %v2662_v43, %v2659_v42  ;;  %v2684_v51 = vpack.c.bf16 %v2668_v45, %v2665_v44 }
  0x1d   : > { %v298_v52 = vpack.c.bf16 %v2674_v47, %v2671_v46  ;;  %v289_v53 = vpack.c.bf16 %v2021_v49, %v2020_v48  ;;  %v224_v54 = vld [vmem:[%s2568_s11] sm:$0xff]  ;;  %v225_v55 = vld [vmem:[%s2568_s11 + $0x8] sm:$0xff]  ;;  %v2102_v58 = vld [vmem:[%s2568_s11 + $0x18] sm:$0xff]  ;;  %v889_v63 = vpack.c.bf16 %v2020_v48, %v2019_v29  ;;  %v890_v9 = vpack.c.bf16 %v2571_v10, %v2021_v49 }
  0x1e   : > { %3327 = vst [vmem:[#allocation2_spill] sm:$0xff] %v2684_v51  ;;  %v2065_v56 = vld [vmem:[%s2568_s11 + $0x2] sm:$0xff]  ;;  %v2066_v57 = vld [vmem:[%s2568_s11 + $0xa] sm:$0xff]  ;;  %v248_v60 = vpack.c.bf16 %v225_v55, %v224_v54  ;;  %v2067_v2 = vld [vmem:[%s2568_s11 + $0x12] sm:$0xff]  ;;  %v893_v49 = vpack.c.bf16 %v2577_v12, %v2662_v43 }
  0x1f   : > { %v2103_v59 = vld [vmem:[%s2568_s11 + $0x20] sm:$0xff]  ;;  %v545_v61 = vpack.c.bf16 %v2066_v57, %v2065_v56  ;;  %v226_v1 = vld [vmem:[%s2568_s11 + $0x10] sm:$0xff]  ;;  %v2104_v4 = vld [vmem:[%s2568_s11 + $0x28] sm:$0xff] }
  0x20   : > { %v717_v62 = vpack.c.bf16 %v2103_v59, %v2102_v58  ;;  %v2709_v3 = vld [vmem:[%s2568_s11 + $0x1a] sm:$0xff]  ;;  %v2105_v5 = vld [vmem:[%s2568_s11 + $0x30] sm:$0xff]  ;;  %v249_v6 = vpack.c.bf16 %v2102_v58, %v226_v1  ;;  %v2722_v18 = vld [vmem:[%s2568_s11 + $0x22] sm:$0xff]  ;;  %v250_v21 = vpack.c.bf16 %v2104_v4, %v2103_v59  ;;  %v894_v58 = vpack.c.bf16 %v2613_v24, %v2584_v14 }
  0x21   : > { %v546_v7 = vpack.c.bf16 %v2709_v3, %v2067_v2  ;;  %v718_v8 = vpack.c.bf16 %v2105_v5, %v2104_v4  ;;  %v2725_v19 = vld [vmem:[%s2568_s11 + $0x2a] sm:$0xff]  ;;  %v2106_v10 = vld [vmem:[%s2568_s11 + $0x38] sm:$0xff]  ;;  %v2107_v20 = vld [vmem:[%s2568_s11 + $0x40] sm:$0xff] }
  0x22   : > { %v547_v22 = vpack.c.bf16 %v2725_v19, %v2722_v18  ;;  %v719_v28 = vpack.c.bf16 %v2107_v20, %v2106_v10  ;;  %v2736_v23 = vld [vmem:[%s2568_s11 + $0x32] sm:$0xff]  ;;  %v2739_v29 = vld [vmem:[%s2568_s11 + $0x3a] sm:$0xff]  ;;  %v2743_v34 = vpack.c.bf16 %v2106_v10, %v2105_v5  ;;  %v2756_v37 = vld [vmem:[%s2568_s11 + $0x42] sm:$0xff] }
  0x23   : > { %v2747_v35 = vpack.c.bf16 %v2739_v29, %v2736_v23  ;;  %v2759_v38 = vld [vmem:[%s2568_s11 + $0x4a] sm:$0xff]  ;;  %v2110_v39 = vld [vmem:[%s2568_s11 + $0x58] sm:$0xff]  ;;  %v2111_v40 = vld [vmem:[%s2568_s11 + $0x60] sm:$0xff] }
  0x24   : > { %v2767_v42 = vpack.c.bf16 %v2759_v38, %v2756_v37  ;;  %v721_v48 = vpack.c.bf16 %v2111_v40, %v2110_v39  ;;  %v2112_v54 = vld [vmem:[%s2568_s11 + $0x68] sm:$0xff]  ;;  %v2113_v55 = vld [vmem:[%s2568_s11 + $0x70] sm:$0xff]  ;;  %v2114_v24 = vld [vmem:[%s2568_s11 + $0x78] sm:$0xff] }
  0x25   : > { %v722_v57 = vpack.c.bf16 %v2113_v55, %v2112_v54  ;;  %v2811_v14 = vld [vmem:[%s2568_s11 + $0x6a] sm:$0xff]  ;;  %v2115_v1 = vld [vmem:[%s2568_s11 + $0x80] sm:$0xff]  ;;  %v2819_v5 = vpack.c.bf16 %v2112_v54, %v2111_v40  ;;  %v896_v54 = vpack.c.bf16 %v2587_v15, %v2668_v45 }
  0x26   : > { %3329 = vst [vmem:[#allocation4_spill] sm:$0xff] %v2811_v14  ;;  %v2884_v15 = vld [vmem:[%s2568_s11 + $0x82] sm:$0xff]  ;;  %v2887_v45 = vld [vmem:[%s2568_s11 + $0x8a] sm:$0xff] }
  0x27   : > { %3338 = vst [vmem:[#allocation13_spill] sm:$0xff] %v2884_v15 }
  0x28   : > { %2045 = vmatmul.msk.bf16.gmra.mxu1 %vm301_vm1, %v2628_v30  ;;  %3339 = vst [vmem:[#allocation14_spill] sm:$0xff] %v2887_v45 }
  0x29   : > { %2048 = vmatmul.msk.bf16.gmra.mxu2 %vm301_vm1, %v2632_v31  ;;  %2051 = vmatmul.msk.bf16.gmra.mxu3 %vm301_vm1, %v297_v32  ;;  %v2108_v32 = vld [vmem:[%s2568_s11 + $0x48] sm:$0xff] }
  0x2a   : > { %2042 = vmatmul.msk.bf16.gmra.mxu0 %vm301_vm1, %v288_v33  ;;  %v2109_v33 = vld [vmem:[%s2568_s11 + $0x50] sm:$0xff]  ;;  %v2763_v41 = vpack.c.bf16 %v2108_v32, %v2107_v20 }
  0x2b   : > { %v720_v36 = vpack.c.bf16 %v2109_v33, %v2108_v32  ;;  %v2785_v56 = vpack.c.bf16 %v2110_v39, %v2109_v33  ;;  %v2117_v32 = vld [vmem:[%s2568_s11 + $0x90] sm:$0xff]  ;;  %v2857_v39 = vpack.c.bf16 %v2114_v24, %v2113_v55 }
  0x38   : > { %2046 = vmatmul.msk.bf16.gmra.mxu1 %vm301_vm1, %v2680_v50 }
  0x39   : > { %2049 = vmatmul.msk.bf16.gmra.mxu2 %vm301_vm1, %v2684_v51  ;;  %2052 = vmatmul.msk.bf16.gmra.mxu3 %vm301_vm1, %v298_v52  ;;  %v2778_v52 = vld [vmem:[%s2568_s11 + $0x52] sm:$0xff]  ;;  %v897_v51 = vpack.c.bf16 %v2619_v26, %v2590_v16 }
  0x3a   : > { %2043 = vmatmul.msk.bf16.gmra.mxu0 %vm301_vm1, %v289_v53  ;;  %v2781_v53 = vld [vmem:[%s2568_s11 + $0x5a] sm:$0xff]  ;;  %v2910_v26 = vld [vmem:[%s2568_s11 + $0x92] sm:$0xff] }
  0x3b   : > { %v2791_v43 = vpack.c.bf16 %v2781_v53, %v2778_v52 }
  0x48   : > { %2053 = vmatmul.msk.bf16.vlgmr.msrb.gmra.mxu1 %vm301_vm1, %v248_v60 }
  0x49   : > { %2090 = vmatmul.msk.bf16.vlgmr.msrb.gmra.mxu2 %vm301_vm1, %v545_v61  ;;  %2127 = vmatmul.msk.bf16.vlgmr.msrb.gmra.mxu3 %vm301_vm1, %v717_v62 }
  0x4a   : > { %2164 = vmatmul.msk.bf16.vlgmr.msrb.gmra.mxu0 %vm301_vm1, %v889_v63 }
  0x58   : > { %2054 = vmatmul.msk.bf16.gmra.mxu1 %vm301_vm1, %v249_v6 }
  0x59   : > { %2091 = vmatmul.msk.bf16.gmra.mxu2 %vm301_vm1, %v546_v7  ;;  %2128 = vmatmul.msk.bf16.gmra.mxu3 %vm301_vm1, %v718_v8  ;;  %v723_v8 = vpack.c.bf16 %v2115_v1, %v2114_v24 }
  0x5a   : > { %2165 = vmatmul.msk.bf16.gmra.mxu0 %vm301_vm1, %v890_v9  ;;  %v895_v9 = vpack.c.bf16 %v2665_v44, %v2616_v25  ;;  %v2846_v25 = vld [vmem:[%s2568_s11 + $0x72] sm:$0xff]  ;;  %v2849_v44 = vld [vmem:[%s2568_s11 + $0x7a] sm:$0xff] }
  0x5b   : > { %3332 = vst [vmem:[#allocation7_spill] sm:$0xff] %v2846_v25 }
  0x5c   : > { %3333 = vst [vmem:[#allocation8_spill] sm:$0xff] %v2849_v44 }
  0x68   : > { %2055 = vmatmul.msk.bf16.gmra.mxu1 %vm301_vm1, %v250_v21 }
  0x69   : > { %2092 = vmatmul.msk.bf16.gmra.mxu2 %vm301_vm1, %v547_v22  ;;  %2129 = vmatmul.msk.bf16.gmra.mxu3 %vm301_vm1, %v719_v28  ;;  %v2116_v28 = vld [vmem:[%s2568_s11 + $0x88] sm:$0xff] }
  0x6a   : > { %2166 = vmatmul.msk.bf16.gmra.mxu0 %vm301_vm1, %v891_v0  ;;  %v2808_v0 = vld [vmem:[%s2568_s11 + $0x62] sm:$0xff] }
  0x6b   : > { %v2825_v7 = vpack.c.bf16 %v2811_v14, %v2808_v0  ;;  %v2915_v14 = vld [vmem:[%s2568_s11 + $0x9a] sm:$0xff] }
  0x78   : > { %2056 = vmatmul.msk.bf16.gmra.mxu1 %vm301_vm1, %v2743_v34 }
  0x79   : > { %2093 = vmatmul.msk.bf16.gmra.mxu2 %vm301_vm1, %v2747_v35  ;;  %2130 = vmatmul.msk.bf16.gmra.mxu3 %vm301_vm1, %v720_v36 }
  0x7a   : > { %2167 = vmatmul.msk.bf16.gmra.mxu0 %vm301_vm1, %v892_v11 }
  0x88   : > { %2057 = vmatmul.msk.bf16.gmra.mxu1 %vm301_vm1, %v2763_v41 }
  0x89   : > { %2094 = vmatmul.msk.bf16.gmra.mxu2 %vm301_vm1, %v2767_v42  ;;  %2131 = vmatmul.msk.bf16.gmra.mxu3 %vm301_vm1, %v721_v48  ;;  %v2863_v48 = vpack.c.bf16 %v2849_v44, %v2846_v25 }
  0x8a   : > { %2168 = vmatmul.msk.bf16.gmra.mxu0 %vm301_vm1, %v893_v49  ;;  %v724_v49 = vpack.c.bf16 %v2117_v32, %v2116_v28 }
  0x8b   : > { %3335 = vst [vmem:[#allocation10_spill] sm:$0xff] %v2863_v48 }
  0x95   : > { %v2787_v12 = vpop.f32.mrf.mxu1 }
  0x97   : > { %v351_v59 = vpop.f32.mrf.mxu0 }
  0x98   : > { %2058 = vmatmul.msk.bf16.gmra.mxu1 %vm301_vm1, %v2785_v56 }
  0x99   : > { %2095 = vmatmul.msk.bf16.gmra.mxu2 %vm301_vm1, %v2791_v43  ;;  %2132 = vmatmul.msk.bf16.gmra.mxu3 %vm301_vm1, %v722_v57 }
  0x9a   : > { %2169 = vmatmul.msk.bf16.gmra.mxu0 %vm301_vm1, %v894_v58 }
  0x9c   : > { %v2801_v60 = vpop.f32.mrf.mxu2  ;;  %v2803_v61 = vpop.f32.mrf.mxu3 }
  0x9d   : > { %3328 = vst [vmem:[#allocation3_spill] sm:$0xff] %v2803_v61  ;;  %v2805_v62 = vpop.f32.mrf.mxu1 }
  0x9f   : > { %v353_v63 = vpop.f32.mrf.mxu0 }
  0xa4   : > { %v2815_v2 = vpop.f32.mrf.mxu2  ;;  %v2817_v4 = vpop.f32.mrf.mxu3 }
  0xa5   : > { %3330 = vst [vmem:[#allocation5_spill] sm:$0xff] %v2817_v4  ;;  %v2821_v6 = vpop.f32.mrf.mxu1 }
  0xa7   : > { %v2829_v11 = vpop.f32.mrf.mxu0 }
  0xa8   : > { %2059 = vmatmul.msk.bf16.gmra.mxu1 %vm301_vm1, %v2819_v5 }
  0xa9   : > { %2096 = vmatmul.msk.bf16.gmra.mxu2 %vm301_vm1, %v2825_v7  ;;  %2133 = vmatmul.msk.bf16.gmra.mxu3 %vm301_vm1, %v723_v8 }
  0xaa   : > { %2170 = vmatmul.msk.bf16.gmra.mxu0 %vm301_vm1, %v895_v9  ;;  %v2118_v9 = vld [vmem:[%s2568_s11 + $0x98] sm:$0xff] }
  0xac   : > { %v2837_v10 = vpop.f32.mrf.mxu2  ;;  %v2839_v20 = vpop.f32.mrf.mxu3 }
  0xad   : > { %3331 = vst [vmem:[#allocation6_spill] sm:$0xff] %v2839_v20  ;;  %v2841_v21 = vpop.f32.mrf.mxu1 }
  0xaf   : > { %v2843_v22 = vpop.f32.mrf.mxu0 }
  0xb4   : > { %v2853_v33 = vpop.f32.mrf.mxu2  ;;  %v2855_v36 = vpop.f32.mrf.mxu3 }
  0xb5   : > { %3334 = vst [vmem:[#allocation9_spill] sm:$0xff] %v2855_v36  ;;  %v2859_v40 = vpop.f32.mrf.mxu1  ;;  %v2119_v36 = vld [vmem:[%s2568_s11 + $0xa0] sm:$0xff] }
  0xb6   : > { %v725_v4 = vpack.c.bf16 %v2119_v36, %v2118_v9 }
  0xb7   : > { %v2867_v57 = vpop.f32.mrf.mxu0 }
  0xb8   : > { %2060 = vmatmul.msk.bf16.gmra.mxu1 %vm301_vm1, %v2857_v39 }
  0xb9   : > { %2097 = vmatmul.msk.bf16.gmra.mxu2 %vm301_vm1, %v2863_v48  ;;  %2134 = vmatmul.msk.bf16.gmra.mxu3 %vm301_vm1, %v724_v49  ;;  %v2895_v49 = vpack.c.bf16 %v2116_v28, %v2115_v1 }
  0xba   : > { %2171 = vmatmul.msk.bf16.gmra.mxu0 %vm301_vm1, %v896_v54 }
  0xbb   : > { %3342 = vst [vmem:[#allocation17_spill] sm:$0xff] %v2895_v49 }
  0xbc   : > { %v2875_v55 = vpop.f32.mrf.mxu2  ;;  %v2877_v58 = vpop.f32.mrf.mxu3 }
  0xbd   : > { %3336 = vst [vmem:[#allocation11_spill] sm:$0xff] %v2875_v55  ;;  %v2879_v24 = vpop.f32.mrf.mxu1 }
  0xbe   : > { %3337 = vst [vmem:[#allocation12_spill] sm:$0xff] %v2877_v58  ;;  %v2899_v58 = vpack.c.bf16 %v2887_v45, %v2884_v15 }
  0xbf   : > { %v2881_v8 = vpop.f32.mrf.mxu0 }
  0xc0   : > { %3343 = vst [vmem:[#allocation18_spill] sm:$0xff] %v2899_v58 }
  0xc4   : > { %v2891_v20 = vpop.f32.mrf.mxu2  ;;  %v2893_v44 = vpop.f32.mrf.mxu3 }
  0xc5   : > { %3340 = vst [vmem:[#allocation15_spill] sm:$0xff] %v2891_v20  ;;  %v459_v54 = vpop.f32.mrf.mxu1  ;;  %v2121_v20 = vld [vmem:[%s2568_s11 + $0xb0] sm:$0xff] }
  0xc6   : > { %3341 = vst [vmem:[#allocation16_spill] sm:$0xff] %v2893_v44  ;;  %v460_v61 = vadd.f32 %v459_v54, %v351_v59 }
  0xc7   : > { %v951_v25 = vpop.f32.mrf.mxu0 }
  0xc8   : > { %2061 = vmatmul.msk.bf16.gmra.mxu1 %vm301_vm1, %v2895_v49  ;;  %v2120_v49 = vld [vmem:[%s2568_s11 + $0xa8] sm:$0xff] }
  0xc9   : > { %2098 = vmatmul.msk.bf16.gmra.mxu2 %vm301_vm1, %v2899_v58  ;;  %2135 = vmatmul.msk.bf16.gmra.mxu3 %vm301_vm1, %v725_v4  ;;  %v2919_v4 = vpack.c.bf16 %v2118_v9, %v2117_v32  ;;  %v2938_v9 = vld [vmem:[%s2568_s11 + $0xa2] sm:$0xff] }
  0xca   : > { %2172 = vmatmul.msk.bf16.gmra.mxu0 %vm301_vm1, %v897_v51 }
  0xcc   : > { %v607_v1 = vpop.f32.mrf.mxu2  ;;  %v779_v28 = vpop.f32.mrf.mxu3 }
  0xcd   : > { %v667_v59 = vadd.f32 %v607_v1, %v460_v61  ;;  %v461_v54 = vpop.f32.mrf.mxu1  ;;  %v2923_v61 = vpack.c.bf16 %v2915_v14, %v2910_v26 }
  0xce   : > { %v462_v44 = vadd.f32 %v461_v54, %v353_v63  ;;  %v726_v63 = vpack.c.bf16 %v2121_v20, %v2120_v49  ;;  %v2943_v54 = vld [vmem:[%s2568_s11 + $0xaa] sm:$0xff] }
  0xcf   : > { %v839_v45 = vadd.f32 %v779_v28, %v667_v59  ;;  %v953_v16 = vpop.f32.mrf.mxu0 }
  0xd1   : > { %v2912_v15 = vadd.f32 %v951_v25, %v839_v45  ;;  %v898_v25 = vpack.c.bf16 %v2671_v46, %v2622_v27 }
  0xd4   : > { %v609_v58 = vpop.f32.mrf.mxu2  ;;  %v781_v55 = vpop.f32.mrf.mxu3 }
  0xd5   : > { %v668_v51 = vadd.f32 %v609_v58, %v462_v44  ;;  %v464_v48 = vpop.f32.mrf.mxu1 }
  0xd6   : > { %v465_v1 = vadd.f32 %v464_v48, %v2829_v11 }
  0xd7   : > { %v840_v45 = vadd.f32 %v781_v55, %v668_v51  ;;  %v956_v28 = vpop.f32.mrf.mxu0  ;;  %v2122_v51 = vld [vmem:[%s2568_s11 + $0xb8] sm:$0xff] }
  0xd8   : > { %2062 = vmatmul.msk.bf16.gmra.mxu1 %vm301_vm1, %v2919_v4 }
  0xd9   : > { %2099 = vmatmul.msk.bf16.gmra.mxu2 %vm301_vm1, %v2923_v61  ;;  %2136 = vmatmul.msk.bf16.gmra.mxu3 %vm301_vm1, %v726_v63  ;;  %v2933_v44 = vadd.f32 %v953_v16, %v840_v45  ;;  %v2947_v63 = vld [vmem:[%s2568_s11 + $0xc0] sm:$0xff] }
  0xda   : > { %2173 = vmatmul.msk.bf16.gmra.mxu0 %vm301_vm1, %v898_v25  ;;  %3346 = vst [vmem:[#allocation21_spill] sm:$0xff] %v2947_v63  ;;  %v2950_v16 = vld [vmem:[%s2568_s11 + $0xc1] sm:$0xff] }
  0xdb   : > { %3344 = vst [vmem:[#allocation19_spill] sm:$0xff] %v2933_v44  ;;  %v2952_v44 = vpack.c.bf16 %v2120_v49, %v2119_v36 }
  0xdc   : > { %v612_v11 = vpop.f32.mrf.mxu2  ;;  %v784_v27 = vpop.f32.mrf.mxu3  ;;  %3347 = vst [vmem:[#allocation22_spill] sm:$0xff] %v2950_v16 }
  0xdd   : > { %v669_v46 = vadd.f32 %v612_v11, %v465_v1  ;;  %v466_v32 = vpop.f32.mrf.mxu1 }
  0xde   : > { %v467_v48 = vadd.f32 %v466_v32, %v2843_v22  ;;  %v2956_v22 = vpack.c.bf16 %v2943_v54, %v2938_v9 }
  0xdf   : > { %v841_v55 = vadd.f32 %v784_v27, %v669_v46  ;;  %v958_v58 = vpop.f32.mrf.mxu0  ;;  %v899_v46 = vpack.c.bf16 %v2950_v16, %v2674_v47  ;;  %v2977_v16 = vld [vmem:[%s2568_s11 + $0xba] sm:$0xff] }
  0xe0   : > { %3350 = vst [vmem:[#allocation25_spill] sm:$0xff] %v2977_v16 }
  0xe1   : > { %v2940_v59 = vadd.f32 %v956_v28, %v841_v55  ;;  %v727_v28 = vpack.c.bf16 %v2947_v63, %v2122_v51 }
  0xe3   : > { %3345 = vst [vmem:[#allocation20_spill] sm:$0xff] %v2940_v59 }
  0xe4   : > { %v614_v25 = vpop.f32.mrf.mxu2  ;;  %v786_v45 = vpop.f32.mrf.mxu3 }
  0xe5   : > { %v670_v1 = vadd.f32 %v614_v25, %v467_v48  ;;  %v469_v11 = vpop.f32.mrf.mxu1 }
  0xe6   : > { %v470_v27 = vadd.f32 %v469_v11, %v2867_v57  ;;  %v2972_v11 = vld [vmem:[%s2568_s11 + $0xb2] sm:$0xff] }
  0xe7   : > { %v842_v32 = vadd.f32 %v786_v45, %v670_v1  ;;  %v961_v55 = vpop.f32.mrf.mxu0 }
  0xe8   : > { %2063 = vmatmul.msk.bf16.gmra.mxu1 %vm301_vm1, %v2952_v44 }
  0xe9   : > { %2100 = vmatmul.msk.bf16.gmra.mxu2 %vm301_vm1, %v2956_v22  ;;  %2137 = vmatmul.msk.bf16.gmra.mxu3 %vm301_vm1, %v727_v28  ;;  %v2967_v36 = vadd.f32 %v958_v58, %v842_v32  ;;  %v2980_v28 = vld [vmem:[%s2568_s11 + $0xc8] sm:$0xff]  ;;  %v2983_v58 = vld [vmem:[%s2568_s11 + $0xd0] sm:$0xff] }
  0xea   : > { %2174 = vmatmul.msk.bf16.gmra.mxu0 %vm301_vm1, %v899_v46  ;;  %3351 = vst [vmem:[#allocation26_spill] sm:$0xff] %v2980_v28  ;;  %v2986_v32 = vld [vmem:[%s2568_s11 + $0xc9] sm:$0xff]  ;;  %v2989_v46 = vld [vmem:[%s2568_s11 + $0xd1] sm:$0xff] }
  0xeb   : > { %3348 = vst [vmem:[#allocation23_spill] sm:$0xff] %v2967_v36  ;;  %v2991_v36 = vpack.c.bf16 %v2122_v51, %v2121_v20 }
  0xec   : > { %v617_v47 = vpop.f32.mrf.mxu2  ;;  %v789_v57 = vpop.f32.mrf.mxu3  ;;  %3352 = vst [vmem:[#allocation27_spill] sm:$0xff] %v2983_v58 }
  0xed   : > { %v671_v49 = vadd.f32 %v617_v47, %v470_v27  ;;  %v471_v48 = vpop.f32.mrf.mxu1  ;;  %3353 = vst [vmem:[#allocation28_spill] sm:$0xff] %v2986_v32 }
  0xee   : > { %v472_v25 = vadd.f32 %v471_v48, %v2881_v8  ;;  %3354 = vst [vmem:[#allocation29_spill] sm:$0xff] %v2989_v46  ;;  %v900_v48 = vpack.c.bf16 %v2989_v46, %v2986_v32 }
  0xef   : > { %v843_v45 = vadd.f32 %v789_v57, %v671_v49  ;;  %v963_v1 = vpop.f32.mrf.mxu0  ;;  %v728_v49 = vpack.c.bf16 %v2983_v58, %v2980_v28 }
  0xf1   : > { %v2974_v59 = vadd.f32 %v961_v55, %v843_v45  ;;  %v2995_v55 = vpack.c.bf16 %v2977_v16, %v2972_v11 }
  0xf3   : > { %3349 = vst [vmem:[#allocation24_spill] sm:$0xff] %v2974_v59 }
  0xf4   : > { %v619_v27 = vpop.f32.mrf.mxu2  ;;  %v791_v47 = vpop.f32.mrf.mxu3 }
  0xf5   : > { %v672_v8 = vadd.f32 %v619_v27, %v472_v25  ;;  %v474_v57 = vpop.f32.mrf.mxu1 }
  0xf6   : > { %v475_v51 = vadd.f32 %v474_v57, %v2787_v12 }
  0xf7   : > { %v844_v45 = vadd.f32 %v791_v47, %v672_v8  ;;  %v966_v59 = vpop.f32.mrf.mxu0 }
  0xf8   : > { %2064 = vmatmul.msk.bf16.gmra.mxu1 %vm301_vm1, %v2991_v36 }
  0xf9   : > { %2101 = vmatmul.msk.bf16.gmra.mxu2 %vm301_vm1, %v2995_v55  ;;  %2138 = vmatmul.msk.bf16.gmra.mxu3 %vm301_vm1, %v728_v49  ;;  %v3006_v20 = vadd.f32 %v963_v1, %v844_v45  ;;  %v1061_v1 = vpack.c.bf16 %v2722_v18, %v2709_v3 }
  0xfa   : > { %2175 = vmatmul.msk.bf16.gmra.mxu0 %vm301_vm1, %v900_v48 }
  0xfb   : > { %3355 = vst [vmem:[#allocation30_spill] sm:$0xff] %v3006_v20 }
  0xfc   : > { %v622_v25 = vpop.f32.mrf.mxu2  ;;  %v794_v27 = vpop.f32.mrf.mxu3 }
  0xfd   : > { %v673_v58 = vadd.f32 %v622_v25, %v475_v51  ;;  %v476_v46 = vpop.f32.mrf.mxu1 }
  0xfe   : > { %v477_v32 = vadd.f32 %v476_v46, %v2805_v62 }
  0xff   : > { %v845_v47 = vadd.f32 %v794_v27, %v673_v58  ;;  %v968_v8 = vpop.f32.mrf.mxu0 }
 0x101   : > { %v3010_v16 = vadd.f32 %v966_v59, %v845_v47 }
 0x104   : > { %v624_v28 = vpop.f32.mrf.mxu2  ;;  %v796_v63 = vpop.f32.mrf.mxu3 }
 0x105   : > { %v674_v49 = vadd.f32 %v624_v28, %v477_v32  ;;  %v479_v45 = vpop.f32.mrf.mxu1 }
 0x106   : > { %v480_v62 = vadd.f32 %v479_v45, %v2821_v6 }
 0x107   : > { %v846_v48 = vadd.f32 %v796_v63, %v674_v49  ;;  %v971_v20 = vpop.f32.mrf.mxu0 }
 0x108   : > { %2201 = vmatmul.msk.bf16.vlgmr.msra.gmra.mxu1 %vm301_vm1, %v1061_v1 }
 0x109   : > { %2238 = vmatmul.msk.bf16.vlgmr.msra.gmra.mxu2 %vm301_vm1, %v2743_v34  ;;  %2275 = vmatmul.msk.bf16.vlgmr.msra.gmra.mxu3 %vm301_vm1, %v2581_v13  ;;  %v3020_v12 = vadd.f32 %v968_v8, %v846_v48  ;;  %v1062_v13 = vpack.c.bf16 %v2736_v23, %v2725_v19 }
 0x10a   : > { %2312 = vmatmul.msk.bf16.vlgmr.msra.gmra.mxu0 %vm301_vm1, %v2747_v35 }
 0x10c   : > { %v627_v3 = vpop.f32.mrf.mxu2  ;;  %v799_v18 = vpop.f32.mrf.mxu3 }
 0x10d   : > { %v675_v59 = vadd.f32 %v627_v3, %v480_v62  ;;  %v481_v63 = vpop.f32.mrf.mxu1 }
 0x10e   : > { %v482_v34 = vadd.f32 %v481_v63, %v2841_v21 }
 0x10f   : > { %v847_v28 = vadd.f32 %v799_v18, %v675_v59  ;;  %v973_v58 = vpop.f32.mrf.mxu0 }
 0x111   : > { %v3025_v32 = vadd.f32 %v971_v20, %v847_v28 }
 0x114   : > { %v629_v46 = vpop.f32.mrf.mxu2  ;;  %v801_v57 = vpop.f32.mrf.mxu3 }
 0x115   : > { %v676_v51 = vadd.f32 %v629_v46, %v482_v34  ;;  %v484_v25 = vpop.f32.mrf.mxu1 }
 0x116   : > { %v485_v21 = vadd.f32 %v484_v25, %v2859_v40 }
 0x117   : > { %v848_v35 = vadd.f32 %v801_v57, %v676_v51  ;;  %v976_v27 = vpop.f32.mrf.mxu0 }
 0x118   : > { %2202 = vmatmul.msk.bf16.gmra.mxu1 %vm301_vm1, %v1062_v13 }
 0x119   : > { %2239 = vmatmul.msk.bf16.gmra.mxu2 %vm301_vm1, %v2763_v41  ;;  %2276 = vmatmul.msk.bf16.gmra.mxu3 %vm301_vm1, %v2628_v30  ;;  %v3035_v6 = vadd.f32 %v973_v58, %v848_v35  ;;  %v1063_v30 = vpack.c.bf16 %v2756_v37, %v2739_v29 }
 0x11a   : > { %2313 = vmatmul.msk.bf16.gmra.mxu0 %vm301_vm1, %v2767_v42 }
 0x11c   : > { %v632_v19 = vpop.f32.mrf.mxu2  ;;  %v804_v23 = vpop.f32.mrf.mxu3 }
 0x11d   : > { %v677_v20 = vadd.f32 %v632_v19, %v485_v21  ;;  %v486_v47 = vpop.f32.mrf.mxu1 }
 0x11e   : > { %v487_v41 = vadd.f32 %v486_v47, %v2879_v24 }
 0x11f   : > { %v849_v8 = vadd.f32 %v804_v23, %v677_v20  ;;  %v978_v1 = vpop.f32.mrf.mxu0 }
 0x121   : > { %v3040_v49 = vadd.f32 %v976_v27, %v849_v8 }
 0x124   : > { %v634_v45 = vpop.f32.mrf.mxu2  ;;  %v806_v48 = vpop.f32.mrf.mxu3 }
 0x125   : > { %v678_v62 = vadd.f32 %v634_v45, %v487_v41  ;;  %v489_v3 = vpop.f32.mrf.mxu1  ;;  %v3357_v45 = vld [vmem:[#allocation11_spill] sm:$0xff] }
 0x126   : > { %v490_v24 = vadd.f32 %v489_v3, %v2801_v60 }
 0x127   : > { %v850_v42 = vadd.f32 %v806_v48, %v678_v62  ;;  %v981_v18 = vpop.f32.mrf.mxu0 }
 0x128   : > { %2203 = vmatmul.msk.bf16.gmra.mxu1 %vm301_vm1, %v1063_v30 }
 0x129   : > { %2240 = vmatmul.msk.bf16.gmra.mxu2 %vm301_vm1, %v2785_v56  ;;  %2277 = vmatmul.msk.bf16.gmra.mxu3 %vm301_vm1, %v2680_v50  ;;  %v3050_v40 = vadd.f32 %v978_v1, %v850_v42  ;;  %v1064_v50 = vpack.c.bf16 %v2778_v52, %v2759_v38 }
 0x12a   : > { %2314 = vmatmul.msk.bf16.gmra.mxu0 %vm301_vm1, %v2791_v43 }
 0x12c   : > { %v637_v29 = vpop.f32.mrf.mxu2  ;;  %v809_v37 = vpop.f32.mrf.mxu3 }
 0x12d   : > { %v679_v59 = vadd.f32 %v637_v29, %v490_v24  ;;  %v491_v63 = vpop.f32.mrf.mxu1  ;;  %v3358_v24 = vld [vmem:[#allocation15_spill] sm:$0xff] }
 0x12e   : > { %v492_v56 = vadd.f32 %v491_v63, %v2815_v2 }
 0x12f   : > { %v851_v28 = vadd.f32 %v809_v37, %v679_v59  ;;  %v983_v58 = vpop.f32.mrf.mxu0  ;;  %v3360_v59 = vld [vmem:[#allocation7_spill] sm:$0xff] }
 0x131   : > { %v3055_v34 = vadd.f32 %v981_v18, %v851_v28 }
 0x134   : > { %v639_v46 = vpop.f32.mrf.mxu2  ;;  %v811_v57 = vpop.f32.mrf.mxu3 }
 0x135   : > { %v680_v13 = vadd.f32 %v639_v46, %v492_v56  ;;  %v494_v51 = vpop.f32.mrf.mxu1 }
 0x136   : > { %v495_v2 = vadd.f32 %v494_v51, %v2837_v10  ;;  %v3363_v51 = vld [vmem:[#allocation18_spill] sm:$0xff] }
 0x137   : > { %v852_v43 = vadd.f32 %v811_v57, %v680_v13  ;;  %v986_v25 = vpop.f32.mrf.mxu0  ;;  %v3361_v57 = vld [vmem:[#allocation17_spill] sm:$0xff] }
 0x138   : > { %2204 = vmatmul.msk.bf16.gmra.mxu1 %vm301_vm1, %v1064_v50  ;;  %v3362_v50 = vld [vmem:[#allocation2_spill] sm:$0xff] }
 0x139   : > { %2241 = vmatmul.msk.bf16.gmra.mxu2 %vm301_vm1, %v2819_v5  ;;  %2278 = vmatmul.msk.bf16.gmra.mxu3 %vm301_vm1, %v2594_v17  ;;  %v3065_v60 = vadd.f32 %v983_v58, %v852_v43  ;;  %v1065_v17 = vpack.c.bf16 %v2808_v0, %v2781_v53  ;;  %v3364_v43 = vld [vmem:[#allocation3_spill] sm:$0xff] }
 0x13a   : > { %2315 = vmatmul.msk.bf16.gmra.mxu0 %vm301_vm1, %v2825_v7 }
 0x13c   : > { %v642_v38 = vpop.f32.mrf.mxu2  ;;  %v814_v52 = vpop.f32.mrf.mxu3 }
 0x13d   : > { %v681_v35 = vadd.f32 %v642_v38, %v495_v2  ;;  %v496_v27 = vpop.f32.mrf.mxu1 }
 0x13e   : > { %v497_v5 = vadd.f32 %v496_v27, %v2853_v33  ;;  %v3356_v33 = vld [vmem:[#allocation10_spill] sm:$0xff] }
 0x13f   : > { %v853_v21 = vadd.f32 %v814_v52, %v681_v35  ;;  %v988_v19 = vpop.f32.mrf.mxu0 }
 0x141   : > { %v3070_v23 = vadd.f32 %v986_v25, %v853_v21 }
 0x144   : > { %v644_v20 = vpop.f32.mrf.mxu2  ;;  %v816_v47 = vpop.f32.mrf.mxu3 }
 0x145   : > { %v682_v8 = vadd.f32 %v644_v20, %v497_v5  ;;  %v499_v1 = vpop.f32.mrf.mxu1  ;;  %v2262_v5 = vld [vmem:[%s2568_s11 + $0x91] sm:$0xff]  ;;  %v2263_v20 = vld [vmem:[%s2568_s11 + $0x99] sm:$0xff] }
 0x146   : > { %v500_v48 = vadd.f32 %v499_v1, %v3357_v45 }
 0x147   : > { %v854_v7 = vadd.f32 %v816_v47, %v682_v8  ;;  %v991_v41 = vpop.f32.mrf.mxu0  ;;  %v3365_v47 = vld [vmem:[#allocation5_spill] sm:$0xff] }
 0x148   : > { %2205 = vmatmul.msk.bf16.gmra.mxu1 %vm301_vm1, %v1065_v17 }
 0x149   : > { %2242 = vmatmul.msk.bf16.gmra.mxu2 %vm301_vm1, %v2857_v39  ;;  %2279 = vmatmul.msk.bf16.gmra.mxu3 %vm301_vm1, %v2632_v31  ;;  %v3080_v10 = vadd.f32 %v988_v19, %v854_v7  ;;  %v3359_v31 = vld [vmem:[#allocation4_spill] sm:$0xff] }
 0x14a   : > { %2316 = vmatmul.msk.bf16.gmra.mxu0 %vm301_vm1, %v3356_v33  ;;  %v1066_v63 = vpack.c.bf16 %v3360_v59, %v3359_v31  ;;  %v3366_v7 = vld [vmem:[#allocation8_spill] sm:$0xff] }
 0x14c   : > { %v647_v53 = vpop.f32.mrf.mxu2  ;;  %v819_v0 = vpop.f32.mrf.mxu3 }
 0x14d   : > { %v683_v30 = vadd.f32 %v647_v53, %v500_v48  ;;  %v501_v62 = vpop.f32.mrf.mxu1  ;;  %v1411_v53 = vpack.c.bf16 %v2263_v20, %v2262_v5 }
 0x14e   : > { %v502_v39 = vadd.f32 %v501_v62, %v3358_v24 }
 0x14f   : > { %v855_v3 = vadd.f32 %v819_v0, %v683_v30  ;;  %v993_v42 = vpop.f32.mrf.mxu0 }
 0x151   : > { %v3085_v18 = vadd.f32 %v991_v41, %v855_v3  ;;  %v3367_v41 = vld [vmem:[#allocation13_spill] sm:$0xff]  ;;  %v3368_v3 = vld [vmem:[#allocation6_spill] sm:$0xff] }
 0x152   : > { %v1067_v33 = vpack.c.bf16 %v3367_v41, %v3366_v7  ;;  %v2267_v7 = vld [vmem:[%s2568_s11 + $0xb9] sm:$0xff] }
 0x154   : > { %v649_v29 = vpop.f32.mrf.mxu2  ;;  %v821_v37 = vpop.f32.mrf.mxu3 }
 0x155   : > { %v684_v28 = vadd.f32 %v649_v29, %v502_v39  ;;  %v504_v58 = vpop.f32.mrf.mxu1 }
 0x156   : > { %v505_v25 = vadd.f32 %v504_v58, %v3364_v43  ;;  %v2265_v58 = vld [vmem:[%s2568_s11 + $0xa9] sm:$0xff] }
 0x157   : > { %v856_v56 = vadd.f32 %v821_v37, %v684_v28  ;;  %v996_v46 = vpop.f32.mrf.mxu0  ;;  %v2264_v28 = vld [vmem:[%s2568_s11 + $0xa1] sm:$0xff] }
 0x158   : > { %2206 = vmatmul.msk.bf16.gmra.mxu1 %vm301_vm1, %v1066_v63 }
 0x159   : > { %2243 = vmatmul.msk.bf16.gmra.mxu2 %vm301_vm1, %v3361_v57  ;;  %2280 = vmatmul.msk.bf16.gmra.mxu3 %vm301_vm1, %v3362_v50  ;;  %v3095_v13 = vadd.f32 %v993_v42, %v856_v56  ;;  %v3370_v50 = vld [vmem:[#allocation14_spill] sm:$0xff] }
 0x15a   : > { %2317 = vmatmul.msk.bf16.gmra.mxu0 %vm301_vm1, %v3363_v51  ;;  %v1068_v51 = vpack.c.bf16 %v2910_v26, %v3370_v50  ;;  %v3371_v26 = vld [vmem:[#allocation12_spill] sm:$0xff]  ;;  %v3169_v50 = vld [vmem:[%s3309_s3] ss:$0 sm:$0xff] }
 0x15c   : > { %v652_v2 = vpop.f32.mrf.mxu2  ;;  %v824_v38 = vpop.f32.mrf.mxu3 }
 0x15d   : > { %v685_v52 = vadd.f32 %v652_v2, %v505_v25  ;;  %v506_v35 = vpop.f32.mrf.mxu1  ;;  %v1412_v25 = vpack.c.bf16 %v2265_v58, %v2264_v28  ;;  %v3373_v28 = vld [vmem:[#allocation19_spill] sm:$0xff] }
 0x15e   : > { %v507_v17 = vadd.f32 %v506_v35, %v3365_v47 }
 0x15f   : > { %v857_v27 = vadd.f32 %v824_v38, %v685_v52  ;;  %v998_v21 = vpop.f32.mrf.mxu0 }
 0x161   : > { %v3100_v19 = vadd.f32 %v996_v46, %v857_v27 }
 0x164   : > { %v654_v8 = vpop.f32.mrf.mxu2  ;;  %v826_v1 = vpop.f32.mrf.mxu3 }
 0x165   : > { %v686_v45 = vadd.f32 %v654_v8, %v507_v17  ;;  %v509_v48 = vpop.f32.mrf.mxu1 }
 0x166   : > { %v510_v42 = vadd.f32 %v509_v48, %v3368_v3  ;;  %v1069_v48 = vpack.c.bf16 %v2938_v9, %v2915_v14 }
 0x167   : > { %v858_v0 = vadd.f32 %v826_v1, %v686_v45  ;;  %v1001_v30 = vpop.f32.mrf.mxu0  ;;  %v2266_v1 = vld [vmem:[%s2568_s11 + $0xb1] sm:$0xff] }
 0x168   : > { %2207 = vmatmul.msk.bf16.gmra.mxu1 %vm301_vm1, %v1067_v33 }
 0x169   : > { %2244 = vmatmul.msk.bf16.gmra.mxu2 %vm301_vm1, %v2919_v4  ;;  %2281 = vmatmul.msk.bf16.gmra.mxu3 %vm301_vm1, %v1411_v53  ;;  %v3111_v62 = vadd.f32 %v998_v21, %v858_v0  ;;  %v3369_v4 = vld [vmem:[#allocation9_spill] sm:$0xff]  ;;  %v1413_v0 = vpack.c.bf16 %v2267_v7, %v2266_v1 }
 0x16a   : > { %2318 = vmatmul.msk.bf16.gmra.mxu0 %vm301_vm1, %v2923_v61 }
 0x16c   : > { %v657_v24 = vpop.f32.mrf.mxu2  ;;  %v829_v39 = vpop.f32.mrf.mxu3 }
 0x16d   : > { %v687_v29 = vadd.f32 %v657_v24, %v510_v42  ;;  %v511_v37 = vpop.f32.mrf.mxu1 }
 0x16e   : > { %v512_v56 = vadd.f32 %v511_v37, %v3369_v4 }
 0x16f   : > { %v859_v31 = vadd.f32 %v829_v39, %v687_v29  ;;  %v1003_v59 = vpop.f32.mrf.mxu0 }
 0x171   : > { %v3116_v63 = vadd.f32 %v1001_v30, %v859_v31 }
 0x174   : > { %v659_v46 = vpop.f32.mrf.mxu2  ;;  %v831_v57 = vpop.f32.mrf.mxu3 }
 0x175   : > { %v688_v61 = vadd.f32 %v659_v46, %v512_v56  ;;  %v514_v43 = vpop.f32.mrf.mxu1  ;;  %v1070_v46 = vpack.c.bf16 %v2972_v11, %v2943_v54 }
 0x176   : > { %v515_v35 = vadd.f32 %v514_v43, %v3371_v26  ;;  %v3375_v43 = vld [vmem:[#allocation21_spill] sm:$0xff]  ;;  %v3378_v26 = vld [vmem:[#allocation28_spill] sm:$0xff] }
 0x177   : > { %v860_v2 = vadd.f32 %v831_v57, %v688_v61  ;;  %v1006_v38 = vpop.f32.mrf.mxu0 }
 0x178   : > { %2208 = vmatmul.msk.bf16.gmra.mxu1 %vm301_vm1, %v1068_v51 }
 0x179   : > { %2245 = vmatmul.msk.bf16.gmra.mxu2 %vm301_vm1, %v2952_v44  ;;  %2282 = vmatmul.msk.bf16.gmra.mxu3 %vm301_vm1, %v1412_v25  ;;  %v3127_v52 = vadd.f32 %v1003_v59, %v860_v2  ;;  %v3372_v44 = vld [vmem:[#allocation16_spill] sm:$0xff]  ;;  %v3152_v59 = vld [vmem:[%s3308_s2] ss:$0 sm:$0xff] }
 0x17a   : > { %2319 = vmatmul.msk.bf16.gmra.mxu0 %vm301_vm1, %v2956_v22  ;;  %v3376_v25 = vld [vmem:[#allocation26_spill] sm:$0xff] }
 0x17b   : > { %v1242_v2 = vpack.c.bf16 %v3376_v25, %v3375_v43  ;;  %v3383_v43 = vld [vmem:[#allocation29_spill] sm:$0xff] }
 0x17c   : > { %v662_v27 = vpop.f32.mrf.mxu2  ;;  %v834_v21 = vpop.f32.mrf.mxu3 }
 0x17d   : > { %v689_v5 = vadd.f32 %v662_v27, %v515_v35  ;;  %v516_v20 = vpop.f32.mrf.mxu1 }
 0x17e   : > { %v517_v41 = vadd.f32 %v516_v20, %v3372_v44 }
 0x17f   : > { %v861_v47 = vadd.f32 %v834_v21, %v689_v5  ;;  %v1008_v17 = vpop.f32.mrf.mxu0 }
 0x181   : > { %v3132_v8 = vadd.f32 %v1006_v38, %v861_v47  ;;  %v3377_v38 = vld [vmem:[#allocation22_spill] sm:$0xff]  ;;  %v3379_v47 = vld [vmem:[#allocation20_spill] sm:$0xff] }
 0x182   : > { %v1414_v35 = vpack.c.bf16 %v3378_v26, %v3377_v38 }
 0x184   : > { %v664_v33 = vpop.f32.mrf.mxu2  ;;  %v836_v45 = vpop.f32.mrf.mxu3 }
 0x185   : > { %v690_v22 = vadd.f32 %v664_v33, %v517_v41  ;;  %v1123_v53 = vpop.f32.mrf.mxu1 }
 0x186   : > { %v1183_v14 = vadd.f32 %v1123_v53, %v2912_v15  ;;  %v2305_v15 = vld [vmem:[%s2568_s11 + $0xc2] sm:$0xff] }
 0x187   : > { %v862_v30 = vadd.f32 %v836_v45, %v690_v22  ;;  %v1639_v3 = vpop.f32.mrf.mxu0 }
 0x188   : > { %2209 = vmatmul.msk.bf16.gmra.mxu1 %vm301_vm1, %v1069_v48 }
 0x189   : > { %2246 = vmatmul.msk.bf16.gmra.mxu2 %vm301_vm1, %v2991_v36  ;;  %2283 = vmatmul.msk.bf16.gmra.mxu3 %vm301_vm1, %v1413_v0  ;;  %v3143_v42 = vadd.f32 %v1008_v17, %v862_v30 }
 0x18a   : > { %2320 = vmatmul.msk.bf16.gmra.mxu0 %vm301_vm1, %v2995_v55  ;;  %v3161_v55 = vld [vmem:[%s2568_s11 + $0xca] sm:$0xff] }
 0x18b   : > { %v1586_v27 = vpack.c.bf16 %v3161_v55, %v2305_v15 }
 0x18c   : > { %v1295_v9 = vpop.f32.mrf.mxu2  ;;  %v1467_v24 = vpop.f32.mrf.mxu3 }
 0x18d   : > { %v1355_v39 = vadd.f32 %v1295_v9, %v1183_v14  ;;  %v1125_v29 = vpop.f32.mrf.mxu1  ;;  %v2234_v9 = vld [vmem:[%s2568_s11 + $0xd8] sm:$0xff] }
 0x18e   : > { %v1184_v58 = vadd.f32 %v1125_v29, %v3373_v28 }
 0x18f   : > { %v1527_v37 = vadd.f32 %v1467_v24, %v1355_v39  ;;  %v1641_v31 = vpop.f32.mrf.mxu0  ;;  %v2271_v24 = vld [vmem:[%s2568_s11 + $0xd9] sm:$0xff]  ;;  %v3380_v39 = vld [vmem:[#allocation23_spill] sm:$0xff] }
 0x190   : > { %v1415_v25 = vpack.c.bf16 %v2271_v24, %v3383_v43  ;;  %v2309_v24 = vld [vmem:[%s2568_s11 + $0xe2] sm:$0xff] }
 0x191   : > { %v1699_v36 = vadd.f32 %v1639_v3, %v1527_v37  ;;  %v2307_v37 = vld [vmem:[%s2568_s11 + $0xd2] sm:$0xff] }
 0x193   : > { %v1727_v57 = vmul.f32 %v3152_v59, %v1699_v36 }
 0x194   : > { %v1297_v4 = vpop.f32.mrf.mxu2  ;;  %v1469_v56 = vpop.f32.mrf.mxu3 }
 0x195   : > { %v1356_v51 = vadd.f32 %v1297_v4, %v1184_v58  ;;  %v1128_v61 = vpop.f32.mrf.mxu1  ;;  %v1755_v21 = vadd.f32 %v3169_v50, %v1727_v57  ;;  %v3381_v58 = vld [vmem:[#allocation25_spill] sm:$0xff] }
 0x196   : > { %v1185_v17 = vadd.f32 %v1128_v61, %v3379_v47  ;;  %v1071_v4 = vpack.c.bf16 %v2305_v15, %v3381_v58 }
 0x197   : > { %v1528_v54 = vadd.f32 %v1469_v56, %v1356_v51  ;;  %v1644_v11 = vpop.f32.mrf.mxu0  ;;  %v1803_v44 = vmul.f32 0.1, %v1755_v21  ;;  %vm1779_vm2 = vcmp.ge.f32.partialorder %v1755_v21, 0.0  ;;  %v3382_v51 = vld [vmem:[#allocation27_spill] sm:$0xff] }
 0x198   : > { %2210 = vmatmul.msk.bf16.gmra.mxu1 %vm301_vm1, %v1070_v46  ;;  %v1243_v61 = vpack.c.bf16 %v2234_v9, %v3382_v51 }
 0x199   : > { %v1700_v5 = vadd.f32 %v1641_v31, %v1528_v54  ;;  %2247 = vmatmul.msk.bf16.gmra.mxu2 %vm301_vm1, %v1242_v2  ;;  %2284 = vmatmul.msk.bf16.gmra.mxu3 %vm301_vm1, %v1414_v35  ;;  %v1827_v0 = vsel %vm1779_vm2, %v1755_v21, %v1803_v44  ;;  %v2308_v31 = vld [vmem:[%s2568_s11 + $0xda] sm:$0xff]  ;;  %v3384_v54 = vld [vmem:[#allocation24_spill] sm:$0xff] }
 0x19a   : > { %2321 = vmatmul.msk.bf16.gmra.mxu0 %vm301_vm1, %v1586_v27  ;;  %v1587_v2 = vpack.c.bf16 %v2308_v31, %v2307_v37 }
 0x19b   : > { %v1728_v20 = vmul.f32 %v3152_v59, %v1700_v5 }
 0x19c   : > { %v1300_v1 = vpop.f32.mrf.mxu2  ;;  %v1472_v7 = vpop.f32.mrf.mxu3 }
 0x19d   : > { %v1756_v41 = vadd.f32 %v3169_v50, %v1728_v20  ;;  %v1357_v33 = vadd.f32 %v1300_v1, %v1185_v17  ;;  %v1130_v45 = vpop.f32.mrf.mxu1 }
 0x19e   : > { %v1186_v29 = vadd.f32 %v1130_v45, %v3380_v39  ;;  %v2310_v39 = vld [vmem:[%s2568_s11 + $0xea] sm:$0xff] }
 0x19f   : > { %vm1780_vm3 = vcmp.ge.f32.partialorder %v1756_v41, 0.0  ;;  %v1804_v48 = vmul.f32 0.1, %v1756_v41  ;;  %v1529_v22 = vadd.f32 %v1472_v7, %v1357_v33  ;;  %v1646_v53 = vpop.f32.mrf.mxu0 }
 0x1a1   : > { %v1828_v30 = vsel %vm1780_vm3, %v1756_v41, %v1804_v48  ;;  %v1701_v3 = vadd.f32 %v1644_v11, %v1529_v22  ;;  %v2235_v22 = vld [vmem:[%s2568_s11 + $0xe0] sm:$0xff] }
 0x1a2   : > { %v2329_v14 = vpack.c.bf16 %v1828_v30, %v1827_v0  ;;  %v2236_v0 = vld [vmem:[%s2568_s11 + $0xe8] sm:$0xff] }
 0x1a3   : > { %v1729_v56 = vmul.f32 %v3152_v59, %v1701_v3  ;;  %v2272_v30 = vld [vmem:[%s2568_s11 + $0xe1] sm:$0xff]  ;;  %v2273_v3 = vld [vmem:[%s2568_s11 + $0xe9] sm:$0xff] }
 0x1a4   : > { %2330 = vst [vmem:[%s3190_s10] sm:$0xff] %v2329_v14   ;;  %v1302_v36 = vpop.f32.mrf.mxu2  ;;  %v1474_v28 = vpop.f32.mrf.mxu3  ;;  %v3385_v14 = vld [vmem:[#allocation30_spill] sm:$0xff] }
 0x1a5   : > { %v1358_v46 = vadd.f32 %v1302_v36, %v1186_v29  ;;  %v1133_v57 = vpop.f32.mrf.mxu1  ;;  %v1757_v35 = vadd.f32 %v3169_v50, %v1729_v56  ;;  %v1072_v36 = vpack.c.bf16 %v2307_v37, %v3161_v55  ;;  %v1244_v56 = vpack.c.bf16 %v2236_v0, %v2235_v22 }
 0x1a6   : > { %v1187_v11 = vadd.f32 %v1133_v57, %v3384_v54  ;;  %v1588_v57 = vpack.c.bf16 %v2310_v39, %v2309_v24 }
 0x1a7   : > { %v1530_v38 = vadd.f32 %v1474_v28, %v1358_v46  ;;  %v1649_v26 = vpop.f32.mrf.mxu0  ;;  %v1805_v20 = vmul.f32 0.1, %v1757_v35  ;;  %vm1781_vm4 = vcmp.ge.f32.partialorder %v1757_v35, 0.0  ;;  %v1416_v46 = vpack.c.bf16 %v2273_v3, %v2272_v30 }
 0x1a8   : > { %2211 = vmatmul.msk.bf16.gmra.mxu1 %vm301_vm1, %v1071_v4 }
 0x1a9   : > { %v1702_v27 = vadd.f32 %v1646_v53, %v1530_v38  ;;  %2248 = vmatmul.msk.bf16.gmra.mxu2 %vm301_vm1, %v1243_v61  ;;  %2285 = vmatmul.msk.bf16.gmra.mxu3 %vm301_vm1, %v1415_v25  ;;  %v1829_v33 = vsel %vm1781_vm4, %v1757_v35, %v1805_v20 }
 0x1aa   : > { %2322 = vmatmul.msk.bf16.gmra.mxu0 %vm301_vm1, %v1587_v2 }
 0x1ab   : > { %v1730_v15 = vmul.f32 %v3152_v59, %v1702_v27 }
 0x1ac   : > { %v1305_v21 = vpop.f32.mrf.mxu2  ;;  %v1477_v5 = vpop.f32.mrf.mxu3 }
 0x1ad   : > { %v1758_v47 = vadd.f32 %v3169_v50, %v1730_v15  ;;  %v1359_v17 = vadd.f32 %v1305_v21, %v1187_v11  ;;  %v1135_v1 = vpop.f32.mrf.mxu1 }
 0x1ae   : > { %v1188_v9 = vadd.f32 %v1135_v1, %v3385_v14 }
 0x1af   : > { %vm1782_vm5 = vcmp.ge.f32.partialorder %v1758_v47, 0.0  ;;  %v1806_v7 = vmul.f32 0.1, %v1758_v47  ;;  %v1531_v44 = vadd.f32 %v1477_v5, %v1359_v17  ;;  %v1651_v41 = vpop.f32.mrf.mxu0 }
 0x1b1   : > { %v1830_v45 = vsel %vm1782_vm5, %v1758_v47, %v1806_v7  ;;  %v1703_v48 = vadd.f32 %v1649_v26, %v1531_v44 }
 0x1b2   : > { %v2334_v53 = vpack.c.bf16 %v1830_v45, %v1829_v33 }
 0x1b3   : > { %v1731_v28 = vmul.f32 %v3152_v59, %v1703_v48 }
 0x1b4   : > { %2386 = vst [vmem:[%s3190_s10 + $0x8] sm:$0xff] %v2334_v53   ;;  %v1307_v29 = vpop.f32.mrf.mxu2  ;;  %v1479_v31 = vpop.f32.mrf.mxu3 }
 0x1b5   : > { %v1360_v58 = vadd.f32 %v1307_v29, %v1188_v9  ;;  %v1138_v4 = vpop.f32.mrf.mxu1  ;;  %v1759_v43 = vadd.f32 %v3169_v50, %v1731_v28 }
 0x1b6   : > { %v1189_v37 = vadd.f32 %v1138_v4, %v3010_v16 }
 0x1b7   : > { %v1532_v51 = vadd.f32 %v1479_v31, %v1360_v58  ;;  %v1654_v61 = vpop.f32.mrf.mxu0  ;;  %v1807_v26 = vmul.f32 0.1, %v1759_v43  ;;  %vm1783_vm6 = vcmp.ge.f32.partialorder %v1759_v43, 0.0 }
 0x1b8   : > { %2212 = vmatmul.msk.bf16.gmra.mxu1 %vm301_vm1, %v1072_v36 }
 0x1b9   : > { %v1704_v25 = vadd.f32 %v1651_v41, %v1532_v51  ;;  %2249 = vmatmul.msk.bf16.gmra.mxu2 %vm301_vm1, %v1244_v56  ;;  %2286 = vmatmul.msk.bf16.gmra.mxu3 %vm301_vm1, %v1416_v46  ;;  %v1831_v5 = vsel %vm1783_vm6, %v1759_v43, %v1807_v26 }
 0x1ba   : > { %2323 = vmatmul.msk.bf16.gmra.mxu0 %vm301_vm1, %v1588_v57 }
 0x1bb   : > { %v1732_v55 = vmul.f32 %v3152_v59, %v1704_v25 }
 0x1bc   : > { %v1310_v2 = vpop.f32.mrf.mxu2  ;;  %v1482_v38 = vpop.f32.mrf.mxu3 }
 0x1bd   : > { %v1760_v35 = vadd.f32 %v3169_v50, %v1732_v55  ;;  %v1361_v27 = vadd.f32 %v1310_v2, %v1189_v37  ;;  %v1140_v15 = vpop.f32.mrf.mxu1 }
 0x1be   : > { %v1190_v1 = vadd.f32 %v1140_v15, %v3020_v12 }
 0x1bf   : > { %vm1784_vm7 = vcmp.ge.f32.partialorder %v1760_v35, 0.0  ;;  %v1808_v54 = vmul.f32 0.1, %v1760_v35  ;;  %v1533_v11 = vadd.f32 %v1482_v38, %v1361_v27  ;;  %v1656_v21 = vpop.f32.mrf.mxu0 }
 0x1c1   : > { %v1832_v20 = vsel %vm1784_vm7, %v1760_v35, %v1808_v54  ;;  %v1705_v47 = vadd.f32 %v1654_v61, %v1533_v11 }
 0x1c2   : > { %v2339_v17 = vpack.c.bf16 %v1832_v20, %v1831_v5 }
 0x1c3   : > { %v1733_v44 = vmul.f32 %v3152_v59, %v1705_v47 }
 0x1c4   : > { %2387 = vst [vmem:[%s3190_s10 + $0x10] sm:$0xff] %v2339_v17   ;;  %v1312_v16 = vpop.f32.mrf.mxu2  ;;  %v1484_v7 = vpop.f32.mrf.mxu3 }
 0x1c5   : > { %v1362_v41 = vadd.f32 %v1312_v16, %v1190_v1  ;;  %v1143_v33 = vpop.f32.mrf.mxu1  ;;  %v1761_v22 = vadd.f32 %v3169_v50, %v1733_v44 }
 0x1c6   : > { %v1191_v30 = vadd.f32 %v1143_v33, %v3025_v32 }
 0x1c7   : > { %v1534_v45 = vadd.f32 %v1484_v7, %v1362_v41  ;;  %v1659_v48 = vpop.f32.mrf.mxu0  ;;  %v1809_v12 = vmul.f32 0.1, %v1761_v22  ;;  %vm1785_vm8 = vcmp.ge.f32.partialorder %v1761_v22, 0.0 }
 0x1c9   : > { %v1706_v53 = vadd.f32 %v1656_v21, %v1534_v45  ;;  %v1833_v28 = vsel %vm1785_vm8, %v1761_v22, %v1809_v12 }
 0x1cb   : > { %v1734_v0 = vmul.f32 %v3152_v59, %v1706_v53 }
 0x1cc   : > { %v1315_v3 = vpop.f32.mrf.mxu2  ;;  %v1487_v14 = vpop.f32.mrf.mxu3 }
 0x1cd   : > { %v1762_v9 = vadd.f32 %v3169_v50, %v1734_v0  ;;  %v1363_v24 = vadd.f32 %v1315_v3, %v1191_v30  ;;  %v1145_v39 = vpop.f32.mrf.mxu1 }
 0x1ce   : > { %v1192_v46 = vadd.f32 %v1145_v39, %v3035_v6 }
 0x1cf   : > { %vm1786_vm9 = vcmp.ge.f32.partialorder %v1762_v9, 0.0  ;;  %v1810_v29 = vmul.f32 0.1, %v1762_v9  ;;  %v1535_v31 = vadd.f32 %v1487_v14, %v1363_v24  ;;  %v1661_v36 = vpop.f32.mrf.mxu0 }
 0x1d1   : > { %v1834_v58 = vsel %vm1786_vm9, %v1762_v9, %v1810_v29  ;;  %v1707_v4 = vadd.f32 %v1659_v48, %v1535_v31 }
 0x1d2   : > { %v2344_v56 = vpack.c.bf16 %v1834_v58, %v1833_v28 }
 0x1d3   : > { %v1735_v51 = vmul.f32 %v3152_v59, %v1707_v4 }
 0x1d4   : > { %2388 = vst [vmem:[%s3190_s10 + $0x18] sm:$0xff] %v2344_v56   ;;  %v1317_v32 = vpop.f32.mrf.mxu2  ;;  %v1489_v57 = vpop.f32.mrf.mxu3 }
 0x1d5   : > { %v1364_v61 = vadd.f32 %v1317_v32, %v1192_v46  ;;  %v1148_v43 = vpop.f32.mrf.mxu1  ;;  %v1763_v37 = vadd.f32 %v3169_v50, %v1735_v51 }
 0x1d6   : > { %v1193_v26 = vadd.f32 %v1148_v43, %v3040_v49 }
 0x1d7   : > { %v1536_v25 = vadd.f32 %v1489_v57, %v1364_v61  ;;  %v1664_v55 = vpop.f32.mrf.mxu0  ;;  %v1811_v6 = vmul.f32 0.1, %v1763_v37  ;;  %vm1787_vm10 = vcmp.ge.f32.partialorder %v1763_v37, 0.0 }
 0x1d9   : > { %v1708_v2 = vadd.f32 %v1661_v36, %v1536_v25  ;;  %v1835_v47 = vsel %vm1787_vm10, %v1763_v37, %v1811_v6 }
 0x1db   : > { %v1736_v38 = vmul.f32 %v3152_v59, %v1708_v2 }
 0x1dc   : > { %v1320_v35 = vpop.f32.mrf.mxu2  ;;  %v1492_v27 = vpop.f32.mrf.mxu3 }
 0x1dd   : > { %v1764_v15 = vadd.f32 %v3169_v50, %v1736_v38  ;;  %v1365_v54 = vadd.f32 %v1320_v35, %v1193_v26  ;;  %v1150_v11 = vpop.f32.mrf.mxu1 }
 0x1de   : > { %v1194_v7 = vadd.f32 %v1150_v11, %v3050_v40 }
 0x1df   : > { %vm1788_vm11 = vcmp.ge.f32.partialorder %v1764_v15, 0.0  ;;  %v1812_v21 = vmul.f32 0.1, %v1764_v15  ;;  %v1537_v5 = vadd.f32 %v1492_v27, %v1365_v54  ;;  %v1666_v20 = vpop.f32.mrf.mxu0 }
 0x1e1   : > { %v1836_v17 = vsel %vm1788_vm11, %v1764_v15, %v1812_v21  ;;  %v1709_v1 = vadd.f32 %v1664_v55, %v1537_v5 }
 0x1e2   : > { %v2349_v16 = vpack.c.bf16 %v1836_v17, %v1835_v47 }
 0x1e3   : > { %v1737_v41 = vmul.f32 %v3152_v59, %v1709_v1 }
 0x1e4   : > { %2389 = vst [vmem:[%s3190_s10 + $0x20] sm:$0xff] %v2349_v16   ;;  %v1322_v49 = vpop.f32.mrf.mxu2  ;;  %v1494_v44 = vpop.f32.mrf.mxu3 }
 0x1e5   : > { %v1366_v33 = vadd.f32 %v1322_v49, %v1194_v7  ;;  %v1153_v45 = vpop.f32.mrf.mxu1  ;;  %v1765_v53 = vadd.f32 %v3169_v50, %v1737_v41 }
 0x1e6   : > { %v1195_v3 = vadd.f32 %v1153_v45, %v3055_v34 }
 0x1e7   : > { %v1538_v48 = vadd.f32 %v1494_v44, %v1366_v33  ;;  %v1669_v22 = vpop.f32.mrf.mxu0  ;;  %v1813_v40 = vmul.f32 0.1, %v1765_v53  ;;  %vm1789_vm12 = vcmp.ge.f32.partialorder %v1765_v53, 0.0 }
 0x1e9   : > { %v1710_v0 = vadd.f32 %v1666_v20, %v1538_v48  ;;  %v1837_v28 = vsel %vm1789_vm12, %v1765_v53, %v1813_v40 }
 0x1eb   : > { %v1738_v30 = vmul.f32 %v3152_v59, %v1710_v0 }
 0x1ec   : > { %v1325_v14 = vpop.f32.mrf.mxu2  ;;  %v1497_v12 = vpop.f32.mrf.mxu3 }
 0x1ed   : > { %v1766_v9 = vadd.f32 %v3169_v50, %v1738_v30  ;;  %v1367_v24 = vadd.f32 %v1325_v14, %v1195_v3  ;;  %v1155_v39 = vpop.f32.mrf.mxu1 }
 0x1ee   : > { %v1196_v46 = vadd.f32 %v1155_v39, %v3065_v60 }
 0x1ef   : > { %vm1790_vm13 = vcmp.ge.f32.partialorder %v1766_v9, 0.0  ;;  %v1814_v29 = vmul.f32 0.1, %v1766_v9  ;;  %v1539_v31 = vadd.f32 %v1497_v12, %v1367_v24  ;;  %v1671_v36 = vpop.f32.mrf.mxu0 }
 0x1f1   : > { %v1838_v58 = vsel %vm1790_vm13, %v1766_v9, %v1814_v29  ;;  %v1711_v4 = vadd.f32 %v1669_v22, %v1539_v31 }
 0x1f2   : > { %v2354_v56 = vpack.c.bf16 %v1838_v58, %v1837_v28 }
 0x1f3   : > { %v1739_v57 = vmul.f32 %v3152_v59, %v1711_v4 }
 0x1f4   : > { %2390 = vst [vmem:[%s3190_s10 + $0x28] sm:$0xff] %v2354_v56   ;;  %v1327_v34 = vpop.f32.mrf.mxu2  ;;  %v1499_v32 = vpop.f32.mrf.mxu3 }
 0x1f5   : > { %v1368_v51 = vadd.f32 %v1327_v34, %v1196_v46  ;;  %v1158_v61 = vpop.f32.mrf.mxu1  ;;  %v1767_v55 = vadd.f32 %v3169_v50, %v1739_v57 }
 0x1f6   : > { %v1197_v38 = vadd.f32 %v1158_v61, %v3070_v23 }
 0x1f7   : > { %v1540_v43 = vadd.f32 %v1499_v32, %v1368_v51  ;;  %v1674_v25 = vpop.f32.mrf.mxu0  ;;  %v1815_v60 = vmul.f32 0.1, %v1767_v55  ;;  %vm1791_vm14 = vcmp.ge.f32.partialorder %v1767_v55, 0.0 }
 0x1f9   : > { %v1712_v37 = vadd.f32 %v1671_v36, %v1540_v43  ;;  %v1839_v5 = vsel %vm1791_vm14, %v1767_v55, %v1815_v60 }
 0x1fb   : > { %v1740_v2 = vmul.f32 %v3152_v59, %v1712_v37 }
 0x1fc   : > { %v1330_v26 = vpop.f32.mrf.mxu2  ;;  %v1502_v35 = vpop.f32.mrf.mxu3 }
 0x1fd   : > { %v1768_v27 = vadd.f32 %v3169_v50, %v1740_v2  ;;  %v1369_v6 = vadd.f32 %v1330_v26, %v1197_v38  ;;  %v1160_v15 = vpop.f32.mrf.mxu1 }
 0x1fe   : > { %v1198_v1 = vadd.f32 %v1160_v15, %v3080_v10 }
 0x1ff   : > { %vm1792_vm15 = vcmp.ge.f32.partialorder %v1768_v27, 0.0  ;;  %v1816_v54 = vmul.f32 0.1, %v1768_v27  ;;  %v1541_v11 = vadd.f32 %v1502_v35, %v1369_v6  ;;  %v1676_v21 = vpop.f32.mrf.mxu0 }
 0x201   : > { %v1840_v20 = vsel %vm1792_vm15, %v1768_v27, %v1816_v54  ;;  %v1713_v47 = vadd.f32 %v1674_v25, %v1541_v11 }
 0x202   : > { %v2359_v17 = vpack.c.bf16 %v1840_v20, %v1839_v5 }
 0x203   : > { %v1741_v7 = vmul.f32 %v3152_v59, %v1713_v47 }
 0x204   : > { %2391 = vst [vmem:[%s3190_s10 + $0x30] sm:$0xff] %v2359_v17   ;;  %v1332_v23 = vpop.f32.mrf.mxu2  ;;  %v1504_v16 = vpop.f32.mrf.mxu3 }
 0x205   : > { %v1370_v49 = vadd.f32 %v1332_v23, %v1198_v1  ;;  %v1163_v44 = vpop.f32.mrf.mxu1  ;;  %v1769_v45 = vadd.f32 %v3169_v50, %v1741_v7 }
 0x206   : > { %v1199_v53 = vadd.f32 %v1163_v44, %v3085_v18 }
 0x207   : > { %v1542_v41 = vadd.f32 %v1504_v16, %v1370_v49  ;;  %v1679_v33 = vpop.f32.mrf.mxu0  ;;  %v1817_v10 = vmul.f32 0.1, %v1769_v45  ;;  %vm1793_vm0 = vcmp.ge.f32.partialorder %v1769_v45, 0.0 }
 0x209   : > { %v1714_v48 = vadd.f32 %v1676_v21, %v1542_v41  ;;  %v1841_v39 = vsel %vm1793_vm0, %v1769_v45, %v1817_v10 }
 0x20b   : > { %v1742_v22 = vmul.f32 %v3152_v59, %v1714_v48 }
 0x20c   : > { %v1335_v0 = vpop.f32.mrf.mxu2  ;;  %v1507_v30 = vpop.f32.mrf.mxu3 }
 0x20d   : > { %v1770_v3 = vadd.f32 %v3169_v50, %v1742_v22  ;;  %v1371_v14 = vadd.f32 %v1335_v0, %v1199_v53  ;;  %v1165_v12 = vpop.f32.mrf.mxu1 }
 0x20e   : > { %v1200_v28 = vadd.f32 %v1165_v12, %v3095_v13 }
 0x20f   : > { %vm1794_vm1 = vcmp.ge.f32.partialorder %v1770_v3, 0.0  ;;  %v1818_v40 = vmul.f32 0.1, %v1770_v3  ;;  %v1543_v9 = vadd.f32 %v1507_v30, %v1371_v14  ;;  %v1681_v24 = vpop.f32.mrf.mxu0 }
 0x211   : > { %v1842_v29 = vsel %vm1794_vm1, %v1770_v3, %v1818_v40  ;;  %v1715_v31 = vadd.f32 %v1679_v33, %v1543_v9 }
 0x212   : > { %v2364_v36 = vpack.c.bf16 %v1842_v29, %v1841_v39 }
 0x213   : > { %v1743_v4 = vmul.f32 %v3152_v59, %v1715_v31 }
 0x214   : > { %2392 = vst [vmem:[%s3190_s10 + $0x38] sm:$0xff] %v2364_v36   ;;  %v1337_v18 = vpop.f32.mrf.mxu2  ;;  %v1509_v58 = vpop.f32.mrf.mxu3 }
 0x215   : > { %v1372_v56 = vadd.f32 %v1337_v18, %v1200_v28  ;;  %v1168_v46 = vpop.f32.mrf.mxu1  ;;  %v1771_v57 = vadd.f32 %v3169_v50, %v1743_v4 }
 0x216   : > { %v1201_v43 = vadd.f32 %v1168_v46, %v3100_v19 }
 0x217   : > { %v1544_v34 = vadd.f32 %v1509_v58, %v1372_v56  ;;  %v1684_v32 = vpop.f32.mrf.mxu0  ;;  %v1819_v13 = vmul.f32 0.1, %v1771_v57  ;;  %vm1795_vm2 = vcmp.ge.f32.partialorder %v1771_v57, 0.0 }
 0x219   : > { %v1716_v51 = vadd.f32 %v1681_v24, %v1544_v34  ;;  %v1843_v27 = vsel %vm1795_vm2, %v1771_v57, %v1819_v13 }
 0x21b   : > { %v1744_v61 = vmul.f32 %v3152_v59, %v1716_v51 }
 0x21c   : > { %v1340_v25 = vpop.f32.mrf.mxu2  ;;  %v1512_v55 = vpop.f32.mrf.mxu3 }
 0x21d   : > { %v1772_v37 = vadd.f32 %v3169_v50, %v1744_v61  ;;  %v1373_v2 = vadd.f32 %v1340_v25, %v1201_v43  ;;  %v1170_v38 = vpop.f32.mrf.mxu1 }
 0x21e   : > { %v1202_v11 = vadd.f32 %v1170_v38, %v3111_v62 }
 0x21f   : > { %vm1796_vm3 = vcmp.ge.f32.partialorder %v1772_v37, 0.0  ;;  %v1820_v26 = vmul.f32 0.1, %v1772_v37  ;;  %v1545_v35 = vadd.f32 %v1512_v55, %v1373_v2  ;;  %v1686_v60 = vpop.f32.mrf.mxu0 }
 0x221   : > { %v1844_v6 = vsel %vm1796_vm3, %v1772_v37, %v1820_v26  ;;  %v1717_v15 = vadd.f32 %v1684_v32, %v1545_v35 }
 0x222   : > { %v2369_v54 = vpack.c.bf16 %v1844_v6, %v1843_v27 }
 0x223   : > { %v1745_v5 = vmul.f32 %v3152_v59, %v1717_v15 }
 0x224   : > { %2393 = vst [vmem:[%s3190_s10 + $0x40] sm:$0xff] %v2369_v54   ;;  %v1342_v19 = vpop.f32.mrf.mxu2  ;;  %v1514_v21 = vpop.f32.mrf.mxu3 }
 0x225   : > { %v1374_v20 = vadd.f32 %v1342_v19, %v1202_v11  ;;  %v1173_v47 = vpop.f32.mrf.mxu1  ;;  %v1773_v1 = vadd.f32 %v3169_v50, %v1745_v5 }
 0x226   : > { %v1203_v49 = vadd.f32 %v1173_v47, %v3116_v63 }
 0x227   : > { %v1546_v17 = vadd.f32 %v1514_v21, %v1374_v20  ;;  %v1689_v16 = vpop.f32.mrf.mxu0  ;;  %v1821_v62 = vmul.f32 0.1, %v1773_v1  ;;  %vm1797_vm4 = vcmp.ge.f32.partialorder %v1773_v1, 0.0 }
 0x229   : > { %v1718_v23 = vadd.f32 %v1686_v60, %v1546_v17  ;;  %v1845_v0 = vsel %vm1797_vm4, %v1773_v1, %v1821_v62 }
 0x22b   : > { %v1746_v7 = vmul.f32 %v3152_v59, %v1718_v23 }
 0x22c   : > { %v1345_v44 = vpop.f32.mrf.mxu2  ;;  %v1517_v41 = vpop.f32.mrf.mxu3 }
 0x22d   : > { %v1774_v33 = vadd.f32 %v3169_v50, %v1746_v7  ;;  %v1375_v45 = vadd.f32 %v1345_v44, %v1203_v49  ;;  %v1175_v48 = vpop.f32.mrf.mxu1 }
 0x22e   : > { %v1204_v14 = vadd.f32 %v1175_v48, %v3127_v52 }
 0x22f   : > { %vm1798_vm5 = vcmp.ge.f32.partialorder %v1774_v33, 0.0  ;;  %v1822_v22 = vmul.f32 0.1, %v1774_v33  ;;  %v1547_v53 = vadd.f32 %v1517_v41, %v1375_v45  ;;  %v1691_v12 = vpop.f32.mrf.mxu0 }
 0x231   : > { %v1846_v30 = vsel %vm1798_vm5, %v1774_v33, %v1822_v22  ;;  %v1719_v10 = vadd.f32 %v1689_v16, %v1547_v53 }
 0x232   : > { %v2374_v3 = vpack.c.bf16 %v1846_v30, %v1845_v0 }
 0x233   : > { %v1747_v9 = vmul.f32 %v3152_v59, %v1719_v10 }
 0x234   : > { %2394 = vst [vmem:[%s3190_s10 + $0x48] sm:$0xff] %v2374_v3   ;;  %v1347_v63 = vpop.f32.mrf.mxu2  ;;  %v1519_v40 = vpop.f32.mrf.mxu3 }
 0x235   : > { %v1376_v24 = vadd.f32 %v1347_v63, %v1204_v14  ;;  %v1178_v39 = vpop.f32.mrf.mxu1  ;;  %v1775_v31 = vadd.f32 %v3169_v50, %v1747_v9 }
 0x236   : > { %v1205_v18 = vadd.f32 %v1178_v39, %v3132_v8 }
 0x237   : > { %v1548_v29 = vadd.f32 %v1519_v40, %v1376_v24  ;;  %v1823_v52 = vmul.f32 0.1, %v1775_v31  ;;  %vm1799_vm6 = vcmp.ge.f32.partialorder %v1775_v31, 0.0  ;;  %v1694_v34 = vpop.f32.mrf.mxu0 }
 0x239   : > { %v1720_v36 = vadd.f32 %v1691_v12, %v1548_v29  ;;  %v1847_v61 = vsel %vm1799_vm6, %v1775_v31, %v1823_v52 }
 0x23b   : > { %v1748_v28 = vmul.f32 %v3152_v59, %v1720_v36 }
 0x23c   : > { %v1350_v58 = vpop.f32.mrf.mxu2  ;;  %v1522_v4 = vpop.f32.mrf.mxu3 }
 0x23d   : > { %v1776_v56 = vadd.f32 %v3169_v50, %v1748_v28  ;;  %v1377_v46 = vadd.f32 %v1350_v58, %v1205_v18  ;;  %v1180_v51 = vpop.f32.mrf.mxu1 }
 0x23e   : > { %v1206_v13 = vadd.f32 %v1180_v51, %v3143_v42 }
 0x23f   : > { %vm1800_vm7 = vcmp.ge.f32.partialorder %v1776_v56, 0.0  ;;  %v1824_v32 = vmul.f32 0.1, %v1776_v56  ;;  %v1549_v57 = vadd.f32 %v1522_v4, %v1377_v46  ;;  %v1696_v35 = vpop.f32.mrf.mxu0 }
 0x241   : > { %v1848_v43 = vsel %vm1800_vm7, %v1776_v56, %v1824_v32  ;;  %v1721_v25 = vadd.f32 %v1694_v34, %v1549_v57 }
 0x242   : > { %v2379_v55 = vpack.c.bf16 %v1848_v43, %v1847_v61 }
 0x243   : > { %v1749_v37 = vmul.f32 %v3152_v59, %v1721_v25 }
 0x244   : > { %2395 = vst [vmem:[%s3190_s10 + $0x50] sm:$0xff] %v2379_v55   ;;  %v1352_v8 = vpop.f32.mrf.mxu2  ;;  %v1524_v38 = vpop.f32.mrf.mxu3 }
 0x245   : > { %v1378_v2 = vadd.f32 %v1352_v8, %v1206_v13  ;;  %v1777_v60 = vadd.f32 %v3169_v50, %v1749_v37 }
 0x247   : > { %v1550_v26 = vadd.f32 %v1524_v38, %v1378_v2  ;;  %v1825_v15 = vmul.f32 0.1, %v1777_v60  ;;  %vm1801_vm8 = vcmp.ge.f32.partialorder %v1777_v60, 0.0 }
 0x249   : > { %v1722_v27 = vadd.f32 %v1696_v35, %v1550_v26  ;;  %v1849_v11 = vsel %vm1801_vm8, %v1777_v60, %v1825_v15 }
 0x24b   : > { %v1750_v6 = vmul.f32 %v3152_v59, %v1722_v27 }
 0x24d   : > { %v1778_v54 = vadd.f32 %v3169_v50, %v1750_v6 }
 0x24f   : > { %vm1802_vm9 = vcmp.ge.f32.partialorder %v1778_v54, 0.0  ;;  %v1826_v42 = vmul.f32 0.1, %v1778_v54 }
 0x251   : > { %v1850_v19 = vsel %vm1802_vm9, %v1778_v54, %v1826_v42 }
 0x252   : > { %v2384_v21 = vpack.c.bf16 %v1850_v19, %v1849_v11 }
 0x254   : > { %2396 = vst [vmem:[%s3190_s10 + $0x58] sm:$0xff] %v2384_v21  }
 0x255 PF: > { %s14_s19 = sadd.s32 1, %s2482_s19   ;;  %s3386_s15 = smov %s2474_s17 }
 0x256   : > { %p11_p7 = scmp.ge.s32.totalorder %s14_s19, 6   ;;  %s3387_s16 = smov %s2478_s18 }
 0x257   : > { %s3388_s17 = smov %s3391_s20  ;;  %s3389_s18 = smov %s3395_s21 }
 0x258   :  { %13 = sbr.rel (!%p11_p7) target bundleno = 3 (0x3), region = 83 }

// kernel: _lambda_.17
= control target key start
LH: loop header
LB: loop body
LE: loop exit
PB: predicated region body
PF: predicated region fallthrough
CT: control target
= control target key end

     0   :  { %s572_s15 = smov 0   ;;  %s574_s16 = smov 0   ;;  %s625_s0 = inlined_call_operand.vmem [shape: f32[2,64,32], index: 0, kind: input, shape index: {}]   ;;  %s626_s1 = inlined_call_operand.vmem [shape: bf16[1,32,128], index: 1, kind: input, shape index: {}]   ;;  %s627_s2 = inlined_call_operand.vmem [shape: f32[1,128], index: 2, kind: input, shape index: {}]   ;;  %s628_s3 = inlined_call_operand.vmem [shape: f32[1,128], index: 3, kind: input, shape index: {}]   ;;  %s629_s4 = inlined_call_operand.vmem [shape: bf16[2,64,128], index: 4, kind: output, shape index: {}]  }
   0x1   :  { %s576_s17 = smov 0  }
   0x2 LB: > { %s26_s18 = sadd.s32 1, %s541_s16  ;;  %p445_p0 = scmp.ge.s32.totalorder %s545_s17, 1  ;;  %s545_s17 = sphi %s576_s17, %s14_s17   ;;  %s541_s16 = sphi %s574_s16, %s631_s16   ;;  %s537_s15 = sphi %s572_s15, %s630_s15  }
   0x3   : > { %p28_p1 = scmp.ge.s32.totalorder %s26_s18, 2  ;;  %p176_p2 = scmp.lt.s32.totalorder %s545_s17, 3 }
   0x5   : > { %s633_s18 = smov (%p28_p1, %s26_s18), 0  ;;  %p177_p3 = pnand %p445_p0, %p176_p2 }
   0x6   : > { %p206_p4 = scmp.lt.s32.totalorder (!%p177_p3), %s537_s15, 1 }
   0x7   : > { %180 = sbr.rel (%p177_p3) target bundleno = 172 (0xac), region = 36 }
   0xc   : > { %v467_v0 = vld [vmem:[%s626_s1 + $0x8] sm:$0xff]  ;;  %v466_v1 = vld [vmem:[%s626_s1] sm:$0xff]  ;;  %s635_s15 = smov (!%p206_p4, %s537_s15), 1  ;;  %vm252_vm0 = vcmask 261120  }
   0xd   : > { %271 = vmatpush.bf16.msra.mxu0 %v467_v0  ;;  %491 = vmatpush.bf16.msra.mxu1 %v467_v0  ;;  %s464_s23 = sshll.u32 %s635_s15, 6  ;;  %v521_v14 = vld [vmem:[%s627_s2] ss:$0 sm:$0xff]  ;;  %s465_s5 = sshll.u32 %s635_s15, 5 }
   0xe   : > { %492 = vmatpush.bf16.msra.mxu2 %v467_v0  ;;  %493 = vmatpush.bf16.msra.mxu3 %v467_v0  ;;  %s210_s26 = scalar_lea.vmem %s625_s0, %s464_s23  ;;  %v522_v18 = vld [vmem:[%s628_s3] ss:$0 sm:$0xff]  ;;  %s219_s8 = scalar_lea.vmem %s629_s4, %s465_s5 }
   0xf   : > { %v224_v2 = vld [vmem:[%s210_s26] sm:$0xff]  ;;  %v225_v3 = vld [vmem:[%s210_s26 + $0x8] sm:$0xff]  ;;  %v226_v4 = vld [vmem:[%s210_s26 + $0x10] sm:$0xff] }
  0x10   : > { %v232_v5 = vpack.c.bf16 %v225_v3, %v224_v2  ;;  %v227_v6 = vld [vmem:[%s210_s26 + $0x18] sm:$0xff]  ;;  %v228_v7 = vld [vmem:[%s210_s26 + $0x20] sm:$0xff]  ;;  %v229_v8 = vld [vmem:[%s210_s26 + $0x28] sm:$0xff] }
  0x11   : > { %272 = vmatpush.bf16.msra.mxu0 %v466_v1  ;;  %494 = vmatpush.bf16.msra.mxu1 %v466_v1  ;;  %v233_v9 = vpack.c.bf16 %v227_v6, %v226_v4  ;;  %v234_v10 = vpack.c.bf16 %v229_v8, %v228_v7  ;;  %v230_v11 = vld [vmem:[%s210_s26 + $0x30] sm:$0xff]  ;;  %v231_v12 = vld [vmem:[%s210_s26 + $0x38] sm:$0xff] }
  0x12   : > { %495 = vmatpush.bf16.msra.mxu2 %v466_v1  ;;  %496 = vmatpush.bf16.msra.mxu3 %v466_v1  ;;  %v235_v13 = vpack.c.bf16 %v231_v12, %v230_v11 }
  0x14   : > { %458 = vmatmul.msk.bf16.vlgmr.msra.gmra.mxu0 %vm252_vm0, %v232_v5  ;;  %459 = vmatmul.msk.bf16.vlgmr.msra.gmra.mxu1 %vm252_vm0, %v233_v9 }
  0x15   : > { %460 = vmatmul.msk.bf16.vlgmr.msra.gmra.mxu2 %vm252_vm0, %v234_v10  ;;  %461 = vmatmul.msk.bf16.vlgmr.msra.gmra.mxu3 %vm252_vm0, %v235_v13 }
  0x91   : > { %v274_v15 = vpop.f32.mrf.mxu0  ;;  %v279_v16 = vpop.f32.mrf.mxu1 }
  0x92   : > { %v298_v17 = vmul.f32 %v521_v14, %v274_v15  ;;  %v300_v19 = vmul.f32 %v521_v14, %v279_v16 }
  0x94   : > { %v310_v20 = vadd.f32 %v522_v18, %v298_v17  ;;  %v312_v22 = vadd.f32 %v522_v18, %v300_v19 }
  0x96   : > { %v326_v29 = vmul.f32 0.1, %v310_v20  ;;  %vm318_vm1 = vcmp.ge.f32.partialorder %v310_v20, 0.0  ;;  %v328_v32 = vmul.f32 0.1, %v312_v22  ;;  %vm320_vm2 = vcmp.ge.f32.partialorder %v312_v22, 0.0 }
  0x98   : > { %v284_v21 = vpop.f32.mrf.mxu2  ;;  %v289_v23 = vpop.f32.mrf.mxu3  ;;  %v334_v37 = vsel %vm318_vm1, %v310_v20, %v326_v29  ;;  %v336_v41 = vsel %vm320_vm2, %v312_v22, %v328_v32 }
  0x99   : > { %v276_v24 = vpop.f32.mrf.mxu0  ;;  %v281_v26 = vpop.f32.mrf.mxu1  ;;  %v302_v27 = vmul.f32 %v521_v14, %v284_v21  ;;  %v304_v30 = vmul.f32 %v521_v14, %v289_v23 }
  0x9a   : > { %v299_v25 = vmul.f32 %v521_v14, %v276_v24  ;;  %v301_v28 = vmul.f32 %v521_v14, %v281_v26 }
  0x9b   : > { %v314_v35 = vadd.f32 %v522_v18, %v302_v27  ;;  %v316_v38 = vadd.f32 %v522_v18, %v304_v30 }
  0x9c   : > { %v311_v31 = vadd.f32 %v522_v18, %v299_v25  ;;  %v313_v33 = vadd.f32 %v522_v18, %v301_v28 }
  0x9d   : > { %v330_v48 = vmul.f32 0.1, %v314_v35  ;;  %vm322_vm5 = vcmp.ge.f32.partialorder %v314_v35, 0.0  ;;  %v332_v50 = vmul.f32 0.1, %v316_v38  ;;  %vm324_vm6 = vcmp.ge.f32.partialorder %v316_v38, 0.0 }
  0x9e   : > { %vm319_vm3 = vcmp.ge.f32.partialorder %v311_v31, 0.0  ;;  %v327_v34 = vmul.f32 0.1, %v311_v31  ;;  %vm321_vm4 = vcmp.ge.f32.partialorder %v313_v33, 0.0  ;;  %v329_v36 = vmul.f32 0.1, %v313_v33 }
  0x9f   : > { %v338_v54 = vsel %vm322_vm5, %v314_v35, %v330_v48  ;;  %v340_v56 = vsel %vm324_vm6, %v316_v38, %v332_v50 }
  0xa0   : > { %v335_v39 = vsel %vm319_vm3, %v311_v31, %v327_v34  ;;  %v286_v40 = vpop.f32.mrf.mxu2  ;;  %v337_v43 = vsel %vm321_vm4, %v313_v33, %v329_v36  ;;  %v291_v45 = vpop.f32.mrf.mxu3 }
  0xa1   : > { %v471_v42 = vpack.c.bf16 %v335_v39, %v334_v37  ;;  %v303_v44 = vmul.f32 %v521_v14, %v286_v40  ;;  %v476_v46 = vpack.c.bf16 %v337_v43, %v336_v41  ;;  %v305_v47 = vmul.f32 %v521_v14, %v291_v45 }
  0xa3   : > { %472 = vst [vmem:[%s219_s8] sm:$0xff] %v471_v42   ;;  %v315_v49 = vadd.f32 %v522_v18, %v303_v44  ;;  %v317_v51 = vadd.f32 %v522_v18, %v305_v47 }
  0xa4   : > { %488 = vst [vmem:[%s219_s8 + $0x8] sm:$0xff] %v476_v46  }
  0xa5   : > { %vm323_vm7 = vcmp.ge.f32.partialorder %v315_v49, 0.0  ;;  %v331_v52 = vmul.f32 0.1, %v315_v49  ;;  %vm325_vm8 = vcmp.ge.f32.partialorder %v317_v51, 0.0  ;;  %v333_v53 = vmul.f32 0.1, %v317_v51 }
  0xa7   : > { %v339_v55 = vsel %vm323_vm7, %v315_v49, %v331_v52  ;;  %v341_v58 = vsel %vm325_vm8, %v317_v51, %v333_v53 }
  0xa8   : > { %v481_v57 = vpack.c.bf16 %v339_v55, %v338_v54  ;;  %v486_v59 = vpack.c.bf16 %v341_v58, %v340_v56 }
  0xaa   : > { %489 = vst [vmem:[%s219_s8 + $0x10] sm:$0xff] %v481_v57  }
  0xab   : > { %490 = vst [vmem:[%s219_s8 + $0x18] sm:$0xff] %v486_v59  }
  0xac PF: > { %s14_s17 = sadd.s32 1, %s545_s17   ;;  %s630_s15 = smov %s541_s16 }
  0xad   : > { %p11_p5 = scmp.ge.s32.totalorder %s14_s17, 4   ;;  %s631_s16 = smov %s633_s18 }
  0xaf   :  { %13 = sbr.rel (!%p11_p5) target bundleno = 2 (0x2), region = 67 }

// kernel: _lambda_.16
= control target key start
LH: loop header
LB: loop body
LE: loop exit
PB: predicated region body
PF: predicated region fallthrough
CT: control target
= control target key end

     0   :  { %s1312_s15 = smov 0   ;;  %s1314_s16 = smov 0   ;;  %s1519_s0 = inlined_call_operand.vmem [shape: f32[2,160,64], index: 0, kind: input, shape index: {}]   ;;  %s1520_s1 = inlined_call_operand.vmem [shape: bf16[4,64,128], index: 1, kind: input, shape index: {}]   ;;  %s1521_s2 = inlined_call_operand.vmem [shape: f32[1,128], index: 2, kind: input, shape index: {}]   ;;  %s1522_s3 = inlined_call_operand.vmem [shape: f32[1,128], index: 3, kind: input, shape index: {}]   ;;  %s1523_s4 = inlined_call_operand.vmem [shape: bf16[2,128,128], index: 4, kind: output, shape index: {}]  }
   0x1   :  { %s1316_s17 = smov 0  }
   0x2 LB: > { %s26_s18 = sadd.s32 1, %s1281_s16  ;;  %p998_p0 = scmp.ge.s32.totalorder %s1285_s17, 1  ;;  %s1285_s17 = sphi %s1316_s17, %s14_s17   ;;  %s1281_s16 = sphi %s1314_s16, %s1525_s16   ;;  %s1277_s15 = sphi %s1312_s15, %s1524_s15  }
   0x3   : > { %p28_p1 = scmp.ge.s32.totalorder %s26_s18, 2  ;;  %p176_p2 = scmp.lt.s32.totalorder %s1285_s17, 3 }
   0x5   : > { %s1527_s18 = smov (%p28_p1, %s26_s18), 0  ;;  %p177_p3 = pnand %p998_p0, %p176_p2 }
   0x6   : > { %p206_p4 = scmp.lt.s32.totalorder (!%p177_p3), %s1277_s15, 1 }
   0x7   : > { %180 = sbr.rel (%p177_p3) target bundleno = 296 (0x128), region = 36 }
   0xc   : > { %v1180_v0 = vld [vmem:[%s1520_s1 + $0x38] sm:$0xff]  ;;  %v1179_v4 = vld [vmem:[%s1520_s1 + $0x30] sm:$0xff]  ;;  %s1529_s15 = smov (!%p206_p4, %s1277_s15), 1  ;;  %v1178_v8 = vld [vmem:[%s1520_s1 + $0x28] sm:$0xff]  ;;  %vm315_vm0 = vcmask 523264  }
   0xd   : > { %v1176_v1 = vld [vmem:[%s1520_s1 + $0x18] sm:$0xff]  ;;  %344 = vmatpush.bf16.msra.mxu0 %v1180_v0  ;;  %v1175_v5 = vld [vmem:[%s1520_s1 + $0x10] sm:$0xff]  ;;  %s1236_s9 = smul.u32 160, %s1529_s15  ;;  %v1174_v9 = vld [vmem:[%s1520_s1 + $0x8] sm:$0xff]  ;;  %s1172_s11 = sshll.u32 %s1529_s15, 6 }
   0xe   : > { %v1184_v2 = vld [vmem:[%s1520_s1 + $0x58] sm:$0xff]  ;;  %441 = vmatpush.bf16.msra.mxu1 %v1176_v1  ;;  %v1183_v6 = vld [vmem:[%s1520_s1 + $0x50] sm:$0xff]  ;;  %v1182_v10 = vld [vmem:[%s1520_s1 + $0x48] sm:$0xff]  ;;  %s1472_s14 = scalar_lea.vmem %s1523_s4, %s1172_s11 }
   0xf   : > { %v1188_v3 = vld [vmem:[%s1520_s1 + $0x78] sm:$0xff]  ;;  %573 = vmatpush.bf16.msra.mxu2 %v1184_v2  ;;  %v1187_v7 = vld [vmem:[%s1520_s1 + $0x70] sm:$0xff]  ;;  %s1366_s20 = scalar_lea.vmem %s1519_s0, %s1236_s9  ;;  %v1186_v11 = vld [vmem:[%s1520_s1 + $0x68] sm:$0xff] }
  0x10   : > { %721 = vmatpush.bf16.msra.mxu3 %v1188_v3  ;;  %v1177_v12 = vld [vmem:[%s1520_s1 + $0x20] sm:$0xff]  ;;  %v1003_v17 = vld [vmem:[%s1366_s20 + $0x9] sm:$0xff]  ;;  %v1075_v21 = vld [vmem:[%s1366_s20 + $0x18] sm:$0xff] }
  0x11   : > { %345 = vmatpush.bf16.msra.mxu0 %v1179_v4  ;;  %v1173_v13 = vld [vmem:[%s1520_s1] sm:$0xff]  ;;  %v225_v19 = vld [vmem:[%s1366_s20 + $0x8] sm:$0xff]  ;;  %v1074_v20 = vld [vmem:[%s1366_s20 + $0x10] sm:$0xff] }
  0x12   : > { %442 = vmatpush.bf16.msra.mxu1 %v1175_v5  ;;  %v1181_v14 = vld [vmem:[%s1520_s1 + $0x40] sm:$0xff]  ;;  %v1122_v22 = vld [vmem:[%s1366_s20 + $0x11] sm:$0xff]  ;;  %v504_v26 = vpack.c.bf16 %v1075_v21, %v1074_v20  ;;  %v1077_v29 = vld [vmem:[%s1366_s20 + $0x28] sm:$0xff] }
  0x13   : > { %574 = vmatpush.bf16.msra.mxu2 %v1183_v6  ;;  %v1185_v15 = vld [vmem:[%s1520_s1 + $0x60] sm:$0xff]  ;;  %v1125_v31 = vld [vmem:[%s1366_s20 + $0x29] sm:$0xff]  ;;  %v1079_v35 = vld [vmem:[%s1366_s20 + $0x38] sm:$0xff] }
  0x14   : > { %722 = vmatpush.bf16.msra.mxu3 %v1187_v7  ;;  %v1002_v16 = vld [vmem:[%s1366_s20 + $0x1] sm:$0xff]  ;;  %v1123_v23 = vld [vmem:[%s1366_s20 + $0x19] sm:$0xff]  ;;  %v1078_v34 = vld [vmem:[%s1366_s20 + $0x30] sm:$0xff] }
  0x15   : > { %346 = vmatpush.bf16.msra.mxu0 %v1178_v8  ;;  %v224_v18 = vld [vmem:[%s1366_s20] sm:$0xff]  ;;  %v274_v24 = vpack.c.bf16 %v1003_v17, %v1002_v16  ;;  %v652_v27 = vpack.c.bf16 %v1123_v23, %v1122_v22  ;;  %v1126_v36 = vld [vmem:[%s1366_s20 + $0x31] sm:$0xff]  ;;  %v506_v38 = vpack.c.bf16 %v1079_v35, %v1078_v34  ;;  %v1081_v41 = vld [vmem:[%s1366_s20 + $0x48] sm:$0xff] }
  0x16   : > { %443 = vmatpush.bf16.msra.mxu1 %v1174_v9  ;;  %v240_v25 = vpack.c.bf16 %v225_v19, %v224_v18  ;;  %v1076_v28 = vld [vmem:[%s1366_s20 + $0x20] sm:$0xff]  ;;  %v1129_v43 = vld [vmem:[%s1366_s20 + $0x49] sm:$0xff]  ;;  %v1083_v47 = vld [vmem:[%s1366_s20 + $0x58] sm:$0xff] }
  0x17   : > { %575 = vmatpush.bf16.msra.mxu2 %v1182_v10  ;;  %v1124_v30 = vld [vmem:[%s1366_s20 + $0x21] sm:$0xff]  ;;  %v505_v32 = vpack.c.bf16 %v1077_v29, %v1076_v28  ;;  %v1127_v37 = vld [vmem:[%s1366_s20 + $0x39] sm:$0xff]  ;;  %v1082_v46 = vld [vmem:[%s1366_s20 + $0x50] sm:$0xff] }
  0x18   : > { %723 = vmatpush.bf16.msra.mxu3 %v1186_v11  ;;  %v653_v33 = vpack.c.bf16 %v1125_v31, %v1124_v30  ;;  %v654_v39 = vpack.c.bf16 %v1127_v37, %v1126_v36  ;;  %v1080_v40 = vld [vmem:[%s1366_s20 + $0x40] sm:$0xff]  ;;  %v1130_v48 = vld [vmem:[%s1366_s20 + $0x51] sm:$0xff]  ;;  %v508_v50 = vpack.c.bf16 %v1083_v47, %v1082_v46  ;;  %v1085_v53 = vld [vmem:[%s1366_s20 + $0x68] sm:$0xff] }
  0x19   : > { %347 = vmatpush.bf16.msra.mxu0 %v1177_v12  ;;  %v1128_v42 = vld [vmem:[%s1366_s20 + $0x41] sm:$0xff]  ;;  %v507_v44 = vpack.c.bf16 %v1081_v41, %v1080_v40  ;;  %v1131_v49 = vld [vmem:[%s1366_s20 + $0x59] sm:$0xff]  ;;  %v1133_v55 = vld [vmem:[%s1366_s20 + $0x69] sm:$0xff] }
  0x1a   : > { %444 = vmatpush.bf16.msra.mxu1 %v1173_v13  ;;  %v655_v45 = vpack.c.bf16 %v1129_v43, %v1128_v42  ;;  %v656_v51 = vpack.c.bf16 %v1131_v49, %v1130_v48  ;;  %v1084_v52 = vld [vmem:[%s1366_s20 + $0x60] sm:$0xff]  ;;  %v1086_v58 = vld [vmem:[%s1366_s20 + $0x70] sm:$0xff]  ;;  %v1087_v59 = vld [vmem:[%s1366_s20 + $0x78] sm:$0xff] }
  0x1b   : > { %576 = vmatpush.bf16.msra.mxu2 %v1181_v14  ;;  %v1132_v54 = vld [vmem:[%s1366_s20 + $0x61] sm:$0xff]  ;;  %v509_v56 = vpack.c.bf16 %v1085_v53, %v1084_v52  ;;  %v1134_v60 = vld [vmem:[%s1366_s20 + $0x71] sm:$0xff]  ;;  %v1135_v61 = vld [vmem:[%s1366_s20 + $0x79] sm:$0xff]  ;;  %v510_v62 = vpack.c.bf16 %v1087_v59, %v1086_v58 }
  0x1c   : > { %724 = vmatpush.bf16.msra.mxu3 %v1185_v15  ;;  %1042 = vmatmul.msk.bf16.vlgmr.msra.gmra.mxu0 %vm315_vm0, %v274_v24  ;;  %v657_v57 = vpack.c.bf16 %v1133_v55, %v1132_v54  ;;  %v658_v63 = vpack.c.bf16 %v1135_v61, %v1134_v60  ;;  %v1088_v0 = vld [vmem:[%s1366_s20 + $0x80] sm:$0xff]  ;;  %v1089_v1 = vld [vmem:[%s1366_s20 + $0x88] sm:$0xff] }
  0x1d   : > { %1066 = vmatmul.msk.bf16.vlgmr.msra.gmra.mxu1 %vm315_vm0, %v240_v25  ;;  %v1136_v2 = vld [vmem:[%s1366_s20 + $0x81] sm:$0xff]  ;;  %v1137_v3 = vld [vmem:[%s1366_s20 + $0x89] sm:$0xff]  ;;  %v511_v4 = vpack.c.bf16 %v1089_v1, %v1088_v0  ;;  %v1457_v15 = vld [vmem:[%s1521_s2] ss:$0 sm:$0xff] }
  0x1e   : > { %1114 = vmatmul.msk.bf16.vlgmr.msra.gmra.mxu2 %vm315_vm0, %v504_v26  ;;  %v659_v5 = vpack.c.bf16 %v1137_v3, %v1136_v2  ;;  %v1463_v17 = vld [vmem:[%s1522_s3] ss:$0 sm:$0xff] }
  0x1f   : > { %1162 = vmatmul.msk.bf16.vlgmr.msra.gmra.mxu3 %vm315_vm0, %v652_v27 }
  0x2c   : > { %1043 = vmatmul.msk.bf16.gmra.mxu0 %vm315_vm0, %v652_v27 }
  0x2d   : > { %1067 = vmatmul.msk.bf16.gmra.mxu1 %vm315_vm0, %v504_v26 }
  0x2e   : > { %1115 = vmatmul.msk.bf16.gmra.mxu2 %vm315_vm0, %v505_v32 }
  0x2f   : > { %1163 = vmatmul.msk.bf16.gmra.mxu3 %vm315_vm0, %v653_v33 }
  0x3c   : > { %1044 = vmatmul.msk.bf16.gmra.mxu0 %vm315_vm0, %v653_v33 }
  0x3d   : > { %1068 = vmatmul.msk.bf16.gmra.mxu1 %vm315_vm0, %v505_v32 }
  0x3e   : > { %1116 = vmatmul.msk.bf16.gmra.mxu2 %vm315_vm0, %v506_v38 }
  0x3f   : > { %1164 = vmatmul.msk.bf16.gmra.mxu3 %vm315_vm0, %v654_v39 }
  0x4c   : > { %1045 = vmatmul.msk.bf16.gmra.mxu0 %vm315_vm0, %v654_v39 }
  0x4d   : > { %1069 = vmatmul.msk.bf16.gmra.mxu1 %vm315_vm0, %v506_v38 }
  0x4e   : > { %1117 = vmatmul.msk.bf16.gmra.mxu2 %vm315_vm0, %v507_v44 }
  0x4f   : > { %1165 = vmatmul.msk.bf16.gmra.mxu3 %vm315_vm0, %v655_v45 }
  0x5c   : > { %1046 = vmatmul.msk.bf16.gmra.mxu0 %vm315_vm0, %v655_v45 }
  0x5d   : > { %1070 = vmatmul.msk.bf16.gmra.mxu1 %vm315_vm0, %v507_v44 }
  0x5e   : > { %1118 = vmatmul.msk.bf16.gmra.mxu2 %vm315_vm0, %v508_v50 }
  0x5f   : > { %1166 = vmatmul.msk.bf16.gmra.mxu3 %vm315_vm0, %v656_v51 }
  0x6c   : > { %1047 = vmatmul.msk.bf16.gmra.mxu0 %vm315_vm0, %v656_v51 }
  0x6d   : > { %1071 = vmatmul.msk.bf16.gmra.mxu1 %vm315_vm0, %v508_v50 }
  0x6e   : > { %1119 = vmatmul.msk.bf16.gmra.mxu2 %vm315_vm0, %v509_v56 }
  0x6f   : > { %1167 = vmatmul.msk.bf16.gmra.mxu3 %vm315_vm0, %v657_v57 }
  0x7c   : > { %1048 = vmatmul.msk.bf16.gmra.mxu0 %vm315_vm0, %v657_v57 }
  0x7d   : > { %1072 = vmatmul.msk.bf16.gmra.mxu1 %vm315_vm0, %v509_v56 }
  0x7e   : > { %1120 = vmatmul.msk.bf16.gmra.mxu2 %vm315_vm0, %v510_v62 }
  0x7f   : > { %1168 = vmatmul.msk.bf16.gmra.mxu3 %vm315_vm0, %v658_v63 }
  0x8c   : > { %1049 = vmatmul.msk.bf16.gmra.mxu0 %vm315_vm0, %v658_v63 }
  0x8d   : > { %1073 = vmatmul.msk.bf16.gmra.mxu1 %vm315_vm0, %v510_v62 }
  0x8e   : > { %1121 = vmatmul.msk.bf16.gmra.mxu2 %vm315_vm0, %v511_v4 }
  0x8f   : > { %1169 = vmatmul.msk.bf16.gmra.mxu3 %vm315_vm0, %v659_v5 }
  0x99   : > { %v349_v6 = vpop.f32.mrf.mxu0 }
  0x9a   : > { %v446_v7 = vpop.f32.mrf.mxu1 }
  0x9b   : > { %v447_v8 = vadd.f32 %v446_v7, %v349_v6 }
  0xa1   : > { %v578_v9 = vpop.f32.mrf.mxu2  ;;  %v351_v12 = vpop.f32.mrf.mxu0 }
  0xa2   : > { %v726_v10 = vpop.f32.mrf.mxu3  ;;  %v618_v11 = vadd.f32 %v578_v9, %v447_v8  ;;  %v448_v13 = vpop.f32.mrf.mxu1 }
  0xa3   : > { %v449_v18 = vadd.f32 %v448_v13, %v351_v12 }
  0xa4   : > { %v766_v14 = vadd.f32 %v726_v10, %v618_v11 }
  0xa6   : > { %v786_v16 = vmul.f32 %v1457_v15, %v766_v14 }
  0xa8   : > { %v806_v24 = vadd.f32 %v1463_v17, %v786_v16 }
  0xa9   : > { %v580_v19 = vpop.f32.mrf.mxu2  ;;  %v354_v22 = vpop.f32.mrf.mxu0 }
  0xaa   : > { %v728_v20 = vpop.f32.mrf.mxu3  ;;  %v619_v21 = vadd.f32 %v580_v19, %v449_v18  ;;  %v451_v23 = vpop.f32.mrf.mxu1  ;;  %v838_v28 = vmul.f32 0.1, %v806_v24  ;;  %vm822_vm1 = vcmp.ge.f32.partialorder %v806_v24, 0.0 }
  0xab   : > { %v452_v27 = vadd.f32 %v451_v23, %v354_v22 }
  0xac   : > { %v767_v25 = vadd.f32 %v728_v20, %v619_v21  ;;  %v854_v36 = vsel %vm822_vm1, %v806_v24, %v838_v28 }
  0xae   : > { %v787_v26 = vmul.f32 %v1457_v15, %v767_v25 }
  0xb0   : > { %v807_v29 = vadd.f32 %v1463_v17, %v787_v26 }
  0xb1   : > { %v583_v30 = vpop.f32.mrf.mxu2  ;;  %v356_v34 = vpop.f32.mrf.mxu0 }
  0xb2   : > { %v731_v31 = vpop.f32.mrf.mxu3  ;;  %vm823_vm2 = vcmp.ge.f32.partialorder %v807_v29, 0.0  ;;  %v839_v32 = vmul.f32 0.1, %v807_v29  ;;  %v620_v33 = vadd.f32 %v583_v30, %v452_v27  ;;  %v453_v35 = vpop.f32.mrf.mxu1 }
  0xb3   : > { %v454_v41 = vadd.f32 %v453_v35, %v356_v34 }
  0xb4   : > { %v855_v37 = vsel %vm823_vm2, %v807_v29, %v839_v32  ;;  %v768_v38 = vadd.f32 %v731_v31, %v620_v33 }
  0xb5   : > { %v1192_v39 = vpack.c.bf16 %v855_v37, %v854_v36 }
  0xb6   : > { %v788_v40 = vmul.f32 %v1457_v15, %v768_v38 }
  0xb7   : > { %1193 = vst [vmem:[%s1472_s14] sm:$0xff] %v1192_v39  }
  0xb8   : > { %v808_v47 = vadd.f32 %v1463_v17, %v788_v40 }
  0xb9   : > { %v585_v42 = vpop.f32.mrf.mxu2  ;;  %v359_v45 = vpop.f32.mrf.mxu0 }
  0xba   : > { %v733_v43 = vpop.f32.mrf.mxu3  ;;  %v621_v44 = vadd.f32 %v585_v42, %v454_v41  ;;  %v456_v46 = vpop.f32.mrf.mxu1  ;;  %v840_v51 = vmul.f32 0.1, %v808_v47  ;;  %vm824_vm3 = vcmp.ge.f32.partialorder %v808_v47, 0.0 }
  0xbb   : > { %v457_v50 = vadd.f32 %v456_v46, %v359_v45 }
  0xbc   : > { %v769_v48 = vadd.f32 %v733_v43, %v621_v44  ;;  %v856_v59 = vsel %vm824_vm3, %v808_v47, %v840_v51 }
  0xbe   : > { %v789_v49 = vmul.f32 %v1457_v15, %v769_v48 }
  0xc0   : > { %v809_v52 = vadd.f32 %v1463_v17, %v789_v49 }
  0xc1   : > { %v588_v53 = vpop.f32.mrf.mxu2  ;;  %v361_v57 = vpop.f32.mrf.mxu0 }
  0xc2   : > { %v736_v54 = vpop.f32.mrf.mxu3  ;;  %vm825_vm4 = vcmp.ge.f32.partialorder %v809_v52, 0.0  ;;  %v841_v55 = vmul.f32 0.1, %v809_v52  ;;  %v622_v56 = vadd.f32 %v588_v53, %v457_v50  ;;  %v458_v58 = vpop.f32.mrf.mxu1 }
  0xc3   : > { %v459_v0 = vadd.f32 %v458_v58, %v361_v57 }
  0xc4   : > { %v857_v60 = vsel %vm825_vm4, %v809_v52, %v841_v55  ;;  %v770_v61 = vadd.f32 %v736_v54, %v622_v56 }
  0xc5   : > { %v1197_v62 = vpack.c.bf16 %v857_v60, %v856_v59 }
  0xc6   : > { %v790_v63 = vmul.f32 %v1457_v15, %v770_v61 }
  0xc7   : > { %1229 = vst [vmem:[%s1472_s14 + $0x8] sm:$0xff] %v1197_v62  }
  0xc8   : > { %v810_v6 = vadd.f32 %v1463_v17, %v790_v63 }
  0xc9   : > { %v590_v1 = vpop.f32.mrf.mxu2  ;;  %v364_v4 = vpop.f32.mrf.mxu0 }
  0xca   : > { %v738_v2 = vpop.f32.mrf.mxu3  ;;  %v623_v3 = vadd.f32 %v590_v1, %v459_v0  ;;  %v461_v5 = vpop.f32.mrf.mxu1  ;;  %v842_v10 = vmul.f32 0.1, %v810_v6  ;;  %vm826_vm5 = vcmp.ge.f32.partialorder %v810_v6, 0.0 }
  0xcb   : > { %v462_v9 = vadd.f32 %v461_v5, %v364_v4 }
  0xcc   : > { %v771_v7 = vadd.f32 %v738_v2, %v623_v3  ;;  %v858_v20 = vsel %vm826_vm5, %v810_v6, %v842_v10 }
  0xce   : > { %v791_v8 = vmul.f32 %v1457_v15, %v771_v7 }
  0xd0   : > { %v811_v11 = vadd.f32 %v1463_v17, %v791_v8 }
  0xd1   : > { %v593_v12 = vpop.f32.mrf.mxu2  ;;  %v366_v18 = vpop.f32.mrf.mxu0 }
  0xd2   : > { %v741_v13 = vpop.f32.mrf.mxu3  ;;  %vm827_vm6 = vcmp.ge.f32.partialorder %v811_v11, 0.0  ;;  %v843_v14 = vmul.f32 0.1, %v811_v11  ;;  %v624_v16 = vadd.f32 %v593_v12, %v462_v9  ;;  %v463_v19 = vpop.f32.mrf.mxu1 }
  0xd3   : > { %v464_v25 = vadd.f32 %v463_v19, %v366_v18 }
  0xd4   : > { %v859_v21 = vsel %vm827_vm6, %v811_v11, %v843_v14  ;;  %v772_v22 = vadd.f32 %v741_v13, %v624_v16 }
  0xd5   : > { %v1202_v23 = vpack.c.bf16 %v859_v21, %v858_v20 }
  0xd6   : > { %v792_v24 = vmul.f32 %v1457_v15, %v772_v22 }
  0xd7   : > { %1230 = vst [vmem:[%s1472_s14 + $0x10] sm:$0xff] %v1202_v23  }
  0xd8   : > { %v812_v31 = vadd.f32 %v1463_v17, %v792_v24 }
  0xd9   : > { %v595_v26 = vpop.f32.mrf.mxu2  ;;  %v369_v29 = vpop.f32.mrf.mxu0 }
  0xda   : > { %v743_v27 = vpop.f32.mrf.mxu3  ;;  %v625_v28 = vadd.f32 %v595_v26, %v464_v25  ;;  %v466_v30 = vpop.f32.mrf.mxu1  ;;  %v844_v35 = vmul.f32 0.1, %v812_v31  ;;  %vm828_vm7 = vcmp.ge.f32.partialorder %v812_v31, 0.0 }
  0xdb   : > { %v467_v34 = vadd.f32 %v466_v30, %v369_v29 }
  0xdc   : > { %v773_v32 = vadd.f32 %v743_v27, %v625_v28  ;;  %v860_v43 = vsel %vm828_vm7, %v812_v31, %v844_v35 }
  0xde   : > { %v793_v33 = vmul.f32 %v1457_v15, %v773_v32 }
  0xe0   : > { %v813_v36 = vadd.f32 %v1463_v17, %v793_v33 }
  0xe1   : > { %v598_v37 = vpop.f32.mrf.mxu2  ;;  %v371_v41 = vpop.f32.mrf.mxu0 }
  0xe2   : > { %v746_v38 = vpop.f32.mrf.mxu3  ;;  %vm829_vm8 = vcmp.ge.f32.partialorder %v813_v36, 0.0  ;;  %v845_v39 = vmul.f32 0.1, %v813_v36  ;;  %v626_v40 = vadd.f32 %v598_v37, %v467_v34  ;;  %v468_v42 = vpop.f32.mrf.mxu1 }
  0xe3   : > { %v469_v48 = vadd.f32 %v468_v42, %v371_v41 }
  0xe4   : > { %v861_v44 = vsel %vm829_vm8, %v813_v36, %v845_v39  ;;  %v774_v45 = vadd.f32 %v746_v38, %v626_v40 }
  0xe5   : > { %v1207_v46 = vpack.c.bf16 %v861_v44, %v860_v43 }
  0xe6   : > { %v794_v47 = vmul.f32 %v1457_v15, %v774_v45 }
  0xe7   : > { %1231 = vst [vmem:[%s1472_s14 + $0x18] sm:$0xff] %v1207_v46  }
  0xe8   : > { %v814_v54 = vadd.f32 %v1463_v17, %v794_v47 }
  0xe9   : > { %v600_v49 = vpop.f32.mrf.mxu2  ;;  %v374_v52 = vpop.f32.mrf.mxu0 }
  0xea   : > { %v748_v50 = vpop.f32.mrf.mxu3  ;;  %v627_v51 = vadd.f32 %v600_v49, %v469_v48  ;;  %v471_v53 = vpop.f32.mrf.mxu1  ;;  %v846_v58 = vmul.f32 0.1, %v814_v54  ;;  %vm830_vm9 = vcmp.ge.f32.partialorder %v814_v54, 0.0 }
  0xeb   : > { %v472_v57 = vadd.f32 %v471_v53, %v374_v52 }
  0xec   : > { %v775_v55 = vadd.f32 %v748_v50, %v627_v51  ;;  %v862_v2 = vsel %vm830_vm9, %v814_v54, %v846_v58 }
  0xee   : > { %v795_v56 = vmul.f32 %v1457_v15, %v775_v55 }
  0xf0   : > { %v815_v59 = vadd.f32 %v1463_v17, %v795_v56 }
  0xf1   : > { %v603_v60 = vpop.f32.mrf.mxu2  ;;  %v376_v0 = vpop.f32.mrf.mxu0 }
  0xf2   : > { %v751_v61 = vpop.f32.mrf.mxu3  ;;  %vm831_vm10 = vcmp.ge.f32.partialorder %v815_v59, 0.0  ;;  %v847_v62 = vmul.f32 0.1, %v815_v59  ;;  %v628_v63 = vadd.f32 %v603_v60, %v472_v57  ;;  %v473_v1 = vpop.f32.mrf.mxu1 }
  0xf3   : > { %v474_v7 = vadd.f32 %v473_v1, %v376_v0 }
  0xf4   : > { %v863_v3 = vsel %vm831_vm10, %v815_v59, %v847_v62  ;;  %v776_v4 = vadd.f32 %v751_v61, %v628_v63 }
  0xf5   : > { %v1212_v5 = vpack.c.bf16 %v863_v3, %v862_v2 }
  0xf6   : > { %v796_v6 = vmul.f32 %v1457_v15, %v776_v4 }
  0xf7   : > { %1232 = vst [vmem:[%s1472_s14 + $0x20] sm:$0xff] %v1212_v5  }
  0xf8   : > { %v816_v13 = vadd.f32 %v1463_v17, %v796_v6 }
  0xf9   : > { %v605_v8 = vpop.f32.mrf.mxu2  ;;  %v379_v11 = vpop.f32.mrf.mxu0 }
  0xfa   : > { %v753_v9 = vpop.f32.mrf.mxu3  ;;  %v629_v10 = vadd.f32 %v605_v8, %v474_v7  ;;  %v476_v12 = vpop.f32.mrf.mxu1  ;;  %v848_v19 = vmul.f32 0.1, %v816_v13  ;;  %vm832_vm11 = vcmp.ge.f32.partialorder %v816_v13, 0.0 }
  0xfb   : > { %v477_v18 = vadd.f32 %v476_v12, %v379_v11 }
  0xfc   : > { %v777_v14 = vadd.f32 %v753_v9, %v629_v10  ;;  %v864_v27 = vsel %vm832_vm11, %v816_v13, %v848_v19 }
  0xfe   : > { %v797_v16 = vmul.f32 %v1457_v15, %v777_v14 }
 0x100   : > { %v817_v20 = vadd.f32 %v1463_v17, %v797_v16 }
 0x101   : > { %v608_v21 = vpop.f32.mrf.mxu2  ;;  %v381_v25 = vpop.f32.mrf.mxu0 }
 0x102   : > { %v756_v22 = vpop.f32.mrf.mxu3  ;;  %vm833_vm12 = vcmp.ge.f32.partialorder %v817_v20, 0.0  ;;  %v849_v23 = vmul.f32 0.1, %v817_v20  ;;  %v630_v24 = vadd.f32 %v608_v21, %v477_v18  ;;  %v478_v26 = vpop.f32.mrf.mxu1 }
 0x103   : > { %v479_v32 = vadd.f32 %v478_v26, %v381_v25 }
 0x104   : > { %v865_v28 = vsel %vm833_vm12, %v817_v20, %v849_v23  ;;  %v778_v29 = vadd.f32 %v756_v22, %v630_v24 }
 0x105   : > { %v1217_v30 = vpack.c.bf16 %v865_v28, %v864_v27 }
 0x106   : > { %v798_v31 = vmul.f32 %v1457_v15, %v778_v29 }
 0x107   : > { %1233 = vst [vmem:[%s1472_s14 + $0x28] sm:$0xff] %v1217_v30  }
 0x108   : > { %v818_v38 = vadd.f32 %v1463_v17, %v798_v31 }
 0x109   : > { %v610_v33 = vpop.f32.mrf.mxu2  ;;  %v384_v36 = vpop.f32.mrf.mxu0 }
 0x10a   : > { %v758_v34 = vpop.f32.mrf.mxu3  ;;  %v631_v35 = vadd.f32 %v610_v33, %v479_v32  ;;  %v481_v37 = vpop.f32.mrf.mxu1  ;;  %v850_v42 = vmul.f32 0.1, %v818_v38  ;;  %vm834_vm13 = vcmp.ge.f32.partialorder %v818_v38, 0.0 }
 0x10b   : > { %v482_v41 = vadd.f32 %v481_v37, %v384_v36 }
 0x10c   : > { %v779_v39 = vadd.f32 %v758_v34, %v631_v35  ;;  %v866_v48 = vsel %vm834_vm13, %v818_v38, %v850_v42 }
 0x10e   : > { %v799_v40 = vmul.f32 %v1457_v15, %v779_v39 }
 0x110   : > { %v819_v43 = vadd.f32 %v1463_v17, %v799_v40 }
 0x111   : > { %v613_v44 = vpop.f32.mrf.mxu2  ;;  %v386_v52 = vpop.f32.mrf.mxu0 }
 0x112   : > { %v761_v45 = vpop.f32.mrf.mxu3  ;;  %vm835_vm14 = vcmp.ge.f32.partialorder %v819_v43, 0.0  ;;  %v851_v46 = vmul.f32 0.1, %v819_v43  ;;  %v632_v47 = vadd.f32 %v613_v44, %v482_v41  ;;  %v483_v53 = vpop.f32.mrf.mxu1 }
 0x113   : > { %v484_v55 = vadd.f32 %v483_v53, %v386_v52 }
 0x114   : > { %v867_v49 = vsel %vm835_vm14, %v819_v43, %v851_v46  ;;  %v780_v50 = vadd.f32 %v761_v45, %v632_v47 }
 0x115   : > { %v1222_v51 = vpack.c.bf16 %v867_v49, %v866_v48 }
 0x116   : > { %v800_v54 = vmul.f32 %v1457_v15, %v780_v50 }
 0x117   : > { %1234 = vst [vmem:[%s1472_s14 + $0x30] sm:$0xff] %v1222_v51  }
 0x118   : > { %v820_v59 = vadd.f32 %v1463_v17, %v800_v54 }
 0x119   : > { %v615_v56 = vpop.f32.mrf.mxu2 }
 0x11a   : > { %v633_v57 = vadd.f32 %v615_v56, %v484_v55  ;;  %v763_v58 = vpop.f32.mrf.mxu3  ;;  %v852_v62 = vmul.f32 0.1, %v820_v59  ;;  %vm836_vm15 = vcmp.ge.f32.partialorder %v820_v59, 0.0 }
 0x11c   : > { %v781_v60 = vadd.f32 %v763_v58, %v633_v57  ;;  %v868_v1 = vsel %vm836_vm15, %v820_v59, %v852_v62 }
 0x11e   : > { %v801_v61 = vmul.f32 %v1457_v15, %v781_v60 }
 0x120   : > { %v821_v63 = vadd.f32 %v1463_v17, %v801_v61 }
 0x122   : > { %vm837_vm0 = vcmp.ge.f32.partialorder %v821_v63, 0.0  ;;  %v853_v0 = vmul.f32 0.1, %v821_v63 }
 0x124   : > { %v869_v2 = vsel %vm837_vm0, %v821_v63, %v853_v0 }
 0x125   : > { %v1227_v3 = vpack.c.bf16 %v869_v2, %v868_v1 }
 0x127   : > { %1235 = vst [vmem:[%s1472_s14 + $0x38] sm:$0xff] %v1227_v3  }
 0x128 PF: > { %s14_s17 = sadd.s32 1, %s1285_s17   ;;  %s1524_s15 = smov %s1281_s16 }
 0x129   : > { %p11_p5 = scmp.ge.s32.totalorder %s14_s17, 4   ;;  %s1525_s16 = smov %s1527_s18 }
 0x12b   :  { %13 = sbr.rel (!%p11_p5) target bundleno = 2 (0x2), region = 73 }

// kernel: _lambda_.18
= control target key start
LH: loop header
LB: loop body
LE: loop exit
PB: predicated region body
PF: predicated region fallthrough
CT: control target
= control target key end

     0   :  { %s1931_s15 = smov 0   ;;  %s1933_s16 = smov 0   ;;  %s2367_s0 = inlined_call_operand.vmem [shape: f32[2,176,16], index: 0, kind: input, shape index: {}]   ;;  %s2368_s1 = inlined_call_operand.vmem [shape: bf16[9,16,128], index: 1, kind: input, shape index: {}]   ;;  %s2369_s2 = inlined_call_operand.vmem [shape: f32[1,128], index: 2, kind: input, shape index: {}]   ;;  %s2370_s3 = inlined_call_operand.vmem [shape: f32[1,128], index: 3, kind: input, shape index: {}]   ;;  %s2371_s4 = inlined_call_operand.vmem [shape: bf16[2,128,128], index: 4, kind: output, shape index: {}]  }
   0x1   :  { %s1935_s17 = smov 0  }
   0x2 LB: > { %s26_s18 = sadd.s32 1, %s1900_s16  ;;  %p1537_p0 = scmp.ge.s32.totalorder %s1904_s17, 1  ;;  %s1904_s17 = sphi %s1935_s17, %s14_s17   ;;  %s1900_s16 = sphi %s1933_s16, %s2373_s16   ;;  %s1896_s15 = sphi %s1931_s15, %s2372_s15  }
   0x3   : > { %p28_p1 = scmp.ge.s32.totalorder %s26_s18, 2  ;;  %p176_p2 = scmp.lt.s32.totalorder %s1904_s17, 3 }
   0x5   : > { %s2375_s18 = smov (%p28_p1, %s26_s18), 0  ;;  %p177_p3 = pnand %p1537_p0, %p176_p2 }
   0x6   : > { %p206_p4 = scmp.lt.s32.totalorder (!%p177_p3), %s1896_s15, 1 }
   0x7   : > { %180 = sbr.rel (%p177_p3) target bundleno = 448 (0x1c0), region = 36 }
   0xc   : > { %v1797_v0 = vld [vmem:[%s2368_s1 + $0x8] sm:$0xff]  ;;  %v1798_v1 = vld [vmem:[%s2368_s1 + $0x10] sm:$0xff]  ;;  %v1799_v2 = vld [vmem:[%s2368_s1 + $0x18] sm:$0xff]  ;;  %s2377_s15 = smov (!%p206_p4, %s1896_s15), 1  ;;  %vm285_vm0 = vcmask 130048  }
   0xd   : > { %v1796_v3 = vld [vmem:[%s2368_s1] sm:$0xff]  ;;  %1852 = vmatpush.bf16.msra.mxu1 %v1797_v0  ;;  %1853 = vmatpush.bf16.msra.mxu2 %v1797_v0  ;;  %s1855_s29 = smul.u32 176, %s2377_s15  ;;  %v1802_v17 = vld [vmem:[%s2368_s1 + $0x30] sm:$0xff]  ;;  %v1803_v18 = vld [vmem:[%s2368_s1 + $0x38] sm:$0xff]  ;;  %s1795_s23 = sshll.u32 %s2377_s15, 6 }
   0xe   : > { %v1800_v4 = vld [vmem:[%s2368_s1 + $0x20] sm:$0xff]  ;;  %1854 = vmatpush.bf16.msra.mxu3 %v1797_v0  ;;  %317 = vmatpush.bf16.msra.mxu0 %v1797_v0  ;;  %v1801_v19 = vld [vmem:[%s2368_s1 + $0x28] sm:$0xff]  ;;  %s2307_s26 = scalar_lea.vmem %s2371_s4, %s1795_s23 }
   0xf   : > { %s1970_s6 = scalar_lea.vmem %s2367_s0, %s1855_s29  ;;  %v1804_v20 = vld [vmem:[%s2368_s1 + $0x40] sm:$0xff] }
  0x10   : > { %v1545_v5 = vld [vmem:[%s1970_s6 + $0x21] sm:$0xff]  ;;  %v1546_v6 = vld [vmem:[%s1970_s6 + $0x29] sm:$0xff]  ;;  %v1547_v21 = vld [vmem:[%s1970_s6 + $0x31] sm:$0xff] }
  0x11   : > { %504 = vmatpush.bf16.msrb.mxu2 %v1798_v1  ;;  %396 = vmatpush.bf16.msrb.mxu1 %v1796_v3  ;;  %v1549_v7 = vld [vmem:[%s1970_s6 + $0x41] sm:$0xff]  ;;  %v1975_v8 = vpack.c.bf16 %v1546_v6, %v1545_v5  ;;  %v1550_v9 = vld [vmem:[%s1970_s6 + $0x49] sm:$0xff]  ;;  %v1548_v22 = vld [vmem:[%s1970_s6 + $0x39] sm:$0xff] }
  0x12   : > { %628 = vmatpush.bf16.msrb.mxu3 %v1799_v2  ;;  %752 = vmatpush.bf16.msrb.mxu0 %v1800_v4  ;;  %v1553_v10 = vld [vmem:[%s1970_s6 + $0x61] sm:$0xff]  ;;  %v1554_v11 = vld [vmem:[%s1970_s6 + $0x69] sm:$0xff]  ;;  %v1980_v12 = vpack.c.bf16 %v1550_v9, %v1549_v7  ;;  %v1551_v23 = vld [vmem:[%s1970_s6 + $0x51] sm:$0xff]  ;;  %v2013_v29 = vpack.c.bf16 %v1548_v22, %v1547_v21 }
  0x13   : > { %v1982_v13 = vpack.c.bf16 %v1554_v11, %v1553_v10  ;;  %v1541_v14 = vld [vmem:[%s1970_s6 + $0x1] sm:$0xff]  ;;  %v1542_v15 = vld [vmem:[%s1970_s6 + $0x9] sm:$0xff]  ;;  %1565 = vmatmul.msk.bf16.vlgmr.msra.gmra.mxu1 %vm285_vm0, %v1975_v8  ;;  %v1552_v24 = vld [vmem:[%s1970_s6 + $0x59] sm:$0xff] }
  0x14   : > { %v268_v16 = vpack.c.bf16 %v1542_v15, %v1541_v14  ;;  %1567 = vmatmul.msk.bf16.vlgmr.msra.gmra.mxu2 %vm285_vm0, %v1980_v12  ;;  %v1555_v25 = vld [vmem:[%s1970_s6 + $0x71] sm:$0xff]  ;;  %v1556_v26 = vld [vmem:[%s1970_s6 + $0x79] sm:$0xff]  ;;  %v2015_v30 = vpack.c.bf16 %v1552_v24, %v1551_v23  ;;  %v225_v34 = vld [vmem:[%s1970_s6 + $0x8] sm:$0xff] }
  0x15   : > { %1569 = vmatmul.msk.bf16.vlgmr.msra.gmra.mxu3 %vm285_vm0, %v1982_v13  ;;  %1000 = vmatpush.bf16.msra.mxu2 %v1802_v17  ;;  %v1543_v27 = vld [vmem:[%s1970_s6 + $0x11] sm:$0xff]  ;;  %v1544_v28 = vld [vmem:[%s1970_s6 + $0x19] sm:$0xff]  ;;  %v2017_v31 = vpack.c.bf16 %v1556_v26, %v1555_v25  ;;  %v1583_v35 = vld [vmem:[%s1970_s6 + $0x2] sm:$0xff] }
  0x16   : > { %1563 = vmatmul.msk.bf16.vlgmr.msra.gmra.mxu0 %vm285_vm0, %v268_v16  ;;  %1124 = vmatpush.bf16.msra.mxu3 %v1803_v18  ;;  %v269_v32 = vpack.c.bf16 %v1544_v28, %v1543_v27  ;;  %v224_v33 = vld [vmem:[%s1970_s6] sm:$0xff]  ;;  %v1584_v36 = vld [vmem:[%s1970_s6 + $0xa] sm:$0xff]  ;;  %v1614_v38 = vld [vmem:[%s1970_s6 + $0x18] sm:$0xff] }
  0x17   : > { %876 = vmatpush.bf16.msra.mxu1 %v1801_v19  ;;  %1248 = vmatpush.bf16.msra.mxu0 %v1804_v20  ;;  %v1613_v37 = vld [vmem:[%s1970_s6 + $0x10] sm:$0xff]  ;;  %v240_v39 = vpack.c.bf16 %v225_v34, %v224_v33  ;;  %v456_v40 = vpack.c.bf16 %v1584_v36, %v1583_v35  ;;  %v1586_v43 = vld [vmem:[%s1970_s6 + $0x1a] sm:$0xff]  ;;  %v1616_v45 = vld [vmem:[%s1970_s6 + $0x28] sm:$0xff] }
  0x18   : > { %v580_v41 = vpack.c.bf16 %v1614_v38, %v1613_v37  ;;  %v1585_v42 = vld [vmem:[%s1970_s6 + $0x12] sm:$0xff]  ;;  %v1615_v44 = vld [vmem:[%s1970_s6 + $0x20] sm:$0xff]  ;;  %v1588_v49 = vld [vmem:[%s1970_s6 + $0x2a] sm:$0xff] }
  0x19   : > { %v2040_v46 = vpack.c.bf16 %v1586_v43, %v1585_v42  ;;  %v2042_v47 = vpack.c.bf16 %v1616_v45, %v1615_v44  ;;  %v1587_v48 = vld [vmem:[%s1970_s6 + $0x22] sm:$0xff]  ;;  %v1617_v50 = vld [vmem:[%s1970_s6 + $0x30] sm:$0xff]  ;;  %v1618_v51 = vld [vmem:[%s1970_s6 + $0x38] sm:$0xff] }
  0x1a   : > { %v2055_v52 = vpack.c.bf16 %v1588_v49, %v1587_v48  ;;  %v2057_v53 = vpack.c.bf16 %v1618_v51, %v1617_v50  ;;  %v1589_v54 = vld [vmem:[%s1970_s6 + $0x32] sm:$0xff]  ;;  %v1590_v55 = vld [vmem:[%s1970_s6 + $0x3a] sm:$0xff]  ;;  %v1620_v57 = vld [vmem:[%s1970_s6 + $0x48] sm:$0xff] }
  0x1b   : > { %v1619_v56 = vld [vmem:[%s1970_s6 + $0x40] sm:$0xff]  ;;  %v2071_v58 = vpack.c.bf16 %v1590_v55, %v1589_v54  ;;  %v1592_v61 = vld [vmem:[%s1970_s6 + $0x4a] sm:$0xff]  ;;  %v1622_v63 = vld [vmem:[%s1970_s6 + $0x58] sm:$0xff] }
  0x1c   : > { %v2073_v59 = vpack.c.bf16 %v1620_v57, %v1619_v56  ;;  %v1591_v60 = vld [vmem:[%s1970_s6 + $0x42] sm:$0xff]  ;;  %v1621_v62 = vld [vmem:[%s1970_s6 + $0x50] sm:$0xff]  ;;  %v1594_v3 = vld [vmem:[%s1970_s6 + $0x5a] sm:$0xff] }
  0x1d   : > { %v2087_v0 = vpack.c.bf16 %v1592_v61, %v1591_v60  ;;  %v2089_v1 = vpack.c.bf16 %v1622_v63, %v1621_v62  ;;  %v1593_v2 = vld [vmem:[%s1970_s6 + $0x52] sm:$0xff]  ;;  %v1623_v4 = vld [vmem:[%s1970_s6 + $0x60] sm:$0xff]  ;;  %v1624_v5 = vld [vmem:[%s1970_s6 + $0x68] sm:$0xff] }
  0x1e   : > { %v2103_v6 = vpack.c.bf16 %v1594_v3, %v1593_v2  ;;  %v2105_v7 = vpack.c.bf16 %v1624_v5, %v1623_v4  ;;  %v1595_v9 = vld [vmem:[%s1970_s6 + $0x62] sm:$0xff]  ;;  %v1596_v10 = vld [vmem:[%s1970_s6 + $0x6a] sm:$0xff]  ;;  %v1626_v14 = vld [vmem:[%s1970_s6 + $0x78] sm:$0xff] }
  0x1f   : > { %v1625_v11 = vld [vmem:[%s1970_s6 + $0x70] sm:$0xff]  ;;  %v2121_v16 = vpack.c.bf16 %v1596_v10, %v1595_v9  ;;  %v1598_v24 = vld [vmem:[%s1970_s6 + $0x7a] sm:$0xff]  ;;  %v1628_v26 = vld [vmem:[%s1970_s6 + $0x88] sm:$0xff] }
  0x20   : > { %v2123_v17 = vpack.c.bf16 %v1626_v14, %v1625_v11  ;;  %v1597_v23 = vld [vmem:[%s1970_s6 + $0x72] sm:$0xff]  ;;  %v1627_v25 = vld [vmem:[%s1970_s6 + $0x80] sm:$0xff]  ;;  %v1658_v28 = vld [vmem:[%s1970_s6 + $0x89] sm:$0xff] }
  0x21   : > { %v1657_v27 = vld [vmem:[%s1970_s6 + $0x81] sm:$0xff]  ;;  %v2151_v35 = vpack.c.bf16 %v1598_v24, %v1597_v23  ;;  %v2153_v36 = vpack.c.bf16 %v1628_v26, %v1627_v25 }
  0x22   : > { %v2155_v37 = vpack.c.bf16 %v1658_v28, %v1657_v27 }
  0x23   : > { %1566 = vmatmul.msk.bf16.gmra.mxu1 %vm285_vm0, %v2013_v29 }
  0x24   : > { %1568 = vmatmul.msk.bf16.gmra.mxu2 %vm285_vm0, %v2015_v30 }
  0x25   : > { %1570 = vmatmul.msk.bf16.gmra.mxu3 %vm285_vm0, %v2017_v31 }
  0x26   : > { %1564 = vmatmul.msk.bf16.gmra.mxu0 %vm285_vm0, %v269_v32 }
  0x33   : > { %1575 = vmatmul.msk.bf16.vlgmr.msrb.gmra.mxu1 %vm285_vm0, %v240_v39 }
  0x34   : > { %1605 = vmatmul.msk.bf16.vlgmr.msrb.gmra.mxu2 %vm285_vm0, %v456_v40 }
  0x35   : > { %1635 = vmatmul.msk.bf16.vlgmr.msrb.gmra.mxu3 %vm285_vm0, %v580_v41 }
  0x36   : > { %1665 = vmatmul.msk.bf16.vlgmr.msrb.gmra.mxu0 %vm285_vm0, %v269_v32 }
  0x43   : > { %1576 = vmatmul.msk.bf16.gmra.mxu1 %vm285_vm0, %v580_v41 }
  0x44   : > { %1606 = vmatmul.msk.bf16.gmra.mxu2 %vm285_vm0, %v2040_v46 }
  0x45   : > { %1636 = vmatmul.msk.bf16.gmra.mxu3 %vm285_vm0, %v2042_v47 }
  0x46   : > { %1666 = vmatmul.msk.bf16.gmra.mxu0 %vm285_vm0, %v1975_v8 }
  0x53   : > { %1577 = vmatmul.msk.bf16.gmra.mxu1 %vm285_vm0, %v2042_v47 }
  0x54   : > { %1607 = vmatmul.msk.bf16.gmra.mxu2 %vm285_vm0, %v2055_v52 }
  0x55   : > { %1637 = vmatmul.msk.bf16.gmra.mxu3 %vm285_vm0, %v2057_v53 }
  0x56   : > { %1667 = vmatmul.msk.bf16.gmra.mxu0 %vm285_vm0, %v2013_v29 }
  0x63   : > { %1578 = vmatmul.msk.bf16.gmra.mxu1 %vm285_vm0, %v2057_v53 }
  0x64   : > { %1608 = vmatmul.msk.bf16.gmra.mxu2 %vm285_vm0, %v2071_v58 }
  0x65   : > { %1638 = vmatmul.msk.bf16.gmra.mxu3 %vm285_vm0, %v2073_v59 }
  0x66   : > { %1668 = vmatmul.msk.bf16.gmra.mxu0 %vm285_vm0, %v1980_v12 }
  0x73   : > { %1579 = vmatmul.msk.bf16.gmra.mxu1 %vm285_vm0, %v2073_v59 }
  0x74   : > { %1609 = vmatmul.msk.bf16.gmra.mxu2 %vm285_vm0, %v2087_v0 }
  0x75   : > { %1639 = vmatmul.msk.bf16.gmra.mxu3 %vm285_vm0, %v2089_v1 }
  0x76   : > { %1669 = vmatmul.msk.bf16.gmra.mxu0 %vm285_vm0, %v2015_v30 }
  0x83   : > { %1580 = vmatmul.msk.bf16.gmra.mxu1 %vm285_vm0, %v2089_v1 }
  0x84   : > { %1610 = vmatmul.msk.bf16.gmra.mxu2 %vm285_vm0, %v2103_v6 }
  0x85   : > { %1640 = vmatmul.msk.bf16.gmra.mxu3 %vm285_vm0, %v2105_v7 }
  0x86   : > { %1670 = vmatmul.msk.bf16.gmra.mxu0 %vm285_vm0, %v1982_v13 }
  0x90   : > { %v2119_v15 = vpop.f32.mrf.mxu1 }
  0x93   : > { %v319_v18 = vpop.f32.mrf.mxu0  ;;  %1581 = vmatmul.msk.bf16.gmra.mxu1 %vm285_vm0, %v2105_v7 }
  0x94   : > { %1611 = vmatmul.msk.bf16.gmra.mxu2 %vm285_vm0, %v2121_v16 }
  0x95   : > { %1641 = vmatmul.msk.bf16.gmra.mxu3 %vm285_vm0, %v2123_v17 }
  0x96   : > { %1671 = vmatmul.msk.bf16.gmra.mxu0 %vm285_vm0, %v2017_v31 }
  0x97   : > { %v2133_v19 = vpop.f32.mrf.mxu2 }
  0x98   : > { %v2135_v20 = vpop.f32.mrf.mxu3  ;;  %v2137_v21 = vpop.f32.mrf.mxu1 }
  0x9b   : > { %v321_v22 = vpop.f32.mrf.mxu0 }
  0x9f   : > { %v2145_v32 = vpop.f32.mrf.mxu2 }
  0xa0   : > { %v2147_v33 = vpop.f32.mrf.mxu3  ;;  %v2149_v34 = vpop.f32.mrf.mxu1 }
  0xa3   : > { %v324_v38 = vpop.f32.mrf.mxu0  ;;  %1582 = vmatmul.msk.bf16.gmra.mxu1 %vm285_vm0, %v2123_v17 }
  0xa4   : > { %1612 = vmatmul.msk.bf16.gmra.mxu2 %vm285_vm0, %v2151_v35 }
  0xa5   : > { %1642 = vmatmul.msk.bf16.gmra.mxu3 %vm285_vm0, %v2153_v36 }
  0xa6   : > { %1672 = vmatmul.msk.bf16.gmra.mxu0 %vm285_vm0, %v2155_v37 }
  0xa7   : > { %v2165_v39 = vpop.f32.mrf.mxu2 }
  0xa8   : > { %v2167_v40 = vpop.f32.mrf.mxu3  ;;  %v2169_v41 = vpop.f32.mrf.mxu1 }
  0xab   : > { %v326_v42 = vpop.f32.mrf.mxu0 }
  0xaf   : > { %v2171_v43 = vpop.f32.mrf.mxu2 }
  0xb0   : > { %v2173_v44 = vpop.f32.mrf.mxu3  ;;  %v398_v45 = vpop.f32.mrf.mxu1 }
  0xb1   : > { %v399_v48 = vadd.f32 %v398_v45, %v319_v18 }
  0xb3   : > { %v754_v49 = vpop.f32.mrf.mxu0  ;;  %1695 = vmatmul.msk.bf16.vlgmr.msra.gmra.mxu1 %vm285_vm0, %v2040_v46 }
  0xb4   : > { %1725 = vmatmul.msk.bf16.vlgmr.msra.gmra.mxu2 %vm285_vm0, %v2042_v47 }
  0xb5   : > { %1755 = vmatmul.msk.bf16.vlgmr.msra.gmra.mxu3 %vm285_vm0, %v1975_v8 }
  0xb6   : > { %1785 = vmatmul.msk.bf16.vlgmr.msra.gmra.mxu0 %vm285_vm0, %v2055_v52 }
  0xb7   : > { %v506_v50 = vpop.f32.mrf.mxu2 }
  0xb8   : > { %v630_v51 = vpop.f32.mrf.mxu3  ;;  %v546_v54 = vadd.f32 %v506_v50, %v399_v48  ;;  %v400_v55 = vpop.f32.mrf.mxu1 }
  0xb9   : > { %v401_v56 = vadd.f32 %v400_v55, %v321_v22 }
  0xba   : > { %v670_v57 = vadd.f32 %v630_v51, %v546_v54 }
  0xbb   : > { %v756_v60 = vpop.f32.mrf.mxu0 }
  0xbc   : > { %v2183_v61 = vadd.f32 %v754_v49, %v670_v57 }
  0xbf   : > { %v508_v62 = vpop.f32.mrf.mxu2 }
  0xc0   : > { %v632_v46 = vpop.f32.mrf.mxu3  ;;  %v547_v63 = vadd.f32 %v508_v62, %v401_v56  ;;  %v403_v2 = vpop.f32.mrf.mxu1 }
  0xc1   : > { %v404_v47 = vadd.f32 %v403_v2, %v324_v38 }
  0xc2   : > { %v671_v3 = vadd.f32 %v632_v46, %v547_v63 }
  0xc3   : > { %v759_v4 = vpop.f32.mrf.mxu0  ;;  %1696 = vmatmul.msk.bf16.gmra.mxu1 %vm285_vm0, %v2055_v52 }
  0xc4   : > { %1726 = vmatmul.msk.bf16.gmra.mxu2 %vm285_vm0, %v2057_v53  ;;  %v2191_v8 = vadd.f32 %v756_v60, %v671_v3 }
  0xc5   : > { %1756 = vmatmul.msk.bf16.gmra.mxu3 %vm285_vm0, %v2013_v29 }
  0xc6   : > { %1786 = vmatmul.msk.bf16.gmra.mxu0 %vm285_vm0, %v2071_v58 }
  0xc7   : > { %v511_v5 = vpop.f32.mrf.mxu2 }
  0xc8   : > { %v635_v9 = vpop.f32.mrf.mxu3  ;;  %v548_v10 = vadd.f32 %v511_v5, %v404_v47  ;;  %v405_v11 = vpop.f32.mrf.mxu1 }
  0xc9   : > { %v406_v14 = vadd.f32 %v405_v11, %v326_v42 }
  0xca   : > { %v672_v18 = vadd.f32 %v635_v9, %v548_v10 }
  0xcb   : > { %v761_v22 = vpop.f32.mrf.mxu0 }
  0xcc   : > { %v2195_v23 = vadd.f32 %v759_v4, %v672_v18 }
  0xcf   : > { %v513_v52 = vpop.f32.mrf.mxu2 }
  0xd0   : > { %v637_v24 = vpop.f32.mrf.mxu3  ;;  %v549_v53 = vadd.f32 %v513_v52, %v406_v14  ;;  %v408_v25 = vpop.f32.mrf.mxu1 }
  0xd1   : > { %v409_v29 = vadd.f32 %v408_v25, %v2119_v15 }
  0xd2   : > { %v673_v26 = vadd.f32 %v637_v24, %v549_v53 }
  0xd3   : > { %v764_v27 = vpop.f32.mrf.mxu0  ;;  %1697 = vmatmul.msk.bf16.gmra.mxu1 %vm285_vm0, %v2071_v58 }
  0xd4   : > { %1727 = vmatmul.msk.bf16.gmra.mxu2 %vm285_vm0, %v2073_v59  ;;  %v2204_v28 = vadd.f32 %v761_v22, %v673_v26 }
  0xd5   : > { %1757 = vmatmul.msk.bf16.gmra.mxu3 %vm285_vm0, %v1980_v12 }
  0xd6   : > { %1787 = vmatmul.msk.bf16.gmra.mxu0 %vm285_vm0, %v2087_v0 }
  0xd7   : > { %v516_v38 = vpop.f32.mrf.mxu2 }
  0xd8   : > { %v640_v42 = vpop.f32.mrf.mxu3  ;;  %v550_v45 = vadd.f32 %v516_v38, %v409_v29  ;;  %v410_v15 = vpop.f32.mrf.mxu1 }
  0xd9   : > { %v411_v48 = vadd.f32 %v410_v15, %v2137_v21 }
  0xda   : > { %v674_v49 = vadd.f32 %v640_v42, %v550_v45 }
  0xdb   : > { %v766_v50 = vpop.f32.mrf.mxu0 }
  0xdc   : > { %v2209_v58 = vadd.f32 %v764_v27, %v674_v49 }
  0xdf   : > { %v518_v51 = vpop.f32.mrf.mxu2 }
  0xe0   : > { %v642_v59 = vpop.f32.mrf.mxu3  ;;  %v551_v54 = vadd.f32 %v518_v51, %v411_v48  ;;  %v413_v55 = vpop.f32.mrf.mxu1  ;;  %v1776_v51 = vld [vmem:[%s1970_s6 + $0x8a] sm:$0xff] }
  0xe1   : > { %v414_v12 = vadd.f32 %v413_v55, %v2149_v34 }
  0xe2   : > { %v675_v56 = vadd.f32 %v642_v59, %v551_v54 }
  0xe3   : > { %v769_v57 = vpop.f32.mrf.mxu0  ;;  %1698 = vmatmul.msk.bf16.gmra.mxu1 %vm285_vm0, %v2087_v0 }
  0xe4   : > { %1728 = vmatmul.msk.bf16.gmra.mxu2 %vm285_vm0, %v2089_v1  ;;  %v2218_v21 = vadd.f32 %v766_v50, %v675_v56  ;;  %v1775_v50 = vld [vmem:[%s1970_s6 + $0x82] sm:$0xff] }
  0xe5   : > { %1758 = vmatmul.msk.bf16.gmra.mxu3 %vm285_vm0, %v2015_v30 }
  0xe6   : > { %1788 = vmatmul.msk.bf16.gmra.mxu0 %vm285_vm0, %v2103_v6 }
  0xe7   : > { %v521_v60 = vpop.f32.mrf.mxu2 }
  0xe8   : > { %v645_v62 = vpop.f32.mrf.mxu3  ;;  %v552_v46 = vadd.f32 %v521_v60, %v414_v12  ;;  %v415_v34 = vpop.f32.mrf.mxu1  ;;  %v1206_v12 = vpack.c.bf16 %v1776_v51, %v1775_v50 }
  0xe9   : > { %v416_v63 = vadd.f32 %v415_v34, %v2169_v41 }
  0xea   : > { %v676_v2 = vadd.f32 %v645_v62, %v552_v46 }
  0xeb   : > { %v771_v47 = vpop.f32.mrf.mxu0 }
  0xec   : > { %v2223_v0 = vadd.f32 %v769_v57, %v676_v2  ;;  %v1717_v2 = vld [vmem:[%s1970_s6 + $0x90] sm:$0xff] }
  0xef   : > { %v523_v3 = vpop.f32.mrf.mxu2 }
  0xf0   : > { %v647_v1 = vpop.f32.mrf.mxu3  ;;  %v553_v4 = vadd.f32 %v523_v3, %v416_v63  ;;  %v418_v5 = vpop.f32.mrf.mxu1  ;;  %v1747_v3 = vld [vmem:[%s1970_s6 + $0x91] sm:$0xff] }
  0xf1   : > { %v419_v10 = vadd.f32 %v418_v5, %v2133_v19  ;;  %v1778_v5 = vld [vmem:[%s1970_s6 + $0x9a] sm:$0xff] }
  0xf2   : > { %v677_v30 = vadd.f32 %v647_v1, %v553_v4  ;;  %v1777_v4 = vld [vmem:[%s1970_s6 + $0x92] sm:$0xff] }
  0xf3   : > { %v774_v9 = vpop.f32.mrf.mxu0  ;;  %1699 = vmatmul.msk.bf16.gmra.mxu1 %vm285_vm0, %v2103_v6 }
  0xf4   : > { %1729 = vmatmul.msk.bf16.gmra.mxu2 %vm285_vm0, %v2105_v7  ;;  %v2231_v41 = vadd.f32 %v771_v47, %v677_v30 }
  0xf5   : > { %1759 = vmatmul.msk.bf16.gmra.mxu3 %vm285_vm0, %v1982_v13 }
  0xf6   : > { %1789 = vmatmul.msk.bf16.gmra.mxu0 %vm285_vm0, %v2121_v16 }
  0xf7   : > { %v526_v11 = vpop.f32.mrf.mxu2 }
  0xf8   : > { %v650_v14 = vpop.f32.mrf.mxu3  ;;  %v554_v18 = vadd.f32 %v526_v11, %v419_v10  ;;  %v420_v22 = vpop.f32.mrf.mxu1 }
  0xf9   : > { %v421_v7 = vadd.f32 %v420_v22, %v2145_v32 }
  0xfa   : > { %v678_v52 = vadd.f32 %v650_v14, %v554_v18  ;;  %v1207_v18 = vpack.c.bf16 %v1778_v5, %v1777_v4 }
  0xfb   : > { %v776_v24 = vpop.f32.mrf.mxu0 }
  0xfc   : > { %v2236_v6 = vadd.f32 %v774_v9, %v678_v52 }
  0xff   : > { %v528_v53 = vpop.f32.mrf.mxu2 }
 0x100   : > { %v652_v25 = vpop.f32.mrf.mxu3  ;;  %v555_v13 = vadd.f32 %v528_v53, %v421_v7  ;;  %v423_v29 = vpop.f32.mrf.mxu1 }
 0x101   : > { %v424_v32 = vadd.f32 %v423_v29, %v2165_v39 }
 0x102   : > { %v679_v26 = vadd.f32 %v652_v25, %v555_v13 }
 0x103   : > { %v779_v27 = vpop.f32.mrf.mxu0  ;;  %1700 = vmatmul.msk.bf16.gmra.mxu1 %vm285_vm0, %v2121_v16 }
 0x104   : > { %1730 = vmatmul.msk.bf16.gmra.mxu2 %vm285_vm0, %v2123_v17  ;;  %v2245_v19 = vadd.f32 %v776_v24, %v679_v26 }
 0x105   : > { %1760 = vmatmul.msk.bf16.gmra.mxu3 %vm285_vm0, %v2017_v31 }
 0x106   : > { %1790 = vmatmul.msk.bf16.gmra.mxu0 %vm285_vm0, %v2151_v35 }
 0x107   : > { %v531_v38 = vpop.f32.mrf.mxu2 }
 0x108   : > { %v655_v42 = vpop.f32.mrf.mxu3  ;;  %v556_v45 = vadd.f32 %v531_v38, %v424_v32  ;;  %v425_v15 = vpop.f32.mrf.mxu1 }
 0x109   : > { %v426_v17 = vadd.f32 %v425_v15, %v2171_v43 }
 0x10a   : > { %v680_v48 = vadd.f32 %v655_v42, %v556_v45 }
 0x10b   : > { %v781_v49 = vpop.f32.mrf.mxu0 }
 0x10c   : > { %v2250_v16 = vadd.f32 %v779_v27, %v680_v48 }
 0x10f   : > { %v533_v31 = vpop.f32.mrf.mxu2 }
 0x110   : > { %v657_v59 = vpop.f32.mrf.mxu3  ;;  %v557_v54 = vadd.f32 %v533_v31, %v426_v17  ;;  %v428_v55 = vpop.f32.mrf.mxu1 }
 0x111   : > { %v429_v57 = vadd.f32 %v428_v55, %v2135_v20 }
 0x112   : > { %v681_v56 = vadd.f32 %v657_v59, %v557_v54 }
 0x113   : > { %v784_v39 = vpop.f32.mrf.mxu0  ;;  %1701 = vmatmul.msk.bf16.gmra.mxu1 %vm285_vm0, %v2151_v35 }
 0x114   : > { %1731 = vmatmul.msk.bf16.gmra.mxu2 %vm285_vm0, %v2153_v36  ;;  %v2261_v43 = vadd.f32 %v781_v49, %v681_v56  ;;  %v1718_v36 = vld [vmem:[%s1970_s6 + $0x98] sm:$0xff] }
 0x115   : > { %1761 = vmatmul.msk.bf16.gmra.mxu3 %vm285_vm0, %v2155_v37  ;;  %v1748_v37 = vld [vmem:[%s1970_s6 + $0x99] sm:$0xff]  ;;  %v959_v11 = vpack.c.bf16 %v1718_v36, %v1717_v2 }
 0x116   : > { %1791 = vmatmul.msk.bf16.gmra.mxu0 %vm285_vm0, %v1206_v12  ;;  %v1083_v14 = vpack.c.bf16 %v1748_v37, %v1747_v3 }
 0x117   : > { %v536_v60 = vpop.f32.mrf.mxu2 }
 0x118   : > { %v660_v62 = vpop.f32.mrf.mxu3  ;;  %v558_v46 = vadd.f32 %v536_v60, %v429_v57  ;;  %v430_v34 = vpop.f32.mrf.mxu1 }
 0x119   : > { %v431_v1 = vadd.f32 %v430_v34, %v2147_v33 }
 0x11a   : > { %v682_v35 = vadd.f32 %v660_v62, %v558_v46 }
 0x11b   : > { %v786_v63 = vpop.f32.mrf.mxu0 }
 0x11c   : > { %v2266_v47 = vadd.f32 %v784_v39, %v682_v35 }
 0x11f   : > { %v538_v30 = vpop.f32.mrf.mxu2 }
 0x120   : > { %v662_v9 = vpop.f32.mrf.mxu3  ;;  %v559_v10 = vadd.f32 %v538_v30, %v431_v1  ;;  %v433_v20 = vpop.f32.mrf.mxu1 }
 0x121   : > { %v434_v33 = vadd.f32 %v433_v20, %v2167_v40 }
 0x122   : > { %v683_v22 = vadd.f32 %v662_v9, %v559_v10 }
 0x123   : > { %v789_v52 = vpop.f32.mrf.mxu0  ;;  %1702 = vmatmul.msk.bf16.gmra.mxu1 %vm285_vm0, %v1206_v12 }
 0x124   : > { %1732 = vmatmul.msk.bf16.gmra.mxu2 %vm285_vm0, %v959_v11  ;;  %v2277_v24 = vadd.f32 %v786_v63, %v683_v22 }
 0x125   : > { %1762 = vmatmul.msk.bf16.gmra.mxu3 %vm285_vm0, %v1083_v14 }
 0x126   : > { %1792 = vmatmul.msk.bf16.gmra.mxu0 %vm285_vm0, %v1207_v18 }
 0x127   : > { %v541_v7 = vpop.f32.mrf.mxu2 }
 0x128   : > { %v665_v53 = vpop.f32.mrf.mxu3  ;;  %v560_v25 = vadd.f32 %v541_v7, %v434_v33  ;;  %v435_v13 = vpop.f32.mrf.mxu1 }
 0x129   : > { %v436_v32 = vadd.f32 %v435_v13, %v2173_v44  ;;  %v2290_v44 = vld [vmem:[%s2369_s2] ss:$0 sm:$0xff] }
 0x12a   : > { %v684_v29 = vadd.f32 %v665_v53, %v560_v25 }
 0x12b   : > { %v791_v26 = vpop.f32.mrf.mxu0 }
 0x12c   : > { %v2281_v27 = vadd.f32 %v789_v52, %v684_v29 }
 0x12f   : > { %v543_v38 = vpop.f32.mrf.mxu2 }
 0x130   : > { %v667_v42 = vpop.f32.mrf.mxu3  ;;  %v561_v45 = vadd.f32 %v543_v38, %v436_v32  ;;  %v878_v15 = vpop.f32.mrf.mxu1 }
 0x131   : > { %v918_v40 = vadd.f32 %v878_v15, %v2183_v61  ;;  %v2297_v61 = vld [vmem:[%s2370_s3] ss:$0 sm:$0xff] }
 0x132   : > { %v685_v48 = vadd.f32 %v667_v42, %v561_v45 }
 0x133   : > { %v1250_v49 = vpop.f32.mrf.mxu0 }
 0x134   : > { %v2284_v17 = vadd.f32 %v791_v26, %v685_v48 }
 0x137   : > { %v1002_v50 = vpop.f32.mrf.mxu2 }
 0x138   : > { %v1126_v51 = vpop.f32.mrf.mxu3  ;;  %v1042_v31 = vadd.f32 %v1002_v50, %v918_v40  ;;  %v880_v59 = vpop.f32.mrf.mxu1 }
 0x139   : > { %v919_v56 = vadd.f32 %v880_v59, %v2191_v8 }
 0x13a   : > { %v1166_v54 = vadd.f32 %v1126_v51, %v1042_v31 }
 0x13b   : > { %v1252_v55 = vpop.f32.mrf.mxu0 }
 0x13c   : > { %v1290_v12 = vadd.f32 %v1250_v49, %v1166_v54 }
 0x13e   : > { %v1310_v60 = vmul.f32 %v2290_v44, %v1290_v12 }
 0x13f   : > { %v1004_v39 = vpop.f32.mrf.mxu2 }
 0x140   : > { %v1128_v57 = vpop.f32.mrf.mxu3  ;;  %v1043_v62 = vadd.f32 %v1004_v39, %v919_v56  ;;  %v883_v46 = vpop.f32.mrf.mxu1  ;;  %v1330_v63 = vadd.f32 %v2297_v61, %v1310_v60 }
 0x141   : > { %v920_v8 = vadd.f32 %v883_v46, %v2195_v23 }
 0x142   : > { %v1167_v34 = vadd.f32 %v1128_v57, %v1043_v62  ;;  %v1362_v1 = vmul.f32 0.1, %v1330_v63  ;;  %vm1346_vm1 = vcmp.ge.f32.partialorder %v1330_v63, 0.0 }
 0x143   : > { %v1255_v35 = vpop.f32.mrf.mxu0 }
 0x144   : > { %v1291_v2 = vadd.f32 %v1252_v55, %v1167_v34  ;;  %v1378_v11 = vsel %vm1346_vm1, %v1330_v63, %v1362_v1 }
 0x146   : > { %v1311_v36 = vmul.f32 %v2290_v44, %v1291_v2 }
 0x147   : > { %v1007_v3 = vpop.f32.mrf.mxu2 }
 0x148   : > { %v1131_v37 = vpop.f32.mrf.mxu3  ;;  %v1331_v4 = vadd.f32 %v2297_v61, %v1311_v36  ;;  %v1044_v5 = vadd.f32 %v1007_v3, %v920_v8  ;;  %v885_v30 = vpop.f32.mrf.mxu1 }
 0x149   : > { %v921_v22 = vadd.f32 %v885_v30, %v2204_v28 }
 0x14a   : > { %vm1347_vm2 = vcmp.ge.f32.partialorder %v1331_v4, 0.0  ;;  %v1363_v9 = vmul.f32 0.1, %v1331_v4  ;;  %v1168_v10 = vadd.f32 %v1131_v37, %v1044_v5 }
 0x14b   : > { %v1257_v20 = vpop.f32.mrf.mxu0 }
 0x14c   : > { %v1379_v23 = vsel %vm1347_vm2, %v1331_v4, %v1363_v9  ;;  %v1292_v14 = vadd.f32 %v1255_v35, %v1168_v10 }
 0x14d   : > { %v1808_v18 = vpack.c.bf16 %v1379_v23, %v1378_v11 }
 0x14e   : > { %v1312_v7 = vmul.f32 %v2290_v44, %v1292_v14 }
 0x14f   : > { %1809 = vst [vmem:[%s2307_s26] sm:$0xff] %v1808_v18   ;;  %v1009_v52 = vpop.f32.mrf.mxu2 }
 0x150   : > { %v1133_v33 = vpop.f32.mrf.mxu3  ;;  %v1045_v53 = vadd.f32 %v1009_v52, %v921_v22  ;;  %v888_v25 = vpop.f32.mrf.mxu1  ;;  %v1332_v26 = vadd.f32 %v2297_v61, %v1312_v7 }
 0x151   : > { %v922_v42 = vadd.f32 %v888_v25, %v2209_v58 }
 0x152   : > { %v1169_v13 = vadd.f32 %v1133_v33, %v1045_v53  ;;  %v1364_v28 = vmul.f32 0.1, %v1332_v26  ;;  %vm1348_vm3 = vcmp.ge.f32.partialorder %v1332_v26, 0.0 }
 0x153   : > { %v1260_v29 = vpop.f32.mrf.mxu0 }
 0x154   : > { %v1293_v32 = vadd.f32 %v1257_v20, %v1169_v13  ;;  %v1380_v59 = vsel %vm1348_vm3, %v1332_v26, %v1364_v28 }
 0x156   : > { %v1313_v38 = vmul.f32 %v2290_v44, %v1293_v32 }
 0x157   : > { %v1012_v45 = vpop.f32.mrf.mxu2 }
 0x158   : > { %v1136_v15 = vpop.f32.mrf.mxu3  ;;  %v1333_v48 = vadd.f32 %v2297_v61, %v1313_v38  ;;  %v1046_v49 = vadd.f32 %v1012_v45, %v922_v42  ;;  %v890_v40 = vpop.f32.mrf.mxu1 }
 0x159   : > { %v923_v56 = vadd.f32 %v890_v40, %v2218_v21 }
 0x15a   : > { %vm1349_vm4 = vcmp.ge.f32.partialorder %v1333_v48, 0.0  ;;  %v1365_v50 = vmul.f32 0.1, %v1333_v48  ;;  %v1170_v51 = vadd.f32 %v1136_v15, %v1046_v49 }
 0x15b   : > { %v1262_v31 = vpop.f32.mrf.mxu0 }
 0x15c   : > { %v1381_v54 = vsel %vm1349_vm4, %v1333_v48, %v1365_v50  ;;  %v1294_v55 = vadd.f32 %v1260_v29, %v1170_v51 }
 0x15d   : > { %v1813_v12 = vpack.c.bf16 %v1381_v54, %v1380_v59 }
 0x15e   : > { %v1314_v57 = vmul.f32 %v2290_v44, %v1294_v55 }
 0x15f   : > { %1845 = vst [vmem:[%s2307_s26 + $0x8] sm:$0xff] %v1813_v12   ;;  %v1014_v58 = vpop.f32.mrf.mxu2 }
 0x160   : > { %v1138_v39 = vpop.f32.mrf.mxu3  ;;  %v1047_v60 = vadd.f32 %v1014_v58, %v923_v56  ;;  %v893_v62 = vpop.f32.mrf.mxu1  ;;  %v1334_v35 = vadd.f32 %v2297_v61, %v1314_v57 }
 0x161   : > { %v924_v36 = vadd.f32 %v893_v62, %v2223_v0 }
 0x162   : > { %v1171_v46 = vadd.f32 %v1138_v39, %v1047_v60  ;;  %v1366_v21 = vmul.f32 0.1, %v1334_v35  ;;  %vm1350_vm5 = vcmp.ge.f32.partialorder %v1334_v35, 0.0 }
 0x163   : > { %v1265_v34 = vpop.f32.mrf.mxu0 }
 0x164   : > { %v1295_v63 = vadd.f32 %v1262_v31, %v1171_v46  ;;  %v1382_v10 = vsel %vm1350_vm5, %v1334_v35, %v1366_v21 }
 0x166   : > { %v1315_v2 = vmul.f32 %v2290_v44, %v1295_v63 }
 0x167   : > { %v1017_v8 = vpop.f32.mrf.mxu2 }
 0x168   : > { %v1141_v3 = vpop.f32.mrf.mxu3  ;;  %v1335_v37 = vadd.f32 %v2297_v61, %v1315_v2  ;;  %v1048_v1 = vadd.f32 %v1017_v8, %v924_v36  ;;  %v895_v4 = vpop.f32.mrf.mxu1 }
 0x169   : > { %v925_v14 = vadd.f32 %v895_v4, %v2231_v41 }
 0x16a   : > { %vm1351_vm6 = vcmp.ge.f32.partialorder %v1335_v37, 0.0  ;;  %v1367_v5 = vmul.f32 0.1, %v1335_v37  ;;  %v1172_v30 = vadd.f32 %v1141_v3, %v1048_v1 }
 0x16b   : > { %v1267_v9 = vpop.f32.mrf.mxu0 }
 0x16c   : > { %v1383_v20 = vsel %vm1351_vm6, %v1335_v37, %v1367_v5  ;;  %v1296_v11 = vadd.f32 %v1265_v34, %v1172_v30 }
 0x16d   : > { %v1818_v23 = vpack.c.bf16 %v1383_v20, %v1382_v10 }
 0x16e   : > { %v1316_v22 = vmul.f32 %v2290_v44, %v1296_v11 }
 0x16f   : > { %1846 = vst [vmem:[%s2307_s26 + $0x10] sm:$0xff] %v1818_v23   ;;  %v1019_v0 = vpop.f32.mrf.mxu2 }
 0x170   : > { %v1143_v18 = vpop.f32.mrf.mxu3  ;;  %v1049_v52 = vadd.f32 %v1019_v0, %v925_v14  ;;  %v898_v33 = vpop.f32.mrf.mxu1  ;;  %v1336_v25 = vadd.f32 %v2297_v61, %v1316_v22 }
 0x171   : > { %v926_v26 = vadd.f32 %v898_v33, %v2236_v6 }
 0x172   : > { %v1173_v7 = vadd.f32 %v1143_v18, %v1049_v52  ;;  %v1368_v41 = vmul.f32 0.1, %v1336_v25  ;;  %vm1352_vm7 = vcmp.ge.f32.partialorder %v1336_v25, 0.0 }
 0x173   : > { %v1270_v53 = vpop.f32.mrf.mxu0 }
 0x174   : > { %v1297_v13 = vadd.f32 %v1267_v9, %v1173_v7  ;;  %v1384_v40 = vsel %vm1352_vm7, %v1336_v25, %v1368_v41 }
 0x176   : > { %v1317_v29 = vmul.f32 %v2290_v44, %v1297_v13 }
 0x177   : > { %v1022_v32 = vpop.f32.mrf.mxu2 }
 0x178   : > { %v1146_v38 = vpop.f32.mrf.mxu3  ;;  %v1337_v42 = vadd.f32 %v2297_v61, %v1317_v29  ;;  %v1050_v45 = vadd.f32 %v1022_v32, %v926_v26  ;;  %v900_v15 = vpop.f32.mrf.mxu1 }
 0x179   : > { %v927_v59 = vadd.f32 %v900_v15, %v2245_v19 }
 0x17a   : > { %vm1353_vm8 = vcmp.ge.f32.partialorder %v1337_v42, 0.0  ;;  %v1369_v28 = vmul.f32 0.1, %v1337_v42  ;;  %v1174_v48 = vadd.f32 %v1146_v38, %v1050_v45 }
 0x17b   : > { %v1272_v49 = vpop.f32.mrf.mxu0 }
 0x17c   : > { %v1385_v50 = vsel %vm1353_vm8, %v1337_v42, %v1369_v28  ;;  %v1298_v51 = vadd.f32 %v1270_v53, %v1174_v48 }
 0x17d   : > { %v1823_v31 = vpack.c.bf16 %v1385_v50, %v1384_v40 }
 0x17e   : > { %v1318_v55 = vmul.f32 %v2290_v44, %v1298_v51 }
 0x17f   : > { %1847 = vst [vmem:[%s2307_s26 + $0x18] sm:$0xff] %v1823_v31   ;;  %v1024_v6 = vpop.f32.mrf.mxu2 }
 0x180   : > { %v1148_v54 = vpop.f32.mrf.mxu3  ;;  %v1051_v12 = vadd.f32 %v1024_v6, %v927_v59  ;;  %v903_v56 = vpop.f32.mrf.mxu1  ;;  %v1338_v57 = vadd.f32 %v2297_v61, %v1318_v55 }
 0x181   : > { %v928_v46 = vadd.f32 %v903_v56, %v2250_v16 }
 0x182   : > { %v1175_v58 = vadd.f32 %v1148_v54, %v1051_v12  ;;  %v1370_v19 = vmul.f32 0.1, %v1338_v57  ;;  %vm1354_vm9 = vcmp.ge.f32.partialorder %v1338_v57, 0.0 }
 0x183   : > { %v1275_v39 = vpop.f32.mrf.mxu0 }
 0x184   : > { %v1299_v60 = vadd.f32 %v1272_v49, %v1175_v58  ;;  %v1386_v37 = vsel %vm1354_vm9, %v1338_v57, %v1370_v19 }
 0x186   : > { %v1319_v62 = vmul.f32 %v2290_v44, %v1299_v60 }
 0x187   : > { %v1027_v34 = vpop.f32.mrf.mxu2 }
 0x188   : > { %v1151_v35 = vpop.f32.mrf.mxu3  ;;  %v1339_v63 = vadd.f32 %v2297_v61, %v1319_v62  ;;  %v1052_v2 = vadd.f32 %v1027_v34, %v928_v46  ;;  %v905_v36 = vpop.f32.mrf.mxu1 }
 0x189   : > { %v929_v30 = vadd.f32 %v905_v36, %v2261_v43 }
 0x18a   : > { %vm1355_vm10 = vcmp.ge.f32.partialorder %v1339_v63, 0.0  ;;  %v1371_v8 = vmul.f32 0.1, %v1339_v63  ;;  %v1176_v3 = vadd.f32 %v1151_v35, %v1052_v2 }
 0x18b   : > { %v1277_v21 = vpop.f32.mrf.mxu0 }
 0x18c   : > { %v1387_v1 = vsel %vm1355_vm10, %v1339_v63, %v1371_v8  ;;  %v1300_v4 = vadd.f32 %v1275_v39, %v1176_v3 }
 0x18d   : > { %v1828_v5 = vpack.c.bf16 %v1387_v1, %v1386_v37 }
 0x18e   : > { %v1320_v10 = vmul.f32 %v2290_v44, %v1300_v4 }
 0x18f   : > { %1848 = vst [vmem:[%s2307_s26 + $0x20] sm:$0xff] %v1828_v5   ;;  %v1029_v16 = vpop.f32.mrf.mxu2 }
 0x190   : > { %v1153_v9 = vpop.f32.mrf.mxu3  ;;  %v1053_v20 = vadd.f32 %v1029_v16, %v929_v30  ;;  %v908_v11 = vpop.f32.mrf.mxu1  ;;  %v1340_v14 = vadd.f32 %v2297_v61, %v1320_v10 }
 0x191   : > { %v930_v52 = vadd.f32 %v908_v11, %v2266_v47 }
 0x192   : > { %v1177_v23 = vadd.f32 %v1153_v9, %v1053_v20  ;;  %v1372_v43 = vmul.f32 0.1, %v1340_v14  ;;  %vm1356_vm11 = vcmp.ge.f32.partialorder %v1340_v14, 0.0 }
 0x193   : > { %v1280_v18 = vpop.f32.mrf.mxu0 }
 0x194   : > { %v1301_v0 = vadd.f32 %v1277_v21, %v1177_v23  ;;  %v1388_v32 = vsel %vm1356_vm11, %v1340_v14, %v1372_v43 }
 0x196   : > { %v1321_v22 = vmul.f32 %v2290_v44, %v1301_v0 }
 0x197   : > { %v1032_v33 = vpop.f32.mrf.mxu2 }
 0x198   : > { %v1156_v7 = vpop.f32.mrf.mxu3  ;;  %v1341_v53 = vadd.f32 %v2297_v61, %v1321_v22  ;;  %v1054_v25 = vadd.f32 %v1032_v33, %v930_v52  ;;  %v910_v13 = vpop.f32.mrf.mxu1 }
 0x199   : > { %v931_v45 = vadd.f32 %v910_v13, %v2277_v24 }
 0x19a   : > { %vm1357_vm12 = vcmp.ge.f32.partialorder %v1341_v53, 0.0  ;;  %v1373_v29 = vmul.f32 0.1, %v1341_v53  ;;  %v1178_v26 = vadd.f32 %v1156_v7, %v1054_v25 }
 0x19b   : > { %v1282_v15 = vpop.f32.mrf.mxu0 }
 0x19c   : > { %v1389_v38 = vsel %vm1357_vm12, %v1341_v53, %v1373_v29  ;;  %v1302_v41 = vadd.f32 %v1280_v18, %v1178_v26 }
 0x19d   : > { %v1833_v42 = vpack.c.bf16 %v1389_v38, %v1388_v32 }
 0x19e   : > { %v1322_v48 = vmul.f32 %v2290_v44, %v1302_v41 }
 0x19f   : > { %1849 = vst [vmem:[%s2307_s26 + $0x28] sm:$0xff] %v1833_v42   ;;  %v1034_v47 = vpop.f32.mrf.mxu2 }
 0x1a0   : > { %v1158_v28 = vpop.f32.mrf.mxu3  ;;  %v1055_v49 = vadd.f32 %v1034_v47, %v931_v45  ;;  %v913_v40 = vpop.f32.mrf.mxu1  ;;  %v1342_v51 = vadd.f32 %v2297_v61, %v1322_v48 }
 0x1a1   : > { %v932_v6 = vadd.f32 %v913_v40, %v2281_v27 }
 0x1a2   : > { %v1179_v50 = vadd.f32 %v1158_v28, %v1055_v49  ;;  %v1374_v24 = vmul.f32 0.1, %v1342_v51  ;;  %vm1358_vm13 = vcmp.ge.f32.partialorder %v1342_v51, 0.0 }
 0x1a3   : > { %v1285_v58 = vpop.f32.mrf.mxu0 }
 0x1a4   : > { %v1303_v31 = vadd.f32 %v1282_v15, %v1179_v50  ;;  %v1390_v62 = vsel %vm1358_vm13, %v1342_v51, %v1374_v24 }
 0x1a6   : > { %v1323_v59 = vmul.f32 %v2290_v44, %v1303_v31 }
 0x1a7   : > { %v1037_v54 = vpop.f32.mrf.mxu2 }
 0x1a8   : > { %v1161_v55 = vpop.f32.mrf.mxu3  ;;  %v1343_v12 = vadd.f32 %v2297_v61, %v1323_v59  ;;  %v1056_v56 = vadd.f32 %v1037_v54, %v932_v6  ;;  %v915_v60 = vpop.f32.mrf.mxu1 }
 0x1a9   : > { %v933_v19 = vadd.f32 %v915_v60, %v2284_v17 }
 0x1aa   : > { %vm1359_vm14 = vcmp.ge.f32.partialorder %v1343_v12, 0.0  ;;  %v1375_v39 = vmul.f32 0.1, %v1343_v12  ;;  %v1180_v57 = vadd.f32 %v1161_v55, %v1056_v56 }
 0x1ab   : > { %v1287_v3 = vpop.f32.mrf.mxu0 }
 0x1ac   : > { %v1391_v46 = vsel %vm1359_vm14, %v1343_v12, %v1375_v39  ;;  %v1304_v34 = vadd.f32 %v1285_v58, %v1180_v57 }
 0x1ad   : > { %v1838_v35 = vpack.c.bf16 %v1391_v46, %v1390_v62 }
 0x1ae   : > { %v1324_v63 = vmul.f32 %v2290_v44, %v1304_v34 }
 0x1af   : > { %1850 = vst [vmem:[%s2307_s26 + $0x30] sm:$0xff] %v1838_v35   ;;  %v1039_v27 = vpop.f32.mrf.mxu2 }
 0x1b0   : > { %v1057_v2 = vadd.f32 %v1039_v27, %v933_v19  ;;  %v1163_v36 = vpop.f32.mrf.mxu3  ;;  %v1344_v21 = vadd.f32 %v2297_v61, %v1324_v63 }
 0x1b2   : > { %v1181_v8 = vadd.f32 %v1163_v36, %v1057_v2  ;;  %v1376_v4 = vmul.f32 0.1, %v1344_v21  ;;  %vm1360_vm15 = vcmp.ge.f32.partialorder %v1344_v21, 0.0 }
 0x1b4   : > { %v1305_v37 = vadd.f32 %v1287_v3, %v1181_v8  ;;  %v1392_v30 = vsel %vm1360_vm15, %v1344_v21, %v1376_v4 }
 0x1b6   : > { %v1325_v1 = vmul.f32 %v2290_v44, %v1305_v37 }
 0x1b8   : > { %v1345_v5 = vadd.f32 %v2297_v61, %v1325_v1 }
 0x1ba   : > { %vm1361_vm0 = vcmp.ge.f32.partialorder %v1345_v5, 0.0  ;;  %v1377_v17 = vmul.f32 0.1, %v1345_v5 }
 0x1bc   : > { %v1393_v16 = vsel %vm1361_vm0, %v1345_v5, %v1377_v17 }
 0x1bd   : > { %v1843_v9 = vpack.c.bf16 %v1393_v16, %v1392_v30 }
 0x1bf   : > { %1851 = vst [vmem:[%s2307_s26 + $0x38] sm:$0xff] %v1843_v9  }
 0x1c0 PF: > { %s14_s17 = sadd.s32 1, %s1904_s17   ;;  %s2372_s15 = smov %s1900_s16 }
 0x1c1   : > { %p11_p5 = scmp.ge.s32.totalorder %s14_s17, 4   ;;  %s2373_s16 = smov %s2375_s18 }
 0x1c3   :  { %13 = sbr.rel (!%p11_p5) target bundleno = 2 (0x2), region = 83 }

// kernel: _lambda_.19
= control target key start
LH: loop header
LB: loop body
LE: loop exit
PB: predicated region body
PF: predicated region fallthrough
CT: control target
= control target key end

     0   :  { %s1042_s15 = smov 0   ;;  %s1044_s16 = smov 0   ;;  %s1197_s0 = inlined_call_operand.vmem [shape: f32[2,48,128], index: 0, kind: input, shape index: {}]   ;;  %s1198_s1 = inlined_call_operand.vmem [shape: bf16[4,128,128], index: 1, kind: input, shape index: {}]   ;;  %s1199_s2 = inlined_call_operand.vmem [shape: f32[1,128], index: 2, kind: input, shape index: {}]   ;;  %s1200_s3 = inlined_call_operand.vmem [shape: f32[1,128], index: 3, kind: input, shape index: {}]   ;;  %s1201_s4 = inlined_call_operand.vmem [shape: bf16[2,32,128], index: 4, kind: output, shape index: {}]  }
   0x1   :  { %s1046_s17 = smov 0  }
   0x2 LB: > { %s26_s18 = sadd.s32 1, %s1011_s16  ;;  %p728_p0 = scmp.ge.s32.totalorder %s1015_s17, 1  ;;  %s1015_s17 = sphi %s1046_s17, %s14_s17   ;;  %s1011_s16 = sphi %s1044_s16, %s1203_s16   ;;  %s1007_s15 = sphi %s1042_s15, %s1202_s15  }
   0x3   : > { %p28_p1 = scmp.ge.s32.totalorder %s26_s18, 2  ;;  %p176_p2 = scmp.lt.s32.totalorder %s1015_s17, 3 }
   0x5   : > { %s1205_s18 = smov (%p28_p1, %s26_s18), 0  ;;  %p177_p3 = pnand %p728_p0, %p176_p2 }
   0x6   : > { %p206_p4 = scmp.lt.s32.totalorder (!%p177_p3), %s1007_s15, 1 }
   0x7   : > { %180 = sbr.rel (%p177_p3) target bundleno = 216 (0xd8), region = 36 }
   0xc   : > { %v938_v0 = vld [vmem:[%s1198_s1 + $0x78] sm:$0xff]  ;;  %v937_v4 = vld [vmem:[%s1198_s1 + $0x70] sm:$0xff]  ;;  %v936_v8 = vld [vmem:[%s1198_s1 + $0x68] sm:$0xff]  ;;  %s1207_s15 = smov (!%p206_p4, %s1007_s15), 1 }
   0xd   : > { %v930_v1 = vld [vmem:[%s1198_s1 + $0x38] sm:$0xff]  ;;  %318 = vmatpush.bf16.msra.mxu0 %v938_v0  ;;  %v929_v5 = vld [vmem:[%s1198_s1 + $0x30] sm:$0xff]  ;;  %v928_v9 = vld [vmem:[%s1198_s1 + $0x28] sm:$0xff]  ;;  %s966_s19 = smul.u32 48, %s1207_s15  ;;  %s922_s25 = sshll.u32 %s1207_s15, 4 }
   0xe   : > { %v946_v2 = vld [vmem:[%s1198_s1 + $0xb8] sm:$0xff]  ;;  %385 = vmatpush.bf16.msra.mxu1 %v930_v1  ;;  %v945_v6 = vld [vmem:[%s1198_s1 + $0xb0] sm:$0xff]  ;;  %v944_v10 = vld [vmem:[%s1198_s1 + $0xa8] sm:$0xff]  ;;  %s219_s28 = scalar_lea.vmem %s1201_s4, %s922_s25 }
   0xf   : > { %v954_v3 = vld [vmem:[%s1198_s1 + $0xf8] sm:$0xff]  ;;  %477 = vmatpush.bf16.msra.mxu2 %v946_v2  ;;  %v953_v7 = vld [vmem:[%s1198_s1 + $0xf0] sm:$0xff]  ;;  %v952_v11 = vld [vmem:[%s1198_s1 + $0xe8] sm:$0xff]  ;;  %s1148_s30 = scalar_lea.vmem %s1197_s0, %s966_s19 }
  0x10   : > { %573 = vmatpush.bf16.msra.mxu3 %v954_v3  ;;  %v935_v12 = vld [vmem:[%s1198_s1 + $0x60] sm:$0xff]  ;;  %v934_v16 = vld [vmem:[%s1198_s1 + $0x58] sm:$0xff]  ;;  %v933_v20 = vld [vmem:[%s1198_s1 + $0x50] sm:$0xff] }
  0x11   : > { %319 = vmatpush.bf16.msra.mxu0 %v937_v4  ;;  %v927_v13 = vld [vmem:[%s1198_s1 + $0x20] sm:$0xff]  ;;  %v926_v17 = vld [vmem:[%s1198_s1 + $0x18] sm:$0xff]  ;;  %v925_v21 = vld [vmem:[%s1198_s1 + $0x10] sm:$0xff] }
  0x12   : > { %386 = vmatpush.bf16.msra.mxu1 %v929_v5  ;;  %v943_v14 = vld [vmem:[%s1198_s1 + $0xa0] sm:$0xff]  ;;  %v942_v18 = vld [vmem:[%s1198_s1 + $0x98] sm:$0xff]  ;;  %v941_v22 = vld [vmem:[%s1198_s1 + $0x90] sm:$0xff] }
  0x13   : > { %478 = vmatpush.bf16.msra.mxu2 %v945_v6  ;;  %v951_v15 = vld [vmem:[%s1198_s1 + $0xe0] sm:$0xff]  ;;  %v950_v19 = vld [vmem:[%s1198_s1 + $0xd8] sm:$0xff]  ;;  %v949_v23 = vld [vmem:[%s1198_s1 + $0xd0] sm:$0xff] }
  0x14   : > { %574 = vmatpush.bf16.msra.mxu3 %v953_v7  ;;  %v932_v24 = vld [vmem:[%s1198_s1 + $0x48] sm:$0xff]  ;;  %v931_v28 = vld [vmem:[%s1198_s1 + $0x40] sm:$0xff]  ;;  %v817_v36 = vld [vmem:[%s1148_s30 + $0x10] sm:$0xff] }
  0x15   : > { %320 = vmatpush.bf16.msra.mxu0 %v936_v8  ;;  %v924_v25 = vld [vmem:[%s1198_s1 + $0x8] sm:$0xff]  ;;  %v923_v29 = vld [vmem:[%s1198_s1] sm:$0xff]  ;;  %v869_v37 = vld [vmem:[%s1148_s30 + $0x11] sm:$0xff] }
  0x16   : > { %387 = vmatpush.bf16.msra.mxu1 %v928_v9  ;;  %v940_v26 = vld [vmem:[%s1198_s1 + $0x88] sm:$0xff]  ;;  %v939_v30 = vld [vmem:[%s1198_s1 + $0x80] sm:$0xff]  ;;  %v226_v43 = vld [vmem:[%s1148_s30 + $0x18] sm:$0xff] }
  0x17   : > { %479 = vmatpush.bf16.msra.mxu2 %v944_v10  ;;  %v948_v27 = vld [vmem:[%s1198_s1 + $0xc8] sm:$0xff]  ;;  %v223_v33 = vld [vmem:[%s1148_s30] sm:$0xff]  ;;  %v228_v47 = vpack.c.bf16 %v226_v43, %v817_v36 }
  0x18   : > { %575 = vmatpush.bf16.msra.mxu3 %v952_v11  ;;  %v732_v31 = vld [vmem:[%s1148_s30 + $0x1] sm:$0xff]  ;;  %v733_v32 = vld [vmem:[%s1148_s30 + $0x9] sm:$0xff]  ;;  %v735_v42 = vld [vmem:[%s1148_s30 + $0x19] sm:$0xff] }
  0x19   : > { %321 = vmatpush.bf16.msra.mxu0 %v935_v12  ;;  %v224_v34 = vld [vmem:[%s1148_s30 + $0x8] sm:$0xff]  ;;  %v947_v35 = vld [vmem:[%s1198_s1 + $0xc0] sm:$0xff]  ;;  %v251_v38 = vpack.c.bf16 %v733_v32, %v732_v31  ;;  %v506_v41 = vpack.c.bf16 %v869_v37, %v733_v32  ;;  %v252_v46 = vpack.c.bf16 %v735_v42, %v869_v37 }
  0x1a   : > { %388 = vmatpush.bf16.msra.mxu1 %v927_v13  ;;  %v227_v39 = vpack.c.bf16 %v224_v34, %v223_v33  ;;  %v410_v40 = vpack.c.bf16 %v817_v36, %v224_v34  ;;  %v819_v44 = vld [vmem:[%s1148_s30 + $0x20] sm:$0xff] }
  0x1b   : > { %480 = vmatpush.bf16.msra.mxu2 %v943_v14  ;;  %v871_v45 = vld [vmem:[%s1148_s30 + $0x21] sm:$0xff]  ;;  %v411_v48 = vpack.c.bf16 %v819_v44, %v226_v43  ;;  %v991_v59 = vld [vmem:[%s1199_s2] ss:$0 sm:$0xff] }
  0x1c   : > { %576 = vmatpush.bf16.msra.mxu3 %v951_v15  ;;  %v507_v49 = vpack.c.bf16 %v871_v45, %v735_v42  ;;  %v992_v61 = vld [vmem:[%s1200_s3] ss:$0 sm:$0xff] }
  0x1d   : > { %322 = vmatpush.bf16.msra.mxu0 %v934_v16 }
  0x1e   : > { %389 = vmatpush.bf16.msra.mxu1 %v926_v17 }
  0x1f   : > { %481 = vmatpush.bf16.msra.mxu2 %v942_v18 }
  0x20   : > { %577 = vmatpush.bf16.msra.mxu3 %v950_v19 }
  0x21   : > { %323 = vmatpush.bf16.msra.mxu0 %v933_v20 }
  0x22   : > { %390 = vmatpush.bf16.msra.mxu1 %v925_v21 }
  0x23   : > { %482 = vmatpush.bf16.msra.mxu2 %v941_v22 }
  0x24   : > { %578 = vmatpush.bf16.msra.mxu3 %v949_v23 }
  0x25   : > { %324 = vmatpush.bf16.msra.mxu0 %v932_v24 }
  0x26   : > { %391 = vmatpush.bf16.msra.mxu1 %v924_v25 }
  0x27   : > { %483 = vmatpush.bf16.msra.mxu2 %v940_v26 }
  0x28   : > { %579 = vmatpush.bf16.msra.mxu3 %v948_v27 }
  0x29   : > { %325 = vmatpush.bf16.msra.mxu0 %v931_v28 }
  0x2a   : > { %392 = vmatpush.bf16.msra.mxu1 %v923_v29 }
  0x2b   : > { %484 = vmatpush.bf16.msra.mxu2 %v939_v30 }
  0x2c   : > { %580 = vmatpush.bf16.msra.mxu3 %v947_v35  ;;  %326 = vmatmul.bf16.vlgmr.msra.gmra.mxu0 %v251_v38 }
  0x2d   : > { %393 = vmatmul.bf16.vlgmr.msra.gmra.mxu1 %v227_v39 }
  0x2e   : > { %485 = vmatmul.bf16.vlgmr.msra.gmra.mxu2 %v410_v40 }
  0x2f   : > { %581 = vmatmul.bf16.vlgmr.msra.gmra.mxu3 %v506_v41 }
  0x3c   : > { %331 = vmatmul.bf16.gmra.mxu0 %v252_v46 }
  0x3d   : > { %398 = vmatmul.bf16.gmra.mxu1 %v228_v47 }
  0x3e   : > { %490 = vmatmul.bf16.gmra.mxu2 %v411_v48 }
  0x3f   : > { %586 = vmatmul.bf16.gmra.mxu3 %v507_v49 }
  0xa9   : > { %v327_v50 = vpop.f32.mrf.mxu0 }
  0xaa   : > { %v394_v51 = vpop.f32.mrf.mxu1 }
  0xab   : > { %v395_v52 = vadd.f32 %v394_v51, %v327_v50 }
  0xb1   : > { %v486_v53 = vpop.f32.mrf.mxu2  ;;  %v329_v56 = vpop.f32.mrf.mxu0 }
  0xb2   : > { %v582_v54 = vpop.f32.mrf.mxu3  ;;  %v496_v55 = vadd.f32 %v486_v53, %v395_v52  ;;  %v396_v57 = vpop.f32.mrf.mxu1 }
  0xb3   : > { %v397_v62 = vadd.f32 %v396_v57, %v329_v56 }
  0xb4   : > { %v592_v58 = vadd.f32 %v582_v54, %v496_v55 }
  0xb6   : > { %v600_v60 = vmul.f32 %v991_v59, %v592_v58 }
  0xb8   : > { %v608_v4 = vadd.f32 %v992_v61, %v600_v60 }
  0xb9   : > { %v488_v63 = vpop.f32.mrf.mxu2  ;;  %v332_v2 = vpop.f32.mrf.mxu0 }
  0xba   : > { %v584_v0 = vpop.f32.mrf.mxu3  ;;  %v497_v1 = vadd.f32 %v488_v63, %v397_v62  ;;  %v399_v3 = vpop.f32.mrf.mxu1  ;;  %v616_v8 = vmul.f32 0.1, %v608_v4  ;;  %vm612_vm0 = vcmp.ge.f32.partialorder %v608_v4, 0.0 }
  0xbb   : > { %v400_v7 = vadd.f32 %v399_v3, %v332_v2 }
  0xbc   : > { %v593_v5 = vadd.f32 %v584_v0, %v497_v1  ;;  %v620_v14 = vsel %vm612_vm0, %v608_v4, %v616_v8 }
  0xbe   : > { %v601_v6 = vmul.f32 %v991_v59, %v593_v5 }
  0xc0   : > { %v609_v9 = vadd.f32 %v992_v61, %v601_v6 }
  0xc1   : > { %v491_v10 = vpop.f32.mrf.mxu2  ;;  %v334_v18 = vpop.f32.mrf.mxu0 }
  0xc2   : > { %v587_v11 = vpop.f32.mrf.mxu3  ;;  %vm613_vm1 = vcmp.ge.f32.partialorder %v609_v9, 0.0  ;;  %v617_v12 = vmul.f32 0.1, %v609_v9  ;;  %v498_v13 = vadd.f32 %v491_v10, %v400_v7  ;;  %v401_v19 = vpop.f32.mrf.mxu1 }
  0xc3   : > { %v402_v21 = vadd.f32 %v401_v19, %v334_v18 }
  0xc4   : > { %v621_v15 = vsel %vm613_vm1, %v609_v9, %v617_v12  ;;  %v594_v16 = vadd.f32 %v587_v11, %v498_v13 }
  0xc5   : > { %v958_v17 = vpack.c.bf16 %v621_v15, %v620_v14 }
  0xc6   : > { %v602_v20 = vmul.f32 %v991_v59, %v594_v16 }
  0xc7   : > { %959 = vst [vmem:[%s219_s28] sm:$0xff] %v958_v17  }
  0xc8   : > { %v610_v25 = vadd.f32 %v992_v61, %v602_v20 }
  0xc9   : > { %v493_v22 = vpop.f32.mrf.mxu2 }
  0xca   : > { %v499_v23 = vadd.f32 %v493_v22, %v402_v21  ;;  %v589_v24 = vpop.f32.mrf.mxu3  ;;  %v618_v28 = vmul.f32 0.1, %v610_v25  ;;  %vm614_vm2 = vcmp.ge.f32.partialorder %v610_v25, 0.0 }
  0xcc   : > { %v595_v26 = vadd.f32 %v589_v24, %v499_v23  ;;  %v622_v31 = vsel %vm614_vm2, %v610_v25, %v618_v28 }
  0xce   : > { %v603_v27 = vmul.f32 %v991_v59, %v595_v26 }
  0xd0   : > { %v611_v29 = vadd.f32 %v992_v61, %v603_v27 }
  0xd2   : > { %vm615_vm3 = vcmp.ge.f32.partialorder %v611_v29, 0.0  ;;  %v619_v30 = vmul.f32 0.1, %v611_v29 }
  0xd4   : > { %v623_v32 = vsel %vm615_vm3, %v611_v29, %v619_v30 }
  0xd5   : > { %v963_v33 = vpack.c.bf16 %v623_v32, %v622_v31 }
  0xd7   : > { %965 = vst [vmem:[%s219_s28 + $0x8] sm:$0xff] %v963_v33  }
  0xd8 PF: > { %s14_s17 = sadd.s32 1, %s1015_s17   ;;  %s1202_s15 = smov %s1011_s16 }
  0xd9   : > { %p11_p5 = scmp.ge.s32.totalorder %s14_s17, 4   ;;  %s1203_s16 = smov %s1205_s18 }
  0xdb   :  { %13 = sbr.rel (!%p11_p5) target bundleno = 2 (0x2), region = 73 }

// kernel: _lambda_.20
= control target key start
LH: loop header
LB: loop body
LE: loop exit
PB: predicated region body
PF: predicated region fallthrough
CT: control target
= control target key end

     0   :  { %s532_s15 = smov 0   ;;  %s534_s16 = smov 0   ;;  %s587_s0 = inlined_call_operand.vmem [shape: f32[2,32,64], index: 0, kind: input, shape index: {}]   ;;  %s588_s1 = inlined_call_operand.vmem [shape: bf16[1,64,128], index: 1, kind: input, shape index: {}]   ;;  %s589_s2 = inlined_call_operand.vmem [shape: f32[1,128], index: 2, kind: input, shape index: {}]   ;;  %s590_s3 = inlined_call_operand.vmem [shape: f32[1,128], index: 3, kind: input, shape index: {}]   ;;  %s591_s4 = inlined_call_operand.vmem [shape: bf16[2,32,128], index: 4, kind: output, shape index: {}]  }
   0x1   :  { %s536_s17 = smov 0  }
   0x2 LB: > { %s26_s18 = sadd.s32 1, %s501_s16  ;;  %p411_p0 = scmp.ge.s32.totalorder %s505_s17, 1  ;;  %s505_s17 = sphi %s536_s17, %s14_s17   ;;  %s501_s16 = sphi %s534_s16, %s593_s16   ;;  %s497_s15 = sphi %s532_s15, %s592_s15  }
   0x3   : > { %p28_p1 = scmp.ge.s32.totalorder %s26_s18, 2  ;;  %p176_p2 = scmp.lt.s32.totalorder %s505_s17, 3 }
   0x5   : > { %s595_s18 = smov (%p28_p1, %s26_s18), 0  ;;  %p177_p3 = pnand %p411_p0, %p176_p2 }
   0x6   : > { %p206_p4 = scmp.lt.s32.totalorder (!%p177_p3), %s497_s15, 1 }
   0x7   : > { %180 = sbr.rel (%p177_p3) target bundleno = 173 (0xad), region = 36 }
   0xc   : > { %v441_v0 = vld [vmem:[%s588_s1 + $0x18] sm:$0xff]  ;;  %v440_v1 = vld [vmem:[%s588_s1 + $0x10] sm:$0xff]  ;;  %s597_s15 = smov (!%p206_p4, %s497_s15), 1  ;;  %v439_v2 = vld [vmem:[%s588_s1 + $0x8] sm:$0xff]  ;;  %vm262_vm0 = vcmask 523264  }
   0xd   : > { %273 = vmatpush.bf16.msra.mxu0 %v441_v0  ;;  %453 = vmatpush.bf16.msra.mxu1 %v441_v0  ;;  %s436_s23 = sshll.u32 %s597_s15, 5  ;;  %v438_v3 = vld [vmem:[%s588_s1] sm:$0xff]  ;;  %s437_s9 = sshll.u32 %s597_s15, 4 }
   0xe   : > { %s210_s28 = scalar_lea.vmem %s587_s0, %s436_s23  ;;  %v481_v10 = vld [vmem:[%s589_s2] ss:$0 sm:$0xff]  ;;  %s219_s12 = scalar_lea.vmem %s591_s4, %s437_s9 }
   0xf   : > { %v224_v4 = vld [vmem:[%s210_s28] sm:$0xff]  ;;  %v225_v5 = vld [vmem:[%s210_s28 + $0x8] sm:$0xff]  ;;  %v226_v6 = vld [vmem:[%s210_s28 + $0x10] sm:$0xff] }
  0x10   : > { %v227_v7 = vld [vmem:[%s210_s28 + $0x18] sm:$0xff]  ;;  %v228_v8 = vpack.c.bf16 %v225_v5, %v224_v4  ;;  %v482_v14 = vld [vmem:[%s590_s3] ss:$0 sm:$0xff] }
  0x11   : > { %274 = vmatpush.bf16.msra.mxu0 %v440_v1  ;;  %454 = vmatpush.bf16.msra.mxu1 %v440_v1  ;;  %v229_v9 = vpack.c.bf16 %v227_v7, %v226_v6 }
  0x15   : > { %275 = vmatpush.bf16.msra.mxu0 %v439_v2  ;;  %455 = vmatpush.bf16.msra.mxu1 %v439_v2 }
  0x19   : > { %276 = vmatpush.bf16.msra.mxu0 %v438_v3  ;;  %456 = vmatpush.bf16.msra.mxu1 %v438_v3 }
  0x1c   : > { %432 = vmatmul.msk.bf16.vlgmr.msra.gmra.mxu0 %vm262_vm0, %v228_v8  ;;  %433 = vmatmul.msk.bf16.vlgmr.msra.gmra.mxu1 %vm262_vm0, %v229_v9 }
  0x99   : > { %v278_v11 = vpop.f32.mrf.mxu0  ;;  %v283_v12 = vpop.f32.mrf.mxu1 }
  0x9a   : > { %v292_v13 = vmul.f32 %v481_v10, %v278_v11  ;;  %v294_v15 = vmul.f32 %v481_v10, %v283_v12 }
  0x9c   : > { %v300_v16 = vadd.f32 %v482_v14, %v292_v13  ;;  %v302_v17 = vadd.f32 %v482_v14, %v294_v15 }
  0x9e   : > { %v308_v22 = vmul.f32 0.1, %v300_v16  ;;  %v310_v23 = vmul.f32 0.1, %v302_v17  ;;  %vm304_vm1 = vcmp.ge.f32.partialorder %v300_v16, 0.0  ;;  %vm306_vm2 = vcmp.ge.f32.partialorder %v302_v17, 0.0 }
  0xa0   : > { %v312_v28 = vsel %vm304_vm1, %v300_v16, %v308_v22  ;;  %v314_v29 = vsel %vm306_vm2, %v302_v17, %v310_v23 }
  0xa1   : > { %v280_v18 = vpop.f32.mrf.mxu0  ;;  %v285_v19 = vpop.f32.mrf.mxu1 }
  0xa2   : > { %v293_v20 = vmul.f32 %v481_v10, %v280_v18  ;;  %v295_v21 = vmul.f32 %v481_v10, %v285_v19 }
  0xa4   : > { %v301_v24 = vadd.f32 %v482_v14, %v293_v20  ;;  %v303_v25 = vadd.f32 %v482_v14, %v295_v21 }
  0xa6   : > { %vm305_vm3 = vcmp.ge.f32.partialorder %v301_v24, 0.0  ;;  %v309_v26 = vmul.f32 0.1, %v301_v24  ;;  %vm307_vm4 = vcmp.ge.f32.partialorder %v303_v25, 0.0  ;;  %v311_v27 = vmul.f32 0.1, %v303_v25 }
  0xa8   : > { %v313_v30 = vsel %vm305_vm3, %v301_v24, %v309_v26  ;;  %v315_v31 = vsel %vm307_vm4, %v303_v25, %v311_v27 }
  0xa9   : > { %v445_v32 = vpack.c.bf16 %v313_v30, %v312_v28  ;;  %v450_v33 = vpack.c.bf16 %v315_v31, %v314_v29 }
  0xab   : > { %446 = vst [vmem:[%s219_s12] sm:$0xff] %v445_v32  }
  0xac   : > { %452 = vst [vmem:[%s219_s12 + $0x8] sm:$0xff] %v450_v33  }
  0xad PF: > { %s14_s17 = sadd.s32 1, %s505_s17   ;;  %s592_s15 = smov %s501_s16 }
  0xae   : > { %p11_p5 = scmp.ge.s32.totalorder %s14_s17, 4   ;;  %s593_s16 = smov %s595_s18 }
  0xb0   :  { %13 = sbr.rel (!%p11_p5) target bundleno = 2 (0x2), region = 67 }

// kernel: _lambda_.21
= control target key start
LH: loop header
LB: loop body
LE: loop exit
PB: predicated region body
PF: predicated region fallthrough
CT: control target
= control target key end

     0   :  { %s1115_s15 = smov 0   ;;  %s1117_s16 = smov 0   ;;  %s1250_s0 = inlined_call_operand.vmem [shape: f32[2,56,32], index: 0, kind: input, shape index: {}]   ;;  %s1251_s1 = inlined_call_operand.vmem [shape: bf16[9,32,128], index: 1, kind: input, shape index: {}]   ;;  %s1252_s2 = inlined_call_operand.vmem [shape: f32[1,128], index: 2, kind: input, shape index: {}]   ;;  %s1253_s3 = inlined_call_operand.vmem [shape: f32[1,128], index: 3, kind: input, shape index: {}]   ;;  %s1254_s4 = inlined_call_operand.vmem [shape: bf16[2,32,128], index: 4, kind: output, shape index: {}]  }
   0x1   :  { %s1119_s17 = smov 0  }
   0x2 LB: > { %s26_s18 = sadd.s32 1, %s1084_s16  ;;  %p847_p0 = scmp.ge.s32.totalorder %s1088_s17, 1  ;;  %s1088_s17 = sphi %s1119_s17, %s14_s17   ;;  %s1084_s16 = sphi %s1117_s16, %s1256_s16   ;;  %s1080_s15 = sphi %s1115_s15, %s1255_s15  }
   0x3   : > { %p28_p1 = scmp.ge.s32.totalorder %s26_s18, 2  ;;  %p176_p2 = scmp.lt.s32.totalorder %s1088_s17, 3 }
   0x5   : > { %s1258_s18 = smov (%p28_p1, %s26_s18), 0  ;;  %p177_p3 = pnand %p847_p0, %p176_p2 }
   0x6   : > { %p206_p4 = scmp.lt.s32.totalorder (!%p177_p3), %s1080_s15, 1 }
   0x7   : > { %180 = sbr.rel (%p177_p3) target bundleno = 239 (0xef), region = 36 }
   0xc   : > { %v1011_v0 = vld [vmem:[%s1251_s1 + $0x18] sm:$0xff]  ;;  %v1013_v1 = vld [vmem:[%s1251_s1 + $0x28] sm:$0xff]  ;;  %v1010_v3 = vld [vmem:[%s1251_s1 + $0x10] sm:$0xff]  ;;  %s1260_s15 = smov (!%p206_p4, %s1080_s15), 1  ;;  %vm259_vm0 = vcmask 261120  }
   0xd   : > { %v1015_v2 = vld [vmem:[%s1251_s1 + $0x38] sm:$0xff]  ;;  %272 = vmatpush.bf16.msra.mxu0 %v1011_v0  ;;  %1037 = vmatpush.bf16.msra.mxu1 %v1011_v0  ;;  %v1009_v4 = vld [vmem:[%s1251_s1 + $0x8] sm:$0xff]  ;;  %v1012_v5 = vld [vmem:[%s1251_s1 + $0x20] sm:$0xff]  ;;  %s1039_s5 = smul.u32 56, %s1260_s15  ;;  %s1007_s19 = sshll.u32 %s1260_s15, 4 }
   0xe   : > { %359 = vmatpush.bf16.msra.mxu2 %v1013_v1  ;;  %413 = vmatpush.bf16.msra.mxu3 %v1015_v2  ;;  %v1014_v6 = vld [vmem:[%s1251_s1 + $0x30] sm:$0xff]  ;;  %v1017_v7 = vld [vmem:[%s1251_s1 + $0x48] sm:$0xff]  ;;  %v1023_v9 = vld [vmem:[%s1251_s1 + $0x78] sm:$0xff]  ;;  %s219_s22 = scalar_lea.vmem %s1254_s4, %s1007_s19 }
   0xf   : > { %v1021_v8 = vld [vmem:[%s1251_s1 + $0x68] sm:$0xff]  ;;  %s1169_s20 = scalar_lea.vmem %s1250_s0, %s1039_s5  ;;  %v1008_v10 = vld [vmem:[%s1251_s1] sm:$0xff]  ;;  %v1019_v23 = vld [vmem:[%s1251_s1 + $0x58] sm:$0xff] }
  0x10   : > { %v851_v11 = vld [vmem:[%s1169_s20 + $0x1] sm:$0xff]  ;;  %v852_v12 = vld [vmem:[%s1169_s20 + $0x9] sm:$0xff]  ;;  %v853_v13 = vld [vmem:[%s1169_s20 + $0x11] sm:$0xff] }
  0x11   : > { %273 = vmatpush.bf16.msra.mxu0 %v1010_v3  ;;  %1038 = vmatpush.bf16.msra.mxu1 %v1010_v3  ;;  %v1016_v14 = vld [vmem:[%s1251_s1 + $0x40] sm:$0xff]  ;;  %v240_v15 = vpack.c.bf16 %v852_v12, %v851_v11  ;;  %v880_v18 = vld [vmem:[%s1169_s20 + $0xa] sm:$0xff]  ;;  %v881_v31 = vld [vmem:[%s1169_s20 + $0x12] sm:$0xff]  ;;  %v436_v35 = vpack.c.bf16 %v853_v13, %v852_v12 }
  0x12   : > { %360 = vmatpush.bf16.msra.mxu2 %v1012_v5  ;;  %v854_v16 = vld [vmem:[%s1169_s20 + $0x19] sm:$0xff]  ;;  %414 = vmatpush.bf16.msra.mxu3 %v1014_v6  ;;  %v879_v17 = vld [vmem:[%s1169_s20 + $0x2] sm:$0xff]  ;;  %v898_v22 = vld [vmem:[%s1169_s20 + $0x10] sm:$0xff]  ;;  %v490_v44 = vpack.c.bf16 %v881_v31, %v880_v18 }
  0x13   : > { %v241_v19 = vpack.c.bf16 %v854_v16, %v853_v13  ;;  %v328_v20 = vpack.c.bf16 %v880_v18, %v879_v17  ;;  %v897_v21 = vld [vmem:[%s1169_s20 + $0x8] sm:$0xff]  ;;  %v1020_v26 = vld [vmem:[%s1251_s1 + $0x60] sm:$0xff]  ;;  %v1022_v27 = vld [vmem:[%s1251_s1 + $0x70] sm:$0xff] }
  0x14   : > { %867 = vmatmul.msk.bf16.vlgmr.msra.gmra.mxu0 %vm259_vm0, %v240_v15  ;;  %v382_v24 = vpack.c.bf16 %v898_v22, %v897_v21  ;;  %v1025_v25 = vld [vmem:[%s1251_s1 + $0x88] sm:$0xff]  ;;  %v1018_v28 = vld [vmem:[%s1251_s1 + $0x50] sm:$0xff]  ;;  %v1024_v29 = vld [vmem:[%s1251_s1 + $0x80] sm:$0xff] }
  0x15   : > { %309 = vmatpush.bf16.msrb.mxu1 %v1009_v4  ;;  %467 = vmatpush.bf16.msrb.mxu0 %v1017_v7  ;;  %v224_v30 = vld [vmem:[%s1169_s20] sm:$0xff]  ;;  %v899_v33 = vld [vmem:[%s1169_s20 + $0x18] sm:$0xff]  ;;  %v954_v42 = vld [vmem:[%s1169_s20 + $0x28] sm:$0xff] }
  0x16   : > { %575 = vmatpush.bf16.msrb.mxu2 %v1021_v8  ;;  %629 = vmatpush.bf16.msrb.mxu3 %v1023_v9  ;;  %v882_v32 = vld [vmem:[%s1169_s20 + $0x1a] sm:$0xff]  ;;  %v228_v36 = vpack.c.bf16 %v897_v21, %v224_v30  ;;  %v229_v41 = vpack.c.bf16 %v899_v33, %v898_v22  ;;  %v972_v43 = vld [vmem:[%s1169_s20 + $0x29] sm:$0xff] }
  0x17   : > { %868 = vmatmul.msk.bf16.vlgmr.msra.gmra.mxu1 %vm259_vm0, %v241_v19  ;;  %895 = vmatmul.msk.bf16.vlgmr.msra.gmra.mxu2 %vm259_vm0, %v328_v20  ;;  %v900_v34 = vld [vmem:[%s1169_s20 + $0x20] sm:$0xff]  ;;  %v329_v37 = vpack.c.bf16 %v882_v32, %v881_v31  ;;  %v990_v48 = vld [vmem:[%s1169_s20 + $0x2a] sm:$0xff] }
  0x18   : > { %913 = vmatmul.msk.bf16.vlgmr.msra.gmra.mxu3 %vm259_vm0, %v382_v24  ;;  %v383_v38 = vpack.c.bf16 %v900_v34, %v899_v33  ;;  %v918_v39 = vld [vmem:[%s1169_s20 + $0x21] sm:$0xff]  ;;  %v545_v45 = vpack.c.bf16 %v954_v42, %v900_v34  ;;  %v1065_v34 = vld [vmem:[%s1253_s3] ss:$0 sm:$0xff] }
  0x19   : > { %310 = vmatpush.bf16.msrb.mxu1 %v1008_v10  ;;  %468 = vmatpush.bf16.msrb.mxu0 %v1016_v14  ;;  %v437_v40 = vpack.c.bf16 %v918_v39, %v854_v16  ;;  %v599_v46 = vpack.c.bf16 %v972_v43, %v918_v39  ;;  %v936_v47 = vld [vmem:[%s1169_s20 + $0x22] sm:$0xff] }
  0x1a   : > { %576 = vmatpush.bf16.msrb.mxu2 %v1020_v26  ;;  %630 = vmatpush.bf16.msrb.mxu3 %v1022_v27  ;;  %v653_v49 = vpack.c.bf16 %v990_v48, %v936_v47  ;;  %v491_v50 = vpack.c.bf16 %v936_v47, %v882_v32  ;;  %v1064_v26 = vld [vmem:[%s1252_s2] ss:$0 sm:$0xff] }
  0x1d   : > { %521 = vmatpush.bf16.msra.mxu1 %v1019_v23  ;;  %683 = vmatpush.bf16.msra.mxu0 %v1025_v25 }
  0x21   : > { %522 = vmatpush.bf16.msra.mxu1 %v1018_v28  ;;  %684 = vmatpush.bf16.msra.mxu0 %v1024_v29 }
  0x24   : > { %931 = vmatmul.msk.bf16.vlgmr.msrb.gmra.mxu0 %vm259_vm0, %v436_v35 }
  0x27   : > { %877 = vmatmul.msk.bf16.vlgmr.msrb.gmra.mxu1 %vm259_vm0, %v228_v36  ;;  %896 = vmatmul.msk.bf16.gmra.mxu2 %vm259_vm0, %v329_v37 }
  0x28   : > { %914 = vmatmul.msk.bf16.gmra.mxu3 %vm259_vm0, %v383_v38 }
  0x34   : > { %932 = vmatmul.msk.bf16.gmra.mxu0 %vm259_vm0, %v437_v40 }
  0x37   : > { %878 = vmatmul.msk.bf16.gmra.mxu1 %vm259_vm0, %v229_v41  ;;  %967 = vmatmul.msk.bf16.vlgmr.msrb.gmra.mxu2 %vm259_vm0, %v229_v41 }
  0x38   : > { %985 = vmatmul.msk.bf16.vlgmr.msrb.gmra.mxu3 %vm259_vm0, %v241_v19 }
  0x44   : > { %1003 = vmatmul.msk.bf16.vlgmr.msra.gmra.mxu0 %vm259_vm0, %v329_v37 }
  0x47   : > { %949 = vmatmul.msk.bf16.vlgmr.msra.gmra.mxu1 %vm259_vm0, %v490_v44  ;;  %968 = vmatmul.msk.bf16.gmra.mxu2 %vm259_vm0, %v545_v45 }
  0x48   : > { %986 = vmatmul.msk.bf16.gmra.mxu3 %vm259_vm0, %v599_v46 }
  0x54   : > { %1004 = vmatmul.msk.bf16.gmra.mxu0 %vm259_vm0, %v653_v49 }
  0x57   : > { %950 = vmatmul.msk.bf16.gmra.mxu1 %vm259_vm0, %v491_v50 }
  0x91   : > { %v275_v51 = vpop.f32.mrf.mxu0 }
  0x94   : > { %v280_v52 = vpop.f32.mrf.mxu1 }
  0x99   : > { %v277_v54 = vpop.f32.mrf.mxu0 }
  0x9a   : > { %v362_v53 = vpop.f32.mrf.mxu2 }
  0x9b   : > { %v416_v55 = vpop.f32.mrf.mxu3 }
  0x9c   : > { %v282_v56 = vpop.f32.mrf.mxu1 }
  0xa1   : > { %v470_v58 = vpop.f32.mrf.mxu0 }
  0xa2   : > { %v364_v57 = vpop.f32.mrf.mxu2 }
  0xa3   : > { %v418_v60 = vpop.f32.mrf.mxu3 }
  0xa4   : > { %v312_v59 = vpop.f32.mrf.mxu1 }
  0xa5   : > { %v313_v4 = vadd.f32 %v312_v59, %v275_v51 }
  0xa7   : > { %v372_v6 = vadd.f32 %v362_v53, %v313_v4 }
  0xa9   : > { %v472_v61 = vpop.f32.mrf.mxu0  ;;  %v426_v9 = vadd.f32 %v416_v55, %v372_v6 }
  0xaa   : > { %v367_v63 = vpop.f32.mrf.mxu2 }
  0xab   : > { %v421_v0 = vpop.f32.mrf.mxu3  ;;  %v480_v13 = vadd.f32 %v470_v58, %v426_v9 }
  0xac   : > { %v314_v62 = vpop.f32.mrf.mxu1 }
  0xad   : > { %v315_v10 = vadd.f32 %v314_v62, %v277_v54 }
  0xaf   : > { %v373_v14 = vadd.f32 %v364_v57, %v315_v10 }
  0xb1   : > { %v475_v1 = vpop.f32.mrf.mxu0  ;;  %v427_v18 = vadd.f32 %v418_v60, %v373_v14 }
  0xb2   : > { %v369_v3 = vpop.f32.mrf.mxu2 }
  0xb3   : > { %v423_v5 = vpop.f32.mrf.mxu3  ;;  %v481_v23 = vadd.f32 %v472_v61, %v427_v18 }
  0xb4   : > { %v317_v2 = vpop.f32.mrf.mxu1 }
  0xb5   : > { %v318_v19 = vadd.f32 %v317_v2, %v280_v52 }
  0xb7   : > { %v374_v24 = vadd.f32 %v367_v63, %v318_v19 }
  0xb9   : > { %v477_v7 = vpop.f32.mrf.mxu0  ;;  %v428_v31 = vadd.f32 %v421_v0, %v374_v24 }
  0xba   : > { %v578_v11 = vpop.f32.mrf.mxu2 }
  0xbb   : > { %v632_v12 = vpop.f32.mrf.mxu3  ;;  %v482_v37 = vadd.f32 %v475_v1, %v428_v31 }
  0xbc   : > { %v319_v8 = vpop.f32.mrf.mxu1 }
  0xbd   : > { %v320_v32 = vadd.f32 %v319_v8, %v282_v56 }
  0xbf   : > { %v375_v38 = vadd.f32 %v369_v3, %v320_v32 }
  0xc1   : > { %v686_v16 = vpop.f32.mrf.mxu0  ;;  %v429_v46 = vadd.f32 %v423_v5, %v375_v38 }
  0xc2   : > { %v580_v22 = vpop.f32.mrf.mxu2 }
  0xc3   : > { %v634_v27 = vpop.f32.mrf.mxu3  ;;  %v483_v53 = vadd.f32 %v477_v7, %v429_v46 }
  0xc4   : > { %v524_v15 = vpop.f32.mrf.mxu1 }
  0xc5   : > { %v534_v17 = vadd.f32 %v524_v15, %v480_v13 }
  0xc7   : > { %v588_v20 = vadd.f32 %v578_v11, %v534_v17 }
  0xc9   : > { %v642_v21 = vadd.f32 %v632_v12, %v588_v20  ;;  %v688_v30 = vpop.f32.mrf.mxu0 }
  0xca   : > { %v583_v41 = vpop.f32.mrf.mxu2 }
  0xcb   : > { %v696_v25 = vadd.f32 %v686_v16, %v642_v21  ;;  %v637_v45 = vpop.f32.mrf.mxu3 }
  0xcc   : > { %v526_v28 = vpop.f32.mrf.mxu1 }
  0xcd   : > { %v535_v29 = vadd.f32 %v526_v28, %v481_v23  ;;  %v704_v33 = vmul.f32 %v1064_v26, %v696_v25 }
  0xcf   : > { %v589_v35 = vadd.f32 %v580_v22, %v535_v29  ;;  %v712_v39 = vadd.f32 %v1065_v34, %v704_v33 }
  0xd1   : > { %v643_v36 = vadd.f32 %v634_v27, %v589_v35  ;;  %v720_v47 = vmul.f32 0.1, %v712_v39  ;;  %vm716_vm1 = vcmp.ge.f32.partialorder %v712_v39, 0.0  ;;  %v691_v50 = vpop.f32.mrf.mxu0 }
  0xd2   : > { %v585_v60 = vpop.f32.mrf.mxu2 }
  0xd3   : > { %v697_v40 = vadd.f32 %v688_v30, %v643_v36  ;;  %v724_v54 = vsel %vm716_vm1, %v712_v39, %v720_v47  ;;  %v639_v63 = vpop.f32.mrf.mxu3 }
  0xd4   : > { %v529_v42 = vpop.f32.mrf.mxu1 }
  0xd5   : > { %v705_v43 = vmul.f32 %v1064_v26, %v697_v40  ;;  %v536_v44 = vadd.f32 %v529_v42, %v482_v37 }
  0xd7   : > { %v713_v48 = vadd.f32 %v1065_v34, %v705_v43  ;;  %v590_v49 = vadd.f32 %v583_v41, %v536_v44 }
  0xd9   : > { %vm717_vm2 = vcmp.ge.f32.partialorder %v713_v48, 0.0  ;;  %v721_v51 = vmul.f32 0.1, %v713_v48  ;;  %v644_v52 = vadd.f32 %v637_v45, %v590_v49  ;;  %v693_v1 = vpop.f32.mrf.mxu0 }
  0xdb   : > { %v725_v55 = vsel %vm717_vm2, %v713_v48, %v721_v51  ;;  %v698_v56 = vadd.f32 %v691_v50, %v644_v52 }
  0xdc   : > { %v1029_v57 = vpack.c.bf16 %v725_v55, %v724_v54  ;;  %v531_v58 = vpop.f32.mrf.mxu1 }
  0xdd   : > { %v537_v59 = vadd.f32 %v531_v58, %v483_v53  ;;  %v706_v61 = vmul.f32 %v1064_v26, %v698_v56 }
  0xde   : > { %1030 = vst [vmem:[%s219_s22] sm:$0xff] %v1029_v57  }
  0xdf   : > { %v591_v62 = vadd.f32 %v585_v60, %v537_v59  ;;  %v714_v2 = vadd.f32 %v1065_v34, %v706_v61 }
  0xe1   : > { %v645_v0 = vadd.f32 %v639_v63, %v591_v62  ;;  %v722_v5 = vmul.f32 0.1, %v714_v2  ;;  %vm718_vm3 = vcmp.ge.f32.partialorder %v714_v2, 0.0 }
  0xe3   : > { %v699_v3 = vadd.f32 %v693_v1, %v645_v0  ;;  %v726_v8 = vsel %vm718_vm3, %v714_v2, %v722_v5 }
  0xe5   : > { %v707_v4 = vmul.f32 %v1064_v26, %v699_v3 }
  0xe7   : > { %v715_v6 = vadd.f32 %v1065_v34, %v707_v4 }
  0xe9   : > { %vm719_vm4 = vcmp.ge.f32.partialorder %v715_v6, 0.0  ;;  %v723_v7 = vmul.f32 0.1, %v715_v6 }
  0xeb   : > { %v727_v9 = vsel %vm719_vm4, %v715_v6, %v723_v7 }
  0xec   : > { %v1034_v10 = vpack.c.bf16 %v727_v9, %v726_v8 }
  0xee   : > { %1036 = vst [vmem:[%s219_s22 + $0x8] sm:$0xff] %v1034_v10  }
  0xef PF: > { %s14_s17 = sadd.s32 1, %s1088_s17   ;;  %s1255_s15 = smov %s1084_s16 }
  0xf0   : > { %p11_p5 = scmp.ge.s32.totalorder %s14_s17, 4   ;;  %s1256_s16 = smov %s1258_s18 }
  0xf2   :  { %13 = sbr.rel (!%p11_p5) target bundleno = 2 (0x2), region = 83 }

</bundles_post_ra>
